<compile_context>
chip_gen: v7x
topology: tpu7x:2x2x1
jax: 0.10.0
libtpu: 0.0.40
codegen_flags: <defaults>
</compile_context>

<pallas_src>
import jax
import jax.numpy as jnp
from jax.experimental import pallas as pl
from jax.experimental.pallas import tpu as pltpu


def _round_up(x, m):
    return (x + m - 1) // m * m


# ---------------------------------------------------------------------------
# Pallas kernel 1: fused conv-as-matmul (BN/bias folded), lane-dense output
#   O(OC, Mp) = relu( W(OC, K) @ X(K, Mp) + shift(OC, 1) )
# ---------------------------------------------------------------------------
def _conv_matmul_kernel(w_ref, x_ref, shift_ref, o_ref):
    acc = jnp.dot(w_ref[...], x_ref[...], preferred_element_type=jnp.float32)
    o_ref[...] = jnp.maximum(acc + shift_ref[...], 0.0).astype(o_ref.dtype)


def conv_matmul(w, x, shift, *, out_dtype=jnp.bfloat16):
    """w: (OC, K) bf16, x: (K, Mp) bf16 (Mp % 128 == 0), shift: (OC, 1) f32."""
    OC, K = w.shape
    K2, M = x.shape
    assert K == K2 and M % 128 == 0
    flops = 2 * OC * K * M
    bytes_accessed = 2 * (OC * K + K * M + OC * M) + 4 * OC
    return pl.pallas_call(
        _conv_matmul_kernel,
        out_shape=jax.ShapeDtypeStruct((OC, M), out_dtype),
        grid=(1,),
        in_specs=[
            pl.BlockSpec((OC, K), lambda i: (0, 0)),
            pl.BlockSpec((K, M), lambda i: (0, 0)),
            pl.BlockSpec((OC, 1), lambda i: (0, 0)),
        ],
        out_specs=pl.BlockSpec((OC, M), lambda i: (0, 0)),
        compiler_params=pltpu.CompilerParams(dimension_semantics=("arbitrary",)),
        cost_estimate=pl.CostEstimate(
            flops=flops, transcendentals=0, bytes_accessed=bytes_accessed),
    )(w, x, shift)


# ---------------------------------------------------------------------------
# Pallas kernel 2: fused fc1(+ReLU)+fc2 head, computed transposed:
#   outT(A, N) = W2 @ relu(W1 @ featT + b1) + b2
# tiled over fc1's H rows so each 1.6 MB H-major weight block is a contiguous
# DMA pipelined by the grid; fc2 partials accumulate in an f32 VMEM scratch and
# the (A, N) output is written once on the last grid step.
# ---------------------------------------------------------------------------
def _fc_head_kernel(xT_ref, w1_ref, b1_ref, w2_ref, b2_ref, o_ref, acc_ref):
    j = pl.program_id(0)

    @pl.when(j == 0)
    def _():
        acc_ref[...] = jnp.zeros_like(acc_ref)

    # fc1 chunk: (block_h, K) @ (K, N) -> (block_h, N); bias + ReLU in f32.
    h = jnp.dot(w1_ref[...], xT_ref[...], preferred_element_type=jnp.float32)
    h = jnp.maximum(h + b1_ref[...], 0.0)
    # fc2 partial: (A, block_h) @ (block_h, N) -> (A, N), accumulated in VMEM.
    acc_ref[...] += jnp.dot(w2_ref[...], h.astype(w2_ref.dtype),
                            preferred_element_type=jnp.float32)

    @pl.when(j == pl.num_programs(0) - 1)
    def _():
        o_ref[...] = acc_ref[...] + b2_ref[...]


def fc_head(xT, w1, b1, w2, b2, *, block_h=256):
    """xT: (K, N) bf16, w1: (H, K) bf16 (H-major), b1: (H, 1) f32,
    w2: (A, H) bf16, b2: (A, 1) f32  ->  (A, N) f32."""
    K, N = xT.shape
    H, K2 = w1.shape
    A, H2 = w2.shape
    assert K == K2 and H == H2 and H % block_h == 0
    flops = 2 * H * K * N + 2 * A * H * N
    bytes_accessed = 2 * (K * N + H * K + A * H) + 4 * (H + A + A * N)
    return pl.pallas_call(
        _fc_head_kernel,
        out_shape=jax.ShapeDtypeStruct((A, N), jnp.float32),
        grid=(H // block_h,),
        in_specs=[
            pl.BlockSpec((K, N), lambda j: (0, 0)),        # features (resident)
            pl.BlockSpec((block_h, K), lambda j: (j, 0)),  # contiguous w1 rows
            pl.BlockSpec((block_h, 1), lambda j: (j, 0)),  # b1 chunk
            pl.BlockSpec((A, block_h), lambda j: (0, j)),  # w2 columns
            pl.BlockSpec((A, 1), lambda j: (0, 0)),        # b2 (resident)
        ],
        out_specs=pl.BlockSpec((A, N), lambda j: (0, 0)),
        scratch_shapes=[pltpu.VMEM((A, N), jnp.float32)],
        compiler_params=pltpu.CompilerParams(dimension_semantics=("arbitrary",)),
        cost_estimate=pl.CostEstimate(
            flops=flops, transcendentals=0, bytes_accessed=bytes_accessed),
    )(xT, w1, b1, w2, b2)


# ---------------------------------------------------------------------------
# Glue: (C, H, W, N)-layout im2col (pure slicing/stack/reshape, no transposes),
# columns ordered (oh, ow, n) and zero-padded to a multiple of 128 lanes.
# ---------------------------------------------------------------------------
def im2col_chwn(x, kh, kw, stride):
    c, h, w, n = x.shape
    oh = (h - kh) // stride + 1
    ow = (w - kw) // stride + 1
    patches = []
    for i in range(kh):
        for j in range(kw):
            patches.append(
                x[:, i:i + stride * oh:stride, j:j + stride * ow:stride, :])
    cols = jnp.stack(patches, axis=1)                 # (C, KH*KW, OH, OW, N)
    cols = cols.reshape(c * kh * kw, oh * ow * n)
    m = oh * ow * n
    m_pad = _round_up(m, 128)
    if m_pad != m:
        cols = jnp.pad(cols, ((0, 0), (0, m_pad - m)))
    return cols, oh, ow


# ---------------------------------------------------------------------------
# Parameters: PyTorch-style init + one-time inference prep (BN/bias/255 fold,
# bf16 weight storage, matmul-ready layouts)
# ---------------------------------------------------------------------------
def init_params(key, in_channels=4, n_actions=6):
    ks = jax.random.split(key, 16)

    def conv_block(kw_, kb_, kg_, kbeta_, oc, ic, ksz):
        w = jax.random.normal(kw_, (oc, ic, ksz, ksz), jnp.float32) * 0.05
        b = jax.random.normal(kb_, (oc,), jnp.float32) * 0.01
        gamma = 1.0 + 0.1 * jax.random.normal(kg_, (oc,), jnp.float32)
        beta = 0.1 * jax.random.normal(kbeta_, (oc,), jnp.float32)
        mean = jnp.zeros((oc,), jnp.float32)
        var = jnp.ones((oc,), jnp.float32)
        return (w, b, gamma, beta, mean, var)

    return {
        "conv1": conv_block(ks[0], ks[1], ks[2], ks[3], 32, in_channels, 8),
        "conv2": conv_block(ks[4], ks[5], ks[6], ks[7], 64, 32, 4),
        "conv3": conv_block(ks[8], ks[9], ks[10], ks[11], 64, 64, 3),
        "fc1_w": jax.random.normal(ks[12], (512, 64 * 7 * 7), jnp.float32) * 0.02,
        "fc1_b": jax.random.normal(ks[13], (512,), jnp.float32) * 0.01,
        "fc2_w": jax.random.normal(ks[14], (n_actions, 512), jnp.float32) * 0.02,
        "fc2_b": jax.random.normal(ks[15], (n_actions,), jnp.float32) * 0.01,
    }


def prepare_inference_params(params, eps=1e-5):
    """Fold BN (and the /255 input normalisation) into weights; cast to bf16."""
    prep = {}
    for name in ("conv1", "conv2", "conv3"):
        w, b, gamma, beta, mean, var = params[name]
        oc = w.shape[0]
        s = gamma / jnp.sqrt(var + eps)                     # (OC,)
        w_mat = w.reshape(oc, -1) * s[:, None]              # fold BN scale (f32)
        if name == "conv1":
            w_mat = w_mat / 255.0                           # fold x/255
        shift = (b - mean) * s + beta                       # conv bias + BN shift
        prep[name] = (w_mat.astype(jnp.bfloat16),
                      shift.reshape(oc, 1).astype(jnp.float32))
    # fc1 weight kept H-major (512, 3136) -> fully contiguous row-block DMAs.
    prep["fc1_w"] = params["fc1_w"].astype(jnp.bfloat16)
    prep["fc1_b"] = params["fc1_b"].reshape(-1, 1).astype(jnp.float32)
    prep["fc2_w"] = params["fc2_w"].astype(jnp.bfloat16)     # (A, 512)
    prep["fc2_b"] = params["fc2_b"].reshape(-1, 1).astype(jnp.float32)
    return prep


# ---------------------------------------------------------------------------
# Full forward (jit this)
# ---------------------------------------------------------------------------
_KSIZE = {"conv1": 8, "conv2": 4, "conv3": 3}
_STRIDE = {"conv1": 4, "conv2": 2, "conv3": 1}


def convnn_forward(prep, x):
    """x: (N, C, H, W) raw pixels 0..255 -> (N, n_actions) f32."""
    n = x.shape[0]
    # (C, H, W, N) layout; the /255 scaling is folded into conv1's weights.
    # TODO(synk): bf16 cast is exact for integer pixel values 0..255 but loses
    #             mantissa bits for arbitrary float inputs.
    a = x.astype(jnp.bfloat16).transpose(1, 2, 3, 0)
    for name in ("conv1", "conv2", "conv3"):
        w_mat, shift = prep[name]
        k, s = _KSIZE[name], _STRIDE[name]
        cols, oh, ow = im2col_chwn(a, k, k, s)              # (K, M_pad)
        out = conv_matmul(w_mat, cols, shift)               # (OC, M_pad) bf16
        a = out[:, :oh * ow * n].reshape(out.shape[0], oh, ow, n)
    # (64, 7, 7, N) flattens directly to (3136, N) in PyTorch (c, h, w) order —
    # no transpose needed.
    xT = a.reshape(-1, n)
    outT = fc_head(xT, prep["fc1_w"], prep["fc1_b"],
                   prep["fc2_w"], prep["fc2_b"])            # (A, N) f32
    return outT.T                                            # (N, A)


if __name__ == "__main__":
    key = jax.random.PRNGKey(0)
    k_params, k_x = jax.random.split(key)
    params = init_params(k_params, in_channels=4, n_actions=6)
    prep = prepare_inference_params(params)

    # batch=2; spatial must be 84x84 so that 64*7*7 matches fc1, as in the module.
    x = jax.random.uniform(k_x, (2, 4, 84, 84), jnp.float32,
                           minval=0.0, maxval=255.0)

    fwd = jax.jit(convnn_forward)
    out = jax.block_until_ready(fwd(prep, x))
    assert out.shape == (2, 6) and out.dtype == jnp.float32
    print("KERNEL_OK")
</pallas_src>

<mosaic_0001>
module attributes {stable_mosaic.version = 11 : i64} {
  func.func @_conv_matmul_kernel(%arg0: i32, %arg1: memref<32x256xbf16, #tpu.memory_space<vmem>>, %arg2: memref<256x896xbf16, #tpu.memory_space<vmem>>, %arg3: memref<32x1xf32, #tpu.memory_space<vmem>>, %arg4: memref<32x896xbf16, #tpu.memory_space<vmem>>) attributes {dimension_semantics = [#tpu.dimension_semantics<arbitrary>], iteration_bounds = array<i64: 1>, scalar_prefetch = 0 : i64, scratch_operands = 0 : i64, tpu.core_type = #tpu.core_type<tc>, window_params = [{pipeline_mode = #tpu.pipeline_mode<synchronous>, transform_indices = @transform_0, window_bounds = array<i64: 32, 256>}, {pipeline_mode = #tpu.pipeline_mode<synchronous>, transform_indices = @transform_1, window_bounds = array<i64: 256, 896>}, {pipeline_mode = #tpu.pipeline_mode<synchronous>, transform_indices = @transform_2, window_bounds = array<i64: 32, 1>}, {pipeline_mode = #tpu.pipeline_mode<synchronous>, transform_indices = @transform_3, window_bounds = array<i64: 32, 896>}]} {
    %c0 = arith.constant 0 : index
    %c0_0 = arith.constant 0 : index
    %0 = vector.load %arg1[%c0, %c0_0] : memref<32x256xbf16, #tpu.memory_space<vmem>>, vector<32x256xbf16>
    %c0_1 = arith.constant 0 : index
    %c0_2 = arith.constant 0 : index
    %1 = vector.load %arg2[%c0_1, %c0_2] : memref<256x896xbf16, #tpu.memory_space<vmem>>, vector<256x896xbf16>
    %cst = arith.constant dense<0.000000e+00> : vector<32x896xf32>
    %2 = tpu.matmul %0, %1, %cst {dimension_numbers = #tpu.dot_dimension_numbers<[1], [0], [0], [1], [0, 0, 1, 1], [], []>} : vector<32x256xbf16>, vector<256x896xbf16>, vector<32x896xf32> -> vector<32x896xf32>
    %c0_3 = arith.constant 0 : index
    %c0_4 = arith.constant 0 : index
    %3 = vector.load %arg3[%c0_3, %c0_4] : memref<32x1xf32, #tpu.memory_space<vmem>>, vector<32x1xf32>
    %4 = vector.broadcast %3 : vector<32x1xf32> to vector<32x896xf32>
    %5 = arith.addf %2, %4 : vector<32x896xf32>
    %cst_5 = arith.constant 0.000000e+00 : f32
    %6 = vector.broadcast %cst_5 : f32 to vector<32x896xf32>
    %7 = arith.maximumf %5, %6 : vector<32x896xf32>
    %8 = arith.truncf %7 : vector<32x896xf32> to vector<32x896xbf16>
    %c0_6 = arith.constant 0 : index
    %c0_7 = arith.constant 0 : index
    %9 = vector.load %arg4[%c0_6, %c0_7] : memref<32x896xbf16, #tpu.memory_space<vmem>>, vector<32x896xbf16>
    tpu.vector_store %arg4[%c0_6, %c0_7], %8 {strides = array<i32>} : memref<32x896xbf16, #tpu.memory_space<vmem>>, vector<32x896xbf16>,
    return
  }
  func.func @transform_0(%arg0: i32) -> (i32, i32) {
    %c0_i32 = arith.constant 0 : i32
    %c0_i32_0 = arith.constant 0 : i32
    %c0_i32_1 = arith.constant 0 : i32
    return %c0_i32, %c0_i32_0 : i32, i32
  }
  func.func @transform_1(%arg0: i32) -> (i32, i32) {
    %c0_i32 = arith.constant 0 : i32
    %c0_i32_0 = arith.constant 0 : i32
    %c0_i32_1 = arith.constant 0 : i32
    return %c0_i32, %c0_i32_0 : i32, i32
  }
  func.func @transform_2(%arg0: i32) -> (i32, i32) {
    %c0_i32 = arith.constant 0 : i32
    %c0_i32_0 = arith.constant 0 : i32
    %c0_i32_1 = arith.constant 0 : i32
    return %c0_i32, %c0_i32_0 : i32, i32
  }
  func.func @transform_3(%arg0: i32) -> (i32, i32) {
    %c0_i32 = arith.constant 0 : i32
    %c0_i32_0 = arith.constant 0 : i32
    %c0_i32_1 = arith.constant 0 : i32
    return %c0_i32, %c0_i32_0 : i32, i32
  }
}

module attributes {stable_mosaic.version = 11 : i64} {
  func.func @_conv_matmul_kernel(%arg0: i32, %arg1: memref<64x512xbf16, #tpu.memory_space<vmem>>, %arg2: memref<512x256xbf16, #tpu.memory_space<vmem>>, %arg3: memref<64x1xf32, #tpu.memory_space<vmem>>, %arg4: memref<64x256xbf16, #tpu.memory_space<vmem>>) attributes {dimension_semantics = [#tpu.dimension_semantics<arbitrary>], iteration_bounds = array<i64: 1>, scalar_prefetch = 0 : i64, scratch_operands = 0 : i64, tpu.core_type = #tpu.core_type<tc>, window_params = [{pipeline_mode = #tpu.pipeline_mode<synchronous>, transform_indices = @transform_0, window_bounds = array<i64: 64, 512>}, {pipeline_mode = #tpu.pipeline_mode<synchronous>, transform_indices = @transform_1, window_bounds = array<i64: 512, 256>}, {pipeline_mode = #tpu.pipeline_mode<synchronous>, transform_indices = @transform_2, window_bounds = array<i64: 64, 1>}, {pipeline_mode = #tpu.pipeline_mode<synchronous>, transform_indices = @transform_3, window_bounds = array<i64: 64, 256>}]} {
    %c0 = arith.constant 0 : index
    %c0_0 = arith.constant 0 : index
    %0 = vector.load %arg1[%c0, %c0_0] : memref<64x512xbf16, #tpu.memory_space<vmem>>, vector<64x512xbf16>
    %c0_1 = arith.constant 0 : index
    %c0_2 = arith.constant 0 : index
    %1 = vector.load %arg2[%c0_1, %c0_2] : memref<512x256xbf16, #tpu.memory_space<vmem>>, vector<512x256xbf16>
    %cst = arith.constant dense<0.000000e+00> : vector<64x256xf32>
    %2 = tpu.matmul %0, %1, %cst {dimension_numbers = #tpu.dot_dimension_numbers<[1], [0], [0], [1], [0, 0, 1, 1], [], []>} : vector<64x512xbf16>, vector<512x256xbf16>, vector<64x256xf32> -> vector<64x256xf32>
    %c0_3 = arith.constant 0 : index
    %c0_4 = arith.constant 0 : index
    %3 = vector.load %arg3[%c0_3, %c0_4] : memref<64x1xf32, #tpu.memory_space<vmem>>, vector<64x1xf32>
    %4 = vector.broadcast %3 : vector<64x1xf32> to vector<64x256xf32>
    %5 = arith.addf %2, %4 : vector<64x256xf32>
    %cst_5 = arith.constant 0.000000e+00 : f32
    %6 = vector.broadcast %cst_5 : f32 to vector<64x256xf32>
    %7 = arith.maximumf %5, %6 : vector<64x256xf32>
    %8 = arith.truncf %7 : vector<64x256xf32> to vector<64x256xbf16>
    %c0_6 = arith.constant 0 : index
    %c0_7 = arith.constant 0 : index
    %9 = vector.load %arg4[%c0_6, %c0_7] : memref<64x256xbf16, #tpu.memory_space<vmem>>, vector<64x256xbf16>
    tpu.vector_store %arg4[%c0_6, %c0_7], %8 {strides = array<i32>} : memref<64x256xbf16, #tpu.memory_space<vmem>>, vector<64x256xbf16>,
    return
  }
  func.func @transform_0(%arg0: i32) -> (i32, i32) {
    %c0_i32 = arith.constant 0 : i32
    %c0_i32_0 = arith.constant 0 : i32
    %c0_i32_1 = arith.constant 0 : i32
    return %c0_i32, %c0_i32_0 : i32, i32
  }
  func.func @transform_1(%arg0: i32) -> (i32, i32) {
    %c0_i32 = arith.constant 0 : i32
    %c0_i32_0 = arith.constant 0 : i32
    %c0_i32_1 = arith.constant 0 : i32
    return %c0_i32, %c0_i32_0 : i32, i32
  }
  func.func @transform_2(%arg0: i32) -> (i32, i32) {
    %c0_i32 = arith.constant 0 : i32
    %c0_i32_0 = arith.constant 0 : i32
    %c0_i32_1 = arith.constant 0 : i32
    return %c0_i32, %c0_i32_0 : i32, i32
  }
  func.func @transform_3(%arg0: i32) -> (i32, i32) {
    %c0_i32 = arith.constant 0 : i32
    %c0_i32_0 = arith.constant 0 : i32
    %c0_i32_1 = arith.constant 0 : i32
    return %c0_i32, %c0_i32_0 : i32, i32
  }
}

module attributes {stable_mosaic.version = 11 : i64} {
  func.func @_conv_matmul_kernel(%arg0: i32, %arg1: memref<64x576xbf16, #tpu.memory_space<vmem>>, %arg2: memref<576x128xbf16, #tpu.memory_space<vmem>>, %arg3: memref<64x1xf32, #tpu.memory_space<vmem>>, %arg4: memref<64x128xbf16, #tpu.memory_space<vmem>>) attributes {dimension_semantics = [#tpu.dimension_semantics<arbitrary>], iteration_bounds = array<i64: 1>, scalar_prefetch = 0 : i64, scratch_operands = 0 : i64, tpu.core_type = #tpu.core_type<tc>, window_params = [{pipeline_mode = #tpu.pipeline_mode<synchronous>, transform_indices = @transform_0, window_bounds = array<i64: 64, 576>}, {pipeline_mode = #tpu.pipeline_mode<synchronous>, transform_indices = @transform_1, window_bounds = array<i64: 576, 128>}, {pipeline_mode = #tpu.pipeline_mode<synchronous>, transform_indices = @transform_2, window_bounds = array<i64: 64, 1>}, {pipeline_mode = #tpu.pipeline_mode<synchronous>, transform_indices = @transform_3, window_bounds = array<i64: 64, 128>}]} {
    %c0 = arith.constant 0 : index
    %c0_0 = arith.constant 0 : index
    %0 = vector.load %arg1[%c0, %c0_0] : memref<64x576xbf16, #tpu.memory_space<vmem>>, vector<64x576xbf16>
    %c0_1 = arith.constant 0 : index
    %c0_2 = arith.constant 0 : index
    %1 = vector.load %arg2[%c0_1, %c0_2] : memref<576x128xbf16, #tpu.memory_space<vmem>>, vector<576x128xbf16>
    %cst = arith.constant dense<0.000000e+00> : vector<64x128xf32>
    %2 = tpu.matmul %0, %1, %cst {dimension_numbers = #tpu.dot_dimension_numbers<[1], [0], [0], [1], [0, 0, 1, 1], [], []>} : vector<64x576xbf16>, vector<576x128xbf16>, vector<64x128xf32> -> vector<64x128xf32>
    %c0_3 = arith.constant 0 : index
    %c0_4 = arith.constant 0 : index
    %3 = vector.load %arg3[%c0_3, %c0_4] : memref<64x1xf32, #tpu.memory_space<vmem>>, vector<64x1xf32>
    %4 = vector.broadcast %3 : vector<64x1xf32> to vector<64x128xf32>
    %5 = arith.addf %2, %4 : vector<64x128xf32>
    %cst_5 = arith.constant 0.000000e+00 : f32
    %6 = vector.broadcast %cst_5 : f32 to vector<64x128xf32>
    %7 = arith.maximumf %5, %6 : vector<64x128xf32>
    %8 = arith.truncf %7 : vector<64x128xf32> to vector<64x128xbf16>
    %c0_6 = arith.constant 0 : index
    %c0_7 = arith.constant 0 : index
    %9 = vector.load %arg4[%c0_6, %c0_7] : memref<64x128xbf16, #tpu.memory_space<vmem>>, vector<64x128xbf16>
    tpu.vector_store %arg4[%c0_6, %c0_7], %8 {strides = array<i32>} : memref<64x128xbf16, #tpu.memory_space<vmem>>, vector<64x128xbf16>,
    return
  }
  func.func @transform_0(%arg0: i32) -> (i32, i32) {
    %c0_i32 = arith.constant 0 : i32
    %c0_i32_0 = arith.constant 0 : i32
    %c0_i32_1 = arith.constant 0 : i32
    return %c0_i32, %c0_i32_0 : i32, i32
  }
  func.func @transform_1(%arg0: i32) -> (i32, i32) {
    %c0_i32 = arith.constant 0 : i32
    %c0_i32_0 = arith.constant 0 : i32
    %c0_i32_1 = arith.constant 0 : i32
    return %c0_i32, %c0_i32_0 : i32, i32
  }
  func.func @transform_2(%arg0: i32) -> (i32, i32) {
    %c0_i32 = arith.constant 0 : i32
    %c0_i32_0 = arith.constant 0 : i32
    %c0_i32_1 = arith.constant 0 : i32
    return %c0_i32, %c0_i32_0 : i32, i32
  }
  func.func @transform_3(%arg0: i32) -> (i32, i32) {
    %c0_i32 = arith.constant 0 : i32
    %c0_i32_0 = arith.constant 0 : i32
    %c0_i32_1 = arith.constant 0 : i32
    return %c0_i32, %c0_i32_0 : i32, i32
  }
}

module attributes {stable_mosaic.version = 11 : i64} {
  func.func @_fc_head_kernel(%arg0: i32, %arg1: memref<3136x2xbf16, #tpu.memory_space<vmem>>, %arg2: memref<256x3136xbf16, #tpu.memory_space<vmem>>, %arg3: memref<256x1xf32, #tpu.memory_space<vmem>>, %arg4: memref<6x256xbf16, #tpu.memory_space<vmem>>, %arg5: memref<6x1xf32, #tpu.memory_space<vmem>>, %arg6: memref<6x2xf32, #tpu.memory_space<vmem>>, %arg7: memref<6x2xf32, #tpu.memory_space<vmem>>) attributes {dimension_semantics = [#tpu.dimension_semantics<arbitrary>], iteration_bounds = array<i64: 2>, scalar_prefetch = 0 : i64, scratch_operands = 1 : i64, tpu.core_type = #tpu.core_type<tc>, window_params = [{pipeline_mode = #tpu.pipeline_mode<synchronous>, transform_indices = @transform_0, window_bounds = array<i64: 3136, 2>}, {transform_indices = @transform_1, window_bounds = array<i64: 256, 3136>}, {transform_indices = @transform_2, window_bounds = array<i64: 256, 1>}, {transform_indices = @transform_3, window_bounds = array<i64: 6, 256>}, {pipeline_mode = #tpu.pipeline_mode<synchronous>, transform_indices = @transform_4, window_bounds = array<i64: 6, 1>}, {pipeline_mode = #tpu.pipeline_mode<synchronous>, transform_indices = @transform_5, window_bounds = array<i64: 6, 2>}]} {
    %c0_i32 = arith.constant 0 : i32
    %0 = arith.cmpi eq, %arg0, %c0_i32 : i32
    %1 = arith.extui %0 : i1 to i32
    %c0_i32_0 = arith.constant 0 : i32
    %2 = arith.cmpi ne, %1, %c0_i32_0 : i32
    scf.if %2 {
      %cst_15 = arith.constant 0.000000e+00 : f32
      %20 = vector.broadcast %cst_15 : f32 to vector<6x2xf32>
      %c0_16 = arith.constant 0 : index
      %c0_17 = arith.constant 0 : index
      %21 = vector.load %arg7[%c0_16, %c0_17] : memref<6x2xf32, #tpu.memory_space<vmem>>, vector<6x2xf32>
      tpu.vector_store %arg7[%c0_16, %c0_17], %20 {strides = array<i32>} : memref<6x2xf32, #tpu.memory_space<vmem>>, vector<6x2xf32>,
    } else {
    }
    %c0 = arith.constant 0 : index
    %c0_1 = arith.constant 0 : index
    %3 = vector.load %arg2[%c0, %c0_1] : memref<256x3136xbf16, #tpu.memory_space<vmem>>, vector<256x3136xbf16>
    %c0_2 = arith.constant 0 : index
    %c0_3 = arith.constant 0 : index
    %4 = vector.load %arg1[%c0_2, %c0_3] : memref<3136x2xbf16, #tpu.memory_space<vmem>>, vector<3136x2xbf16>
    %cst = arith.constant dense<0.000000e+00> : vector<256x2xf32>
    %5 = tpu.matmul %3, %4, %cst {dimension_numbers = #tpu.dot_dimension_numbers<[1], [0], [0], [1], [0, 0, 1, 1], [], []>} : vector<256x3136xbf16>, vector<3136x2xbf16>, vector<256x2xf32> -> vector<256x2xf32>
    %c0_4 = arith.constant 0 : index
    %c0_5 = arith.constant 0 : index
    %6 = vector.load %arg3[%c0_4, %c0_5] : memref<256x1xf32, #tpu.memory_space<vmem>>, vector<256x1xf32>
    %7 = vector.broadcast %6 : vector<256x1xf32> to vector<256x2xf32>
    %8 = arith.addf %5, %7 : vector<256x2xf32>
    %cst_6 = arith.constant 0.000000e+00 : f32
    %9 = vector.broadcast %cst_6 : f32 to vector<256x2xf32>
    %10 = arith.maximumf %8, %9 : vector<256x2xf32>
    %c0_7 = arith.constant 0 : index
    %c0_8 = arith.constant 0 : index
    %11 = vector.load %arg7[%c0_7, %c0_8] : memref<6x2xf32, #tpu.memory_space<vmem>>, vector<6x2xf32>
    %c0_9 = arith.constant 0 : index
    %c0_10 = arith.constant 0 : index
    %12 = vector.load %arg4[%c0_9, %c0_10] : memref<6x256xbf16, #tpu.memory_space<vmem>>, vector<6x256xbf16>
    %13 = arith.truncf %10 : vector<256x2xf32> to vector<256x2xbf16>
    %cst_11 = arith.constant dense<0.000000e+00> : vector<6x2xf32>
    %14 = tpu.matmul %12, %13, %cst_11 {dimension_numbers = #tpu.dot_dimension_numbers<[1], [0], [0], [1], [0, 0, 1, 1], [], []>} : vector<6x256xbf16>, vector<256x2xbf16>, vector<6x2xf32> -> vector<6x2xf32>
    %15 = arith.addf %11, %14 : vector<6x2xf32>
    %c0_12 = arith.constant 0 : index
    %c0_13 = arith.constant 0 : index
    %16 = vector.load %arg7[%c0_12, %c0_13] : memref<6x2xf32, #tpu.memory_space<vmem>>, vector<6x2xf32>
    tpu.vector_store %arg7[%c0_12, %c0_13], %15 {strides = array<i32>} : memref<6x2xf32, #tpu.memory_space<vmem>>, vector<6x2xf32>,
    %c1_i32 = arith.constant 1 : i32
    %17 = arith.cmpi eq, %arg0, %c1_i32 : i32
    %18 = arith.extui %17 : i1 to i32
    %c0_i32_14 = arith.constant 0 : i32
    %19 = arith.cmpi ne, %18, %c0_i32_14 : i32
    scf.if %19 {
      %c0_15 = arith.constant 0 : index
      %c0_16 = arith.constant 0 : index
      %20 = vector.load %arg7[%c0_15, %c0_16] : memref<6x2xf32, #tpu.memory_space<vmem>>, vector<6x2xf32>
      %c0_17 = arith.constant 0 : index
      %c0_18 = arith.constant 0 : index
      %21 = vector.load %arg5[%c0_17, %c0_18] : memref<6x1xf32, #tpu.memory_space<vmem>>, vector<6x1xf32>
      %22 = vector.broadcast %21 : vector<6x1xf32> to vector<6x2xf32>
      %23 = arith.addf %20, %22 : vector<6x2xf32>
      %c0_19 = arith.constant 0 : index
      %c0_20 = arith.constant 0 : index
      %24 = vector.load %arg6[%c0_19, %c0_20] : memref<6x2xf32, #tpu.memory_space<vmem>>, vector<6x2xf32>
      tpu.vector_store %arg6[%c0_19, %c0_20], %23 {strides = array<i32>} : memref<6x2xf32, #tpu.memory_space<vmem>>, vector<6x2xf32>,
    } else {
    }
    return
  }
  func.func @transform_0(%arg0: i32) -> (i32, i32) {
    %c0_i32 = arith.constant 0 : i32
    %c0_i32_0 = arith.constant 0 : i32
    %c0_i32_1 = arith.constant 0 : i32
    return %c0_i32, %c0_i32_0 : i32, i32
  }
  func.func @transform_1(%arg0: i32) -> (i32, i32) {
    %c0_i32 = arith.constant 0 : i32
    %c0_i32_0 = arith.constant 0 : i32
    return %arg0, %c0_i32 : i32, i32
  }
  func.func @transform_2(%arg0: i32) -> (i32, i32) {
    %c0_i32 = arith.constant 0 : i32
    %c0_i32_0 = arith.constant 0 : i32
    return %arg0, %c0_i32 : i32, i32
  }
  func.func @transform_3(%arg0: i32) -> (i32, i32) {
    %c0_i32 = arith.constant 0 : i32
    %c0_i32_0 = arith.constant 0 : i32
    return %c0_i32, %arg0 : i32, i32
  }
  func.func @transform_4(%arg0: i32) -> (i32, i32) {
    %c0_i32 = arith.constant 0 : i32
    %c0_i32_0 = arith.constant 0 : i32
    %c0_i32_1 = arith.constant 0 : i32
    return %c0_i32, %c0_i32_0 : i32, i32
  }
  func.func @transform_5(%arg0: i32) -> (i32, i32) {
    %c0_i32 = arith.constant 0 : i32
    %c0_i32_0 = arith.constant 0 : i32
    %c0_i32_1 = arith.constant 0 : i32
    return %c0_i32, %c0_i32_0 : i32, i32
  }
}

</mosaic_0001>

<bundles_post_ra>
// kernel: convnn_forward.4
= control target key start
LH: loop header
LB: loop body
LE: loop exit
PB: predicated region body
PF: predicated region fallthrough
CT: control target
= control target key end

     0   :  { %v1456_v11 = vmov 0   ;;  %s1945_s1 = inlined_call_operand.vmem [shape: bf16[256,896], index: 1, kind: input, shape index: {}]   ;;  %s1946_s0 = inlined_call_operand.vmem [shape: bf16[32,256], index: 0, kind: input, shape index: {}]   ;;  %s1947_s2 = inlined_call_operand.vmem [shape: f32[32,1], index: 2, kind: input, shape index: {}]   ;;  %s1948_s3 = inlined_call_operand.vmem [shape: bf16[32,896], index: 3, kind: output, shape index: {}]  }
   0x1   :  { %v1290_v0 = vld [vmem:[%s1945_s1 + $0x4] ss:$28 sps:$4 sm:$0xff]   ;;  %v1293_v2 = vld [vmem:[%s1945_s1 + $0x3c] ss:$28 sps:$4 sm:$0xff]   ;;  %v1296_v4 = vld [vmem:[%s1945_s1 + $0x74] ss:$28 sps:$4 sm:$0xff]   ;;  %1288 = vset.pattern.permute.xlu0 %v1456_v11  ;;  %1289 = vset.pattern.permute.xlu1 %v1456_v11 }
   0x2   :  { %v1292_v1 = vld [vmem:[%s1945_s1] ss:$28 sps:$4 sm:$0xff]   ;;  %767 = vmatprep.subr.bf16.mxu0 %v1290_v0  ;;  %v1295_v3 = vld [vmem:[%s1945_s1 + $0x38] ss:$28 sps:$4 sm:$0xff]   ;;  %v1298_v5 = vld [vmem:[%s1945_s1 + $0x70] ss:$28 sps:$4 sm:$0xff]  }
   0x3   :  { %768 = vmatpush1.bf16.msra.mxu0 %v1292_v1  ;;  %v1299_v6 = vld [vmem:[%s1945_s1 + $0xac] ss:$28 sps:$4 sm:$0xff]   ;;  %v1302_v10 = vld [vmem:[%s1945_s1 + $0xe4] ss:$28 sps:$4 sm:$0xff]   ;;  %v1323_v15 = vld [vmem:[%s1945_s1 + $0x7c] ss:$28 sps:$4 sm:$0xff]  }
   0x4   :  { %769 = vmatprep.subr.bf16.mxu0 %v1293_v2  ;;  %v1311_v7 = vld [vmem:[%s1945_s1 + $0xc] ss:$28 sps:$4 sm:$0xff]   ;;  %v1317_v12 = vld [vmem:[%s1945_s1 + $0x44] ss:$28 sps:$4 sm:$0xff]   ;;  %v1305_v16 = vld [vmem:[%s1945_s1 + $0x11c] ss:$28 sps:$4 sm:$0xff]  }
   0x5   :  { %v1313_v8 = vld [vmem:[%s1945_s1 + $0x8] ss:$28 sps:$4 sm:$0xff]   ;;  %820 = vmatprep.subr.bf16.mxu1 %v1311_v7  ;;  %v1319_v13 = vld [vmem:[%s1945_s1 + $0x40] ss:$28 sps:$4 sm:$0xff]   ;;  %v1325_v17 = vld [vmem:[%s1945_s1 + $0x78] ss:$28 sps:$4 sm:$0xff]  }
   0x6   :  { %v1301_v9 = vld [vmem:[%s1945_s1 + $0xa8] ss:$28 sps:$4 sm:$0xff]   ;;  %821 = vmatpush1.bf16.msra.mxu1 %v1313_v8  ;;  %v1304_v14 = vld [vmem:[%s1945_s1 + $0xe0] ss:$28 sps:$4 sm:$0xff]   ;;  %v1329_v18 = vld [vmem:[%s1945_s1 + $0xb4] ss:$28 sps:$4 sm:$0xff]  }
   0x7   :  { %770 = vmatpush1.bf16.msra.mxu0 %v1295_v3  ;;  %822 = vmatprep.subr.bf16.mxu1 %v1317_v12  ;;  %v1307_v19 = vld [vmem:[%s1945_s1 + $0x118] ss:$28 sps:$4 sm:$0xff]   ;;  %v1331_v21 = vld [vmem:[%s1945_s1 + $0xb0] ss:$28 sps:$4 sm:$0xff]   ;;  %v1337_v25 = vld [vmem:[%s1945_s1 + $0xe8] ss:$28 sps:$4 sm:$0xff]  }
   0x8   :  { %771 = vmatprep.subr.bf16.mxu0 %v1296_v4  ;;  %v1308_v20 = vld [vmem:[%s1945_s1 + $0x154] ss:$28 sps:$4 sm:$0xff]   ;;  %v1335_v22 = vld [vmem:[%s1945_s1 + $0xec] ss:$28 sps:$4 sm:$0xff]   ;;  %v1341_v26 = vld [vmem:[%s1945_s1 + $0x124] ss:$28 sps:$4 sm:$0xff]  }
   0x9   :  { %v1310_v23 = vld [vmem:[%s1945_s1 + $0x150] ss:$28 sps:$4 sm:$0xff]   ;;  %v1316_v27 = vld [vmem:[%s1945_s1 + $0x188] ss:$28 sps:$4 sm:$0xff]   ;;  %v1343_v29 = vld [vmem:[%s1945_s1 + $0x120] ss:$28 sps:$4 sm:$0xff]  }
   0xa   :  { %823 = vmatpush1.bf16.msra.mxu1 %v1319_v13  ;;  %v1314_v24 = vld [vmem:[%s1945_s1 + $0x18c] ss:$28 sps:$4 sm:$0xff]   ;;  %v1320_v28 = vld [vmem:[%s1945_s1 + $0x1c4] ss:$28 sps:$4 sm:$0xff]   ;;  %v1347_v30 = vld [vmem:[%s1945_s1 + $0x15c] ss:$28 sps:$4 sm:$0xff]  }
   0xb   :  { %772 = vmatpush1.bf16.msra.mxu0 %v1298_v5  ;;  %824 = vmatprep.subr.bf16.mxu1 %v1323_v15  ;;  %v1322_v31 = vld [vmem:[%s1945_s1 + $0x1c0] ss:$28 sps:$4 sm:$0xff]   ;;  %v1349_v33 = vld [vmem:[%s1945_s1 + $0x158] ss:$28 sps:$4 sm:$0xff]   ;;  %v1585_v36 = vld [vmem:[%s1946_s0 + $0x4] ss:$8 sps:$4 sm:$0xff]  }
   0xc   :  { %773 = vmatprep.subr.bf16.mxu0 %v1299_v6  ;;  %v1326_v32 = vld [vmem:[%s1945_s1 + $0x1fc] ss:$28 sps:$4 sm:$0xff]   ;;  %v1353_v34 = vld [vmem:[%s1945_s1 + $0x194] ss:$28 sps:$4 sm:$0xff]   ;;  %799 = vmatprep.mubr.bf16.mxu0 %v1585_v36  ;;  %v1359_v39 = vld [vmem:[%s1945_s1 + $0x1cc] ss:$28 sps:$4 sm:$0xff]  }
   0xd   :  { %v1328_v35 = vld [vmem:[%s1945_s1 + $0x1f8] ss:$28 sps:$4 sm:$0xff]   ;;  %v1355_v38 = vld [vmem:[%s1945_s1 + $0x190] ss:$28 sps:$4 sm:$0xff]   ;;  %852 = vmatprep.mubr.bf16.mxu1 %v1585_v36  ;;  %v1361_v42 = vld [vmem:[%s1945_s1 + $0x1c8] ss:$28 sps:$4 sm:$0xff]  }
   0xe   :  { %825 = vmatpush1.bf16.msra.mxu1 %v1325_v17  ;;  %v1332_v37 = vld [vmem:[%s1945_s1 + $0x234] ss:$28 sps:$4 sm:$0xff]   ;;  %v1338_v41 = vld [vmem:[%s1945_s1 + $0x26c] ss:$28 sps:$4 sm:$0xff]   ;;  %v1365_v43 = vld [vmem:[%s1945_s1 + $0x204] ss:$28 sps:$4 sm:$0xff]  }
   0xf   :  { %774 = vmatpush1.bf16.msra.mxu0 %v1301_v9  ;;  %826 = vmatprep.subr.bf16.mxu1 %v1329_v18  ;;  %v1334_v40 = vld [vmem:[%s1945_s1 + $0x230] ss:$28 sps:$4 sm:$0xff]   ;;  %v1340_v44 = vld [vmem:[%s1945_s1 + $0x268] ss:$28 sps:$4 sm:$0xff]   ;;  %v1369_v46 = vld [vmem:[%s1945_s1 + $0x200] ss:$28 sps:$4 sm:$0xff]  }
  0x10   :  { %775 = vmatprep.subr.bf16.mxu0 %v1302_v10  ;;  %v1344_v45 = vld [vmem:[%s1945_s1 + $0x2a4] ss:$28 sps:$4 sm:$0xff]   ;;  %v1374_v47 = vld [vmem:[%s1945_s1 + $0x23c] ss:$28 sps:$4 sm:$0xff]   ;;  %v1380_v51 = vld [vmem:[%s1945_s1 + $0x274] ss:$28 sps:$4 sm:$0xff]  }
  0x11   :  { %v1346_v48 = vld [vmem:[%s1945_s1 + $0x2a0] ss:$28 sps:$4 sm:$0xff]   ;;  %v1376_v50 = vld [vmem:[%s1945_s1 + $0x238] ss:$28 sps:$4 sm:$0xff]   ;;  %v1382_v54 = vld [vmem:[%s1945_s1 + $0x270] ss:$28 sps:$4 sm:$0xff]  }
  0x12   :  { %827 = vmatpush1.bf16.msra.mxu1 %v1331_v21  ;;  %v1350_v49 = vld [vmem:[%s1945_s1 + $0x2dc] ss:$28 sps:$4 sm:$0xff]   ;;  %v1356_v53 = vld [vmem:[%s1945_s1 + $0x314] ss:$28 sps:$4 sm:$0xff]   ;;  %v1386_v55 = vld [vmem:[%s1945_s1 + $0x2ac] ss:$28 sps:$4 sm:$0xff]  }
  0x13   :  { %776 = vmatpush1.bf16.msra.mxu0 %v1304_v14  ;;  %828 = vmatprep.subr.bf16.mxu1 %v1335_v22  ;;  %v1352_v52 = vld [vmem:[%s1945_s1 + $0x2d8] ss:$28 sps:$4 sm:$0xff]   ;;  %v1358_v56 = vld [vmem:[%s1945_s1 + $0x310] ss:$28 sps:$4 sm:$0xff]   ;;  %v1388_v58 = vld [vmem:[%s1945_s1 + $0x2a8] ss:$28 sps:$4 sm:$0xff]  }
  0x14   :  { %777 = vmatprep.subr.bf16.mxu0 %v1305_v16  ;;  %v1362_v57 = vld [vmem:[%s1945_s1 + $0x34c] ss:$28 sps:$4 sm:$0xff]   ;;  %v1392_v59 = vld [vmem:[%s1945_s1 + $0x2e4] ss:$28 sps:$4 sm:$0xff]   ;;  %v1373_v62 = vld [vmem:[%s1945_s1 + $0x14] ss:$28 sps:$4 sm:$0xff]  }
  0x15   :  { %v1364_v60 = vld [vmem:[%s1945_s1 + $0x348] ss:$28 sps:$4 sm:$0xff]   ;;  %v1394_v63 = vld [vmem:[%s1945_s1 + $0x2e0] ss:$28 sps:$4 sm:$0xff]   ;;  %v1371_v1 = vld [vmem:[%s1945_s1 + $0x10] ss:$28 sps:$4 sm:$0xff]  }
  0x16   :  { %829 = vmatpush1.bf16.msra.mxu1 %v1337_v25  ;;  %v1664_v61 = vld [vmem:[%s1946_s0] ss:$8 sps:$4 sm:$0xff]   ;;  %v1398_v0 = vld [vmem:[%s1945_s1 + $0x31c] ss:$28 sps:$4 sm:$0xff]   ;;  %v1404_v4 = vld [vmem:[%s1945_s1 + $0x354] ss:$28 sps:$4 sm:$0xff]  }
  0x17   :  { %778 = vmatpush1.bf16.msra.mxu0 %v1307_v19  ;;  %830 = vmatprep.subr.bf16.mxu1 %v1341_v26  ;;  %v1379_v2 = vld [vmem:[%s1945_s1 + $0x4c] ss:$28 sps:$4 sm:$0xff]   ;;  %v1400_v3 = vld [vmem:[%s1945_s1 + $0x318] ss:$28 sps:$4 sm:$0xff]   ;;  %v1385_v6 = vld [vmem:[%s1945_s1 + $0x84] ss:$28 sps:$4 sm:$0xff]  }
  0x18   :  { %779 = vmatprep.subr.bf16.mxu0 %v1308_v20  ;;  %v1377_v5 = vld [vmem:[%s1945_s1 + $0x48] ss:$28 sps:$4 sm:$0xff]   ;;  %v1406_v7 = vld [vmem:[%s1945_s1 + $0x350] ss:$28 sps:$4 sm:$0xff]   ;;  %v1410_v8 = vld [vmem:[%s1945_s1 + $0x1d8] ss:$28 sps:$4 sm:$0xff]  }
  0x19   :  { %v1383_v9 = vld [vmem:[%s1945_s1 + $0x80] ss:$28 sps:$4 sm:$0xff]   ;;  %v1411_v11 = vld [vmem:[%s1945_s1 + $0x18] ss:$28 sps:$4 sm:$0xff]   ;;  %v1415_v12 = vld [vmem:[%s1945_s1 + $0x210] ss:$28 sps:$4 sm:$0xff]  }
  0x1a   :  { %831 = vmatpush1.bf16.msra.mxu1 %v1343_v29  ;;  %v1391_v10 = vld [vmem:[%s1945_s1 + $0xbc] ss:$28 sps:$4 sm:$0xff]   ;;  %v1397_v15 = vld [vmem:[%s1945_s1 + $0xf4] ss:$28 sps:$4 sm:$0xff]   ;;  %v1420_v17 = vld [vmem:[%s1945_s1 + $0x248] ss:$28 sps:$4 sm:$0xff]  }
  0x1b   :  { %780 = vmatpush1.bf16.msra.mxu0 %v1310_v23  ;;  %832 = vmatprep.subr.bf16.mxu1 %v1347_v30  ;;  %v1715_v13 = vld [vmem:[%s1946_s0 + $0x14] ss:$8 sps:$4 sm:$0xff]   ;;  %v1416_v16 = vld [vmem:[%s1945_s1 + $0x50] ss:$28 sps:$4 sm:$0xff]   ;;  %v1421_v21 = vld [vmem:[%s1945_s1 + $0x88] ss:$28 sps:$4 sm:$0xff]  }
  0x1c   :  { %781 = vmatprep.subr.bf16.mxu0 %v1314_v24  ;;  %v1389_v14 = vld [vmem:[%s1945_s1 + $0xb8] ss:$28 sps:$4 sm:$0xff]   ;;  %v1395_v19 = vld [vmem:[%s1945_s1 + $0xf0] ss:$28 sps:$4 sm:$0xff]   ;;  %v1425_v22 = vld [vmem:[%s1945_s1 + $0x280] ss:$28 sps:$4 sm:$0xff]  }
  0x1d   :  { %v1734_v18 = vld [vmem:[%s1946_s0 + $0x10] ss:$8 sps:$4 sm:$0xff]   ;;  %v1403_v20 = vld [vmem:[%s1945_s1 + $0x12c] ss:$28 sps:$4 sm:$0xff]   ;;  %v147_v23 = vld [vmem:[%s1947_s2] sm:$0xff] }
  0x1e   :  { %833 = vmatpush1.bf16.msra.mxu1 %v1349_v33  ;;  %v1401_v24 = vld [vmem:[%s1945_s1 + $0x128] ss:$28 sps:$4 sm:$0xff]   ;;  %153 = vperm.xlu0 %1288, %v147_v23   ;;  %v149_v25 = vld [vmem:[%s1947_s2 + $0x10] sm:$0xff]  ;;  %v1407_v30 = vld [vmem:[%s1945_s1 + $0x160] ss:$28 sps:$4 sm:$0xff]  }
  0x1f   :  { %782 = vmatpush1.bf16.msra.mxu0 %v1316_v27  ;;  %834 = vmatprep.subr.bf16.mxu1 %v1353_v34  ;;  %v1409_v26 = vld [vmem:[%s1945_s1 + $0x164] ss:$28 sps:$4 sm:$0xff]   ;;  %v148_v27 = vld [vmem:[%s1947_s2 + $0x8] sm:$0xff]  ;;  %v1430_v29 = vld [vmem:[%s1945_s1 + $0x2b8] ss:$28 sps:$4 sm:$0xff]  }
  0x20   :  { %783 = vmatprep.subr.bf16.mxu0 %v1320_v28  ;;  %v1426_v28 = vld [vmem:[%s1945_s1 + $0xc0] ss:$28 sps:$4 sm:$0xff]   ;;  %163 = vperm.xlu1 %1289, %v149_v25   ;;  %v1431_v33 = vld [vmem:[%s1945_s1 + $0xf8] ss:$28 sps:$4 sm:$0xff]   ;;  %v1435_v34 = vld [vmem:[%s1945_s1 + $0x2f0] ss:$28 sps:$4 sm:$0xff]  }
  0x22   :  { %835 = vmatpush1.bf16.msra.mxu1 %v1355_v38  ;;  %158 = vperm.xlu0 %1288, %v148_v27   ;;  %v1443_v38 = vld [vmem:[%s1945_s1 + $0x328] ss:$28 sps:$4 sm:$0xff]  }
  0x23   :  { %784 = vmatpush1.bf16.msra.mxu0 %v1322_v31  ;;  %836 = vmatprep.subr.bf16.mxu1 %v1359_v39  ;;  %v150_v31 = vld [vmem:[%s1947_s2 + $0x18] sm:$0xff]  ;;  %v1417_v39 = vld [vmem:[%s1945_s1 + $0x1d0] ss:$28 sps:$4 sm:$0xff]  }
  0x24   :  { %785 = vmatprep.subr.bf16.mxu0 %v1326_v32  ;;  %v1414_v32 = vld [vmem:[%s1945_s1 + $0x19c] ss:$28 sps:$4 sm:$0xff]   ;;  %168 = vperm.xlu1 %1289, %v150_v31  }
  0x26   :  { %837 = vmatpush1.bf16.msra.mxu1 %v1361_v42  ;;  %v1448_v42 = vld [vmem:[%s1945_s1 + $0x360] ss:$28 sps:$4 sm:$0xff]  }
  0x27   :  { %786 = vmatpush1.bf16.msra.mxu0 %v1328_v35  ;;  %838 = vmatprep.subr.bf16.mxu1 %v1365_v43  ;;  %v1412_v35 = vld [vmem:[%s1945_s1 + $0x198] ss:$28 sps:$4 sm:$0xff]   ;;  %v1422_v43 = vld [vmem:[%s1945_s1 + $0x208] ss:$28 sps:$4 sm:$0xff]  }
  0x28   :  { %787 = vmatprep.subr.bf16.mxu0 %v1332_v37  ;;  %v1436_v37 = vld [vmem:[%s1945_s1 + $0x130] ss:$28 sps:$4 sm:$0xff]  }
  0x2a   :  { %839 = vmatpush1.bf16.msra.mxu1 %v1369_v46  ;;  %v1427_v46 = vld [vmem:[%s1945_s1 + $0x240] ss:$28 sps:$4 sm:$0xff]  }
  0x2b   :  { %788 = vmatpush1.bf16.msra.mxu0 %v1334_v40  ;;  %840 = vmatprep.subr.bf16.mxu1 %v1374_v47  ;;  %v1424_v40 = vld [vmem:[%s1945_s1 + $0x20c] ss:$28 sps:$4 sm:$0xff]   ;;  %v1434_v47 = vld [vmem:[%s1945_s1 + $0x27c] ss:$28 sps:$4 sm:$0xff]  }
  0x2c   :  { %789 = vmatprep.subr.bf16.mxu0 %v1338_v41  ;;  %v1444_v41 = vld [vmem:[%s1945_s1 + $0x168] ss:$28 sps:$4 sm:$0xff]  }
  0x2e   :  { %841 = vmatpush1.bf16.msra.mxu1 %v1376_v50  ;;  %v1437_v50 = vld [vmem:[%s1945_s1 + $0x2b0] ss:$28 sps:$4 sm:$0xff]  }
  0x2f   :  { %790 = vmatpush1.bf16.msra.mxu0 %v1340_v44  ;;  %842 = vmatprep.subr.bf16.mxu1 %v1380_v51  ;;  %v1429_v44 = vld [vmem:[%s1945_s1 + $0x244] ss:$28 sps:$4 sm:$0xff]   ;;  %v1447_v51 = vld [vmem:[%s1945_s1 + $0x2ec] ss:$28 sps:$4 sm:$0xff]  }
  0x30   :  { %791 = vmatprep.subr.bf16.mxu0 %v1344_v45  ;;  %v1449_v45 = vld [vmem:[%s1945_s1 + $0x1a0] ss:$28 sps:$4 sm:$0xff]  }
  0x32   :  { %843 = vmatpush1.bf16.msra.mxu1 %v1382_v54  ;;  %v1450_v54 = vld [vmem:[%s1945_s1 + $0x320] ss:$28 sps:$4 sm:$0xff]  }
  0x33   :  { %792 = vmatpush1.bf16.msra.mxu0 %v1346_v48  ;;  %844 = vmatprep.subr.bf16.mxu1 %v1386_v55  ;;  %v1432_v48 = vld [vmem:[%s1945_s1 + $0x278] ss:$28 sps:$4 sm:$0xff]  }
  0x34   :  { %793 = vmatprep.subr.bf16.mxu0 %v1350_v49  ;;  %v1439_v49 = vld [vmem:[%s1945_s1 + $0x2b4] ss:$28 sps:$4 sm:$0xff]   ;;  %v1455_v55 = vld [vmem:[%s1945_s1 + $0x35c] ss:$28 sps:$4 sm:$0xff]  }
  0x36   :  { %845 = vmatpush1.bf16.msra.mxu1 %v1388_v58 }
  0x37   :  { %794 = vmatpush1.bf16.msra.mxu0 %v1352_v52  ;;  %846 = vmatprep.subr.bf16.mxu1 %v1392_v59  ;;  %v1445_v52 = vld [vmem:[%s1945_s1 + $0x2e8] ss:$28 sps:$4 sm:$0xff]  }
  0x38   :  { %795 = vmatprep.subr.bf16.mxu0 %v1356_v53  ;;  %v1452_v53 = vld [vmem:[%s1945_s1 + $0x324] ss:$28 sps:$4 sm:$0xff]  }
  0x3a   :  { %847 = vmatpush1.bf16.msra.mxu1 %v1394_v63 }
  0x3b   :  { %796 = vmatpush1.bf16.msra.mxu0 %v1358_v56  ;;  %848 = vmatprep.subr.bf16.mxu1 %v1398_v0  ;;  %v1453_v56 = vld [vmem:[%s1945_s1 + $0x358] ss:$28 sps:$4 sm:$0xff]  }
  0x3c   :  { %797 = vmatprep.subr.bf16.mxu0 %v1362_v57 }
  0x3e   :  { %849 = vmatpush1.bf16.msra.mxu1 %v1400_v3 }
  0x3f   :  { %798 = vmatpush1.bf16.msra.mxu0 %v1364_v60  ;;  %850 = vmatprep.subr.bf16.mxu1 %v1404_v4 }
  0x40   :  { %873 = vmatprep.subr.bf16.mxu0 %v1373_v62 }
  0x42   :  { %800 = vmatmul.mubr.bf16.vlgmr.msra.gmra.mrb[0].mxu0 %v1664_v61  ;;  %851 = vmatpush1.bf16.msra.mxu1 %v1406_v7 }
  0x43   :  { %874 = vmatpush1.bf16.msra.mxu0 %v1371_v1  ;;  %1259 = vmatprep.subr.bf16.mxu1 %v1410_v8 }
  0x44   :  { %875 = vmatprep.subr.bf16.mxu0 %v1379_v2  ;;  %809 = vmatprep.mubr.bf16.mxu0 %v1715_v13 }
  0x45   :  { %853 = vmatmul.mubr.bf16.vlgmr.msra.gmra.mrb[0].mxu1 %v1664_v61 }
  0x46   :  { %1260 = vmatpush3.bf16.msra.mxu1 %v1411_v11  ;;  %862 = vmatprep.mubr.bf16.mxu1 %v1715_v13 }
  0x47   :  { %876 = vmatpush1.bf16.msra.mxu0 %v1377_v5  ;;  %1261 = vmatprep.subr.bf16.mxu1 %v1415_v12 }
  0x48   :  { %877 = vmatprep.subr.bf16.mxu0 %v1385_v6 }
  0x4a   :  { %810 = vmatmul.mubr.bf16.gmra.mrb[4].mxu0 %v1734_v18  ;;  %1262 = vmatpush3.bf16.msra.mxu1 %v1416_v16 }
  0x4b   :  { %878 = vmatpush1.bf16.msra.mxu0 %v1383_v9  ;;  %905 = vmatprep.mubr.bf16.mxu0 %v1585_v36 }
  0x4c   :  { %879 = vmatprep.subr.bf16.mxu0 %v1391_v10  ;;  %1263 = vmatprep.subr.bf16.mxu1 %v1420_v17 }
  0x4d   :  { %863 = vmatmul.mubr.bf16.gmra.mrb[4].mxu1 %v1734_v18 }
  0x4e   :  { %1264 = vmatpush3.bf16.msra.mxu1 %v1421_v21  ;;  %958 = vmatprep.mubr.bf16.mxu1 %v1585_v36  ;;  %v1419_v36 = vld [vmem:[%s1945_s1 + $0x1d4] ss:$28 sps:$4 sm:$0xff]  }
  0x4f   :  { %880 = vmatpush1.bf16.msra.mxu0 %v1389_v14  ;;  %1265 = vmatprep.subr.bf16.mxu1 %v1425_v22 }
  0x50   :  { %881 = vmatprep.subr.bf16.mxu0 %v1397_v15 }
  0x52   :  { %1266 = vmatpush3.bf16.msra.mxu1 %v1426_v28 }
  0x53   :  { %882 = vmatpush1.bf16.msra.mxu0 %v1395_v19  ;;  %1267 = vmatprep.subr.bf16.mxu1 %v1430_v29 }
  0x54   :  { %883 = vmatprep.subr.bf16.mxu0 %v1403_v20 }
  0x56   :  { %1268 = vmatpush3.bf16.msra.mxu1 %v1431_v33 }
  0x57   :  { %884 = vmatpush1.bf16.msra.mxu0 %v1401_v24  ;;  %1269 = vmatprep.subr.bf16.mxu1 %v1435_v34 }
  0x58   :  { %885 = vmatprep.subr.bf16.mxu0 %v1409_v26 }
  0x5a   :  { %1270 = vmatpush3.bf16.msra.mxu1 %v1436_v37 }
  0x5b   :  { %886 = vmatpush1.bf16.msra.mxu0 %v1407_v30  ;;  %1271 = vmatprep.subr.bf16.mxu1 %v1443_v38 }
  0x5c   :  { %887 = vmatprep.subr.bf16.mxu0 %v1414_v32 }
  0x5e   :  { %1272 = vmatpush3.bf16.msra.mxu1 %v1444_v41 }
  0x5f   :  { %888 = vmatpush1.bf16.msra.mxu0 %v1412_v35  ;;  %1273 = vmatprep.subr.bf16.mxu1 %v1448_v42 }
  0x60   :  { %889 = vmatprep.subr.bf16.mxu0 %v1419_v36 }
  0x62   :  { %1274 = vmatpush3.bf16.msra.mxu1 %v1449_v45 }
  0x63   :  { %890 = vmatpush1.bf16.msra.mxu0 %v1417_v39 }
  0x64   :  { %891 = vmatprep.subr.bf16.mxu0 %v1424_v40 }
  0x65   :  { %959 = vmatmul.mubr.bf16.vlgmr.msra.gmra.mrb[8].mxu1 %v1664_v61 }
  0x66   :  { %966 = vmatprep.mubr.bf16.mxu1 %v1715_v13 }
  0x67   :  { %892 = vmatpush1.bf16.msra.mxu0 %v1422_v43 }
  0x68   :  { %893 = vmatprep.subr.bf16.mxu0 %v1429_v44 }
  0x6b   :  { %894 = vmatpush1.bf16.msra.mxu0 %v1427_v46 }
  0x6c   :  { %895 = vmatprep.subr.bf16.mxu0 %v1434_v47 }
  0x6d   :  { %967 = vmatmul.mubr.bf16.gmra.mrb[12].mxu1 %v1734_v18 }
  0x6f   :  { %896 = vmatpush1.bf16.msra.mxu0 %v1432_v48 }
  0x70   :  { %897 = vmatprep.subr.bf16.mxu0 %v1439_v49 }
  0x73   :  { %898 = vmatpush1.bf16.msra.mxu0 %v1437_v50 }
  0x74   :  { %899 = vmatprep.subr.bf16.mxu0 %v1447_v51 }
  0x77   :  { %900 = vmatpush1.bf16.msra.mxu0 %v1445_v52 }
  0x78   :  { %901 = vmatprep.subr.bf16.mxu0 %v1452_v53 }
  0x7b   :  { %902 = vmatpush1.bf16.msra.mxu0 %v1450_v54 }
  0x7c   :  { %903 = vmatprep.subr.bf16.mxu0 %v1455_v55 }
  0x7f   :  { %904 = vmatpush1.bf16.msra.mxu0 %v1453_v56 }
  0x82   :  { %906 = vmatmul.mubr.bf16.vlgmr.msra.gmra.mrb[8].mxu0 %v1664_v61 }
  0x83   :  { %915 = vmatprep.mubr.bf16.mxu0 %v1715_v13 }
  0x8a   :  { %916 = vmatmul.mubr.bf16.gmra.mrb[12].mxu0 %v1734_v18 }
  0x9d   :  { %v1861_v57 = vpop.permute.xlu0 %153 }
  0x9f   :  { %v1875_v10 = vpop.permute.xlu1 %163 }
  0xa1   :  { %v1863_v59 = vpop.permute.xlu0 %158 }
  0xa3   :  { %v1882_v26 = vpop.permute.xlu1 %168 }
 0x115   :  { %v801_v58 = vpop.f32.mrb[0].mxu0 }
 0x116   :  { %v802_v60 = vadd.f32 %v801_v58, %v1861_v57  ;;  %v803_v62 = vpop.f32.mrb[1].mxu0 }
 0x117   :  { %v804_v63 = vadd.f32 %v803_v62, %v1861_v57  ;;  %v805_v0 = vpop.f32.mrb[2].mxu0 }
 0x118   :  { %v975_v1 = vmax.f32 %v802_v60, 0.0  ;;  %v806_v2 = vadd.f32 %v805_v0, %v1863_v59  ;;  %v807_v3 = vpop.f32.mrb[3].mxu0  ;;  %v854_v9 = vpop.f32.mrb[0].mxu1 }
 0x119   :  { %v976_v61 = vmax.f32 %v804_v63, 0.0  ;;  %v808_v4 = vadd.f32 %v807_v3, %v1863_v59  ;;  %v855_v11 = vadd.f32 %v854_v9, %v1861_v57  ;;  %v856_v12 = vpop.f32.mrb[1].mxu1 }
 0x11a   :  { %v982_v5 = vmax.f32 %v806_v2, 0.0  ;;  %v857_v13 = vadd.f32 %v856_v12, %v1861_v57  ;;  %v858_v14 = vpop.f32.mrb[2].mxu1 }
 0x11b   :  { %v1243_v6 = vpack.c.bf16 %v976_v61, %v975_v1  ;;  %v983_v7 = vmax.f32 %v808_v4, 0.0  ;;  %v977_v15 = vmax.f32 %v855_v11, 0.0  ;;  %v859_v16 = vadd.f32 %v858_v14, %v1863_v59  ;;  %v860_v17 = vpop.f32.mrb[3].mxu1 }
 0x11c   :  { %v978_v18 = vmax.f32 %v857_v13, 0.0  ;;  %v861_v19 = vadd.f32 %v860_v17, %v1863_v59 }
 0x11d   :  { %1091 = vst [vmem:[%s1948_s3] sm:$0xff] %v1243_v6  ;;  %v1247_v8 = vpack.c.bf16 %v983_v7, %v982_v5  ;;  %v811_v20 = vpop.f32.mrb[4].mxu0  ;;  %v984_v21 = vmax.f32 %v859_v16, 0.0 }
 0x11e   :  { %v812_v22 = vadd.f32 %v811_v20, %v1875_v10  ;;  %v813_v23 = vpop.f32.mrb[5].mxu0  ;;  %v1244_v24 = vpack.c.bf16 %v978_v18, %v977_v15  ;;  %v985_v25 = vmax.f32 %v861_v19, 0.0 }
 0x11f   :  { %1095 = vst [vmem:[%s1948_s3 + $0x1c] sm:$0xff] %v1247_v8  ;;  %v814_v27 = vadd.f32 %v813_v23, %v1875_v10  ;;  %v815_v28 = vpop.f32.mrb[6].mxu0 }
 0x120   :  { %v989_v29 = vmax.f32 %v812_v22, 0.0  ;;  %v816_v30 = vadd.f32 %v815_v28, %v1882_v26  ;;  %v817_v31 = vpop.f32.mrb[7].mxu0  ;;  %1092 = vst [vmem:[%s1948_s3 + $0x8] sm:$0xff] %v1244_v24  ;;  %v1248_v32 = vpack.c.bf16 %v985_v25, %v984_v21  ;;  %v864_v33 = vpop.f32.mrb[4].mxu1 }
 0x121   :  { %v990_v34 = vmax.f32 %v814_v27, 0.0  ;;  %v818_v35 = vadd.f32 %v817_v31, %v1882_v26  ;;  %v865_v36 = vadd.f32 %v864_v33, %v1875_v10  ;;  %v866_v37 = vpop.f32.mrb[5].mxu1 }
 0x122   :  { %v996_v38 = vmax.f32 %v816_v30, 0.0  ;;  %1096 = vst [vmem:[%s1948_s3 + $0x24] sm:$0xff] %v1248_v32  ;;  %v867_v39 = vadd.f32 %v866_v37, %v1875_v10  ;;  %v868_v40 = vpop.f32.mrb[6].mxu1 }
 0x123   :  { %v1251_v41 = vpack.c.bf16 %v990_v34, %v989_v29  ;;  %v997_v42 = vmax.f32 %v818_v35, 0.0  ;;  %v991_v43 = vmax.f32 %v865_v36, 0.0  ;;  %v869_v44 = vadd.f32 %v868_v40, %v1882_v26  ;;  %v870_v45 = vpop.f32.mrb[7].mxu1 }
 0x124   :  { %v992_v46 = vmax.f32 %v867_v39, 0.0  ;;  %v871_v47 = vadd.f32 %v870_v45, %v1882_v26 }
 0x125   :  { %1099 = vst [vmem:[%s1948_s3 + $0x38] sm:$0xff] %v1251_v41  ;;  %v1255_v48 = vpack.c.bf16 %v997_v42, %v996_v38  ;;  %v998_v49 = vmax.f32 %v869_v44, 0.0 }
 0x126   :  { %v1252_v50 = vpack.c.bf16 %v992_v46, %v991_v43  ;;  %v999_v51 = vmax.f32 %v871_v47, 0.0 }
 0x127   :  { %1103 = vst [vmem:[%s1948_s3 + $0x54] sm:$0xff] %v1255_v48 }
 0x128   :  { %1100 = vst [vmem:[%s1948_s3 + $0x40] sm:$0xff] %v1252_v50  ;;  %v1256_v52 = vpack.c.bf16 %v999_v51, %v998_v49 }
 0x12a   :  { %1104 = vst [vmem:[%s1948_s3 + $0x5c] sm:$0xff] %v1256_v52 }
 0x138   :  { %v1275_v53 = vpop.f32.mrb[8].mxu1 }
 0x139   :  { %v1276_v54 = vpop.f32.mrb[9].mxu1 }
 0x13a   :  { %v1277_v55 = vadd.f32 %v1276_v54, %v1275_v53  ;;  %v1278_v56 = vpop.f32.mrb[10].mxu1 }
 0x13b   :  { %v1279_v58 = vpop.f32.mrb[11].mxu1 }
 0x13c   :  { %v961_v60 = vadd.f32 %v1277_v55, %v1861_v57  ;;  %v1280_v62 = vadd.f32 %v1279_v58, %v1278_v56 }
 0x13e   :  { %v981_v63 = vmax.f32 %v961_v60, 0.0  ;;  %v964_v0 = vadd.f32 %v1280_v62, %v1863_v59 }
 0x140   :  { %v1246_v1 = vpack.c.bf16 %v981_v63, %v981_v63  ;;  %v988_v2 = vmax.f32 %v964_v0, 0.0  ;;  %v1281_v3 = vpop.f32.mrb[12].mxu1 }
 0x141   :  { %v1282_v61 = vpop.f32.mrb[13].mxu1 }
 0x142   :  { %1094 = vst [vmem:[%s1948_s3 + $0x18] sm:$0xf] %v1246_v1  ;;  %v1250_v4 = vpack.c.bf16 %v988_v2, %v988_v2  ;;  %v1283_v5 = vadd.f32 %v1282_v61, %v1281_v3  ;;  %v1284_v6 = vpop.f32.mrb[14].mxu1 }
 0x143   :  { %v1285_v7 = vpop.f32.mrb[15].mxu1 }
 0x144   :  { %1098 = vst [vmem:[%s1948_s3 + $0x34] sm:$0xf] %v1250_v4  ;;  %v969_v8 = vadd.f32 %v1283_v5, %v1875_v10  ;;  %v1286_v9 = vadd.f32 %v1285_v7, %v1284_v6 }
 0x146   :  { %v995_v11 = vmax.f32 %v969_v8, 0.0  ;;  %v972_v12 = vadd.f32 %v1286_v9, %v1882_v26 }
 0x148   :  { %v1254_v13 = vpack.c.bf16 %v995_v11, %v995_v11  ;;  %v1002_v14 = vmax.f32 %v972_v12, 0.0 }
 0x14a   :  { %1102 = vst [vmem:[%s1948_s3 + $0x50] sm:$0xf] %v1254_v13  ;;  %v1258_v15 = vpack.c.bf16 %v1002_v14, %v1002_v14 }
 0x14c   :  { %1106 = vst [vmem:[%s1948_s3 + $0x6c] sm:$0xf] %v1258_v15 }
 0x155   :  { %v907_v16 = vpop.f32.mrb[8].mxu0 }
 0x156   :  { %v908_v17 = vadd.f32 %v907_v16, %v1861_v57  ;;  %v909_v18 = vpop.f32.mrb[9].mxu0 }
 0x157   :  { %v910_v19 = vadd.f32 %v909_v18, %v1861_v57  ;;  %v911_v20 = vpop.f32.mrb[10].mxu0 }
 0x158   :  { %v979_v21 = vmax.f32 %v908_v17, 0.0  ;;  %v912_v22 = vadd.f32 %v911_v20, %v1863_v59  ;;  %v913_v23 = vpop.f32.mrb[11].mxu0 }
 0x159   :  { %v980_v24 = vmax.f32 %v910_v19, 0.0  ;;  %v914_v25 = vadd.f32 %v913_v23, %v1863_v59 }
 0x15a   :  { %v986_v27 = vmax.f32 %v912_v22, 0.0 }
 0x15b   :  { %v1245_v28 = vpack.c.bf16 %v980_v24, %v979_v21  ;;  %v987_v29 = vmax.f32 %v914_v25, 0.0 }
 0x15d   :  { %1093 = vst [vmem:[%s1948_s3 + $0x10] sm:$0xff] %v1245_v28  ;;  %v1249_v30 = vpack.c.bf16 %v987_v29, %v986_v27  ;;  %v917_v31 = vpop.f32.mrb[12].mxu0 }
 0x15e   :  { %v918_v32 = vadd.f32 %v917_v31, %v1875_v10  ;;  %v919_v57 = vpop.f32.mrb[13].mxu0 }
 0x15f   :  { %1097 = vst [vmem:[%s1948_s3 + $0x2c] sm:$0xff] %v1249_v30  ;;  %v920_v33 = vadd.f32 %v919_v57, %v1875_v10  ;;  %v921_v34 = vpop.f32.mrb[14].mxu0 }
 0x160   :  { %v993_v59 = vmax.f32 %v918_v32, 0.0  ;;  %v922_v35 = vadd.f32 %v921_v34, %v1882_v26  ;;  %v923_v36 = vpop.f32.mrb[15].mxu0 }
 0x161   :  { %v994_v37 = vmax.f32 %v920_v33, 0.0  ;;  %v924_v38 = vadd.f32 %v923_v36, %v1882_v26 }
 0x162   :  { %v1000_v39 = vmax.f32 %v922_v35, 0.0 }
 0x163   :  { %v1253_v40 = vpack.c.bf16 %v994_v37, %v993_v59  ;;  %v1001_v41 = vmax.f32 %v924_v38, 0.0 }
 0x165   :  { %1101 = vst [vmem:[%s1948_s3 + $0x48] sm:$0xff] %v1253_v40  ;;  %v1257_v42 = vpack.c.bf16 %v1001_v41, %v1000_v39 }
 0x167   :  { %1105 = vst [vmem:[%s1948_s3 + $0x64] sm:$0xff] %v1257_v42 }

// kernel: convnn_forward.5
= control target key start
LH: loop header
LB: loop body
LE: loop exit
PB: predicated region body
PF: predicated region fallthrough
CT: control target
= control target key end

     0   :  { %v1015_v1 = vmov 0   ;;  %s1324_s1 = inlined_call_operand.vmem [shape: bf16[512,256], index: 1, kind: input, shape index: {}]   ;;  %s1325_s0 = inlined_call_operand.vmem [shape: bf16[64,512], index: 0, kind: input, shape index: {}]   ;;  %s1326_s2 = inlined_call_operand.vmem [shape: f32[64,1], index: 2, kind: input, shape index: {}]   ;;  %s1327_s3 = inlined_call_operand.vmem [shape: bf16[64,256], index: 3, kind: output, shape index: {}]  }
   0x1   :  { %v895_v0 = vld [vmem:[%s1324_s1 + $0x4] ss:$8 sps:$4 sm:$0xff]   ;;  %893 = vset.pattern.permute.xlu0 %v1015_v1  ;;  %894 = vset.pattern.permute.xlu1 %v1015_v1  ;;  %v899_v3 = vld [vmem:[%s1324_s1] ss:$8 sps:$4 sm:$0xff]   ;;  %v901_v5 = vld [vmem:[%s1324_s1 + $0x14] ss:$8 sps:$4 sm:$0xff]  }
   0x2   :  { %v897_v2 = vld [vmem:[%s1324_s1 + $0x104] ss:$8 sps:$4 sm:$0xff]   ;;  %542 = vmatprep.subr.bf16.mxu1 %v895_v0  ;;  %v900_v4 = vld [vmem:[%s1324_s1 + $0x100] ss:$8 sps:$4 sm:$0xff]   ;;  %v903_v6 = vld [vmem:[%s1324_s1 + $0x114] ss:$8 sps:$4 sm:$0xff]  }
   0x3   :  { %615 = vmatprep.subr.bf16.mxu0 %v897_v2  ;;  %543 = vmatpush1.bf16.msra.mxu1 %v899_v3  ;;  %v905_v7 = vld [vmem:[%s1324_s1 + $0x10] ss:$8 sps:$4 sm:$0xff]   ;;  %v907_v9 = vld [vmem:[%s1324_s1 + $0x24] ss:$8 sps:$4 sm:$0xff]   ;;  %v911_v11 = vld [vmem:[%s1324_s1 + $0x20] ss:$8 sps:$4 sm:$0xff]  }
   0x4   :  { %616 = vmatpush1.bf16.msra.mxu0 %v900_v4  ;;  %544 = vmatprep.subr.bf16.mxu1 %v901_v5  ;;  %v906_v8 = vld [vmem:[%s1324_s1 + $0x110] ss:$8 sps:$4 sm:$0xff]   ;;  %v909_v10 = vld [vmem:[%s1324_s1 + $0x124] ss:$8 sps:$4 sm:$0xff]   ;;  %v912_v12 = vld [vmem:[%s1324_s1 + $0x120] ss:$8 sps:$4 sm:$0xff]  }
   0x5   :  { %617 = vmatprep.subr.bf16.mxu0 %v903_v6  ;;  %v913_v13 = vld [vmem:[%s1324_s1 + $0x34] ss:$8 sps:$4 sm:$0xff]   ;;  %v917_v15 = vld [vmem:[%s1324_s1 + $0x30] ss:$8 sps:$4 sm:$0xff]   ;;  %v919_v17 = vld [vmem:[%s1324_s1 + $0x44] ss:$8 sps:$4 sm:$0xff]  }
   0x6   :  { %v915_v14 = vld [vmem:[%s1324_s1 + $0x134] ss:$8 sps:$4 sm:$0xff]   ;;  %v918_v16 = vld [vmem:[%s1324_s1 + $0x130] ss:$8 sps:$4 sm:$0xff]   ;;  %v921_v18 = vld [vmem:[%s1324_s1 + $0x144] ss:$8 sps:$4 sm:$0xff]  }
   0x7   :  { %545 = vmatpush1.bf16.msra.mxu1 %v905_v7  ;;  %v923_v19 = vld [vmem:[%s1324_s1 + $0x40] ss:$8 sps:$4 sm:$0xff]   ;;  %v925_v21 = vld [vmem:[%s1324_s1 + $0x54] ss:$8 sps:$4 sm:$0xff]   ;;  %v929_v23 = vld [vmem:[%s1324_s1 + $0x50] ss:$8 sps:$4 sm:$0xff]  }
   0x8   :  { %618 = vmatpush1.bf16.msra.mxu0 %v906_v8  ;;  %546 = vmatprep.subr.bf16.mxu1 %v907_v9  ;;  %v924_v20 = vld [vmem:[%s1324_s1 + $0x140] ss:$8 sps:$4 sm:$0xff]   ;;  %v927_v22 = vld [vmem:[%s1324_s1 + $0x154] ss:$8 sps:$4 sm:$0xff]   ;;  %v930_v24 = vld [vmem:[%s1324_s1 + $0x150] ss:$8 sps:$4 sm:$0xff]  }
   0x9   :  { %619 = vmatprep.subr.bf16.mxu0 %v909_v10  ;;  %v931_v25 = vld [vmem:[%s1324_s1 + $0x64] ss:$8 sps:$4 sm:$0xff]   ;;  %v935_v27 = vld [vmem:[%s1324_s1 + $0x60] ss:$8 sps:$4 sm:$0xff]   ;;  %v937_v29 = vld [vmem:[%s1324_s1 + $0x74] ss:$8 sps:$4 sm:$0xff]  }
   0xa   :  { %v933_v26 = vld [vmem:[%s1324_s1 + $0x164] ss:$8 sps:$4 sm:$0xff]   ;;  %v936_v28 = vld [vmem:[%s1324_s1 + $0x160] ss:$8 sps:$4 sm:$0xff]   ;;  %v939_v30 = vld [vmem:[%s1324_s1 + $0x174] ss:$8 sps:$4 sm:$0xff]  }
   0xb   :  { %547 = vmatpush1.bf16.msra.mxu1 %v911_v11  ;;  %v941_v31 = vld [vmem:[%s1324_s1 + $0x70] ss:$8 sps:$4 sm:$0xff]   ;;  %v943_v33 = vld [vmem:[%s1324_s1 + $0x84] ss:$8 sps:$4 sm:$0xff]   ;;  %v947_v35 = vld [vmem:[%s1324_s1 + $0x80] ss:$8 sps:$4 sm:$0xff]  }
   0xc   :  { %620 = vmatpush1.bf16.msra.mxu0 %v912_v12  ;;  %548 = vmatprep.subr.bf16.mxu1 %v913_v13  ;;  %v942_v32 = vld [vmem:[%s1324_s1 + $0x170] ss:$8 sps:$4 sm:$0xff]   ;;  %v945_v34 = vld [vmem:[%s1324_s1 + $0x184] ss:$8 sps:$4 sm:$0xff]   ;;  %v948_v36 = vld [vmem:[%s1324_s1 + $0x180] ss:$8 sps:$4 sm:$0xff]  }
   0xd   :  { %621 = vmatprep.subr.bf16.mxu0 %v915_v14  ;;  %v949_v37 = vld [vmem:[%s1324_s1 + $0x94] ss:$8 sps:$4 sm:$0xff]   ;;  %v953_v39 = vld [vmem:[%s1324_s1 + $0x90] ss:$8 sps:$4 sm:$0xff]   ;;  %v955_v41 = vld [vmem:[%s1324_s1 + $0xa4] ss:$8 sps:$4 sm:$0xff]  }
   0xe   :  { %v951_v38 = vld [vmem:[%s1324_s1 + $0x194] ss:$8 sps:$4 sm:$0xff]   ;;  %v954_v40 = vld [vmem:[%s1324_s1 + $0x190] ss:$8 sps:$4 sm:$0xff]   ;;  %v957_v42 = vld [vmem:[%s1324_s1 + $0x1a4] ss:$8 sps:$4 sm:$0xff]  }
   0xf   :  { %549 = vmatpush1.bf16.msra.mxu1 %v917_v15  ;;  %v959_v43 = vld [vmem:[%s1324_s1 + $0xa0] ss:$8 sps:$4 sm:$0xff]   ;;  %v961_v45 = vld [vmem:[%s1324_s1 + $0xb4] ss:$8 sps:$4 sm:$0xff]   ;;  %v965_v47 = vld [vmem:[%s1324_s1 + $0xb0] ss:$8 sps:$4 sm:$0xff]  }
  0x10   :  { %622 = vmatpush1.bf16.msra.mxu0 %v918_v16  ;;  %550 = vmatprep.subr.bf16.mxu1 %v919_v17  ;;  %v960_v44 = vld [vmem:[%s1324_s1 + $0x1a0] ss:$8 sps:$4 sm:$0xff]   ;;  %v963_v46 = vld [vmem:[%s1324_s1 + $0x1b4] ss:$8 sps:$4 sm:$0xff]   ;;  %v966_v48 = vld [vmem:[%s1324_s1 + $0x1b0] ss:$8 sps:$4 sm:$0xff]  }
  0x11   :  { %623 = vmatprep.subr.bf16.mxu0 %v921_v18  ;;  %v967_v49 = vld [vmem:[%s1324_s1 + $0xc4] ss:$8 sps:$4 sm:$0xff]   ;;  %v971_v53 = vld [vmem:[%s1324_s1 + $0xc0] ss:$8 sps:$4 sm:$0xff]   ;;  %v973_v55 = vld [vmem:[%s1324_s1 + $0xd4] ss:$8 sps:$4 sm:$0xff]  }
  0x12   :  { %v993_v50 = vld [vmem:[%s1325_s0 + $0x4] ss:$16 sps:$4 sm:$0xff]   ;;  %v996_v52 = vld [vmem:[%s1325_s0 + $0xc] ss:$16 sps:$4 sm:$0xff]   ;;  %v972_v54 = vld [vmem:[%s1324_s1 + $0x1c0] ss:$8 sps:$4 sm:$0xff]  }
  0x13   :  { %551 = vmatpush1.bf16.msra.mxu1 %v923_v19  ;;  %v969_v51 = vld [vmem:[%s1324_s1 + $0x1c4] ss:$8 sps:$4 sm:$0xff]   ;;  %574 = vmatprep.mubr.bf16.mxu1 %v993_v50  ;;  %v975_v56 = vld [vmem:[%s1324_s1 + $0x1d4] ss:$8 sps:$4 sm:$0xff]   ;;  %v977_v57 = vld [vmem:[%s1324_s1 + $0xd0] ss:$8 sps:$4 sm:$0xff]  }
  0x14   :  { %624 = vmatpush1.bf16.msra.mxu0 %v924_v20  ;;  %552 = vmatprep.subr.bf16.mxu1 %v925_v21  ;;  %v978_v58 = vld [vmem:[%s1324_s1 + $0x1d0] ss:$8 sps:$4 sm:$0xff]   ;;  %v979_v59 = vld [vmem:[%s1324_s1 + $0xe4] ss:$8 sps:$4 sm:$0xff]   ;;  %v983_v0 = vld [vmem:[%s1324_s1 + $0xe0] ss:$8 sps:$4 sm:$0xff]  }
  0x15   :  { %625 = vmatprep.subr.bf16.mxu0 %v927_v22  ;;  %647 = vmatprep.mubr.bf16.mxu0 %v996_v52  ;;  %v981_v60 = vld [vmem:[%s1324_s1 + $0x1e4] ss:$8 sps:$4 sm:$0xff]   ;;  %v96_v62 = vld [vmem:[%s1326_s2 + $0x10] sm:$0xff]  ;;  %v984_v1 = vld [vmem:[%s1324_s1 + $0x1e0] ss:$8 sps:$4 sm:$0xff]  }
  0x16   :  { %v94_v61 = vld [vmem:[%s1326_s2] sm:$0xff]  ;;  %v95_v63 = vld [vmem:[%s1326_s2 + $0x8] sm:$0xff]  ;;  %114 = vperm.xlu1 %894, %v96_v62   ;;  %v97_v2 = vld [vmem:[%s1326_s2 + $0x18] sm:$0xff] }
  0x17   :  { %553 = vmatpush1.bf16.msra.mxu1 %v929_v23  ;;  %104 = vperm.xlu0 %893, %v94_v61   ;;  %v985_v3 = vld [vmem:[%s1324_s1 + $0xf4] ss:$8 sps:$4 sm:$0xff]   ;;  %v98_v5 = vld [vmem:[%s1326_s2 + $0x20] sm:$0xff]  ;;  %v989_v6 = vld [vmem:[%s1324_s1 + $0xf0] ss:$8 sps:$4 sm:$0xff]  }
  0x18   :  { %626 = vmatpush1.bf16.msra.mxu0 %v930_v24  ;;  %554 = vmatprep.subr.bf16.mxu1 %v931_v25  ;;  %v987_v4 = vld [vmem:[%s1324_s1 + $0x1f4] ss:$8 sps:$4 sm:$0xff]   ;;  %v990_v7 = vld [vmem:[%s1324_s1 + $0x1f0] ss:$8 sps:$4 sm:$0xff]   ;;  %v99_v8 = vld [vmem:[%s1326_s2 + $0x28] sm:$0xff] }
  0x19   :  { %627 = vmatprep.subr.bf16.mxu0 %v933_v26  ;;  %v991_v9 = vld [vmem:[%s1325_s0] ss:$16 sps:$4 sm:$0xff]   ;;  %v994_v10 = vld [vmem:[%s1325_s0 + $0x8] ss:$16 sps:$4 sm:$0xff]   ;;  %v997_v12 = vld [vmem:[%s1325_s0 + $0x24] ss:$16 sps:$4 sm:$0xff]  }
  0x1a   :  { %119 = vperm.xlu1 %894, %v97_v2   ;;  %v100_v11 = vld [vmem:[%s1326_s2 + $0x30] sm:$0xff]  ;;  %v999_v13 = vld [vmem:[%s1325_s0 + $0x2c] ss:$16 sps:$4 sm:$0xff]   ;;  %v1002_v16 = vld [vmem:[%s1325_s0 + $0x28] ss:$16 sps:$4 sm:$0xff]  }
  0x1b   :  { %555 = vmatpush1.bf16.msra.mxu1 %v935_v27  ;;  %109 = vperm.xlu0 %893, %v95_v63   ;;  %v101_v14 = vld [vmem:[%s1326_s2 + $0x38] sm:$0xff]  ;;  %v1001_v15 = vld [vmem:[%s1325_s0 + $0x20] ss:$16 sps:$4 sm:$0xff]   ;;  %v1003_v17 = vld [vmem:[%s1325_s0 + $0x44] ss:$16 sps:$4 sm:$0xff]  }
  0x1c   :  { %628 = vmatpush1.bf16.msra.mxu0 %v936_v28  ;;  %556 = vmatprep.subr.bf16.mxu1 %v937_v29  ;;  %v1005_v18 = vld [vmem:[%s1325_s0 + $0x4c] ss:$16 sps:$4 sm:$0xff]   ;;  %v1007_v19 = vld [vmem:[%s1325_s0 + $0x40] ss:$16 sps:$4 sm:$0xff]   ;;  %v1008_v20 = vld [vmem:[%s1325_s0 + $0x48] ss:$16 sps:$4 sm:$0xff]  }
  0x1d   :  { %629 = vmatprep.subr.bf16.mxu0 %v939_v30  ;;  %v1009_v21 = vld [vmem:[%s1325_s0 + $0x64] ss:$16 sps:$4 sm:$0xff]   ;;  %v1011_v22 = vld [vmem:[%s1325_s0 + $0x6c] ss:$16 sps:$4 sm:$0xff]   ;;  %v1013_v23 = vld [vmem:[%s1325_s0 + $0x60] ss:$16 sps:$4 sm:$0xff]  }
  0x1e   :  { %129 = vperm.xlu1 %894, %v99_v8   ;;  %v1014_v24 = vld [vmem:[%s1325_s0 + $0x68] ss:$16 sps:$4 sm:$0xff]  }
  0x1f   :  { %557 = vmatpush1.bf16.msra.mxu1 %v941_v31  ;;  %124 = vperm.xlu0 %893, %v98_v5  }
  0x20   :  { %630 = vmatpush1.bf16.msra.mxu0 %v942_v32  ;;  %558 = vmatprep.subr.bf16.mxu1 %v943_v33 }
  0x21   :  { %631 = vmatprep.subr.bf16.mxu0 %v945_v34 }
  0x22   :  { %139 = vperm.xlu1 %894, %v101_v14  }
  0x23   :  { %559 = vmatpush1.bf16.msra.mxu1 %v947_v35  ;;  %134 = vperm.xlu0 %893, %v100_v11  }
  0x24   :  { %632 = vmatpush1.bf16.msra.mxu0 %v948_v36  ;;  %560 = vmatprep.subr.bf16.mxu1 %v949_v37 }
  0x25   :  { %633 = vmatprep.subr.bf16.mxu0 %v951_v38 }
  0x27   :  { %561 = vmatpush1.bf16.msra.mxu1 %v953_v39 }
  0x28   :  { %634 = vmatpush1.bf16.msra.mxu0 %v954_v40  ;;  %562 = vmatprep.subr.bf16.mxu1 %v955_v41 }
  0x29   :  { %635 = vmatprep.subr.bf16.mxu0 %v957_v42 }
  0x2b   :  { %563 = vmatpush1.bf16.msra.mxu1 %v959_v43 }
  0x2c   :  { %636 = vmatpush1.bf16.msra.mxu0 %v960_v44  ;;  %564 = vmatprep.subr.bf16.mxu1 %v961_v45 }
  0x2d   :  { %637 = vmatprep.subr.bf16.mxu0 %v963_v46 }
  0x2f   :  { %565 = vmatpush1.bf16.msra.mxu1 %v965_v47 }
  0x30   :  { %638 = vmatpush1.bf16.msra.mxu0 %v966_v48  ;;  %566 = vmatprep.subr.bf16.mxu1 %v967_v49 }
  0x31   :  { %639 = vmatprep.subr.bf16.mxu0 %v969_v51 }
  0x33   :  { %567 = vmatpush1.bf16.msra.mxu1 %v971_v53 }
  0x34   :  { %640 = vmatpush1.bf16.msra.mxu0 %v972_v54  ;;  %568 = vmatprep.subr.bf16.mxu1 %v973_v55 }
  0x35   :  { %641 = vmatprep.subr.bf16.mxu0 %v975_v56 }
  0x37   :  { %569 = vmatpush1.bf16.msra.mxu1 %v977_v57 }
  0x38   :  { %642 = vmatpush1.bf16.msra.mxu0 %v978_v58  ;;  %570 = vmatprep.subr.bf16.mxu1 %v979_v59 }
  0x39   :  { %643 = vmatprep.subr.bf16.mxu0 %v981_v60 }
  0x3b   :  { %571 = vmatpush1.bf16.msra.mxu1 %v983_v0 }
  0x3c   :  { %644 = vmatpush1.bf16.msra.mxu0 %v984_v1  ;;  %572 = vmatprep.subr.bf16.mxu1 %v985_v3 }
  0x3d   :  { %645 = vmatprep.subr.bf16.mxu0 %v987_v4 }
  0x3f   :  { %573 = vmatpush1.bf16.msra.mxu1 %v989_v6 }
  0x40   :  { %646 = vmatpush1.bf16.msra.mxu0 %v990_v7 }
  0x42   :  { %575 = vmatmul.mubr.bf16.vlgmr.msra.gmra.mrb[0].mxu1 %v991_v9 }
  0x43   :  { %648 = vmatmul.mubr.bf16.vlgmr.msra.gmra.mrb[0].mxu0 %v994_v10  ;;  %584 = vmatprep.mubr.bf16.mxu1 %v997_v12 }
  0x44   :  { %657 = vmatprep.mubr.bf16.mxu0 %v999_v13 }
  0x4a   :  { %585 = vmatmul.mubr.bf16.gmra.mrb[4].mxu1 %v1001_v15 }
  0x4b   :  { %658 = vmatmul.mubr.bf16.gmra.mrb[4].mxu0 %v1002_v16  ;;  %594 = vmatprep.mubr.bf16.mxu1 %v1003_v17 }
  0x4c   :  { %667 = vmatprep.mubr.bf16.mxu0 %v1005_v18 }
  0x52   :  { %595 = vmatmul.mubr.bf16.gmra.mrb[8].mxu1 %v1007_v19 }
  0x53   :  { %668 = vmatmul.mubr.bf16.gmra.mrb[8].mxu0 %v1008_v20  ;;  %604 = vmatprep.mubr.bf16.mxu1 %v1009_v21 }
  0x54   :  { %677 = vmatprep.mubr.bf16.mxu0 %v1011_v22 }
  0x5a   :  { %605 = vmatmul.mubr.bf16.gmra.mrb[12].mxu1 %v1013_v23 }
  0x5b   :  { %678 = vmatmul.mubr.bf16.gmra.mrb[12].mxu0 %v1014_v24 }
  0x95   :  { %v115_v27 = vpop.permute.xlu1 %114 }
  0x96   :  { %v105_v25 = vpop.permute.xlu0 %104 }
  0x99   :  { %v120_v47 = vpop.permute.xlu1 %119 }
  0x9a   :  { %v110_v26 = vpop.permute.xlu0 %109 }
  0x9d   :  { %v130_v6 = vpop.permute.xlu1 %129 }
  0x9e   :  { %v125_v7 = vpop.permute.xlu0 %124 }
 0x115   :  { %v576_v28 = vpop.f32.mrb[0].mxu1 }
 0x116   :  { %v649_v29 = vpop.f32.mrb[0].mxu0  ;;  %v577_v30 = vadd.f32 %v576_v28, %v105_v25  ;;  %v578_v31 = vpop.f32.mrb[1].mxu1 }
 0x117   :  { %v651_v32 = vpop.f32.mrb[1].mxu0  ;;  %v579_v33 = vadd.f32 %v578_v31, %v105_v25  ;;  %v580_v34 = vpop.f32.mrb[2].mxu1 }
 0x118   :  { %v653_v35 = vpop.f32.mrb[2].mxu0  ;;  %v650_v36 = vadd.f32 %v649_v29, %v577_v30  ;;  %v581_v37 = vadd.f32 %v580_v34, %v110_v26  ;;  %v582_v38 = vpop.f32.mrb[3].mxu1 }
 0x119   :  { %v655_v39 = vpop.f32.mrb[3].mxu0  ;;  %v652_v40 = vadd.f32 %v651_v32, %v579_v33  ;;  %v583_v41 = vadd.f32 %v582_v38, %v110_v26  ;;  %v140_v29 = vpop.permute.xlu1 %139 }
 0x11a   :  { %v688_v42 = vmax.f32 %v650_v36, 0.0  ;;  %v654_v43 = vadd.f32 %v653_v35, %v581_v37  ;;  %v135_v30 = vpop.permute.xlu0 %134 }
 0x11b   :  { %v689_v44 = vmax.f32 %v652_v40, 0.0  ;;  %v656_v45 = vadd.f32 %v655_v39, %v583_v41 }
 0x11c   :  { %v690_v46 = vmax.f32 %v654_v43, 0.0 }
 0x11d   :  { %v852_v48 = vpack.c.bf16 %v689_v44, %v688_v42  ;;  %v691_v49 = vmax.f32 %v656_v45, 0.0  ;;  %v586_v50 = vpop.f32.mrb[4].mxu1 }
 0x11e   :  { %v659_v51 = vpop.f32.mrb[4].mxu0  ;;  %v587_v52 = vadd.f32 %v586_v50, %v115_v27  ;;  %v588_v53 = vpop.f32.mrb[5].mxu1 }
 0x11f   :  { %v661_v54 = vpop.f32.mrb[5].mxu0  ;;  %752 = vst [vmem:[%s1327_s3] sm:$0xff] %v852_v48  ;;  %v853_v55 = vpack.c.bf16 %v691_v49, %v690_v46  ;;  %v589_v56 = vadd.f32 %v588_v53, %v115_v27  ;;  %v590_v57 = vpop.f32.mrb[6].mxu1 }
 0x120   :  { %v663_v58 = vpop.f32.mrb[6].mxu0  ;;  %v660_v59 = vadd.f32 %v659_v51, %v587_v52  ;;  %v591_v60 = vadd.f32 %v590_v57, %v120_v47  ;;  %v592_v61 = vpop.f32.mrb[7].mxu1 }
 0x121   :  { %v665_v62 = vpop.f32.mrb[7].mxu0  ;;  %753 = vst [vmem:[%s1327_s3 + $0x8] sm:$0xff] %v853_v55  ;;  %v662_v63 = vadd.f32 %v661_v54, %v589_v56  ;;  %v593_v0 = vadd.f32 %v592_v61, %v120_v47 }
 0x122   :  { %v692_v1 = vmax.f32 %v660_v59, 0.0  ;;  %v664_v2 = vadd.f32 %v663_v58, %v591_v60 }
 0x123   :  { %v693_v3 = vmax.f32 %v662_v63, 0.0  ;;  %v666_v4 = vadd.f32 %v665_v62, %v593_v0 }
 0x124   :  { %v694_v5 = vmax.f32 %v664_v2, 0.0 }
 0x125   :  { %v854_v8 = vpack.c.bf16 %v693_v3, %v692_v1  ;;  %v695_v9 = vmax.f32 %v666_v4, 0.0  ;;  %v596_v10 = vpop.f32.mrb[8].mxu1 }
 0x126   :  { %v669_v11 = vpop.f32.mrb[8].mxu0  ;;  %v597_v12 = vadd.f32 %v596_v10, %v125_v7  ;;  %v598_v13 = vpop.f32.mrb[9].mxu1 }
 0x127   :  { %v671_v14 = vpop.f32.mrb[9].mxu0  ;;  %754 = vst [vmem:[%s1327_s3 + $0x10] sm:$0xff] %v854_v8  ;;  %v855_v15 = vpack.c.bf16 %v695_v9, %v694_v5  ;;  %v599_v16 = vadd.f32 %v598_v13, %v125_v7  ;;  %v600_v17 = vpop.f32.mrb[10].mxu1 }
 0x128   :  { %v673_v18 = vpop.f32.mrb[10].mxu0  ;;  %v670_v19 = vadd.f32 %v669_v11, %v597_v12  ;;  %v601_v20 = vadd.f32 %v600_v17, %v130_v6  ;;  %v602_v21 = vpop.f32.mrb[11].mxu1 }
 0x129   :  { %v675_v22 = vpop.f32.mrb[11].mxu0  ;;  %755 = vst [vmem:[%s1327_s3 + $0x18] sm:$0xff] %v855_v15  ;;  %v672_v23 = vadd.f32 %v671_v14, %v599_v16  ;;  %v603_v24 = vadd.f32 %v602_v21, %v130_v6 }
 0x12a   :  { %v696_v25 = vmax.f32 %v670_v19, 0.0  ;;  %v674_v26 = vadd.f32 %v673_v18, %v601_v20 }
 0x12b   :  { %v697_v27 = vmax.f32 %v672_v23, 0.0  ;;  %v676_v28 = vadd.f32 %v675_v22, %v603_v24 }
 0x12c   :  { %v698_v31 = vmax.f32 %v674_v26, 0.0 }
 0x12d   :  { %v856_v32 = vpack.c.bf16 %v697_v27, %v696_v25  ;;  %v699_v33 = vmax.f32 %v676_v28, 0.0  ;;  %v606_v34 = vpop.f32.mrb[12].mxu1 }
 0x12e   :  { %v679_v35 = vpop.f32.mrb[12].mxu0  ;;  %v607_v36 = vadd.f32 %v606_v34, %v135_v30  ;;  %v608_v37 = vpop.f32.mrb[13].mxu1 }
 0x12f   :  { %v681_v38 = vpop.f32.mrb[13].mxu0  ;;  %756 = vst [vmem:[%s1327_s3 + $0x20] sm:$0xff] %v856_v32  ;;  %v857_v39 = vpack.c.bf16 %v699_v33, %v698_v31  ;;  %v609_v40 = vadd.f32 %v608_v37, %v135_v30  ;;  %v610_v41 = vpop.f32.mrb[14].mxu1 }
 0x130   :  { %v683_v42 = vpop.f32.mrb[14].mxu0  ;;  %v680_v43 = vadd.f32 %v679_v35, %v607_v36  ;;  %v611_v44 = vadd.f32 %v610_v41, %v140_v29  ;;  %v612_v45 = vpop.f32.mrb[15].mxu1 }
 0x131   :  { %v685_v46 = vpop.f32.mrb[15].mxu0  ;;  %757 = vst [vmem:[%s1327_s3 + $0x28] sm:$0xff] %v857_v39  ;;  %v682_v47 = vadd.f32 %v681_v38, %v609_v40  ;;  %v613_v48 = vadd.f32 %v612_v45, %v140_v29 }
 0x132   :  { %v700_v49 = vmax.f32 %v680_v43, 0.0  ;;  %v684_v50 = vadd.f32 %v683_v42, %v611_v44 }
 0x133   :  { %v701_v51 = vmax.f32 %v682_v47, 0.0  ;;  %v686_v52 = vadd.f32 %v685_v46, %v613_v48 }
 0x134   :  { %v702_v53 = vmax.f32 %v684_v50, 0.0 }
 0x135   :  { %v858_v54 = vpack.c.bf16 %v701_v51, %v700_v49  ;;  %v703_v55 = vmax.f32 %v686_v52, 0.0 }
 0x137   :  { %758 = vst [vmem:[%s1327_s3 + $0x30] sm:$0xff] %v858_v54  ;;  %v859_v56 = vpack.c.bf16 %v703_v55, %v702_v53 }
 0x139   :  { %759 = vst [vmem:[%s1327_s3 + $0x38] sm:$0xff] %v859_v56 }

// kernel: convnn_forward.6
= control target key start
LH: loop header
LB: loop body
LE: loop exit
PB: predicated region body
PF: predicated region fallthrough
CT: control target
= control target key end

     0   :  { %v1013_v1 = vmov 0   ;;  %vm475_vm0 = vcmask 523264   ;;  %s1245_s1 = inlined_call_operand.vmem [shape: bf16[576,128], index: 1, kind: input, shape index: {}]   ;;  %s1246_s0 = inlined_call_operand.vmem [shape: bf16[64,576], index: 0, kind: input, shape index: {}]   ;;  %s1247_s2 = inlined_call_operand.vmem [shape: f32[64,1], index: 2, kind: input, shape index: {}]   ;;  %s1248_s3 = inlined_call_operand.vmem [shape: bf16[64,128], index: 3, kind: output, shape index: {}]  }
   0x1   :  { %v949_v0 = vld [vmem:[%s1245_s1 + $0x40] sm:$0xff]   ;;  %947 = vset.pattern.permute.xlu0 %v1013_v1  ;;  %948 = vset.pattern.permute.xlu1 %v1013_v1  ;;  %v953_v5 = vld [vmem:[%s1245_s1 + $0x48] sm:$0xff]   ;;  %v957_v9 = vld [vmem:[%s1245_s1 + $0x50] sm:$0xff]  }
   0x2   :  { %v950_v2 = vld [vmem:[%s1245_s1 + $0xc0] sm:$0xff]   ;;  %834 = vmatprep.subr.bf16.mxu0 %v949_v0  ;;  %v954_v6 = vld [vmem:[%s1245_s1 + $0xc8] sm:$0xff]   ;;  %v958_v10 = vld [vmem:[%s1245_s1 + $0xd0] sm:$0xff]  }
   0x3   :  { %v951_v3 = vld [vmem:[%s1245_s1] sm:$0xff]   ;;  %874 = vmatprep.subr.bf16.mxu1 %v950_v2  ;;  %v955_v7 = vld [vmem:[%s1245_s1 + $0x8] sm:$0xff]   ;;  %v959_v11 = vld [vmem:[%s1245_s1 + $0x10] sm:$0xff]  }
   0x4   :  { %v952_v4 = vld [vmem:[%s1245_s1 + $0x80] sm:$0xff]   ;;  %835 = vmatpush3.bf16.msra.mxu0 %v951_v3  ;;  %v956_v8 = vld [vmem:[%s1245_s1 + $0x88] sm:$0xff]   ;;  %v960_v12 = vld [vmem:[%s1245_s1 + $0x90] sm:$0xff]  }
   0x5   :  { %875 = vmatpush3.bf16.msra.mxu1 %v952_v4  ;;  %836 = vmatprep.subr.bf16.mxu0 %v953_v5  ;;  %v961_v13 = vld [vmem:[%s1245_s1 + $0x58] sm:$0xff]   ;;  %v965_v17 = vld [vmem:[%s1245_s1 + $0x60] sm:$0xff]   ;;  %v969_v21 = vld [vmem:[%s1245_s1 + $0x68] sm:$0xff]  }
   0x6   :  { %876 = vmatprep.subr.bf16.mxu1 %v954_v6  ;;  %v962_v14 = vld [vmem:[%s1245_s1 + $0xd8] sm:$0xff]   ;;  %v966_v18 = vld [vmem:[%s1245_s1 + $0xe0] sm:$0xff]   ;;  %v970_v22 = vld [vmem:[%s1245_s1 + $0xe8] sm:$0xff]  }
   0x7   :  { %v963_v15 = vld [vmem:[%s1245_s1 + $0x18] sm:$0xff]   ;;  %v967_v19 = vld [vmem:[%s1245_s1 + $0x20] sm:$0xff]   ;;  %v971_v23 = vld [vmem:[%s1245_s1 + $0x28] sm:$0xff]  }
   0x8   :  { %837 = vmatpush3.bf16.msra.mxu0 %v955_v7  ;;  %v964_v16 = vld [vmem:[%s1245_s1 + $0x98] sm:$0xff]   ;;  %v968_v20 = vld [vmem:[%s1245_s1 + $0xa0] sm:$0xff]   ;;  %v972_v24 = vld [vmem:[%s1245_s1 + $0xa8] sm:$0xff]  }
   0x9   :  { %877 = vmatpush3.bf16.msra.mxu1 %v956_v8  ;;  %838 = vmatprep.subr.bf16.mxu0 %v957_v9  ;;  %v973_v25 = vld [vmem:[%s1245_s1 + $0x70] sm:$0xff]   ;;  %v977_v29 = vld [vmem:[%s1245_s1 + $0x78] sm:$0xff]   ;;  %v986_v36 = vld [vmem:[%s1246_s0 + $0xc] ss:$20 sps:$4 sm:$0xff]  }
   0xa   :  { %878 = vmatprep.subr.bf16.mxu1 %v958_v10  ;;  %v974_v26 = vld [vmem:[%s1245_s1 + $0xf0] sm:$0xff]   ;;  %v978_v30 = vld [vmem:[%s1245_s1 + $0xf8] sm:$0xff]   ;;  %v987_v37 = vld [vmem:[%s1245_s1 + $0x100] sm:$0xff]   ;;  %585 = vmatprep.mubr.bf16.mxu1 %v986_v36 }
   0xb   :  { %v975_v27 = vld [vmem:[%s1245_s1 + $0x30] sm:$0xff]   ;;  %v979_v31 = vld [vmem:[%s1245_s1 + $0x38] sm:$0xff]   ;;  %v988_v38 = vld [vmem:[%s1246_s0 + $0x2c] ss:$20 sps:$4 sm:$0xff]  }
   0xc   :  { %839 = vmatpush3.bf16.msra.mxu0 %v959_v11  ;;  %v976_v28 = vld [vmem:[%s1245_s1 + $0xb0] sm:$0xff]   ;;  %v980_v32 = vld [vmem:[%s1245_s1 + $0xb8] sm:$0xff]   ;;  %v994_v40 = vld [vmem:[%s1245_s1 + $0x108] sm:$0xff]  }
   0xd   :  { %879 = vmatpush3.bf16.msra.mxu1 %v960_v12  ;;  %840 = vmatprep.subr.bf16.mxu0 %v961_v13  ;;  %v981_v33 = vld [vmem:[%s1246_s0] ss:$20 sps:$4 sm:$0xff]   ;;  %v983_v34 = vld [vmem:[%s1246_s0 + $0x4] ss:$20 sps:$4 sm:$0xff]   ;;  %v984_v35 = vld [vmem:[%s1246_s0 + $0x8] ss:$20 sps:$4 sm:$0xff]  }
   0xe   :  { %880 = vmatprep.subr.bf16.mxu1 %v962_v14  ;;  %520 = vmatprep.mubr.bf16.mxu0 %v983_v34  ;;  %v990_v39 = vld [vmem:[%s1246_s0 + $0x34] ss:$20 sps:$4 sm:$0xff]   ;;  %v993_v42 = vld [vmem:[%s1246_s0 + $0x30] ss:$20 sps:$4 sm:$0xff]   ;;  %v1008_v46 = vld [vmem:[%s1245_s1 + $0x118] sm:$0xff]  }
   0xf   :  { %v992_v41 = vld [vmem:[%s1246_s0 + $0x28] ss:$20 sps:$4 sm:$0xff]   ;;  %v1001_v45 = vld [vmem:[%s1245_s1 + $0x110] sm:$0xff]   ;;  %v1000_v48 = vld [vmem:[%s1246_s0 + $0x58] ss:$20 sps:$4 sm:$0xff]  }
  0x10   :  { %841 = vmatpush3.bf16.msra.mxu0 %v963_v15  ;;  %v995_v43 = vld [vmem:[%s1246_s0 + $0x54] ss:$20 sps:$4 sm:$0xff]   ;;  %v997_v44 = vld [vmem:[%s1246_s0 + $0x5c] ss:$20 sps:$4 sm:$0xff]   ;;  %v1004_v50 = vld [vmem:[%s1246_s0 + $0x84] ss:$20 sps:$4 sm:$0xff]  }
  0x11   :  { %881 = vmatpush3.bf16.msra.mxu1 %v964_v16  ;;  %842 = vmatprep.subr.bf16.mxu0 %v965_v17  ;;  %v999_v47 = vld [vmem:[%s1246_s0 + $0x50] ss:$20 sps:$4 sm:$0xff]   ;;  %v112_v53 = vld [vmem:[%s1247_s2 + $0x8] sm:$0xff]  ;;  %v114_v54 = vld [vmem:[%s1247_s2 + $0x18] sm:$0xff] }
  0x12   :  { %882 = vmatprep.subr.bf16.mxu1 %v966_v18  ;;  %v1002_v49 = vld [vmem:[%s1246_s0 + $0x7c] ss:$20 sps:$4 sm:$0xff]   ;;  %v111_v51 = vld [vmem:[%s1247_s2] sm:$0xff]  ;;  %v1006_v55 = vld [vmem:[%s1246_s0 + $0x78] ss:$20 sps:$4 sm:$0xff]  }
  0x13   :  { %v113_v52 = vld [vmem:[%s1247_s2 + $0x10] sm:$0xff]  ;;  %121 = vperm.xlu0 %947, %v111_v51   ;;  %v115_v58 = vld [vmem:[%s1247_s2 + $0x20] sm:$0xff]  ;;  %v116_v60 = vld [vmem:[%s1247_s2 + $0x28] sm:$0xff] }
  0x14   :  { %843 = vmatpush3.bf16.msra.mxu0 %v967_v19  ;;  %131 = vperm.xlu1 %948, %v113_v52   ;;  %v1007_v56 = vld [vmem:[%s1246_s0 + $0x80] ss:$20 sps:$4 sm:$0xff]   ;;  %v1009_v57 = vld [vmem:[%s1246_s0 + $0x10] ss:$20 sps:$4 sm:$0xff]   ;;  %v118_v62 = vld [vmem:[%s1247_s2 + $0x38] sm:$0xff] }
  0x15   :  { %883 = vmatpush3.bf16.msra.mxu1 %v968_v20  ;;  %844 = vmatprep.subr.bf16.mxu0 %v969_v21  ;;  %v1010_v59 = vld [vmem:[%s1246_s0 + $0x60] ss:$20 sps:$4 sm:$0xff]   ;;  %v1011_v63 = vld [vmem:[%s1246_s0 + $0x38] ss:$20 sps:$4 sm:$0xff]   ;;  %v1012_v0 = vld [vmem:[%s1246_s0 + $0x88] ss:$20 sps:$4 sm:$0xff]  }
  0x16   :  { %884 = vmatprep.subr.bf16.mxu1 %v970_v22  ;;  %v117_v61 = vld [vmem:[%s1247_s2 + $0x30] sm:$0xff] }
  0x17   :  { %126 = vperm.xlu0 %947, %v112_v53  }
  0x18   :  { %845 = vmatpush3.bf16.msra.mxu0 %v971_v23  ;;  %136 = vperm.xlu1 %948, %v114_v54  }
  0x19   :  { %885 = vmatpush3.bf16.msra.mxu1 %v972_v24  ;;  %846 = vmatprep.subr.bf16.mxu0 %v973_v25 }
  0x1a   :  { %886 = vmatprep.subr.bf16.mxu1 %v974_v26 }
  0x1b   :  { %141 = vperm.xlu0 %947, %v115_v58  }
  0x1c   :  { %847 = vmatpush3.bf16.msra.mxu0 %v975_v27  ;;  %146 = vperm.xlu1 %948, %v116_v60  }
  0x1d   :  { %887 = vmatpush3.bf16.msra.mxu1 %v976_v28  ;;  %848 = vmatprep.subr.bf16.mxu0 %v977_v29 }
  0x1e   :  { %888 = vmatprep.subr.bf16.mxu1 %v978_v30 }
  0x1f   :  { %151 = vperm.xlu0 %947, %v117_v61  }
  0x20   :  { %849 = vmatpush3.bf16.msra.mxu0 %v979_v31  ;;  %156 = vperm.xlu1 %948, %v118_v62  }
  0x21   :  { %889 = vmatpush3.bf16.msra.mxu1 %v980_v32  ;;  %922 = vmatprep.subr.bf16.mxu0 %v987_v37 }
  0x22   :  { %938 = vmatprep.subr.bf16.mxu1 %v987_v37 }
  0x23   :  { %521 = vmatmul.mubr.bf16.vlgmr.msra.gmra.mrb[0].mxu0 %v981_v33 }
  0x24   :  { %586 = vmatmul.mubr.bf16.vlgmr.msra.gmra.mrb[0].mxu1 %v984_v35  ;;  %923 = vmatpush3.bf16.msra.mxu0 %v987_v37 }
  0x25   :  { %942 = vmatpush3.bf16.msra.mxu1 %v987_v37  ;;  %528 = vmatprep.mubr.bf16.mxu0 %v988_v38 }
  0x26   :  { %593 = vmatprep.mubr.bf16.mxu1 %v990_v39  ;;  %924 = vmatprep.subr.bf16.mxu0 %v994_v40 }
  0x27   :  { %939 = vmatprep.subr.bf16.mxu1 %v994_v40 }
  0x28   :  { %925 = vmatpush3.bf16.msra.mxu0 %v994_v40 }
  0x29   :  { %943 = vmatpush3.bf16.msra.mxu1 %v994_v40  ;;  %926 = vmatprep.subr.bf16.mxu0 %v1001_v45 }
  0x2a   :  { %940 = vmatprep.subr.bf16.mxu1 %v1001_v45 }
  0x2b   :  { %529 = vmatmul.mubr.bf16.gmra.mrb[4].mxu0 %v992_v41 }
  0x2c   :  { %594 = vmatmul.mubr.bf16.gmra.mrb[4].mxu1 %v993_v42  ;;  %536 = vmatprep.mubr.bf16.mxu0 %v995_v43 }
  0x2d   :  { %601 = vmatprep.mubr.bf16.mxu1 %v997_v44  ;;  %927 = vmatpush3.bf16.msra.mxu0 %v1001_v45 }
  0x2e   :  { %944 = vmatpush3.bf16.msra.mxu1 %v1001_v45  ;;  %928 = vmatprep.subr.bf16.mxu0 %v1008_v46 }
  0x2f   :  { %941 = vmatprep.subr.bf16.mxu1 %v1008_v46 }
  0x31   :  { %929 = vmatpush3.bf16.msra.mxu0 %v1008_v46 }
  0x32   :  { %945 = vmatpush3.bf16.msra.mxu1 %v1008_v46 }
  0x33   :  { %537 = vmatmul.mubr.bf16.gmra.mrb[8].mxu0 %v999_v47 }
  0x34   :  { %602 = vmatmul.mubr.bf16.gmra.mrb[8].mxu1 %v1000_v48  ;;  %544 = vmatprep.mubr.bf16.mxu0 %v1002_v49 }
  0x35   :  { %609 = vmatprep.mubr.bf16.mxu1 %v1004_v50 }
  0x3b   :  { %545 = vmatmul.mubr.bf16.gmra.mrb[12].mxu0 %v1006_v55 }
  0x3c   :  { %610 = vmatmul.mubr.bf16.gmra.mrb[12].mxu1 %v1007_v56  ;;  %930 = vmatprep.mubr.msk.bf16.mxu0 %vm475_vm0, %v1009_v57 }
  0x3d   :  { %934 = vmatprep.mubr.msk.bf16.mxu1 %vm475_vm0, %v1010_v59 }
  0x43   :  { %931 = vmatmul.mubr.msk.bf16.vlgmr.msra.gmra.mrb[16].mxu0 %vm475_vm0, %v1011_v63 }
  0x44   :  { %935 = vmatmul.mubr.msk.bf16.vlgmr.msra.gmra.mrb[16].mxu1 %vm475_vm0, %v1012_v0 }
  0x92   :  { %v122_v1 = vpop.permute.xlu0 %121 }
  0x93   :  { %v132_v18 = vpop.permute.xlu1 %131 }
  0x96   :  { %v127_v3 = vpop.permute.xlu0 %126 }
  0x97   :  { %v137_v33 = vpop.permute.xlu1 %136 }
  0x9a   :  { %v142_v36 = vpop.permute.xlu0 %141 }
  0x9b   :  { %v147_v50 = vpop.permute.xlu1 %146 }
  0x9e   :  { %v152_v54 = vpop.permute.xlu0 %151 }
  0xf6   :  { %v850_v2 = vpop.f32.mrb[0].mxu0 }
  0xf7   :  { %v890_v4 = vpop.f32.mrb[0].mxu1  ;;  %v851_v5 = vpop.f32.mrb[1].mxu0 }
  0xf8   :  { %v852_v6 = vadd.f32 %v851_v5, %v850_v2  ;;  %v891_v7 = vpop.f32.mrb[1].mxu1  ;;  %v853_v8 = vpop.f32.mrb[2].mxu0 }
  0xf9   :  { %v892_v9 = vadd.f32 %v891_v7, %v890_v4  ;;  %v893_v10 = vpop.f32.mrb[2].mxu1  ;;  %v854_v11 = vpop.f32.mrb[3].mxu0 }
  0xfa   :  { %v523_v12 = vadd.f32 %v852_v6, %v122_v1  ;;  %v855_v13 = vadd.f32 %v854_v11, %v853_v8  ;;  %v894_v14 = vpop.f32.mrb[3].mxu1  ;;  %v157_v4 = vpop.permute.xlu1 %156 }
  0xfb   :  { %v895_v15 = vadd.f32 %v894_v14, %v893_v10 }
  0xfc   :  { %v526_v16 = vadd.f32 %v855_v13, %v127_v3  ;;  %v588_v17 = vadd.f32 %v892_v9, %v523_v12 }
  0xfe   :  { %v856_v19 = vpop.f32.mrb[4].mxu0  ;;  %v1230_v20 = vadd.f32 %v895_v15, %v526_v16 }
  0xff   :  { %v896_v21 = vpop.f32.mrb[4].mxu1  ;;  %v857_v22 = vpop.f32.mrb[5].mxu0 }
 0x100   :  { %v858_v23 = vadd.f32 %v857_v22, %v856_v19  ;;  %v897_v24 = vpop.f32.mrb[5].mxu1  ;;  %v859_v25 = vpop.f32.mrb[6].mxu0 }
 0x101   :  { %v898_v26 = vadd.f32 %v897_v24, %v896_v21  ;;  %v899_v27 = vpop.f32.mrb[6].mxu1  ;;  %v860_v28 = vpop.f32.mrb[7].mxu0 }
 0x102   :  { %v531_v29 = vadd.f32 %v858_v23, %v132_v18  ;;  %v861_v30 = vadd.f32 %v860_v28, %v859_v25  ;;  %v900_v31 = vpop.f32.mrb[7].mxu1 }
 0x103   :  { %v901_v32 = vadd.f32 %v900_v31, %v899_v27 }
 0x104   :  { %v534_v34 = vadd.f32 %v861_v30, %v137_v33  ;;  %v596_v35 = vadd.f32 %v898_v26, %v531_v29 }
 0x106   :  { %v862_v37 = vpop.f32.mrb[8].mxu0  ;;  %v599_v38 = vadd.f32 %v901_v32, %v534_v34 }
 0x107   :  { %v902_v39 = vpop.f32.mrb[8].mxu1  ;;  %v863_v40 = vpop.f32.mrb[9].mxu0 }
 0x108   :  { %v864_v41 = vadd.f32 %v863_v40, %v862_v37  ;;  %v903_v42 = vpop.f32.mrb[9].mxu1  ;;  %v865_v43 = vpop.f32.mrb[10].mxu0 }
 0x109   :  { %v904_v44 = vadd.f32 %v903_v42, %v902_v39  ;;  %v905_v45 = vpop.f32.mrb[10].mxu1  ;;  %v866_v46 = vpop.f32.mrb[11].mxu0 }
 0x10a   :  { %v539_v47 = vadd.f32 %v864_v41, %v142_v36  ;;  %v867_v48 = vadd.f32 %v866_v46, %v865_v43  ;;  %v906_v49 = vpop.f32.mrb[11].mxu1 }
 0x10b   :  { %v907_v51 = vadd.f32 %v906_v49, %v905_v45 }
 0x10c   :  { %v542_v52 = vadd.f32 %v867_v48, %v147_v50  ;;  %v604_v53 = vadd.f32 %v904_v44, %v539_v47 }
 0x10e   :  { %v868_v55 = vpop.f32.mrb[12].mxu0  ;;  %v607_v56 = vadd.f32 %v907_v51, %v542_v52 }
 0x10f   :  { %v908_v57 = vpop.f32.mrb[12].mxu1  ;;  %v869_v58 = vpop.f32.mrb[13].mxu0 }
 0x110   :  { %v870_v59 = vadd.f32 %v869_v58, %v868_v55  ;;  %v909_v60 = vpop.f32.mrb[13].mxu1  ;;  %v871_v61 = vpop.f32.mrb[14].mxu0 }
 0x111   :  { %v910_v62 = vadd.f32 %v909_v60, %v908_v57  ;;  %v911_v63 = vpop.f32.mrb[14].mxu1  ;;  %v872_v0 = vpop.f32.mrb[15].mxu0 }
 0x112   :  { %v547_v1 = vadd.f32 %v870_v59, %v152_v54  ;;  %v873_v2 = vadd.f32 %v872_v0, %v871_v61  ;;  %v912_v3 = vpop.f32.mrb[15].mxu1 }
 0x113   :  { %v913_v5 = vadd.f32 %v912_v3, %v911_v63 }
 0x114   :  { %v550_v6 = vadd.f32 %v873_v2, %v157_v4  ;;  %v612_v7 = vadd.f32 %v910_v62, %v547_v1 }
 0x116   :  { %v932_v8 = vpop.f32.mrb[16].mxu0  ;;  %v615_v9 = vadd.f32 %v913_v5, %v550_v6 }
 0x117   :  { %v661_v10 = vadd.f32 %v932_v8, %v596_v35  ;;  %v936_v11 = vpop.f32.mrb[16].mxu1  ;;  %v652_v12 = vpop.f32.mrb[17].mxu0 }
 0x118   :  { %v677_v13 = vadd.f32 %v936_v11, %v612_v7  ;;  %v653_v14 = vadd.f32 %v652_v12, %v588_v17  ;;  %v668_v15 = vpop.f32.mrb[17].mxu1  ;;  %v933_v16 = vpop.f32.mrb[18].mxu0 }
 0x119   :  { %v669_v18 = vadd.f32 %v668_v15, %v604_v53  ;;  %v664_v19 = vadd.f32 %v933_v16, %v599_v38  ;;  %v937_v21 = vpop.f32.mrb[18].mxu1  ;;  %v655_v22 = vpop.f32.mrb[19].mxu0  ;;  %v685_v26 = vmax.f32 %v661_v10, 0.0 }
 0x11a   :  { %v680_v23 = vadd.f32 %v937_v21, %v615_v9  ;;  %v656_v24 = vadd.f32 %v655_v22, %v1230_v20  ;;  %v671_v25 = vpop.f32.mrb[19].mxu1  ;;  %v689_v29 = vmax.f32 %v677_v13, 0.0  ;;  %v683_v30 = vmax.f32 %v653_v14, 0.0 }
 0x11b   :  { %v686_v27 = vmax.f32 %v664_v19, 0.0  ;;  %v672_v28 = vadd.f32 %v671_v25, %v607_v56  ;;  %v687_v33 = vmax.f32 %v669_v18, 0.0 }
 0x11c   :  { %v690_v31 = vmax.f32 %v680_v23, 0.0  ;;  %v684_v32 = vmax.f32 %v656_v24, 0.0 }
 0x11d   :  { %v819_v34 = vpack.c.bf16 %v686_v27, %v685_v26  ;;  %v688_v17 = vmax.f32 %v672_v28, 0.0 }
 0x11e   :  { %v829_v35 = vpack.c.bf16 %v690_v31, %v689_v29  ;;  %v814_v36 = vpack.c.bf16 %v684_v32, %v683_v30 }
 0x11f   :  { %831 = vst [vmem:[%s1248_s3 + $0x8] sm:$0xff] %v819_v34   ;;  %v824_v37 = vpack.c.bf16 %v688_v17, %v687_v33 }
 0x120   :  { %833 = vst [vmem:[%s1248_s3 + $0x18] sm:$0xff] %v829_v35   ;;  %815 = vst [vmem:[%s1248_s3] sm:$0xff] %v814_v36  }
 0x121   :  { %832 = vst [vmem:[%s1248_s3 + $0x10] sm:$0xff] %v824_v37  }

// kernel: convnn_forward.7
= control target key start
LH: loop header
LB: loop body
LE: loop exit
PB: predicated region body
PF: predicated region fallthrough
CT: control target
= control target key end

     0   :  { %s9649_s18 = smov 0   ;;  %s11397_s0 = inlined_call_operand.vmem [shape: bf16[3136,2], index: 0, kind: input, shape index: {}]   ;;  %s11398_s1 = inlined_call_operand.vmem [shape: bf16[512,3136], index: 1, kind: input, shape index: {}]   ;;  %s11399_s2 = inlined_call_operand.vmem [shape: f32[512,1], index: 2, kind: input, shape index: {}]   ;;  %s11400_s3 = inlined_call_operand.vmem [shape: bf16[6,512], index: 3, kind: input, shape index: {}]   ;;  %s11401_s4 = inlined_call_operand.vmem [shape: f32[6,1], index: 4, kind: input, shape index: {}]   ;;  %s11402_s5 = inlined_call_operand.vmem [shape: f32[6,2], index: 5, kind: output, shape index: {}]  }
   0x1 LB: > { %s9655_s19 = sadd.s32 4294967295, %s9614_s18   ;;  %p6752_p0 = scmp.ge.s32.totalorder %s9614_s18, 1  ;;  %s9614_s18 = sphi %s9649_s18, %s15_s18  }
   0x2   : > { %p206_p1 = scmp.lt.s32.totalorder %s9614_s18, 3 }
   0x4   : > { %p207_p2 = pnand %p6752_p0, %p206_p1 }
   0x5   : > { %s6753_s20 = sshll.u32 (!%p207_p2), %s9655_s19, 5  ;;  %s6757_s21 = sshll.u32 (!%p207_p2), %s9655_s19, 1 }
   0x6   : > { %210 = sbr.rel (%p207_p2) target bundleno = 1339 (0x53b), region = 40  ;;  %p241_p3 = scmp.lt.s32.totalorder (!%p207_p2), %s6753_s20, 63 }
   0x7   : > { %p254_p4 = scmp.lt.s32.totalorder (!%p207_p2), %s6757_s21, 3  ;;  %p6759_p5 = scmp.ne.s32.totalorder (!%p207_p2), %s9655_s19, 0 }
   0xd   : > { %s11404_s20 = smov (!%p241_p3, %s6753_s20), 63  ;;  %s11406_s21 = smov (!%p254_p4, %s6757_s21), 3 }
   0xe   : > { %s8803_s22 = smul.u32 100, %s11404_s20  ;;  %s6756_s23 = sshll.u32 %s11404_s20, 3  ;;  %vm264_vm0 = vcmask (!%p6759_p5), 13312   ;;  %v9616_v0 = vmov (!%p6759_p5), 0.0  }
   0xf   : > { %s9664_s26 = scalar_lea.vmem %s11399_s2, %s6756_s23  ;;  %s6758_s27 = sshll.u32 %s11406_s21, 2  ;;  %265 = vst.msk [vmem:[#allocation2] sm:$0x3f] (!%p6759_p5), %vm264_vm0, %v9616_v0 }
  0x10   : > { %s9669_s30 = scalar_lea.vmem %s11398_s1, %s8803_s22  ;;  %s9674_s8 = scalar_lea.vmem %s11400_s3, %s6758_s27 }
  0x11   : > { %263 = sbr.rel (%p6759_p5) target bundleno = 24 (0x18), region = 44 }
  0x18 PF: > { %v8817_v1 = vld [vmem:[%s11397_s0 + $0x40] sm:$0xff]   ;;  %v9617_v3 = vmov 0   ;;  %v8821_v6 = vld [vmem:[%s11397_s0 + $0x48] sm:$0xff]   ;;  %v8825_v10 = vld [vmem:[%s11397_s0 + $0x50] sm:$0xff]   ;;  %vm4442_vm1 = vcmask 523264   ;;  %vm6682_vm2 = vcmask 13312  }
  0x19   : > { %v8818_v2 = vld [vmem:[%s11397_s0] sm:$0xff]   ;;  %8815 = vset.pattern.permute.xlu0 %v9617_v3  ;;  %8816 = vset.pattern.permute.xlu1 %v9617_v3  ;;  %v8822_v7 = vld [vmem:[%s11397_s0 + $0x8] sm:$0xff]   ;;  %v8826_v11 = vld [vmem:[%s11397_s0 + $0x10] sm:$0xff]   ;;  %p7374_p6 = scmp.ne.s32.totalorder %s9655_s19, 1 }
  0x1a   : > { %7377 = vmatprep.subr.bf16.mxu0 %v8817_v1  ;;  %v8819_v4 = vld [vmem:[%s11397_s0 + $0xc0] sm:$0xff]   ;;  %v8823_v8 = vld [vmem:[%s11397_s0 + $0xc8] sm:$0xff]   ;;  %v8827_v12 = vld [vmem:[%s11397_s0 + $0xd0] sm:$0xff]  }
  0x1b   : > { %7378 = vmatpush3.bf16.msra.mxu0 %v8818_v2  ;;  %v8820_v5 = vld [vmem:[%s11397_s0 + $0x80] sm:$0xff]   ;;  %7489 = vmatprep.subr.bf16.mxu1 %v8819_v4  ;;  %v8824_v9 = vld [vmem:[%s11397_s0 + $0x88] sm:$0xff]   ;;  %v8828_v13 = vld [vmem:[%s11397_s0 + $0x90] sm:$0xff]  }
  0x1c   : > { %7490 = vmatpush3.bf16.msra.mxu1 %v8820_v5  ;;  %7379 = vmatprep.subr.bf16.mxu0 %v8821_v6  ;;  %v8829_v14 = vld [vmem:[%s11397_s0 + $0x58] sm:$0xff]   ;;  %v8833_v18 = vld [vmem:[%s11397_s0 + $0x60] sm:$0xff]   ;;  %v8837_v22 = vld [vmem:[%s11397_s0 + $0x68] sm:$0xff]  }
  0x1d   : > { %7491 = vmatprep.subr.bf16.mxu1 %v8823_v8  ;;  %v8830_v15 = vld [vmem:[%s11397_s0 + $0x18] sm:$0xff]   ;;  %v8834_v19 = vld [vmem:[%s11397_s0 + $0x20] sm:$0xff]   ;;  %v8838_v23 = vld [vmem:[%s11397_s0 + $0x28] sm:$0xff]  }
  0x1e   : > { %v8831_v16 = vld [vmem:[%s11397_s0 + $0xd8] sm:$0xff]   ;;  %v8835_v20 = vld [vmem:[%s11397_s0 + $0xe0] sm:$0xff]   ;;  %v8839_v24 = vld [vmem:[%s11397_s0 + $0xe8] sm:$0xff]  }
  0x1f   : > { %7380 = vmatpush3.bf16.msra.mxu0 %v8822_v7  ;;  %v8832_v17 = vld [vmem:[%s11397_s0 + $0x98] sm:$0xff]   ;;  %v8836_v21 = vld [vmem:[%s11397_s0 + $0xa0] sm:$0xff]   ;;  %v8840_v25 = vld [vmem:[%s11397_s0 + $0xa8] sm:$0xff]  }
  0x20   : > { %7492 = vmatpush3.bf16.msra.mxu1 %v8824_v9  ;;  %7381 = vmatprep.subr.bf16.mxu0 %v8825_v10  ;;  %v8841_v26 = vld [vmem:[%s11397_s0 + $0x70] sm:$0xff]   ;;  %v8845_v30 = vld [vmem:[%s11397_s0 + $0x78] sm:$0xff]   ;;  %v8848_v33 = vld [vmem:[%s9669_s30] ss:$100 sps:$4 sm:$0xff]  }
  0x21   : > { %7493 = vmatprep.subr.bf16.mxu1 %v8827_v12  ;;  %v8842_v27 = vld [vmem:[%s11397_s0 + $0x30] sm:$0xff]   ;;  %v8846_v31 = vld [vmem:[%s11397_s0 + $0x38] sm:$0xff]   ;;  %v8850_v34 = vld [vmem:[%s9669_s30 + $0x4] ss:$100 sps:$4 sm:$0xff]  }
  0x22   : > { %v8843_v28 = vld [vmem:[%s11397_s0 + $0xf0] sm:$0xff]   ;;  %v8847_v32 = vld [vmem:[%s11397_s0 + $0xf8] sm:$0xff]   ;;  %4523 = vmatprep.mubr.bf16.mxu0 %v8850_v34  ;;  %v8852_v36 = vld [vmem:[%s9669_s30 + $0x8] ss:$100 sps:$4 sm:$0xff]  }
  0x23   : > { %7382 = vmatpush3.bf16.msra.mxu0 %v8826_v11  ;;  %v8844_v29 = vld [vmem:[%s11397_s0 + $0xb0] sm:$0xff]   ;;  %v8851_v35 = vld [vmem:[%s11397_s0 + $0xb8] sm:$0xff]   ;;  %v8857_v40 = vld [vmem:[%s9669_s30 + $0xc8] ss:$100 sps:$4 sm:$0xff]  }
  0x24   : > { %7494 = vmatpush3.bf16.msra.mxu1 %v8828_v13  ;;  %7383 = vmatprep.subr.bf16.mxu0 %v8829_v14  ;;  %v8854_v37 = vld [vmem:[%s9669_s30 + $0xc] ss:$100 sps:$4 sm:$0xff]   ;;  %v8858_v39 = vld [vmem:[%s9669_s30 + $0xd4] ss:$100 sps:$4 sm:$0xff]   ;;  %v8864_v43 = vld [vmem:[%s9669_s30 + $0x19c] ss:$100 sps:$4 sm:$0xff]  }
  0x25   : > { %7495 = vmatprep.subr.bf16.mxu1 %v8831_v16  ;;  %v8855_v38 = vld [vmem:[%s9669_s30 + $0xcc] ss:$100 sps:$4 sm:$0xff]   ;;  %4684 = vmatprep.mubr.bf16.mxu1 %v8854_v37  ;;  %v8861_v41 = vld [vmem:[%s9669_s30 + $0x194] ss:$100 sps:$4 sm:$0xff]   ;;  %v8867_v45 = vld [vmem:[%s9669_s30 + $0x25c] ss:$100 sps:$4 sm:$0xff]  }
  0x26   : > { %v8860_v42 = vld [vmem:[%s9669_s30 + $0xd0] ss:$100 sps:$4 sm:$0xff]   ;;  %v8866_v46 = vld [vmem:[%s9669_s30 + $0x198] ss:$100 sps:$4 sm:$0xff]   ;;  %v8870_v47 = vld [vmem:[%s9669_s30 + $0x264] ss:$100 sps:$4 sm:$0xff]  }
  0x27   : > { %7384 = vmatpush3.bf16.msra.mxu0 %v8830_v15  ;;  %v8863_v44 = vld [vmem:[%s9669_s30 + $0x190] ss:$100 sps:$4 sm:$0xff]   ;;  %v8869_v48 = vld [vmem:[%s9669_s30 + $0x258] ss:$100 sps:$4 sm:$0xff]   ;;  %v8873_v49 = vld [vmem:[%s9669_s30 + $0x324] ss:$100 sps:$4 sm:$0xff]  }
  0x28   : > { %7496 = vmatpush3.bf16.msra.mxu1 %v8832_v17  ;;  %7385 = vmatprep.subr.bf16.mxu0 %v8833_v18  ;;  %v8872_v50 = vld [vmem:[%s9669_s30 + $0x260] ss:$100 sps:$4 sm:$0xff]   ;;  %v8876_v51 = vld [vmem:[%s9669_s30 + $0x32c] ss:$100 sps:$4 sm:$0xff]   ;;  %v8882_v59 = vld [vmem:[%s9669_s30 + $0x3f4] ss:$100 sps:$4 sm:$0xff]  }
  0x29   : > { %7497 = vmatprep.subr.bf16.mxu1 %v8835_v20  ;;  %v1090_v52 = vld [vmem:[%s9664_s26 + $0x80] sm:$0xff]  ;;  %v8879_v55 = vld [vmem:[%s9669_s30 + $0x3ec] ss:$100 sps:$4 sm:$0xff]   ;;  %v1093_v61 = vld [vmem:[%s9664_s26 + $0x98] sm:$0xff] }
  0x2a   : > { %v1074_v53 = vld [vmem:[%s9664_s26] sm:$0xff]  ;;  %1188 = vperm.xlu0 %8815, %v1090_v52   ;;  %v1091_v56 = vld [vmem:[%s9664_s26 + $0x88] sm:$0xff]  ;;  %v1092_v60 = vld [vmem:[%s9664_s26 + $0x90] sm:$0xff] }
  0x2b   : > { %7386 = vmatpush3.bf16.msra.mxu0 %v8834_v19  ;;  %v8875_v54 = vld [vmem:[%s9669_s30 + $0x320] ss:$100 sps:$4 sm:$0xff]   ;;  %1108 = vperm.xlu1 %8816, %v1074_v53   ;;  %v1075_v57 = vld [vmem:[%s9664_s26 + $0x8] sm:$0xff]  ;;  %v8885_v0 = vld [vmem:[%s9669_s30 + $0x4b4] ss:$100 sps:$4 sm:$0xff]  }
  0x2c   : > { %7498 = vmatpush3.bf16.msra.mxu1 %v8836_v21  ;;  %7387 = vmatprep.subr.bf16.mxu0 %v8837_v22  ;;  %v8878_v58 = vld [vmem:[%s9669_s30 + $0x328] ss:$100 sps:$4 sm:$0xff]   ;;  %v8924_v62 = vld [vmem:[%s11397_s0 + $0x140] sm:$0xff]   ;;  %v1076_v2 = vld [vmem:[%s9664_s26 + $0x10] sm:$0xff] }
  0x2d   : > { %7499 = vmatprep.subr.bf16.mxu1 %v8839_v24  ;;  %v8881_v63 = vld [vmem:[%s9669_s30 + $0x3e8] ss:$100 sps:$4 sm:$0xff]   ;;  %v8927_v1 = vld [vmem:[%s11397_s0 + $0x100] sm:$0xff]   ;;  %v8884_v3 = vld [vmem:[%s9669_s30 + $0x3f0] ss:$100 sps:$4 sm:$0xff]  }
  0x2e   : > { %1193 = vperm.xlu0 %8815, %v1091_v56   ;;  %v1077_v4 = vld [vmem:[%s9664_s26 + $0x18] sm:$0xff]  ;;  %v8929_v5 = vld [vmem:[%s11397_s0 + $0x1c0] sm:$0xff]   ;;  %v8931_v9 = vld [vmem:[%s11397_s0 + $0x148] sm:$0xff]  }
  0x2f   : > { %7388 = vmatpush3.bf16.msra.mxu0 %v8838_v23  ;;  %1113 = vperm.xlu1 %8816, %v1075_v57   ;;  %v8888_v6 = vld [vmem:[%s9669_s30 + $0x4bc] ss:$100 sps:$4 sm:$0xff]   ;;  %v1095_v10 = vld [vmem:[%s9664_s26 + $0xa8] sm:$0xff]  ;;  %v8887_v13 = vld [vmem:[%s9669_s30 + $0x4b0] ss:$100 sps:$4 sm:$0xff]  }
  0x30   : > { %7500 = vmatpush3.bf16.msra.mxu1 %v8840_v25  ;;  %7389 = vmatprep.subr.bf16.mxu0 %v8841_v26  ;;  %v1094_v7 = vld [vmem:[%s9664_s26 + $0xa0] sm:$0xff]  ;;  %v8932_v11 = vld [vmem:[%s11397_s0 + $0x108] sm:$0xff]   ;;  %v8938_v17 = vld [vmem:[%s11397_s0 + $0x150] sm:$0xff]  }
  0x31   : > { %7501 = vmatprep.subr.bf16.mxu1 %v8843_v28  ;;  %v8930_v8 = vld [vmem:[%s11397_s0 + $0x180] sm:$0xff]   ;;  %v8933_v12 = vld [vmem:[%s11397_s0 + $0x1c8] sm:$0xff]   ;;  %v8890_v19 = vld [vmem:[%s9669_s30 + $0x4b8] ss:$100 sps:$4 sm:$0xff]  }
  0x32   : > { %1198 = vperm.xlu0 %8815, %v1092_v60   ;;  %v8891_v14 = vld [vmem:[%s9669_s30 + $0x57c] ss:$100 sps:$4 sm:$0xff]   ;;  %v8936_v16 = vld [vmem:[%s11397_s0 + $0x188] sm:$0xff]   ;;  %v8941_v20 = vld [vmem:[%s11397_s0 + $0x110] sm:$0xff]  }
  0x33   : > { %7390 = vmatpush3.bf16.msra.mxu0 %v8842_v27  ;;  %1203 = vperm.xlu1 %8816, %v1093_v61   ;;  %v1078_v15 = vld [vmem:[%s9664_s26 + $0x20] sm:$0xff]  ;;  %v1079_v18 = vld [vmem:[%s9664_s26 + $0x28] sm:$0xff]  ;;  %v8943_v22 = vld [vmem:[%s11397_s0 + $0x1d0] sm:$0xff]  }
  0x34   : > { %7502 = vmatpush3.bf16.msra.mxu1 %v8844_v29  ;;  %7391 = vmatprep.subr.bf16.mxu0 %v8845_v30  ;;  %v8894_v21 = vld [vmem:[%s9669_s30 + $0x584] ss:$100 sps:$4 sm:$0xff]   ;;  %v1096_v23 = vld [vmem:[%s9664_s26 + $0xb0] sm:$0xff]  ;;  %v8893_v24 = vld [vmem:[%s9669_s30 + $0x578] ss:$100 sps:$4 sm:$0xff]  }
  0x35   : > { %7503 = vmatprep.subr.bf16.mxu1 %v8847_v32  ;;  %v8944_v25 = vld [vmem:[%s11397_s0 + $0x190] sm:$0xff]   ;;  %v8897_v26 = vld [vmem:[%s9669_s30 + $0x644] ss:$100 sps:$4 sm:$0xff]   ;;  %v8945_v27 = vld [vmem:[%s11397_s0 + $0x158] sm:$0xff]  }
  0x36   : > { %1118 = vperm.xlu0 %8815, %v1076_v2   ;;  %v1097_v28 = vld [vmem:[%s9664_s26 + $0xb8] sm:$0xff]  ;;  %v8896_v32 = vld [vmem:[%s9669_s30 + $0x580] ss:$100 sps:$4 sm:$0xff]   ;;  %v8964_v52 = vld [vmem:[%s11397_s0 + $0x1a8] sm:$0xff]  }
  0x37   : > { %7392 = vmatpush3.bf16.msra.mxu0 %v8846_v31  ;;  %1123 = vperm.xlu1 %8816, %v1077_v4   ;;  %v8946_v29 = vld [vmem:[%s11397_s0 + $0x118] sm:$0xff]   ;;  %v1080_v31 = vld [vmem:[%s9664_s26 + $0x30] sm:$0xff]  ;;  %v8899_v37 = vld [vmem:[%s9669_s30 + $0x640] ss:$100 sps:$4 sm:$0xff]  }
  0x38   : > { %7504 = vmatpush3.bf16.msra.mxu1 %v8851_v35  ;;  %7601 = vmatprep.subr.bf16.mxu0 %v8924_v62  ;;  %v8947_v30 = vld [vmem:[%s11397_s0 + $0x1d8] sm:$0xff]   ;;  %v8952_v35 = vld [vmem:[%s11397_s0 + $0x160] sm:$0xff]   ;;  %v8966_v53 = vld [vmem:[%s11397_s0 + $0x170] sm:$0xff]  }
  0x39   : > { %7713 = vmatprep.subr.bf16.mxu1 %v8929_v5  ;;  %v8950_v34 = vld [vmem:[%s11397_s0 + $0x198] sm:$0xff]   ;;  %v8969_v56 = vld [vmem:[%s11397_s0 + $0x130] sm:$0xff]   ;;  %v8918_v5 = vld [vmem:[%s9669_s30 + $0x8a4] ss:$100 sps:$4 sm:$0xff]  }
  0x3a   : > { %4524 = vmatmul.mubr.bf16.vlgmr.msra.gmra.mrb[0].mxu0 %v8848_v33  ;;  %1208 = vperm.xlu0 %8815, %v1094_v7   ;;  %v8900_v33 = vld [vmem:[%s9669_s30 + $0x64c] ss:$100 sps:$4 sm:$0xff]   ;;  %v8912_v57 = vld [vmem:[%s9669_s30 + $0x7dc] ss:$100 sps:$4 sm:$0xff]  }
  0x3b   : > { %4531 = vmatprep.mubr.bf16.mxu0 %v8855_v38  ;;  %4685 = vmatmul.mubr.bf16.vlgmr.msra.gmra.mrb[0].mxu1 %v8852_v36  ;;  %v1081_v36 = vld [vmem:[%s9664_s26 + $0x38] sm:$0xff]  ;;  %v8955_v38 = vld [vmem:[%s11397_s0 + $0x120] sm:$0xff]   ;;  %v8911_v60 = vld [vmem:[%s9669_s30 + $0x7d0] ss:$100 sps:$4 sm:$0xff]  }
  0x3c   : > { %4692 = vmatprep.mubr.bf16.mxu1 %v8858_v39  ;;  %7602 = vmatpush3.bf16.msra.mxu0 %v8927_v1  ;;  %v8903_v39 = vld [vmem:[%s9669_s30 + $0x70c] ss:$100 sps:$4 sm:$0xff]   ;;  %v8915_v62 = vld [vmem:[%s9669_s30 + $0x89c] ss:$100 sps:$4 sm:$0xff]  }
  0x3d   : > { %7714 = vmatpush3.bf16.msra.mxu1 %v8930_v8  ;;  %7603 = vmatprep.subr.bf16.mxu0 %v8931_v9  ;;  %v8972_v61 = vld [vmem:[%s11397_s0 + $0x1b0] sm:$0xff]   ;;  %v8974_v1 = vld [vmem:[%s11397_s0 + $0x138] sm:$0xff]   ;;  %v1102_v8 = vld [vmem:[%s9664_s26 + $0xe0] sm:$0xff] }
  0x3e   : > { %1213 = vperm.xlu1 %8816, %v1095_v10   ;;  %7715 = vmatprep.subr.bf16.mxu1 %v8933_v12  ;;  %v8975_v2 = vld [vmem:[%s11397_s0 + $0x1f8] sm:$0xff]   ;;  %v1103_v9 = vld [vmem:[%s9664_s26 + $0xe8] sm:$0xff] }
  0x3f   : > { %1128 = vperm.xlu0 %8815, %v1078_v15   ;;  %v8914_v4 = vld [vmem:[%s9669_s30 + $0x7d8] ss:$100 sps:$4 sm:$0xff]   ;;  %v8921_v12 = vld [vmem:[%s9669_s30 + $0x964] ss:$100 sps:$4 sm:$0xff]   ;;  %v8925_v15 = vld [vmem:[%s9669_s30 + $0x96c] ss:$100 sps:$4 sm:$0xff]  }
  0x40   : > { %7604 = vmatpush3.bf16.msra.mxu0 %v8932_v11  ;;  %v1085_v7 = vld [vmem:[%s9664_s26 + $0x58] sm:$0xff]  ;;  %v1086_v11 = vld [vmem:[%s9664_s26 + $0x60] sm:$0xff] }
  0x41   : > { %7716 = vmatpush3.bf16.msra.mxu1 %v8936_v16  ;;  %7605 = vmatprep.subr.bf16.mxu0 %v8938_v17  ;;  %v8917_v10 = vld [vmem:[%s9669_s30 + $0x898] ss:$100 sps:$4 sm:$0xff]   ;;  %v1104_v16 = vld [vmem:[%s9664_s26 + $0xf0] sm:$0xff] }
  0x42   : > { %4532 = vmatmul.mubr.bf16.gmra.mrb[4].mxu0 %v8857_v40  ;;  %1133 = vperm.xlu1 %8816, %v1079_v18   ;;  %v8902_v40 = vld [vmem:[%s9669_s30 + $0x648] ss:$100 sps:$4 sm:$0xff]   ;;  %v1105_v17 = vld [vmem:[%s9664_s26 + $0xf8] sm:$0xff]  ;;  %v8923_v18 = vld [vmem:[%s9669_s30 + $0x960] ss:$100 sps:$4 sm:$0xff]  }
  0x43   : > { %4539 = vmatprep.mubr.bf16.mxu0 %v8861_v41  ;;  %4693 = vmatmul.mubr.bf16.gmra.mrb[4].mxu1 %v8860_v42  ;;  %v8957_v41 = vld [vmem:[%s11397_s0 + $0x1e0] sm:$0xff]  }
  0x44   : > { %4700 = vmatprep.mubr.bf16.mxu1 %v8864_v43  ;;  %7606 = vmatpush3.bf16.msra.mxu0 %v8941_v20  ;;  %v1098_v42 = vld [vmem:[%s9664_s26 + $0xc0] sm:$0xff]  ;;  %v8906_v43 = vld [vmem:[%s9669_s30 + $0x714] ss:$100 sps:$4 sm:$0xff]   ;;  %v8934_v20 = vld [vmem:[%s9669_s30 + $0xa2c] ss:$100 sps:$4 sm:$0xff]  }
  0x45   : > { %7717 = vmatprep.subr.bf16.mxu1 %v8943_v22  ;;  %1218 = vperm.xlu0 %8815, %v1096_v23   ;;  %v8928_v22 = vld [vmem:[%s9669_s30 + $0x968] ss:$100 sps:$4 sm:$0xff]   ;;  %v8939_v23 = vld [vmem:[%s9669_s30 + $0xa34] ss:$100 sps:$4 sm:$0xff]  }
  0x46   : > { %7718 = vmatpush3.bf16.msra.mxu1 %v8944_v25  ;;  %7607 = vmatprep.subr.bf16.mxu0 %v8945_v27  ;;  %v8948_v25 = vld [vmem:[%s9669_s30 + $0xaf4] ss:$100 sps:$4 sm:$0xff]   ;;  %v8953_v27 = vld [vmem:[%s9669_s30 + $0xafc] ss:$100 sps:$4 sm:$0xff]  }
  0x47   : > { %1223 = vperm.xlu1 %8816, %v1097_v28   ;;  %7719 = vmatprep.subr.bf16.mxu1 %v8947_v30  ;;  %v8951_v28 = vld [vmem:[%s9669_s30 + $0xaf0] ss:$100 sps:$4 sm:$0xff]   ;;  %v8956_v30 = vld [vmem:[%s9669_s30 + $0xaf8] ss:$100 sps:$4 sm:$0xff]  }
  0x48   : > { %7608 = vmatpush3.bf16.msra.mxu0 %v8946_v29  ;;  %v8962_v29 = vld [vmem:[%s9669_s30 + $0xbbc] ss:$100 sps:$4 sm:$0xff]  }
  0x49   : > { %1138 = vperm.xlu0 %8815, %v1080_v31   ;;  %7609 = vmatprep.subr.bf16.mxu0 %v8952_v35  ;;  %v8967_v31 = vld [vmem:[%s9669_s30 + $0xbc4] ss:$100 sps:$4 sm:$0xff]  }
  0x4a   : > { %4540 = vmatmul.mubr.bf16.gmra.mrb[8].mxu0 %v8863_v44  ;;  %7720 = vmatpush3.bf16.msra.mxu1 %v8950_v34  ;;  %v8958_v44 = vld [vmem:[%s11397_s0 + $0x1a0] sm:$0xff]   ;;  %v8978_v34 = vld [vmem:[%s9669_s30 + $0x14] ss:$100 sps:$4 sm:$0xff]  }
  0x4b   : > { %4547 = vmatprep.mubr.bf16.mxu0 %v8867_v45  ;;  %4701 = vmatmul.mubr.bf16.gmra.mrb[8].mxu1 %v8866_v46  ;;  %v8959_v45 = vld [vmem:[%s11397_s0 + $0x168] sm:$0xff]   ;;  %v8970_v35 = vld [vmem:[%s9669_s30 + $0xbc0] ss:$100 sps:$4 sm:$0xff]  }
  0x4c   : > { %4708 = vmatprep.mubr.bf16.mxu1 %v8870_v47  ;;  %1143 = vperm.xlu1 %8816, %v1081_v36   ;;  %v1099_v46 = vld [vmem:[%s9664_s26 + $0xc8] sm:$0xff]  ;;  %v9057_v36 = vld [vmem:[%s11397_s0 + $0x2c0] sm:$0xff]  }
  0x4d   : > { %7610 = vmatpush3.bf16.msra.mxu0 %v8955_v38  ;;  %1228 = vperm.xlu0 %8815, %v1098_v42   ;;  %v8960_v47 = vld [vmem:[%s11397_s0 + $0x128] sm:$0xff]   ;;  %v8976_v38 = vld [vmem:[%s9669_s30 + $0x10] ss:$100 sps:$4 sm:$0xff]  }
  0x4e   : > { %7721 = vmatprep.subr.bf16.mxu1 %v8957_v41  ;;  %7611 = vmatprep.subr.bf16.mxu0 %v8959_v45  ;;  %v9055_v41 = vld [vmem:[%s11397_s0 + $0x200] sm:$0xff]   ;;  %v9059_v42 = vld [vmem:[%s11397_s0 + $0x248] sm:$0xff]  }
  0x4f   : > { %7722 = vmatpush3.bf16.msra.mxu1 %v8958_v44  ;;  %v9058_v44 = vld [vmem:[%s11397_s0 + $0x280] sm:$0xff]   ;;  %v9060_v45 = vld [vmem:[%s11397_s0 + $0x208] sm:$0xff]  }
  0x50   : > { %1233 = vperm.xlu1 %8816, %v1099_v46   ;;  %v9061_v46 = vld [vmem:[%s11397_s0 + $0x2c8] sm:$0xff]  }
  0x51   : > { %7612 = vmatpush3.bf16.msra.mxu0 %v8960_v47  ;;  %v8985_v47 = vld [vmem:[%s9669_s30 + $0xd8] ss:$100 sps:$4 sm:$0xff]  }
  0x52   : > { %4548 = vmatmul.mubr.bf16.gmra.mrb[12].mxu0 %v8869_v48  ;;  %v8961_v48 = vld [vmem:[%s11397_s0 + $0x1e8] sm:$0xff]   ;;  %7613 = vmatprep.subr.bf16.mxu0 %v8966_v53  ;;  %v9071_v53 = vld [vmem:[%s11397_s0 + $0x2d0] sm:$0xff]  }
  0x53   : > { %4555 = vmatprep.mubr.bf16.mxu0 %v8873_v49  ;;  %4709 = vmatmul.mubr.bf16.gmra.mrb[12].mxu1 %v8872_v50  ;;  %v1082_v49 = vld [vmem:[%s9664_s26 + $0x40] sm:$0xff]  ;;  %v8905_v50 = vld [vmem:[%s9669_s30 + $0x708] ss:$100 sps:$4 sm:$0xff]  }
  0x54   : > { %4716 = vmatprep.mubr.bf16.mxu1 %v8876_v51  ;;  %7723 = vmatprep.subr.bf16.mxu1 %v8961_v48  ;;  %v8909_v51 = vld [vmem:[%s9669_s30 + $0x7d4] ss:$100 sps:$4 sm:$0xff]  }
  0x55   : > { %1148 = vperm.xlu0 %8815, %v1082_v49   ;;  %7724 = vmatpush3.bf16.msra.mxu1 %v8964_v52  ;;  %v9066_v48 = vld [vmem:[%s11397_s0 + $0x250] sm:$0xff]   ;;  %v8989_v49 = vld [vmem:[%s9669_s30 + $0x1a4] ss:$100 sps:$4 sm:$0xff]  }
  0x56   : > { %7614 = vmatpush3.bf16.msra.mxu0 %v8969_v56  ;;  %v8988_v52 = vld [vmem:[%s9669_s30 + $0xe0] ss:$100 sps:$4 sm:$0xff]   ;;  %v9072_v56 = vld [vmem:[%s11397_s0 + $0x290] sm:$0xff]  }
  0x5a   : > { %4556 = vmatmul.mubr.bf16.gmra.mrb[16].mxu0 %v8875_v54  ;;  %v1083_v54 = vld [vmem:[%s9664_s26 + $0x48] sm:$0xff] }
  0x5b   : > { %4563 = vmatprep.mubr.bf16.mxu0 %v8879_v55  ;;  %4717 = vmatmul.mubr.bf16.gmra.mrb[16].mxu1 %v8878_v58  ;;  %v8908_v55 = vld [vmem:[%s9669_s30 + $0x710] ss:$100 sps:$4 sm:$0xff]  }
  0x5c   : > { %4724 = vmatprep.mubr.bf16.mxu1 %v8882_v59  ;;  %1153 = vperm.xlu1 %8816, %v1083_v54   ;;  %v8971_v58 = vld [vmem:[%s11397_s0 + $0x1f0] sm:$0xff]   ;;  %v9073_v54 = vld [vmem:[%s11397_s0 + $0x258] sm:$0xff]  }
  0x5d   : > { %v1100_v59 = vld [vmem:[%s9664_s26 + $0xd0] sm:$0xff]  ;;  %7725 = vmatprep.subr.bf16.mxu1 %v8971_v58  ;;  %v9075_v58 = vld [vmem:[%s11397_s0 + $0x2d8] sm:$0xff]  }
  0x5e   : > { %1238 = vperm.xlu0 %8815, %v1100_v59   ;;  %7726 = vmatpush3.bf16.msra.mxu1 %v8972_v61  ;;  %v8991_v59 = vld [vmem:[%s9669_s30 + $0x1a0] ss:$100 sps:$4 sm:$0xff]   ;;  %v8995_v61 = vld [vmem:[%s9669_s30 + $0x26c] ss:$100 sps:$4 sm:$0xff]  }
  0x5f   : > { %7727 = vmatprep.subr.bf16.mxu1 %v8975_v2  ;;  %v8998_v2 = vld [vmem:[%s9669_s30 + $0x274] ss:$100 sps:$4 sm:$0xff]  }
  0x62   : > { %4564 = vmatmul.mubr.bf16.gmra.mrb[20].mxu0 %v8881_v63  ;;  %v8973_v63 = vld [vmem:[%s11397_s0 + $0x178] sm:$0xff]  }
  0x63   : > { %4571 = vmatprep.mubr.bf16.mxu0 %v8885_v0  ;;  %4725 = vmatmul.mubr.bf16.gmra.mrb[20].mxu1 %v8884_v3  ;;  %v1101_v0 = vld [vmem:[%s9664_s26 + $0xd8] sm:$0xff]  ;;  %v1084_v3 = vld [vmem:[%s9664_s26 + $0x50] sm:$0xff] }
  0x64   : > { %4732 = vmatprep.mubr.bf16.mxu1 %v8888_v6  ;;  %7615 = vmatprep.subr.bf16.mxu0 %v8973_v63  ;;  %v8979_v6 = vld [vmem:[%s11397_s0 + $0x1b8] sm:$0xff]   ;;  %v9083_v63 = vld [vmem:[%s11397_s0 + $0x220] sm:$0xff]  }
  0x65   : > { %1243 = vperm.xlu1 %8816, %v1101_v0   ;;  %7616 = vmatpush3.bf16.msra.mxu0 %v8974_v1  ;;  %v8994_v0 = vld [vmem:[%s9669_s30 + $0x1a8] ss:$100 sps:$4 sm:$0xff]   ;;  %v9085_v1 = vld [vmem:[%s11397_s0 + $0x2e0] sm:$0xff]  }
  0x66   : > { %1158 = vperm.xlu0 %8815, %v1084_v3   ;;  %7728 = vmatpush3.bf16.msra.mxu1 %v8979_v6  ;;  %v9086_v3 = vld [vmem:[%s11397_s0 + $0x2a0] sm:$0xff]   ;;  %v9089_v6 = vld [vmem:[%s11397_s0 + $0x2e8] sm:$0xff]  }
  0x67   : > { %7937 = vmatprep.subr.bf16.mxu1 %v9057_v36  ;;  %v9024_v36 = vld [vmem:[%s9669_s30 + $0x590] ss:$100 sps:$4 sm:$0xff]  }
  0x69   : > { %1163 = vperm.xlu1 %8816, %v1085_v7   ;;  %v8997_v7 = vld [vmem:[%s9669_s30 + $0x268] ss:$100 sps:$4 sm:$0xff]  }
  0x6a   : > { %4572 = vmatmul.mubr.bf16.gmra.mrb[24].mxu0 %v8887_v13  ;;  %1248 = vperm.xlu0 %8815, %v1102_v8   ;;  %v1087_v13 = vld [vmem:[%s9664_s26 + $0x68] sm:$0xff] }
  0x6b   : > { %4579 = vmatprep.mubr.bf16.mxu0 %v8891_v14  ;;  %4733 = vmatmul.mubr.bf16.gmra.mrb[24].mxu1 %v8890_v19  ;;  %v8920_v14 = vld [vmem:[%s9669_s30 + $0x8a0] ss:$100 sps:$4 sm:$0xff]   ;;  %v1088_v19 = vld [vmem:[%s9664_s26 + $0x70] sm:$0xff]  ;;  %v9092_v8 = vld [vmem:[%s11397_s0 + $0x2a8] sm:$0xff]  }
  0x6c   : > { %4740 = vmatprep.mubr.bf16.mxu1 %v8894_v21  ;;  %v1089_v21 = vld [vmem:[%s9664_s26 + $0x78] sm:$0xff] }
  0x6d   : > { %1253 = vperm.xlu1 %8816, %v1103_v9   ;;  %v9094_v9 = vld [vmem:[%s11397_s0 + $0x270] sm:$0xff]  }
  0x6e   : > { %1168 = vperm.xlu0 %8815, %v1086_v11   ;;  %v9001_v11 = vld [vmem:[%s9669_s30 + $0x334] ss:$100 sps:$4 sm:$0xff]  }
  0x71   : > { %1173 = vperm.xlu1 %8816, %v1087_v13   ;;  %v9097_v13 = vld [vmem:[%s11397_s0 + $0x230] sm:$0xff]  }
  0x72   : > { %4580 = vmatmul.mubr.bf16.gmra.mrb[28].mxu0 %v8893_v24  ;;  %1258 = vperm.xlu0 %8815, %v1104_v16   ;;  %v8937_v24 = vld [vmem:[%s9669_s30 + $0xa28] ss:$100 sps:$4 sm:$0xff]   ;;  %v9101_v16 = vld [vmem:[%s11397_s0 + $0x278] sm:$0xff]  }
  0x73   : > { %4587 = vmatprep.mubr.bf16.mxu0 %v8897_v26  ;;  %4741 = vmatmul.mubr.bf16.gmra.mrb[28].mxu1 %v8896_v32  ;;  %v8942_v26 = vld [vmem:[%s9669_s30 + $0xa30] ss:$100 sps:$4 sm:$0xff]   ;;  %v8965_v32 = vld [vmem:[%s9669_s30 + $0xbb8] ss:$100 sps:$4 sm:$0xff]  }
  0x74   : > { %4748 = vmatprep.mubr.bf16.mxu1 %v8900_v33  ;;  %v9052_v33 = vld [vmem:[%s11397_s0 + $0x240] sm:$0xff]  }
  0x75   : > { %1263 = vperm.xlu1 %8816, %v1105_v17   ;;  %7825 = vmatprep.subr.bf16.mxu0 %v9052_v33  ;;  %v9102_v17 = vld [vmem:[%s11397_s0 + $0x238] sm:$0xff]   ;;  %v9021_v33 = vld [vmem:[%s9669_s30 + $0x588] ss:$100 sps:$4 sm:$0xff]  }
  0x76   : > { %1178 = vperm.xlu0 %8815, %v1088_v19   ;;  %v9003_v19 = vld [vmem:[%s9669_s30 + $0x330] ss:$100 sps:$4 sm:$0xff]  }
  0x79   : > { %1183 = vperm.xlu1 %8816, %v1089_v21   ;;  %v9107_v21 = vld [vmem:[%s11397_s0 + $0x2b8] sm:$0xff]  }
  0x7a   : > { %4588 = vmatmul.mubr.bf16.gmra.mrb[32].mxu0 %v8899_v37  ;;  %v8982_v37 = vld [vmem:[%s9669_s30 + $0x1c] ss:$100 sps:$4 sm:$0xff]  }
  0x7b   : > { %4595 = vmatprep.mubr.bf16.mxu0 %v8903_v39  ;;  %4749 = vmatmul.mubr.bf16.gmra.mrb[32].mxu1 %v8902_v40  ;;  %v8983_v39 = vld [vmem:[%s9669_s30 + $0xdc] ss:$100 sps:$4 sm:$0xff]  }
  0x7c   : > { %4756 = vmatprep.mubr.bf16.mxu1 %v8906_v43  ;;  %v8980_v40 = vld [vmem:[%s9669_s30 + $0x18] ss:$100 sps:$4 sm:$0xff]   ;;  %v8986_v43 = vld [vmem:[%s9669_s30 + $0xe4] ss:$100 sps:$4 sm:$0xff]  }
  0x82   : > { %4596 = vmatmul.mubr.bf16.gmra.mrb[36].mxu0 %v8905_v50  ;;  %v9064_v50 = vld [vmem:[%s11397_s0 + $0x288] sm:$0xff]  }
  0x83   : > { %4603 = vmatprep.mubr.bf16.mxu0 %v8909_v51  ;;  %4757 = vmatmul.mubr.bf16.gmra.mrb[36].mxu1 %v8908_v55  ;;  %v9069_v51 = vld [vmem:[%s11397_s0 + $0x210] sm:$0xff]  }
  0x84   : > { %4764 = vmatprep.mubr.bf16.mxu1 %v8912_v57  ;;  %v8992_v55 = vld [vmem:[%s9669_s30 + $0x1ac] ss:$100 sps:$4 sm:$0xff]   ;;  %v9074_v57 = vld [vmem:[%s11397_s0 + $0x218] sm:$0xff]  }
  0x8a   : > { %4604 = vmatmul.mubr.bf16.gmra.mrb[40].mxu0 %v8911_v60  ;;  %v9080_v60 = vld [vmem:[%s11397_s0 + $0x260] sm:$0xff]  }
  0x8b   : > { %4611 = vmatprep.mubr.bf16.mxu0 %v8915_v62  ;;  %4765 = vmatmul.mubr.bf16.gmra.mrb[40].mxu1 %v8914_v4  ;;  %v9078_v62 = vld [vmem:[%s11397_s0 + $0x298] sm:$0xff]   ;;  %v9087_v4 = vld [vmem:[%s11397_s0 + $0x268] sm:$0xff]  }
  0x8c   : > { %4772 = vmatprep.mubr.bf16.mxu1 %v8918_v5  ;;  %v9088_v5 = vld [vmem:[%s11397_s0 + $0x228] sm:$0xff]  }
  0x92   : > { %4612 = vmatmul.mubr.bf16.gmra.mrb[44].mxu0 %v8917_v10  ;;  %v9000_v10 = vld [vmem:[%s9669_s30 + $0x270] ss:$100 sps:$4 sm:$0xff]  }
  0x93   : > { %4619 = vmatprep.mubr.bf16.mxu0 %v8921_v12  ;;  %4773 = vmatmul.mubr.bf16.gmra.mrb[44].mxu1 %v8920_v14  ;;  %v9004_v12 = vld [vmem:[%s9669_s30 + $0x33c] ss:$100 sps:$4 sm:$0xff]   ;;  %v9099_v14 = vld [vmem:[%s11397_s0 + $0x2f0] sm:$0xff]  }
  0x94   : > { %4780 = vmatprep.mubr.bf16.mxu1 %v8925_v15  ;;  %v9100_v15 = vld [vmem:[%s11397_s0 + $0x2b0] sm:$0xff]  }
  0x9a   : > { %4620 = vmatmul.mubr.bf16.gmra.mrb[48].mxu0 %v8923_v18  ;;  %v9103_v18 = vld [vmem:[%s11397_s0 + $0x2f8] sm:$0xff]  }
  0x9b   : > { %4627 = vmatprep.mubr.bf16.mxu0 %v8934_v20  ;;  %4781 = vmatmul.mubr.bf16.gmra.mrb[48].mxu1 %v8928_v22  ;;  %v9007_v20 = vld [vmem:[%s9669_s30 + $0x3fc] ss:$100 sps:$4 sm:$0xff]  }
  0x9c   : > { %4788 = vmatprep.mubr.bf16.mxu1 %v8939_v23  ;;  %v9006_v22 = vld [vmem:[%s9669_s30 + $0x338] ss:$100 sps:$4 sm:$0xff]   ;;  %v9010_v23 = vld [vmem:[%s9669_s30 + $0x404] ss:$100 sps:$4 sm:$0xff]  }
  0xa2   : > { %4628 = vmatmul.mubr.bf16.gmra.mrb[52].mxu0 %v8937_v24  ;;  %v9009_v24 = vld [vmem:[%s9669_s30 + $0x3f8] ss:$100 sps:$4 sm:$0xff]  }
  0xa3   : > { %4635 = vmatprep.mubr.bf16.mxu0 %v8948_v25  ;;  %4789 = vmatmul.mubr.bf16.gmra.mrb[52].mxu1 %v8942_v26  ;;  %v9013_v25 = vld [vmem:[%s9669_s30 + $0x4c4] ss:$100 sps:$4 sm:$0xff]  }
  0xa4   : > { %4796 = vmatprep.mubr.bf16.mxu1 %v8953_v27  ;;  %v9012_v26 = vld [vmem:[%s9669_s30 + $0x400] ss:$100 sps:$4 sm:$0xff]   ;;  %v9016_v27 = vld [vmem:[%s9669_s30 + $0x4cc] ss:$100 sps:$4 sm:$0xff]  }
  0xaa   : > { %4636 = vmatmul.mubr.bf16.gmra.mrb[56].mxu0 %v8951_v28  ;;  %v9015_v28 = vld [vmem:[%s9669_s30 + $0x4c0] ss:$100 sps:$4 sm:$0xff]  }
  0xab   : > { %4643 = vmatprep.mubr.bf16.mxu0 %v8962_v29  ;;  %4797 = vmatmul.mubr.bf16.gmra.mrb[56].mxu1 %v8956_v30  ;;  %v9019_v29 = vld [vmem:[%s9669_s30 + $0x58c] ss:$100 sps:$4 sm:$0xff]  }
  0xac   : > { %4804 = vmatprep.mubr.bf16.mxu1 %v8967_v31  ;;  %v9018_v30 = vld [vmem:[%s9669_s30 + $0x4c8] ss:$100 sps:$4 sm:$0xff]   ;;  %v9022_v31 = vld [vmem:[%s9669_s30 + $0x594] ss:$100 sps:$4 sm:$0xff]  }
  0xb2   : > { %4644 = vmatmul.mubr.bf16.gmra.mrb[60].mxu0 %v8965_v32  ;;  %v10091_v32 = vpop.permute.xlu0 %1188 }
  0xb3   : > { %4845 = vmatprep.mubr.bf16.mxu0 %v8978_v34  ;;  %4805 = vmatmul.mubr.bf16.gmra.mrb[60].mxu1 %v8970_v35  ;;  %v9025_v34 = vld [vmem:[%s9669_s30 + $0x654] ss:$100 sps:$4 sm:$0xff]   ;;  %v1109_v35 = vpop.permute.xlu1 %1108 }
  0xb4   : > { %5006 = vmatprep.mubr.bf16.mxu1 %v8982_v37 }
  0xb6   : > { %v10096_v37 = vpop.permute.xlu0 %1193 }
  0xba   : > { %4846 = vmatmul.mubr.bf16.vlgmr.msra.gmra.mrb[64].mxu0 %v8976_v38  ;;  %v9028_v38 = vld [vmem:[%s9669_s30 + $0x65c] ss:$100 sps:$4 sm:$0xff]  }
  0xbb   : > { %4853 = vmatprep.mubr.bf16.mxu0 %v8983_v39  ;;  %7826 = vmatpush3.bf16.msra.mxu0 %v9055_v41  ;;  %v1114_v39 = vpop.permute.xlu1 %1113  ;;  %v9031_v41 = vld [vmem:[%s9669_s30 + $0x71c] ss:$100 sps:$4 sm:$0xff]  }
  0xbc   : > { %7827 = vmatprep.subr.bf16.mxu0 %v9059_v42  ;;  %5007 = vmatmul.mubr.bf16.vlgmr.msra.gmra.mrb[64].mxu1 %v8980_v40  ;;  %v9027_v40 = vld [vmem:[%s9669_s30 + $0x650] ss:$100 sps:$4 sm:$0xff]   ;;  %v10101_v42 = vpop.permute.xlu0 %1198 }
  0xbd   : > { %5014 = vmatprep.mubr.bf16.mxu1 %v8986_v43  ;;  %7938 = vmatpush3.bf16.msra.mxu1 %v9058_v44  ;;  %v9030_v43 = vld [vmem:[%s9669_s30 + $0x658] ss:$100 sps:$4 sm:$0xff]  }
  0xbe   : > { %7939 = vmatprep.subr.bf16.mxu1 %v9061_v46  ;;  %v9033_v46 = vld [vmem:[%s9669_s30 + $0x718] ss:$100 sps:$4 sm:$0xff]  }
  0xbf   : > { %7828 = vmatpush3.bf16.msra.mxu0 %v9060_v45  ;;  %v10104_v44 = vpop.permute.xlu1 %1203  ;;  %v9034_v45 = vld [vmem:[%s9669_s30 + $0x724] ss:$100 sps:$4 sm:$0xff]  }
  0xc0   : > { %7829 = vmatprep.subr.bf16.mxu0 %v9066_v48  ;;  %v1119_v48 = vpop.permute.xlu0 %1118 }
  0xc1   : > { %7940 = vmatpush3.bf16.msra.mxu1 %v9064_v50  ;;  %v9036_v50 = vld [vmem:[%s9669_s30 + $0x720] ss:$100 sps:$4 sm:$0xff]  }
  0xc2   : > { %4854 = vmatmul.mubr.bf16.gmra.mrb[68].mxu0 %v8985_v47  ;;  %7941 = vmatprep.subr.bf16.mxu1 %v9071_v53  ;;  %v9037_v47 = vld [vmem:[%s9669_s30 + $0x7e4] ss:$100 sps:$4 sm:$0xff]  }
  0xc3   : > { %4861 = vmatprep.mubr.bf16.mxu0 %v8989_v49  ;;  %7830 = vmatpush3.bf16.msra.mxu0 %v9069_v51  ;;  %v10109_v49 = vpop.permute.xlu1 %1123  ;;  %v9040_v51 = vld [vmem:[%s9669_s30 + $0x7ec] ss:$100 sps:$4 sm:$0xff]   ;;  %v9039_v53 = vld [vmem:[%s9669_s30 + $0x7e0] ss:$100 sps:$4 sm:$0xff]  }
  0xc4   : > { %7831 = vmatprep.subr.bf16.mxu0 %v9073_v54  ;;  %5015 = vmatmul.mubr.bf16.gmra.mrb[68].mxu1 %v8988_v52  ;;  %v10113_v52 = vpop.permute.xlu0 %1208  ;;  %v9043_v54 = vld [vmem:[%s9669_s30 + $0x8ac] ss:$100 sps:$4 sm:$0xff]  }
  0xc5   : > { %5022 = vmatprep.mubr.bf16.mxu1 %v8992_v55  ;;  %7942 = vmatpush3.bf16.msra.mxu1 %v9072_v56  ;;  %v9042_v56 = vld [vmem:[%s9669_s30 + $0x7e8] ss:$100 sps:$4 sm:$0xff]  }
  0xc6   : > { %7943 = vmatprep.subr.bf16.mxu1 %v9075_v58  ;;  %v9046_v58 = vld [vmem:[%s9669_s30 + $0x8b4] ss:$100 sps:$4 sm:$0xff]  }
  0xc7   : > { %7832 = vmatpush3.bf16.msra.mxu0 %v9074_v57  ;;  %v10117_v55 = vpop.permute.xlu1 %1213 }
  0xc8   : > { %7833 = vmatprep.subr.bf16.mxu0 %v9080_v60  ;;  %v10120_v57 = vpop.permute.xlu0 %1128  ;;  %v9045_v60 = vld [vmem:[%s9669_s30 + $0x8a8] ss:$100 sps:$4 sm:$0xff]  }
  0xc9   : > { %7944 = vmatpush3.bf16.msra.mxu1 %v9078_v62  ;;  %v9049_v62 = vld [vmem:[%s9669_s30 + $0x974] ss:$100 sps:$4 sm:$0xff]  }
  0xca   : > { %4862 = vmatmul.mubr.bf16.gmra.mrb[72].mxu0 %v8991_v59  ;;  %7945 = vmatprep.subr.bf16.mxu1 %v9085_v1 }
  0xcb   : > { %4869 = vmatprep.mubr.bf16.mxu0 %v8995_v61  ;;  %7834 = vmatpush3.bf16.msra.mxu0 %v9083_v63  ;;  %v10123_v59 = vpop.permute.xlu1 %1133 }
  0xcc   : > { %7835 = vmatprep.subr.bf16.mxu0 %v9087_v4  ;;  %5023 = vmatmul.mubr.bf16.gmra.mrb[72].mxu1 %v8994_v0 }
  0xcd   : > { %5030 = vmatprep.mubr.bf16.mxu1 %v8998_v2  ;;  %7946 = vmatpush3.bf16.msra.mxu1 %v9086_v3  ;;  %v10127_v2 = vpop.permute.xlu0 %1218 }
  0xce   : > { %7947 = vmatprep.subr.bf16.mxu1 %v9089_v6 }
  0xcf   : > { %7836 = vmatpush3.bf16.msra.mxu0 %v9088_v5 }
  0xd0   : > { %7837 = vmatprep.subr.bf16.mxu0 %v9094_v9  ;;  %v10130_v9 = vpop.permute.xlu1 %1223 }
  0xd1   : > { %7948 = vmatpush3.bf16.msra.mxu1 %v9092_v8  ;;  %v9048_v8 = vld [vmem:[%s9669_s30 + $0x8b0] ss:$100 sps:$4 sm:$0xff]  }
  0xd2   : > { %4870 = vmatmul.mubr.bf16.gmra.mrb[76].mxu0 %v8997_v7  ;;  %7949 = vmatprep.subr.bf16.mxu1 %v9099_v14 }
  0xd3   : > { %4877 = vmatprep.mubr.bf16.mxu0 %v9001_v11  ;;  %7838 = vmatpush3.bf16.msra.mxu0 %v9097_v13 }
  0xd4   : > { %5031 = vmatmul.mubr.bf16.gmra.mrb[76].mxu1 %v9000_v10  ;;  %7839 = vmatprep.subr.bf16.mxu0 %v9101_v16 }
  0xd5   : > { %5038 = vmatprep.mubr.bf16.mxu1 %v9004_v12  ;;  %7950 = vmatpush3.bf16.msra.mxu1 %v9100_v15  ;;  %v9053_v12 = vld [vmem:[%s9669_s30 + $0x97c] ss:$100 sps:$4 sm:$0xff]  }
  0xd6   : > { %7951 = vmatprep.subr.bf16.mxu1 %v9103_v18 }
  0xd7   : > { %7840 = vmatpush3.bf16.msra.mxu0 %v9102_v17  ;;  %v9051_v17 = vld [vmem:[%s9669_s30 + $0x970] ss:$100 sps:$4 sm:$0xff]  }
  0xd9   : > { %7952 = vmatpush3.bf16.msra.mxu1 %v9107_v21 }
  0xda   : > { %4878 = vmatmul.mubr.bf16.gmra.mrb[80].mxu0 %v9003_v19  ;;  %v9062_v19 = vld [vmem:[%s9669_s30 + $0xa3c] ss:$100 sps:$4 sm:$0xff]  }
  0xdb   : > { %4885 = vmatprep.mubr.bf16.mxu0 %v9007_v20  ;;  %v10137_v20 = vpop.permute.xlu0 %1138 }
  0xdc   : > { %5039 = vmatmul.mubr.bf16.gmra.mrb[80].mxu1 %v9006_v22 }
  0xdd   : > { %5046 = vmatprep.mubr.bf16.mxu1 %v9010_v23 }
  0xe2   : > { %4886 = vmatmul.mubr.bf16.gmra.mrb[84].mxu0 %v9009_v24 }
  0xe3   : > { %4893 = vmatprep.mubr.bf16.mxu0 %v9013_v25  ;;  %v10141_v25 = vpop.permute.xlu1 %1143 }
  0xe4   : > { %5047 = vmatmul.mubr.bf16.gmra.mrb[84].mxu1 %v9012_v26 }
  0xe5   : > { %5054 = vmatprep.mubr.bf16.mxu1 %v9016_v27 }
  0xea   : > { %4894 = vmatmul.mubr.bf16.gmra.mrb[88].mxu0 %v9015_v28 }
  0xeb   : > { %4901 = vmatprep.mubr.bf16.mxu0 %v9019_v29 }
  0xec   : > { %5055 = vmatmul.mubr.bf16.gmra.mrb[88].mxu1 %v9018_v30 }
  0xed   : > { %5062 = vmatprep.mubr.bf16.mxu1 %v9022_v31  ;;  %v9056_v31 = vld [vmem:[%s9669_s30 + $0x978] ss:$100 sps:$4 sm:$0xff]  }
  0xf2   : > { %4902 = vmatmul.mubr.bf16.gmra.mrb[92].mxu0 %v9021_v33  ;;  %v9180_v33 = vld [vmem:[%s11397_s0 + $0x340] sm:$0xff]  }
  0xf3   : > { %4909 = vmatprep.mubr.bf16.mxu0 %v9025_v34  ;;  %8049 = vmatprep.subr.bf16.mxu0 %v9180_v33 }
  0xf4   : > { %5063 = vmatmul.mubr.bf16.gmra.mrb[92].mxu1 %v9024_v36  ;;  %v9067_v36 = vld [vmem:[%s9669_s30 + $0xa44] ss:$100 sps:$4 sm:$0xff]  }
  0xf5   : > { %5070 = vmatprep.mubr.bf16.mxu1 %v9028_v38 }
  0xfa   : > { %4910 = vmatmul.mubr.bf16.gmra.mrb[96].mxu0 %v9027_v40  ;;  %v10149_v40 = vpop.permute.xlu0 %1228 }
  0xfb   : > { %4917 = vmatprep.mubr.bf16.mxu0 %v9031_v41  ;;  %v9185_v41 = vld [vmem:[%s11397_s0 + $0x3c0] sm:$0xff]  }
  0xfc   : > { %5071 = vmatmul.mubr.bf16.gmra.mrb[96].mxu1 %v9030_v43  ;;  %8161 = vmatprep.subr.bf16.mxu1 %v9185_v41  ;;  %v9093_v41 = vld [vmem:[%s9669_s30 + $0xbc8] ss:$100 sps:$4 sm:$0xff]  }
  0xfd   : > { %5078 = vmatprep.mubr.bf16.mxu1 %v9034_v45 }
 0x102   : > { %4918 = vmatmul.mubr.bf16.gmra.mrb[100].mxu0 %v9033_v46 }
 0x103   : > { %4925 = vmatprep.mubr.bf16.mxu0 %v9037_v47  ;;  %v10156_v47 = vpop.permute.xlu1 %1233 }
 0x104   : > { %5079 = vmatmul.mubr.bf16.gmra.mrb[100].mxu1 %v9036_v50  ;;  %v9065_v50 = vld [vmem:[%s9669_s30 + $0xa38] ss:$100 sps:$4 sm:$0xff]  }
 0x105   : > { %5086 = vmatprep.mubr.bf16.mxu1 %v9040_v51 }
 0x10a   : > { %4926 = vmatmul.mubr.bf16.gmra.mrb[104].mxu0 %v9039_v53 }
 0x10b   : > { %4933 = vmatprep.mubr.bf16.mxu0 %v9043_v54  ;;  %v9076_v54 = vld [vmem:[%s9669_s30 + $0xb04] ss:$100 sps:$4 sm:$0xff]  }
 0x10c   : > { %5087 = vmatmul.mubr.bf16.gmra.mrb[104].mxu1 %v9042_v56 }
 0x10d   : > { %v7393_v61 = vpop.f32.mrb[0].mxu0  ;;  %5094 = vmatprep.mubr.bf16.mxu1 %v9046_v58 }
 0x10e   : > { %v7394_v63 = vpop.f32.mrb[1].mxu0  ;;  %v7505_v3 = vpop.f32.mrb[0].mxu1 }
 0x10f   : > { %v7395_v0 = vadd.f32 %v7394_v63, %v7393_v61  ;;  %v7396_v1 = vpop.f32.mrb[2].mxu0  ;;  %v7506_v6 = vpop.f32.mrb[1].mxu1  ;;  %v9070_v63 = vld [vmem:[%s9669_s30 + $0xa40] ss:$100 sps:$4 sm:$0xff]  }
 0x110   : > { %v7397_v4 = vpop.f32.mrb[3].mxu0  ;;  %v7507_v10 = vadd.f32 %v7506_v6, %v7505_v3  ;;  %v7508_v11 = vpop.f32.mrb[2].mxu1 }
 0x111   : > { %v4526_v5 = vadd.f32 %v7395_v0, %v1109_v35  ;;  %v7398_v7 = vadd.f32 %v7397_v4, %v7396_v1  ;;  %v7509_v14 = vpop.f32.mrb[3].mxu1  ;;  %v1149_v0 = vpop.permute.xlu0 %1148  ;;  %v9081_v4 = vld [vmem:[%s9669_s30 + $0xb0c] ss:$100 sps:$4 sm:$0xff]  }
 0x112   : > { %4934 = vmatmul.mubr.bf16.gmra.mrb[108].mxu0 %v9045_v60  ;;  %v7510_v16 = vadd.f32 %v7509_v14, %v7508_v11 }
 0x113   : > { %v4529_v13 = vadd.f32 %v7398_v7, %v1114_v39  ;;  %4941 = vmatprep.mubr.bf16.mxu0 %v9049_v62  ;;  %v10133_v15 = vadd.f32 %v7507_v10, %v4526_v5  ;;  %v1154_v7 = vpop.permute.xlu1 %1153 }
 0x114   : > { %5095 = vmatmul.mubr.bf16.gmra.mrb[108].mxu1 %v9048_v8 }
 0x115   : > { %v7399_v18 = vpop.f32.mrb[4].mxu0  ;;  %v10139_v21 = vadd.f32 %v7510_v16, %v4529_v13  ;;  %5102 = vmatprep.mubr.bf16.mxu1 %v9053_v12  ;;  %v9079_v13 = vld [vmem:[%s9669_s30 + $0xb00] ss:$100 sps:$4 sm:$0xff]  }
 0x116   : > { %v7400_v22 = vpop.f32.mrb[5].mxu0  ;;  %v7511_v26 = vpop.f32.mrb[4].mxu1 }
 0x117   : > { %v7402_v23 = vpop.f32.mrb[6].mxu0  ;;  %v7401_v24 = vadd.f32 %v7400_v22, %v7399_v18  ;;  %v7512_v29 = vpop.f32.mrb[5].mxu1 }
 0x118   : > { %v7403_v27 = vpop.f32.mrb[7].mxu0  ;;  %v7513_v34 = vadd.f32 %v7512_v29, %v7511_v26  ;;  %v7514_v35 = vpop.f32.mrb[6].mxu1  ;;  %v9084_v26 = vld [vmem:[%s9669_s30 + $0xb08] ss:$100 sps:$4 sm:$0xff]  }
 0x119   : > { %v4534_v28 = vadd.f32 %v7401_v24, %v1119_v48  ;;  %v7404_v30 = vadd.f32 %v7403_v27, %v7402_v23  ;;  %v7515_v39 = vpop.f32.mrb[7].mxu1  ;;  %v10172_v18 = vpop.permute.xlu0 %1238 }
 0x11a   : > { %4942 = vmatmul.mubr.bf16.gmra.mrb[112].mxu0 %v9051_v17  ;;  %v7516_v45 = vadd.f32 %v7515_v39, %v7514_v35  ;;  %v9090_v17 = vld [vmem:[%s9669_s30 + $0xbcc] ss:$100 sps:$4 sm:$0xff]   ;;  %v10176_v27 = vpop.permute.xlu1 %1243 }
 0x11b   : > { %v4537_v38 = vadd.f32 %v7404_v30, %v10109_v49  ;;  %4949 = vmatprep.mubr.bf16.mxu0 %v9062_v19  ;;  %v10154_v43 = vadd.f32 %v7513_v34, %v4534_v28  ;;  %v9095_v30 = vld [vmem:[%s9669_s30 + $0xbd4] ss:$100 sps:$4 sm:$0xff]  }
 0x11c   : > { %5103 = vmatmul.mubr.bf16.gmra.mrb[112].mxu1 %v9056_v31 }
 0x11d   : > { %v7405_v46 = vpop.f32.mrb[8].mxu0  ;;  %v10158_v48 = vadd.f32 %v7516_v45, %v4537_v38  ;;  %5110 = vmatprep.mubr.bf16.mxu1 %v9067_v36  ;;  %v1159_v36 = vpop.permute.xlu0 %1158 }
 0x11e   : > { %v7406_v49 = vpop.f32.mrb[9].mxu0  ;;  %v7517_v56 = vpop.f32.mrb[8].mxu1 }
 0x11f   : > { %v7408_v51 = vpop.f32.mrb[10].mxu0  ;;  %v7407_v53 = vadd.f32 %v7406_v49, %v7405_v46  ;;  %v7518_v61 = vpop.f32.mrb[9].mxu1  ;;  %v9106_v49 = vld [vmem:[%s9669_s30 + $0x24] ss:$100 sps:$4 sm:$0xff]  }
 0x120   : > { %v7409_v58 = vpop.f32.mrb[11].mxu0  ;;  %v7519_v1 = vadd.f32 %v7518_v61, %v7517_v56  ;;  %v7520_v3 = vpop.f32.mrb[10].mxu1 }
 0x121   : > { %v4542_v60 = vadd.f32 %v7407_v53, %v10120_v57  ;;  %v7410_v62 = vadd.f32 %v7409_v58, %v7408_v51  ;;  %v7521_v6 = vpop.f32.mrb[11].mxu1  ;;  %v9098_v58 = vld [vmem:[%s9669_s30 + $0xbd0] ss:$100 sps:$4 sm:$0xff]  }
 0x122   : > { %4950 = vmatmul.mubr.bf16.gmra.mrb[116].mxu0 %v9065_v50  ;;  %v7522_v10 = vadd.f32 %v7521_v6, %v7520_v3  ;;  %v1164_v50 = vpop.permute.xlu1 %1163  ;;  %v10188_v3 = vpop.permute.xlu0 %1248  ;;  %v9104_v6 = vld [vmem:[%s9669_s30 + $0x20] ss:$100 sps:$4 sm:$0xff]  }
 0x123   : > { %v4545_v5 = vadd.f32 %v7410_v62, %v10123_v59  ;;  %4957 = vmatprep.mubr.bf16.mxu0 %v9076_v54  ;;  %v10166_v8 = vadd.f32 %v7519_v1, %v4542_v60  ;;  %v9110_v62 = vld [vmem:[%s9669_s30 + $0x2c] ss:$100 sps:$4 sm:$0xff]  }
 0x124   : > { %5111 = vmatmul.mubr.bf16.gmra.mrb[116].mxu1 %v9070_v63 }
 0x125   : > { %v7411_v57 = vpop.f32.mrb[12].mxu0  ;;  %v10168_v11 = vadd.f32 %v7522_v10, %v4545_v5  ;;  %5118 = vmatprep.mubr.bf16.mxu1 %v9081_v4 }
 0x126   : > { %v7412_v12 = vpop.f32.mrb[13].mxu0  ;;  %v7523_v59 = vpop.f32.mrb[12].mxu1 }
 0x127   : > { %v7414_v14 = vpop.f32.mrb[14].mxu0  ;;  %v7413_v16 = vadd.f32 %v7412_v12, %v7411_v57  ;;  %v7524_v23 = vpop.f32.mrb[13].mxu1  ;;  %v9111_v57 = vld [vmem:[%s9669_s30 + $0xec] ss:$100 sps:$4 sm:$0xff]  }
 0x128   : > { %v7415_v19 = vpop.f32.mrb[15].mxu0  ;;  %v7525_v28 = vadd.f32 %v7524_v23, %v7523_v59  ;;  %v7526_v29 = vpop.f32.mrb[14].mxu1  ;;  %v9186_v23 = vld [vmem:[%s11397_s0 + $0x380] sm:$0xff]  }
 0x129   : > { %v4550_v22 = vadd.f32 %v7413_v16, %v10137_v20  ;;  %v7416_v24 = vadd.f32 %v7415_v19, %v7414_v14  ;;  %v7527_v33 = vpop.f32.mrb[15].mxu1  ;;  %v10193_v10 = vpop.permute.xlu1 %1253  ;;  %v9108_v16 = vld [vmem:[%s9669_s30 + $0x28] ss:$100 sps:$4 sm:$0xff]  }
 0x12a   : > { %4958 = vmatmul.mubr.bf16.gmra.mrb[120].mxu0 %v9079_v13  ;;  %v7528_v35 = vadd.f32 %v7527_v33, %v7526_v29 }
 0x12b   : > { %v4553_v31 = vadd.f32 %v7416_v24, %v10141_v25  ;;  %4965 = vmatprep.mubr.bf16.mxu0 %v9090_v17  ;;  %v10180_v34 = vadd.f32 %v7525_v28, %v4550_v22  ;;  %v9183_v17 = vld [vmem:[%s11397_s0 + $0x300] sm:$0xff]   ;;  %v9114_v22 = vld [vmem:[%s9669_s30 + $0xf4] ss:$100 sps:$4 sm:$0xff]   ;;  %v9187_v24 = vld [vmem:[%s11397_s0 + $0x348] sm:$0xff]  }
 0x12c   : > { %5119 = vmatmul.mubr.bf16.gmra.mrb[120].mxu1 %v9084_v26 }
 0x12d   : > { %v7417_v20 = vpop.f32.mrb[16].mxu0  ;;  %v10182_v38 = vadd.f32 %v7528_v35, %v4553_v31  ;;  %5126 = vmatprep.mubr.bf16.mxu1 %v9095_v30  ;;  %v1169_v30 = vpop.permute.xlu0 %1168  ;;  %v9188_v31 = vld [vmem:[%s11397_s0 + $0x308] sm:$0xff]  }
 0x12e   : > { %v7418_v39 = vpop.f32.mrb[17].mxu0  ;;  %v7529_v25 = vpop.f32.mrb[16].mxu1 }
 0x12f   : > { %v7420_v45 = vpop.f32.mrb[18].mxu0  ;;  %v7419_v46 = vadd.f32 %v7418_v39, %v7417_v20  ;;  %v7530_v54 = vpop.f32.mrb[17].mxu1  ;;  %v9189_v20 = vld [vmem:[%s11397_s0 + $0x3c8] sm:$0xff]  }
 0x130   : > { %v7421_v51 = vpop.f32.mrb[19].mxu0  ;;  %v7531_v60 = vadd.f32 %v7530_v54, %v7529_v25  ;;  %v7532_v61 = vpop.f32.mrb[18].mxu1  ;;  %v9113_v25 = vld [vmem:[%s9669_s30 + $0xe8] ss:$100 sps:$4 sm:$0xff]   ;;  %v9197_v54 = vld [vmem:[%s11397_s0 + $0x310] sm:$0xff]  }
 0x131   : > { %v4558_v53 = vadd.f32 %v7419_v46, %v1149_v0  ;;  %v7422_v56 = vadd.f32 %v7421_v51, %v7420_v45  ;;  %v7533_v1 = vpop.f32.mrb[19].mxu1  ;;  %v9194_v45 = vld [vmem:[%s11397_s0 + $0x350] sm:$0xff]   ;;  %v9192_v51 = vld [vmem:[%s11397_s0 + $0x388] sm:$0xff]  }
 0x132   : > { %4966 = vmatmul.mubr.bf16.gmra.mrb[124].mxu0 %v9093_v41  ;;  %v7534_v5 = vadd.f32 %v7533_v1, %v7532_v61  ;;  %v9116_v1 = vld [vmem:[%s9669_s30 + $0xf0] ss:$100 sps:$4 sm:$0xff]  }
 0x133   : > { %v4561_v63 = vadd.f32 %v7422_v56, %v1154_v7  ;;  %5167 = vmatprep.mubr.bf16.mxu0 %v9106_v49  ;;  %v10190_v4 = vadd.f32 %v7531_v60, %v4558_v53  ;;  %v9117_v53 = vld [vmem:[%s9669_s30 + $0x1b4] ss:$100 sps:$4 sm:$0xff]  }
 0x134   : > { %5127 = vmatmul.mubr.bf16.gmra.mrb[124].mxu1 %v9098_v58  ;;  %v9199_v60 = vld [vmem:[%s11397_s0 + $0x3d0] sm:$0xff]  }
 0x135   : > { %v7423_v0 = vpop.f32.mrb[20].mxu0  ;;  %v10196_v12 = vadd.f32 %v7534_v5, %v4561_v63  ;;  %5328 = vmatprep.mubr.bf16.mxu1 %v9110_v62  ;;  %v10233_v63 = vpop.permute.xlu0 %1258 }
 0x136   : > { %v7424_v13 = vpop.f32.mrb[21].mxu0  ;;  %v7535_v59 = vpop.f32.mrb[20].mxu1 }
 0x137   : > { %v7426_v7 = vpop.f32.mrb[22].mxu0  ;;  %v7425_v14 = vadd.f32 %v7424_v13, %v7423_v0  ;;  %v7536_v28 = vpop.f32.mrb[21].mxu1  ;;  %v9120_v0 = vld [vmem:[%s9669_s30 + $0x1bc] ss:$100 sps:$4 sm:$0xff]  }
 0x138   : > { %v7427_v19 = vpop.f32.mrb[23].mxu0  ;;  %v7537_v33 = vadd.f32 %v7536_v28, %v7535_v59  ;;  %v7538_v35 = vpop.f32.mrb[22].mxu1  ;;  %v9201_v13 = vld [vmem:[%s11397_s0 + $0x358] sm:$0xff]   ;;  %v9208_v28 = vld [vmem:[%s11397_s0 + $0x360] sm:$0xff]  }
 0x139   : > { %v4566_v26 = vadd.f32 %v7425_v14, %v1159_v36  ;;  %v7428_v29 = vadd.f32 %v7427_v19, %v7426_v7  ;;  %v7539_v41 = vpop.f32.mrb[23].mxu1  ;;  %v1174_v36 = vpop.permute.xlu1 %1173  ;;  %v9202_v59 = vld [vmem:[%s11397_s0 + $0x318] sm:$0xff]  }
 0x13a   : > { %5168 = vmatmul.mubr.bf16.vlgmr.msra.gmra.mrb[128].mxu0 %v9104_v6  ;;  %v7540_v49 = vadd.f32 %v7539_v41, %v7538_v35 }
 0x13b   : > { %v4569_v39 = vadd.f32 %v7428_v29, %v1164_v50  ;;  %5175 = vmatprep.mubr.bf16.mxu0 %v9111_v57  ;;  %8050 = vmatpush3.bf16.msra.mxu0 %v9183_v17  ;;  %v10218_v46 = vadd.f32 %v7537_v33, %v4566_v26  ;;  %v9200_v57 = vld [vmem:[%s11397_s0 + $0x390] sm:$0xff]   ;;  %v9206_v33 = vld [vmem:[%s11397_s0 + $0x398] sm:$0xff]  }
 0x13c   : > { %8051 = vmatprep.subr.bf16.mxu0 %v9187_v24  ;;  %5329 = vmatmul.mubr.bf16.vlgmr.msra.gmra.mrb[128].mxu1 %v9108_v16 }
 0x13d   : > { %v7429_v50 = vpop.f32.mrb[24].mxu0  ;;  %v10228_v56 = vadd.f32 %v7540_v49, %v4569_v39  ;;  %5336 = vmatprep.mubr.bf16.mxu1 %v9114_v22  ;;  %8162 = vmatpush3.bf16.msra.mxu1 %v9186_v23  ;;  %v10243_v17 = vpop.permute.xlu1 %1263  ;;  %v9203_v23 = vld [vmem:[%s11397_s0 + $0x3d8] sm:$0xff]   ;;  %v9211_v39 = vld [vmem:[%s11397_s0 + $0x320] sm:$0xff]  }
 0x13e   : > { %v7430_v58 = vpop.f32.mrb[25].mxu0  ;;  %8163 = vmatprep.subr.bf16.mxu1 %v9189_v20  ;;  %v7541_v5 = vpop.f32.mrb[24].mxu1  ;;  %v9123_v20 = vld [vmem:[%s9669_s30 + $0x27c] ss:$100 sps:$4 sm:$0xff]  }
 0x13f   : > { %v7432_v61 = vpop.f32.mrb[26].mxu0  ;;  %v7431_v62 = vadd.f32 %v7430_v58, %v7429_v50  ;;  %8052 = vmatpush3.bf16.msra.mxu0 %v9188_v31  ;;  %v7542_v14 = vpop.f32.mrb[25].mxu1  ;;  %v9119_v31 = vld [vmem:[%s9669_s30 + $0x1b0] ss:$100 sps:$4 sm:$0xff]   ;;  %v9213_v49 = vld [vmem:[%s11397_s0 + $0x3e0] sm:$0xff]  }
 0x140   : > { %v7433_v6 = vpop.f32.mrb[27].mxu0  ;;  %8053 = vmatprep.subr.bf16.mxu0 %v9194_v45  ;;  %v7543_v19 = vadd.f32 %v7542_v14, %v7541_v5  ;;  %v7544_v22 = vpop.f32.mrb[26].mxu1 }
 0x141   : > { %v4574_v7 = vadd.f32 %v7431_v62, %v1169_v30  ;;  %v7434_v16 = vadd.f32 %v7433_v6, %v7432_v61  ;;  %8164 = vmatpush3.bf16.msra.mxu1 %v9192_v51  ;;  %v7545_v26 = vpop.f32.mrb[27].mxu1  ;;  %v1179_v45 = vpop.permute.xlu0 %1178  ;;  %v9214_v61 = vld [vmem:[%s11397_s0 + $0x3a0] sm:$0xff]   ;;  %v9215_v62 = vld [vmem:[%s11397_s0 + $0x368] sm:$0xff]  }
 0x142   : > { %5176 = vmatmul.mubr.bf16.gmra.mrb[132].mxu0 %v9113_v25  ;;  %v7546_v30 = vadd.f32 %v7545_v26, %v7544_v22  ;;  %8165 = vmatprep.subr.bf16.mxu1 %v9199_v60  ;;  %v1184_v50 = vpop.permute.xlu1 %1183  ;;  %v9126_v60 = vld [vmem:[%s9669_s30 + $0x284] ss:$100 sps:$4 sm:$0xff]  }
 0x143   : > { %v4577_v24 = vadd.f32 %v7434_v16, %v1174_v36  ;;  %5183 = vmatprep.mubr.bf16.mxu0 %v9117_v53  ;;  %8054 = vmatpush3.bf16.msra.mxu0 %v9197_v54  ;;  %v10254_v29 = vadd.f32 %v7543_v19, %v4574_v7  ;;  %v9122_v53 = vld [vmem:[%s9669_s30 + $0x1b8] ss:$100 sps:$4 sm:$0xff]   ;;  %v9217_v7 = vld [vmem:[%s11397_s0 + $0x3e8] sm:$0xff]  }
 0x144   : > { %8055 = vmatprep.subr.bf16.mxu0 %v9201_v13  ;;  %5337 = vmatmul.mubr.bf16.gmra.mrb[132].mxu1 %v9116_v1 }
 0x145   : > { %v7435_v35 = vpop.f32.mrb[28].mxu0  ;;  %v10264_v41 = vadd.f32 %v7546_v30, %v4577_v24  ;;  %5344 = vmatprep.mubr.bf16.mxu1 %v9120_v0  ;;  %8166 = vmatpush3.bf16.msra.mxu1 %v9200_v57  ;;  %v9216_v0 = vld [vmem:[%s11397_s0 + $0x328] sm:$0xff]   ;;  %v9225_v30 = vld [vmem:[%s11397_s0 + $0x330] sm:$0xff]  }
 0x146   : > { %v7436_v36 = vpop.f32.mrb[29].mxu0  ;;  %8167 = vmatprep.subr.bf16.mxu1 %v9203_v23  ;;  %v7547_v54 = vpop.f32.mrb[28].mxu1  ;;  %v9125_v23 = vld [vmem:[%s9669_s30 + $0x278] ss:$100 sps:$4 sm:$0xff]   ;;  %v9220_v24 = vld [vmem:[%s11397_s0 + $0x3a8] sm:$0xff]  }
 0x147   : > { %v7438_v25 = vpop.f32.mrb[30].mxu0  ;;  %v7437_v51 = vadd.f32 %v7436_v36, %v7435_v35  ;;  %8056 = vmatpush3.bf16.msra.mxu0 %v9202_v59  ;;  %v7548_v5 = vpop.f32.mrb[29].mxu1  ;;  %v9222_v59 = vld [vmem:[%s11397_s0 + $0x370] sm:$0xff]  }
 0x148   : > { %v7439_v58 = vpop.f32.mrb[31].mxu0  ;;  %8057 = vmatprep.subr.bf16.mxu0 %v9208_v28  ;;  %v7549_v57 = vadd.f32 %v7548_v5, %v7547_v54  ;;  %v7550_v13 = vpop.f32.mrb[30].mxu1  ;;  %v9129_v28 = vld [vmem:[%s9669_s30 + $0x344] ss:$100 sps:$4 sm:$0xff]  }
 0x149   : > { %v4582_v1 = vadd.f32 %v7437_v51, %v1179_v45  ;;  %v7440_v6 = vadd.f32 %v7439_v58, %v7438_v25  ;;  %8168 = vmatpush3.bf16.msra.mxu1 %v9206_v33  ;;  %v7551_v16 = vpop.f32.mrb[31].mxu1  ;;  %v9227_v25 = vld [vmem:[%s11397_s0 + $0x3f0] sm:$0xff]   ;;  %v9229_v51 = vld [vmem:[%s11397_s0 + $0x378] sm:$0xff]  }
 0x14a   : > { %5184 = vmatmul.mubr.bf16.gmra.mrb[136].mxu0 %v9119_v31  ;;  %v7552_v22 = vadd.f32 %v7551_v16, %v7550_v13  ;;  %8169 = vmatprep.subr.bf16.mxu1 %v9213_v49  ;;  %v9132_v49 = vld [vmem:[%s9669_s30 + $0x34c] ss:$100 sps:$4 sm:$0xff]   ;;  %v9235_v13 = vld [vmem:[%s11397_s0 + $0x3b8] sm:$0xff]  }
 0x14b   : > { %v4585_v14 = vadd.f32 %v7440_v6, %v1184_v50  ;;  %5191 = vmatprep.mubr.bf16.mxu0 %v9123_v20  ;;  %8058 = vmatpush3.bf16.msra.mxu0 %v9211_v39  ;;  %v10286_v19 = vadd.f32 %v7549_v57, %v4582_v1  ;;  %v9128_v39 = vld [vmem:[%s9669_s30 + $0x280] ss:$100 sps:$4 sm:$0xff]   ;;  %v9228_v58 = vld [vmem:[%s11397_s0 + $0x3b0] sm:$0xff]  }
 0x14c   : > { %8059 = vmatprep.subr.bf16.mxu0 %v9215_v62  ;;  %5345 = vmatmul.mubr.bf16.gmra.mrb[136].mxu1 %v9122_v53  ;;  %v9230_v62 = vld [vmem:[%s11397_s0 + $0x338] sm:$0xff]   ;;  %v9131_v57 = vld [vmem:[%s9669_s30 + $0x340] ss:$100 sps:$4 sm:$0xff]  }
 0x14d   : > { %v7441_v26 = vpop.f32.mrb[32].mxu0  ;;  %v10296_v31 = vadd.f32 %v7552_v22, %v4585_v14  ;;  %5352 = vmatprep.mubr.bf16.mxu1 %v9126_v60  ;;  %8170 = vmatpush3.bf16.msra.mxu1 %v9214_v61 }
 0x14e   : > { %v7442_v33 = vpop.f32.mrb[33].mxu0  ;;  %8171 = vmatprep.subr.bf16.mxu1 %v9217_v7  ;;  %v7553_v36 = vpop.f32.mrb[32].mxu1  ;;  %v9135_v7 = vld [vmem:[%s9669_s30 + $0x40c] ss:$100 sps:$4 sm:$0xff]  }
 0x14f   : > { %v7443_v35 = vadd.f32 %v7442_v33, %v7441_v26  ;;  %v7444_v20 = vpop.f32.mrb[34].mxu0  ;;  %8060 = vmatpush3.bf16.msra.mxu0 %v9216_v0  ;;  %v7554_v54 = vpop.f32.mrb[33].mxu1  ;;  %v9134_v33 = vld [vmem:[%s9669_s30 + $0x348] ss:$100 sps:$4 sm:$0xff]  }
 0x150   : > { %v7445_v45 = vpop.f32.mrb[35].mxu0  ;;  %8061 = vmatprep.subr.bf16.mxu0 %v9222_v59  ;;  %v7555_v60 = vadd.f32 %v7554_v54, %v7553_v36  ;;  %v7556_v61 = vpop.f32.mrb[34].mxu1 }
 0x151   : > { %v4590_v50 = vadd.f32 %v7443_v35, %v10091_v32  ;;  %v7446_v53 = vadd.f32 %v7445_v45, %v7444_v20  ;;  %8172 = vmatpush3.bf16.msra.mxu1 %v9220_v24  ;;  %v7557_v5 = vpop.f32.mrb[35].mxu1  ;;  %v9231_v32 = vld [vmem:[%s11397_s0 + $0x3f8] sm:$0xff]  }
 0x152   : > { %5192 = vmatmul.mubr.bf16.gmra.mrb[140].mxu0 %v9125_v23  ;;  %v7558_v0 = vadd.f32 %v7557_v5, %v7556_v61  ;;  %8173 = vmatprep.subr.bf16.mxu1 %v9227_v25 }
 0x153   : > { %v4593_v1 = vadd.f32 %v7446_v53, %v10096_v37  ;;  %5199 = vmatprep.mubr.bf16.mxu0 %v9129_v28  ;;  %8062 = vmatpush3.bf16.msra.mxu0 %v9225_v30  ;;  %v10317_v6 = vadd.f32 %v7555_v60, %v4590_v50  ;;  %v9141_v50 = vld [vmem:[%s9669_s30 + $0x4d4] ss:$100 sps:$4 sm:$0xff]  }
 0x154   : > { %8063 = vmatprep.subr.bf16.mxu0 %v9229_v51  ;;  %5353 = vmatmul.mubr.bf16.gmra.mrb[140].mxu1 %v9128_v39  ;;  %v9138_v39 = vld [vmem:[%s9669_s30 + $0x414] ss:$100 sps:$4 sm:$0xff]   ;;  %v9137_v51 = vld [vmem:[%s9669_s30 + $0x408] ss:$100 sps:$4 sm:$0xff]  }
 0x155   : > { %v7447_v37 = vpop.f32.mrb[36].mxu0  ;;  %v10324_v14 = vadd.f32 %v7558_v0, %v4593_v1  ;;  %5360 = vmatprep.mubr.bf16.mxu1 %v9132_v49  ;;  %8174 = vmatpush3.bf16.msra.mxu1 %v9228_v58 }
 0x156   : > { %v7448_v16 = vpop.f32.mrb[37].mxu0  ;;  %8175 = vmatprep.subr.bf16.mxu1 %v9231_v32  ;;  %v7559_v23 = vpop.f32.mrb[36].mxu1  ;;  %v9140_v32 = vld [vmem:[%s9669_s30 + $0x410] ss:$100 sps:$4 sm:$0xff]  }
 0x157   : > { %v7449_v59 = vadd.f32 %v7448_v16, %v7447_v37  ;;  %v7450_v22 = vpop.f32.mrb[38].mxu0  ;;  %8064 = vmatpush3.bf16.msra.mxu0 %v9230_v62  ;;  %v7560_v30 = vpop.f32.mrb[37].mxu1 }
 0x158   : > { %v7451_v24 = vpop.f32.mrb[39].mxu0  ;;  %v7561_v35 = vadd.f32 %v7560_v30, %v7559_v23  ;;  %v7562_v20 = vpop.f32.mrb[38].mxu1 }
 0x159   : > { %v4598_v26 = vadd.f32 %v7449_v59, %v10101_v42  ;;  %v7452_v28 = vadd.f32 %v7451_v24, %v7450_v22  ;;  %8176 = vmatpush3.bf16.msra.mxu1 %v9235_v13  ;;  %v7563_v45 = vpop.f32.mrb[39].mxu1  ;;  %v9144_v13 = vld [vmem:[%s9669_s30 + $0x4dc] ss:$100 sps:$4 sm:$0xff]   ;;  %v9143_v22 = vld [vmem:[%s9669_s30 + $0x4d0] ss:$100 sps:$4 sm:$0xff]  }
 0x15a   : > { %5200 = vmatmul.mubr.bf16.gmra.mrb[144].mxu0 %v9131_v57  ;;  %v7564_v25 = vadd.f32 %v7563_v45, %v7562_v20 }
 0x15b   : > { %v4601_v36 = vadd.f32 %v7452_v28, %v10104_v44  ;;  %5207 = vmatprep.mubr.bf16.mxu0 %v9135_v7  ;;  %v10330_v49 = vadd.f32 %v7561_v35, %v4598_v26 }
 0x15c   : > { %5361 = vmatmul.mubr.bf16.gmra.mrb[144].mxu1 %v9134_v33 }
 0x15d   : > { %v7453_v42 = vpop.f32.mrb[40].mxu0  ;;  %v10334_v53 = vadd.f32 %v7564_v25, %v4601_v36  ;;  %5368 = vmatprep.mubr.bf16.mxu1 %v9138_v39  ;;  %v9146_v36 = vld [vmem:[%s9669_s30 + $0x4d8] ss:$100 sps:$4 sm:$0xff]  }
 0x15e   : > { %v7454_v54 = vpop.f32.mrb[41].mxu0  ;;  %v7565_v61 = vpop.f32.mrb[40].mxu1 }
 0x15f   : > { %v7455_v58 = vadd.f32 %v7454_v54, %v7453_v42  ;;  %v7456_v60 = vpop.f32.mrb[42].mxu0  ;;  %v7566_v5 = vpop.f32.mrb[41].mxu1 }
 0x160   : > { %v7457_v44 = vpop.f32.mrb[43].mxu0  ;;  %v7567_v0 = vadd.f32 %v7566_v5, %v7565_v61  ;;  %v7568_v57 = vpop.f32.mrb[42].mxu1 }
 0x161   : > { %v4606_v62 = vadd.f32 %v7455_v58, %v10113_v52  ;;  %v7458_v1 = vadd.f32 %v7457_v44, %v7456_v60  ;;  %v7569_v7 = vpop.f32.mrb[43].mxu1  ;;  %v9147_v52 = vld [vmem:[%s9669_s30 + $0x59c] ss:$100 sps:$4 sm:$0xff]  }
 0x162   : > { %5208 = vmatmul.mubr.bf16.gmra.mrb[148].mxu0 %v9137_v51  ;;  %v7570_v59 = vadd.f32 %v7569_v7, %v7568_v57  ;;  %v9150_v51 = vld [vmem:[%s9669_s30 + $0x5a4] ss:$100 sps:$4 sm:$0xff]   ;;  %v9149_v60 = vld [vmem:[%s9669_s30 + $0x598] ss:$100 sps:$4 sm:$0xff]  }
 0x163   : > { %v4609_v37 = vadd.f32 %v7458_v1, %v10117_v55  ;;  %5215 = vmatprep.mubr.bf16.mxu0 %v9141_v50  ;;  %v10340_v16 = vadd.f32 %v7567_v0, %v4606_v62 }
 0x164   : > { %5369 = vmatmul.mubr.bf16.gmra.mrb[148].mxu1 %v9140_v32 }
 0x165   : > { %v7459_v23 = vpop.f32.mrb[44].mxu0  ;;  %v10344_v24 = vadd.f32 %v7570_v59, %v4609_v37  ;;  %5376 = vmatprep.mubr.bf16.mxu1 %v9144_v13  ;;  %v9152_v37 = vld [vmem:[%s9669_s30 + $0x5a0] ss:$100 sps:$4 sm:$0xff]  }
 0x166   : > { %v7460_v26 = vpop.f32.mrb[45].mxu0  ;;  %v7571_v33 = vpop.f32.mrb[44].mxu1 }
 0x167   : > { %v7461_v28 = vadd.f32 %v7460_v26, %v7459_v23  ;;  %v7462_v30 = vpop.f32.mrb[46].mxu0  ;;  %v7572_v39 = vpop.f32.mrb[45].mxu1 }
 0x168   : > { %v7463_v55 = vpop.f32.mrb[47].mxu0  ;;  %v7573_v45 = vadd.f32 %v7572_v39, %v7571_v33  ;;  %v7574_v25 = vpop.f32.mrb[46].mxu1 }
 0x169   : > { %v4614_v35 = vadd.f32 %v7461_v28, %v10127_v2  ;;  %v7464_v20 = vadd.f32 %v7463_v55, %v7462_v30  ;;  %v7575_v50 = vpop.f32.mrb[47].mxu1  ;;  %v9153_v2 = vld [vmem:[%s9669_s30 + $0x664] ss:$100 sps:$4 sm:$0xff]  }
 0x16a   : > { %5216 = vmatmul.mubr.bf16.gmra.mrb[152].mxu0 %v9143_v22  ;;  %v7576_v58 = vadd.f32 %v7575_v50, %v7574_v25  ;;  %v9156_v22 = vld [vmem:[%s9669_s30 + $0x66c] ss:$100 sps:$4 sm:$0xff]   ;;  %v9155_v30 = vld [vmem:[%s9669_s30 + $0x660] ss:$100 sps:$4 sm:$0xff]  }
 0x16b   : > { %v4617_v42 = vadd.f32 %v7464_v20, %v10130_v9  ;;  %5223 = vmatprep.mubr.bf16.mxu0 %v9147_v52  ;;  %v10350_v54 = vadd.f32 %v7573_v45, %v4614_v35 }
 0x16c   : > { %5377 = vmatmul.mubr.bf16.gmra.mrb[152].mxu1 %v9146_v36 }
 0x16d   : > { %v7465_v61 = vpop.f32.mrb[48].mxu0  ;;  %v10354_v44 = vadd.f32 %v7576_v58, %v4617_v42  ;;  %5384 = vmatprep.mubr.bf16.mxu1 %v9150_v51  ;;  %v9158_v42 = vld [vmem:[%s9669_s30 + $0x668] ss:$100 sps:$4 sm:$0xff]  }
 0x16e   : > { %v7466_v62 = vpop.f32.mrb[49].mxu0  ;;  %v7577_v32 = vpop.f32.mrb[48].mxu1 }
 0x16f   : > { %v7467_v1 = vadd.f32 %v7466_v62, %v7465_v61  ;;  %v7468_v5 = vpop.f32.mrb[50].mxu0  ;;  %v7578_v13 = vpop.f32.mrb[49].mxu1 }
 0x170   : > { %v7469_v9 = vpop.f32.mrb[51].mxu0  ;;  %v7579_v7 = vadd.f32 %v7578_v13, %v7577_v32  ;;  %v7580_v59 = vpop.f32.mrb[50].mxu1 }
 0x171   : > { %v4622_v0 = vadd.f32 %v7467_v1, %v10149_v40  ;;  %v7470_v57 = vadd.f32 %v7469_v9, %v7468_v5  ;;  %v7581_v52 = vpop.f32.mrb[51].mxu1  ;;  %v9159_v40 = vld [vmem:[%s9669_s30 + $0x72c] ss:$100 sps:$4 sm:$0xff]  }
 0x172   : > { %5224 = vmatmul.mubr.bf16.gmra.mrb[156].mxu0 %v9149_v60  ;;  %v7582_v28 = vadd.f32 %v7581_v52, %v7580_v59  ;;  %v9162_v60 = vld [vmem:[%s9669_s30 + $0x734] ss:$100 sps:$4 sm:$0xff]   ;;  %v9161_v5 = vld [vmem:[%s9669_s30 + $0x728] ss:$100 sps:$4 sm:$0xff]  }
 0x173   : > { %v4625_v23 = vadd.f32 %v7470_v57, %v10156_v47  ;;  %5231 = vmatprep.mubr.bf16.mxu0 %v9153_v2  ;;  %v10360_v26 = vadd.f32 %v7579_v7, %v4622_v0 }
 0x174   : > { %5385 = vmatmul.mubr.bf16.gmra.mrb[156].mxu1 %v9152_v37 }
 0x175   : > { %v7471_v33 = vpop.f32.mrb[52].mxu0  ;;  %v10364_v55 = vadd.f32 %v7582_v28, %v4625_v23  ;;  %5392 = vmatprep.mubr.bf16.mxu1 %v9156_v22  ;;  %v9164_v23 = vld [vmem:[%s9669_s30 + $0x730] ss:$100 sps:$4 sm:$0xff]  }
 0x176   : > { %v7472_v35 = vpop.f32.mrb[53].mxu0  ;;  %v7583_v36 = vpop.f32.mrb[52].mxu1 }
 0x177   : > { %v7473_v20 = vadd.f32 %v7472_v35, %v7471_v33  ;;  %v7474_v39 = vpop.f32.mrb[54].mxu0  ;;  %v7584_v51 = vpop.f32.mrb[53].mxu1 }
 0x178   : > { %v7475_v47 = vpop.f32.mrb[55].mxu0  ;;  %v7585_v50 = vadd.f32 %v7584_v51, %v7583_v36  ;;  %v7586_v58 = vpop.f32.mrb[54].mxu1 }
 0x179   : > { %v4630_v45 = vadd.f32 %v7473_v20, %v10172_v18  ;;  %v7476_v25 = vadd.f32 %v7475_v47, %v7474_v39  ;;  %v7587_v2 = vpop.f32.mrb[55].mxu1  ;;  %v9165_v18 = vld [vmem:[%s9669_s30 + $0x7f4] ss:$100 sps:$4 sm:$0xff]  }
 0x17a   : > { %5232 = vmatmul.mubr.bf16.gmra.mrb[160].mxu0 %v9155_v30  ;;  %v7588_v1 = vadd.f32 %v7587_v2, %v7586_v58  ;;  %v9168_v30 = vld [vmem:[%s9669_s30 + $0x7fc] ss:$100 sps:$4 sm:$0xff]   ;;  %v9167_v39 = vld [vmem:[%s9669_s30 + $0x7f0] ss:$100 sps:$4 sm:$0xff]  }
 0x17b   : > { %v4633_v61 = vadd.f32 %v7476_v25, %v10176_v27  ;;  %5239 = vmatprep.mubr.bf16.mxu0 %v9159_v40  ;;  %v10370_v62 = vadd.f32 %v7585_v50, %v4630_v45 }
 0x17c   : > { %5393 = vmatmul.mubr.bf16.gmra.mrb[160].mxu1 %v9158_v42 }
 0x17d   : > { %v7477_v32 = vpop.f32.mrb[56].mxu0  ;;  %v10374_v9 = vadd.f32 %v7588_v1, %v4633_v61  ;;  %5400 = vmatprep.mubr.bf16.mxu1 %v9162_v60  ;;  %v9170_v61 = vld [vmem:[%s9669_s30 + $0x7f8] ss:$100 sps:$4 sm:$0xff]  }
 0x17e   : > { %v7478_v0 = vpop.f32.mrb[57].mxu0  ;;  %v7589_v37 = vpop.f32.mrb[56].mxu1 }
 0x17f   : > { %v7479_v57 = vadd.f32 %v7478_v0, %v7477_v32  ;;  %v7480_v13 = vpop.f32.mrb[58].mxu0  ;;  %v7590_v22 = vpop.f32.mrb[57].mxu1 }
 0x180   : > { %v7481_v27 = vpop.f32.mrb[59].mxu0  ;;  %v7591_v52 = vadd.f32 %v7590_v22, %v7589_v37  ;;  %v7592_v28 = vpop.f32.mrb[58].mxu1 }
 0x181   : > { %v4638_v7 = vadd.f32 %v7479_v57, %v10188_v3  ;;  %v7482_v59 = vadd.f32 %v7481_v27, %v7480_v13  ;;  %v7593_v40 = vpop.f32.mrb[59].mxu1  ;;  %v9171_v3 = vld [vmem:[%s9669_s30 + $0x8bc] ss:$100 sps:$4 sm:$0xff]  }
 0x182   : > { %5240 = vmatmul.mubr.bf16.gmra.mrb[164].mxu0 %v9161_v5  ;;  %v7594_v20 = vadd.f32 %v7593_v40, %v7592_v28  ;;  %v9174_v5 = vld [vmem:[%s9669_s30 + $0x8c4] ss:$100 sps:$4 sm:$0xff]   ;;  %v9173_v13 = vld [vmem:[%s9669_s30 + $0x8b8] ss:$100 sps:$4 sm:$0xff]  }
 0x183   : > { %v4641_v33 = vadd.f32 %v7482_v59, %v10193_v10  ;;  %5247 = vmatprep.mubr.bf16.mxu0 %v9165_v18  ;;  %v10380_v35 = vadd.f32 %v7591_v52, %v4638_v7 }
 0x184   : > { %5401 = vmatmul.mubr.bf16.gmra.mrb[164].mxu1 %v9164_v23 }
 0x185   : > { %v7483_v36 = vpop.f32.mrb[60].mxu0  ;;  %v10384_v47 = vadd.f32 %v7594_v20, %v4641_v33  ;;  %5408 = vmatprep.mubr.bf16.mxu1 %v9168_v30  ;;  %v9176_v33 = vld [vmem:[%s9669_s30 + $0x8c0] ss:$100 sps:$4 sm:$0xff]  }
 0x186   : > { %v7484_v45 = vpop.f32.mrb[61].mxu0  ;;  %v7595_v42 = vpop.f32.mrb[60].mxu1 }
 0x187   : > { %v7485_v25 = vadd.f32 %v7484_v45, %v7483_v36  ;;  %v7486_v51 = vpop.f32.mrb[62].mxu0  ;;  %v7596_v60 = vpop.f32.mrb[61].mxu1 }
 0x188   : > { %v7487_v10 = vpop.f32.mrb[63].mxu0  ;;  %v7597_v2 = vadd.f32 %v7596_v60, %v7595_v42  ;;  %v7598_v1 = vpop.f32.mrb[62].mxu1 }
 0x189   : > { %v4646_v50 = vadd.f32 %v7485_v25, %v10233_v63  ;;  %v7488_v58 = vadd.f32 %v7487_v10, %v7486_v51  ;;  %v7599_v18 = vpop.f32.mrb[63].mxu1  ;;  %v9177_v63 = vld [vmem:[%s9669_s30 + $0x984] ss:$100 sps:$4 sm:$0xff]  }
 0x18a   : > { %5248 = vmatmul.mubr.bf16.gmra.mrb[168].mxu0 %v9167_v39  ;;  %v7600_v57 = vadd.f32 %v7599_v18, %v7598_v1  ;;  %v9181_v39 = vld [vmem:[%s9669_s30 + $0x98c] ss:$100 sps:$4 sm:$0xff]   ;;  %v9179_v51 = vld [vmem:[%s9669_s30 + $0x980] ss:$100 sps:$4 sm:$0xff]  }
 0x18b   : > { %v4649_v32 = vadd.f32 %v7488_v58, %v10243_v17  ;;  %5255 = vmatprep.mubr.bf16.mxu0 %v9171_v3  ;;  %v10390_v0 = vadd.f32 %v7597_v2, %v4646_v50  ;;  %v9308_v18 = vld [vmem:[%s11397_s0 + $0x440] sm:$0xff]  }
 0x18c   : > { %5409 = vmatmul.mubr.bf16.gmra.mrb[168].mxu1 %v9170_v61  ;;  %8273 = vmatprep.subr.bf16.mxu0 %v9308_v18  ;;  %v9218_v18 = vld [vmem:[%s9669_s30 + $0xbdc] ss:$100 sps:$4 sm:$0xff]  }
 0x18d   : > { %v7617_v37 = vpop.f32.mrb[64].mxu0  ;;  %v10394_v27 = vadd.f32 %v7600_v57, %v4649_v32  ;;  %5416 = vmatprep.mubr.bf16.mxu1 %v9174_v5  ;;  %v9184_v32 = vld [vmem:[%s9669_s30 + $0x988] ss:$100 sps:$4 sm:$0xff]  }
 0x18e   : > { %v7618_v7 = vpop.f32.mrb[65].mxu0 }
 0x18f   : > { %v7619_v59 = vadd.f32 %v7618_v7, %v7617_v37  ;;  %v7620_v22 = vpop.f32.mrb[66].mxu0  ;;  %v7729_v23 = vpop.f32.mrb[64].mxu1  ;;  %v9195_v37 = vld [vmem:[%s9669_s30 + $0xa54] ss:$100 sps:$4 sm:$0xff]  }
 0x190   : > { %v7621_v17 = vpop.f32.mrb[67].mxu0  ;;  %v7730_v30 = vpop.f32.mrb[65].mxu1 }
 0x191   : > { %v4848_v52 = vadd.f32 %v7619_v59, %v10133_v15  ;;  %v7622_v28 = vadd.f32 %v7621_v17, %v7620_v22  ;;  %v7731_v40 = vadd.f32 %v7730_v30, %v7729_v23  ;;  %v7732_v20 = vpop.f32.mrb[66].mxu1  ;;  %v9190_v15 = vld [vmem:[%s9669_s30 + $0xa4c] ss:$100 sps:$4 sm:$0xff]  }
 0x192   : > { %5256 = vmatmul.mubr.bf16.gmra.mrb[172].mxu0 %v9173_v13  ;;  %v7733_v3 = vpop.f32.mrb[67].mxu1 }
 0x193   : > { %v4851_v36 = vadd.f32 %v7622_v28, %v10139_v21  ;;  %5263 = vmatprep.mubr.bf16.mxu0 %v9177_v63  ;;  %v10400_v45 = vadd.f32 %v7731_v40, %v4848_v52  ;;  %v7734_v25 = vadd.f32 %v7733_v3, %v7732_v20 }
 0x194   : > { %5417 = vmatmul.mubr.bf16.gmra.mrb[172].mxu1 %v9176_v33  ;;  %v9204_v33 = vld [vmem:[%s9669_s30 + $0xb14] ss:$100 sps:$4 sm:$0xff]  }
 0x195   : > { %v7623_v42 = vpop.f32.mrb[68].mxu0  ;;  %v10404_v10 = vadd.f32 %v7734_v25, %v4851_v36  ;;  %5424 = vmatprep.mubr.bf16.mxu1 %v9181_v39  ;;  %v9198_v25 = vld [vmem:[%s9669_s30 + $0xa50] ss:$100 sps:$4 sm:$0xff]  }
 0x196   : > { %v7624_v50 = vpop.f32.mrb[69].mxu0 }
 0x197   : > { %v7625_v58 = vadd.f32 %v7624_v50, %v7623_v42  ;;  %v7626_v60 = vpop.f32.mrb[70].mxu0  ;;  %v7735_v61 = vpop.f32.mrb[68].mxu1 }
 0x198   : > { %v7627_v2 = vpop.f32.mrb[71].mxu0  ;;  %v7736_v5 = vpop.f32.mrb[69].mxu1 }
 0x199   : > { %v4856_v21 = vadd.f32 %v7625_v58, %v10154_v43  ;;  %v7628_v1 = vadd.f32 %v7627_v2, %v7626_v60  ;;  %v7737_v57 = vadd.f32 %v7736_v5, %v7735_v61  ;;  %v7738_v13 = vpop.f32.mrb[70].mxu1  ;;  %v9313_v43 = vld [vmem:[%s11397_s0 + $0x4c0] sm:$0xff]  }
 0x19a   : > { %5264 = vmatmul.mubr.bf16.gmra.mrb[176].mxu0 %v9179_v51  ;;  %v7739_v7 = vpop.f32.mrb[71].mxu1  ;;  %8385 = vmatprep.subr.bf16.mxu1 %v9313_v43 }
 0x19b   : > { %v4859_v63 = vadd.f32 %v7628_v1, %v10158_v48  ;;  %5271 = vmatprep.mubr.bf16.mxu0 %v9190_v15  ;;  %v10416_v59 = vadd.f32 %v7737_v57, %v4856_v21  ;;  %v7740_v22 = vadd.f32 %v7739_v7, %v7738_v13  ;;  %v9193_v48 = vld [vmem:[%s9669_s30 + $0xa48] ss:$100 sps:$4 sm:$0xff]   ;;  %v9209_v15 = vld [vmem:[%s9669_s30 + $0xb1c] ss:$100 sps:$4 sm:$0xff]   ;;  %v9207_v1 = vld [vmem:[%s9669_s30 + $0xb10] ss:$100 sps:$4 sm:$0xff]  }
 0x19c   : > { %5425 = vmatmul.mubr.bf16.gmra.mrb[176].mxu1 %v9184_v32  ;;  %v9212_v7 = vld [vmem:[%s9669_s30 + $0xb18] ss:$100 sps:$4 sm:$0xff]  }
 0x19d   : > { %v7629_v23 = vpop.f32.mrb[72].mxu0  ;;  %v10418_v17 = vadd.f32 %v7740_v22, %v4859_v63  ;;  %5432 = vmatprep.mubr.bf16.mxu1 %v9195_v37 }
 0x19e   : > { %v7630_v52 = vpop.f32.mrb[73].mxu0 }
 0x19f   : > { %v7631_v28 = vadd.f32 %v7630_v52, %v7629_v23  ;;  %v7632_v30 = vpop.f32.mrb[74].mxu0  ;;  %v7741_v40 = vpop.f32.mrb[72].mxu1  ;;  %v9223_v23 = vld [vmem:[%s9669_s30 + $0xbe4] ss:$100 sps:$4 sm:$0xff]  }
 0x1a0   : > { %v7633_v20 = vpop.f32.mrb[75].mxu0  ;;  %v7742_v3 = vpop.f32.mrb[73].mxu1 }
 0x1a1   : > { %v4864_v39 = vadd.f32 %v7631_v28, %v10166_v8  ;;  %v7634_v36 = vadd.f32 %v7633_v20, %v7632_v30  ;;  %v7743_v51 = vadd.f32 %v7742_v3, %v7741_v40  ;;  %v7744_v42 = vpop.f32.mrb[74].mxu1 }
 0x1a2   : > { %5272 = vmatmul.mubr.bf16.gmra.mrb[180].mxu0 %v9193_v48  ;;  %v7745_v58 = vpop.f32.mrb[75].mxu1 }
 0x1a3   : > { %v4867_v50 = vadd.f32 %v7634_v36, %v10168_v11  ;;  %5279 = vmatprep.mubr.bf16.mxu0 %v9204_v33  ;;  %v10426_v60 = vadd.f32 %v7743_v51, %v4864_v39  ;;  %v7746_v61 = vadd.f32 %v7745_v58, %v7744_v42  ;;  %v9221_v33 = vld [vmem:[%s9669_s30 + $0xbd8] ss:$100 sps:$4 sm:$0xff]  }
 0x1a4   : > { %5433 = vmatmul.mubr.bf16.gmra.mrb[180].mxu1 %v9198_v25 }
 0x1a5   : > { %v7635_v2 = vpop.f32.mrb[76].mxu0  ;;  %v10428_v8 = vadd.f32 %v7746_v61, %v4867_v50  ;;  %5440 = vmatprep.mubr.bf16.mxu1 %v9209_v15  ;;  %v9226_v50 = vld [vmem:[%s9669_s30 + $0xbe0] ss:$100 sps:$4 sm:$0xff]  }
 0x1a6   : > { %v7636_v21 = vpop.f32.mrb[77].mxu0 }
 0x1a7   : > { %v7637_v5 = vadd.f32 %v7636_v21, %v7635_v2  ;;  %v7638_v32 = vpop.f32.mrb[78].mxu0  ;;  %v7747_v57 = vpop.f32.mrb[76].mxu1  ;;  %v9238_v2 = vld [vmem:[%s9669_s30 + $0x3c] ss:$100 sps:$4 sm:$0xff]  }
 0x1a8   : > { %v7639_v11 = vpop.f32.mrb[79].mxu0  ;;  %v7748_v63 = vpop.f32.mrb[77].mxu1 }
 0x1a9   : > { %v4872_v13 = vadd.f32 %v7637_v5, %v10180_v34  ;;  %v7640_v37 = vadd.f32 %v7639_v11, %v7638_v32  ;;  %v7749_v43 = vadd.f32 %v7748_v63, %v7747_v57  ;;  %v7750_v22 = vpop.f32.mrb[78].mxu1  ;;  %v9234_v34 = vld [vmem:[%s9669_s30 + $0x34] ss:$100 sps:$4 sm:$0xff]   ;;  %v9239_v57 = vld [vmem:[%s9669_s30 + $0xfc] ss:$100 sps:$4 sm:$0xff]  }
 0x1aa   : > { %5280 = vmatmul.mubr.bf16.gmra.mrb[184].mxu0 %v9207_v1  ;;  %v7751_v48 = vpop.f32.mrb[79].mxu1 }
 0x1ab   : > { %v4875_v52 = vadd.f32 %v7640_v37, %v10182_v38  ;;  %5287 = vmatprep.mubr.bf16.mxu0 %v9218_v18  ;;  %v10436_v28 = vadd.f32 %v7749_v43, %v4872_v13  ;;  %v7752_v30 = vadd.f32 %v7751_v48, %v7750_v22  ;;  %v9232_v18 = vld [vmem:[%s9669_s30 + $0x30] ss:$100 sps:$4 sm:$0xff]   ;;  %v9236_v22 = vld [vmem:[%s9669_s30 + $0x38] ss:$100 sps:$4 sm:$0xff]  }
 0x1ac   : > { %5441 = vmatmul.mubr.bf16.gmra.mrb[184].mxu1 %v9212_v7 }
 0x1ad   : > { %v7641_v40 = vpop.f32.mrb[80].mxu0  ;;  %v10440_v20 = vadd.f32 %v7752_v30, %v4875_v52  ;;  %5448 = vmatprep.mubr.bf16.mxu1 %v9223_v23  ;;  %v9315_v23 = vld [vmem:[%s11397_s0 + $0x448] sm:$0xff]  }
 0x1ae   : > { %v7642_v39 = vpop.f32.mrb[81].mxu0 }
 0x1af   : > { %v7643_v36 = vadd.f32 %v7642_v39, %v7641_v40  ;;  %v7644_v3 = vpop.f32.mrb[82].mxu0  ;;  %v7753_v25 = vpop.f32.mrb[80].mxu1  ;;  %v9314_v39 = vld [vmem:[%s11397_s0 + $0x480] sm:$0xff]  }
 0x1b0   : > { %v7645_v38 = vpop.f32.mrb[83].mxu0  ;;  %v7754_v15 = vpop.f32.mrb[81].mxu1 }
 0x1b1   : > { %v4880_v51 = vadd.f32 %v7643_v36, %v10190_v4  ;;  %v7646_v42 = vadd.f32 %v7645_v38, %v7644_v3  ;;  %v7755_v58 = vadd.f32 %v7754_v15, %v7753_v25  ;;  %v7756_v61 = vpop.f32.mrb[82].mxu1  ;;  %v9316_v36 = vld [vmem:[%s11397_s0 + $0x408] sm:$0xff]   ;;  %v9322_v38 = vld [vmem:[%s11397_s0 + $0x450] sm:$0xff]   ;;  %v9241_v15 = vld [vmem:[%s9669_s30 + $0xf8] ss:$100 sps:$4 sm:$0xff]  }
 0x1b2   : > { %5288 = vmatmul.mubr.bf16.gmra.mrb[188].mxu0 %v9221_v33  ;;  %v7757_v1 = vpop.f32.mrb[83].mxu1  ;;  %v9242_v33 = vld [vmem:[%s9669_s30 + $0x104] ss:$100 sps:$4 sm:$0xff]  }
 0x1b3   : > { %v4883_v21 = vadd.f32 %v7646_v42, %v10196_v12  ;;  %5489 = vmatprep.mubr.bf16.mxu0 %v9234_v34  ;;  %v10446_v5 = vadd.f32 %v7755_v58, %v4880_v51  ;;  %v7758_v32 = vadd.f32 %v7757_v1, %v7756_v61  ;;  %v9311_v12 = vld [vmem:[%s11397_s0 + $0x400] sm:$0xff]  }
 0x1b4   : > { %5449 = vmatmul.mubr.bf16.gmra.mrb[188].mxu1 %v9226_v50  ;;  %v9245_v58 = vld [vmem:[%s9669_s30 + $0x1c4] ss:$100 sps:$4 sm:$0xff]  }
 0x1b5   : > { %v7647_v4 = vpop.f32.mrb[84].mxu0  ;;  %v10450_v11 = vadd.f32 %v7758_v32, %v4883_v21  ;;  %5650 = vmatprep.mubr.bf16.mxu1 %v9238_v2  ;;  %v9320_v2 = vld [vmem:[%s11397_s0 + $0x488] sm:$0xff]   ;;  %v9325_v32 = vld [vmem:[%s11397_s0 + $0x410] sm:$0xff]  }
 0x1b6   : > { %v7648_v13 = vpop.f32.mrb[85].mxu0 }
 0x1b7   : > { %v7649_v37 = vadd.f32 %v7648_v13, %v7647_v4  ;;  %v7650_v63 = vpop.f32.mrb[86].mxu0  ;;  %v7759_v7 = vpop.f32.mrb[84].mxu1  ;;  %v9329_v13 = vld [vmem:[%s11397_s0 + $0x458] sm:$0xff]  }
 0x1b8   : > { %v7651_v43 = vpop.f32.mrb[87].mxu0  ;;  %v7760_v30 = vpop.f32.mrb[85].mxu1 }
 0x1b9   : > { %v4888_v52 = vadd.f32 %v7649_v37, %v10218_v46  ;;  %v7652_v48 = vadd.f32 %v7651_v43, %v7650_v63  ;;  %v7761_v40 = vadd.f32 %v7760_v30, %v7759_v7  ;;  %v7762_v34 = vpop.f32.mrb[86].mxu1  ;;  %v9317_v46 = vld [vmem:[%s11397_s0 + $0x4c8] sm:$0xff]   ;;  %v9244_v7 = vld [vmem:[%s9669_s30 + $0x100] ss:$100 sps:$4 sm:$0xff]  }
 0x1ba   : > { %5490 = vmatmul.mubr.bf16.vlgmr.msra.gmra.mrb[192].mxu0 %v9232_v18  ;;  %v7763_v25 = vpop.f32.mrb[87].mxu1 }
 0x1bb   : > { %v4891_v3 = vadd.f32 %v7652_v48, %v10228_v56  ;;  %5497 = vmatprep.mubr.bf16.mxu0 %v9239_v57  ;;  %8274 = vmatpush3.bf16.msra.mxu0 %v9311_v12  ;;  %v10474_v51 = vadd.f32 %v7761_v40, %v4888_v52  ;;  %v7764_v42 = vadd.f32 %v7763_v25, %v7762_v34  ;;  %v9327_v57 = vld [vmem:[%s11397_s0 + $0x4d0] sm:$0xff]   ;;  %v9247_v25 = vld [vmem:[%s9669_s30 + $0x1c0] ss:$100 sps:$4 sm:$0xff]  }
 0x1bc   : > { %8275 = vmatprep.subr.bf16.mxu0 %v9315_v23  ;;  %5651 = vmatmul.mubr.bf16.vlgmr.msra.gmra.mrb[192].mxu1 %v9236_v22  ;;  %v9248_v23 = vld [vmem:[%s9669_s30 + $0x1cc] ss:$100 sps:$4 sm:$0xff]  }
 0x1bd   : > { %v7653_v50 = vpop.f32.mrb[88].mxu0  ;;  %v10478_v56 = vadd.f32 %v7764_v42, %v4891_v3  ;;  %5658 = vmatprep.mubr.bf16.mxu1 %v9242_v33  ;;  %8386 = vmatpush3.bf16.msra.mxu1 %v9314_v39  ;;  %v9328_v52 = vld [vmem:[%s11397_s0 + $0x490] sm:$0xff]   ;;  %v9331_v33 = vld [vmem:[%s11397_s0 + $0x4d8] sm:$0xff]  }
 0x1be   : > { %v7654_v61 = vpop.f32.mrb[89].mxu0  ;;  %8387 = vmatprep.subr.bf16.mxu1 %v9317_v46  ;;  %v9334_v46 = vld [vmem:[%s11397_s0 + $0x498] sm:$0xff]  }
 0x1bf   : > { %v7655_v21 = vadd.f32 %v7654_v61, %v7653_v50  ;;  %v7656_v1 = vpop.f32.mrb[90].mxu0  ;;  %8276 = vmatpush3.bf16.msra.mxu0 %v9316_v36  ;;  %v7765_v18 = vpop.f32.mrb[88].mxu1  ;;  %v9339_v50 = vld [vmem:[%s11397_s0 + $0x420] sm:$0xff]  }
 0x1c0   : > { %v7657_v4 = vpop.f32.mrb[91].mxu0  ;;  %8277 = vmatprep.subr.bf16.mxu0 %v9322_v38  ;;  %v7766_v12 = vpop.f32.mrb[89].mxu1 }
 0x1c1   : > { %v4896_v37 = vadd.f32 %v7655_v21, %v10254_v29  ;;  %v7658_v63 = vadd.f32 %v7657_v4, %v7656_v1  ;;  %v7767_v43 = vadd.f32 %v7766_v12, %v7765_v18  ;;  %v7768_v22 = vpop.f32.mrb[90].mxu1  ;;  %8388 = vmatpush3.bf16.msra.mxu1 %v9320_v2  ;;  %v9330_v29 = vld [vmem:[%s11397_s0 + $0x418] sm:$0xff]   ;;  %v9341_v2 = vld [vmem:[%s11397_s0 + $0x4e0] sm:$0xff]   ;;  %v9343_v21 = vld [vmem:[%s11397_s0 + $0x468] sm:$0xff]  }
 0x1c2   : > { %5498 = vmatmul.mubr.bf16.gmra.mrb[196].mxu0 %v9241_v15  ;;  %v7769_v30 = vpop.f32.mrb[91].mxu1  ;;  %8389 = vmatprep.subr.bf16.mxu1 %v9327_v57  ;;  %v9251_v15 = vld [vmem:[%s9669_s30 + $0x28c] ss:$100 sps:$4 sm:$0xff]  }
 0x1c3   : > { %v4899_v48 = vadd.f32 %v7658_v63, %v10264_v41  ;;  %5505 = vmatprep.mubr.bf16.mxu0 %v9245_v58  ;;  %8278 = vmatpush3.bf16.msra.mxu0 %v9325_v32  ;;  %v10505_v40 = vadd.f32 %v7767_v43, %v4896_v37  ;;  %v7770_v34 = vadd.f32 %v7769_v30, %v7768_v22  ;;  %v9336_v41 = vld [vmem:[%s11397_s0 + $0x460] sm:$0xff]   ;;  %v9250_v4 = vld [vmem:[%s9669_s30 + $0x1c8] ss:$100 sps:$4 sm:$0xff]   ;;  %v9254_v37 = vld [vmem:[%s9669_s30 + $0x294] ss:$100 sps:$4 sm:$0xff]  }
 0x1c4   : > { %8279 = vmatprep.subr.bf16.mxu0 %v9329_v13  ;;  %5659 = vmatmul.mubr.bf16.gmra.mrb[196].mxu1 %v9244_v7  ;;  %v9342_v63 = vld [vmem:[%s11397_s0 + $0x4a0] sm:$0xff]   ;;  %v9345_v43 = vld [vmem:[%s11397_s0 + $0x4e8] sm:$0xff]  }
 0x1c5   : > { %v7659_v39 = vpop.f32.mrb[92].mxu0  ;;  %v10510_v36 = vadd.f32 %v7770_v34, %v4899_v48  ;;  %5666 = vmatprep.mubr.bf16.mxu1 %v9248_v23  ;;  %8390 = vmatpush3.bf16.msra.mxu1 %v9328_v52 }
 0x1c6   : > { %v7660_v3 = vpop.f32.mrb[93].mxu0  ;;  %8391 = vmatprep.subr.bf16.mxu1 %v9331_v33  ;;  %v9348_v33 = vld [vmem:[%s11397_s0 + $0x4a8] sm:$0xff]  }
 0x1c7   : > { %v7661_v38 = vadd.f32 %v7660_v3, %v7659_v39  ;;  %v7662_v42 = vpop.f32.mrb[94].mxu0  ;;  %8280 = vmatpush3.bf16.msra.mxu0 %v9330_v29  ;;  %v7771_v58 = vpop.f32.mrb[92].mxu1  ;;  %v9253_v29 = vld [vmem:[%s9669_s30 + $0x288] ss:$100 sps:$4 sm:$0xff]   ;;  %v9257_v39 = vld [vmem:[%s9669_s30 + $0x354] ss:$100 sps:$4 sm:$0xff]  }
 0x1c8   : > { %v7663_v61 = vpop.f32.mrb[95].mxu0  ;;  %8281 = vmatprep.subr.bf16.mxu0 %v9336_v41  ;;  %v7772_v18 = vpop.f32.mrb[93].mxu1  ;;  %v9353_v3 = vld [vmem:[%s11397_s0 + $0x430] sm:$0xff]  }
 0x1c9   : > { %v4904_v1 = vadd.f32 %v7661_v38, %v10286_v19  ;;  %v7664_v32 = vadd.f32 %v7663_v61, %v7662_v42  ;;  %v7773_v57 = vadd.f32 %v7772_v18, %v7771_v58  ;;  %v7774_v13 = vpop.f32.mrb[94].mxu1  ;;  %8392 = vmatpush3.bf16.msra.mxu1 %v9334_v46  ;;  %v9344_v19 = vld [vmem:[%s11397_s0 + $0x428] sm:$0xff]   ;;  %v9355_v38 = vld [vmem:[%s11397_s0 + $0x4f0] sm:$0xff]   ;;  %v9357_v42 = vld [vmem:[%s11397_s0 + $0x478] sm:$0xff]  }
 0x1ca   : > { %5506 = vmatmul.mubr.bf16.gmra.mrb[200].mxu0 %v9247_v25  ;;  %v7775_v7 = vpop.f32.mrb[95].mxu1  ;;  %8393 = vmatprep.subr.bf16.mxu1 %v9341_v2  ;;  %v9256_v61 = vld [vmem:[%s9669_s30 + $0x290] ss:$100 sps:$4 sm:$0xff]  }
 0x1cb   : > { %v4907_v12 = vadd.f32 %v7664_v32, %v10296_v31  ;;  %5513 = vmatprep.mubr.bf16.mxu0 %v9251_v15  ;;  %8282 = vmatpush3.bf16.msra.mxu0 %v9339_v50  ;;  %v10539_v22 = vadd.f32 %v7773_v57, %v4904_v1  ;;  %v7776_v23 = vadd.f32 %v7775_v7, %v7774_v13  ;;  %v9350_v31 = vld [vmem:[%s11397_s0 + $0x470] sm:$0xff]   ;;  %v9260_v1 = vld [vmem:[%s9669_s30 + $0x35c] ss:$100 sps:$4 sm:$0xff]  }
 0x1cc   : > { %8283 = vmatprep.subr.bf16.mxu0 %v9343_v21  ;;  %5667 = vmatmul.mubr.bf16.gmra.mrb[200].mxu1 %v9250_v4  ;;  %v9356_v32 = vld [vmem:[%s11397_s0 + $0x4b0] sm:$0xff]   ;;  %v9359_v57 = vld [vmem:[%s11397_s0 + $0x4f8] sm:$0xff]  }
 0x1cd   : > { %v7665_v52 = vpop.f32.mrb[96].mxu0  ;;  %v10544_v48 = vadd.f32 %v7776_v23, %v4907_v12  ;;  %5674 = vmatprep.mubr.bf16.mxu1 %v9254_v37  ;;  %8394 = vmatpush3.bf16.msra.mxu1 %v9342_v63  ;;  %v9259_v12 = vld [vmem:[%s9669_s30 + $0x350] ss:$100 sps:$4 sm:$0xff]   ;;  %v9363_v7 = vld [vmem:[%s11397_s0 + $0x4b8] sm:$0xff]  }
 0x1ce   : > { %v7666_v30 = vpop.f32.mrb[97].mxu0  ;;  %8395 = vmatprep.subr.bf16.mxu1 %v9345_v43 }
 0x1cf   : > { %v7667_v34 = vadd.f32 %v7666_v30, %v7665_v52  ;;  %v7668_v41 = vpop.f32.mrb[98].mxu0  ;;  %8284 = vmatpush3.bf16.msra.mxu0 %v9344_v19  ;;  %v7777_v25 = vpop.f32.mrb[96].mxu1 }
 0x1d0   : > { %v7669_v46 = vpop.f32.mrb[99].mxu0  ;;  %8285 = vmatprep.subr.bf16.mxu0 %v9350_v31  ;;  %v7778_v58 = vpop.f32.mrb[97].mxu1  ;;  %v9263_v31 = vld [vmem:[%s9669_s30 + $0x41c] ss:$100 sps:$4 sm:$0xff]  }
 0x1d1   : > { %v4912_v15 = vadd.f32 %v7667_v34, %v10317_v6  ;;  %v7670_v50 = vadd.f32 %v7669_v46, %v7668_v41  ;;  %v7779_v2 = vadd.f32 %v7778_v58, %v7777_v25  ;;  %v7780_v21 = vpop.f32.mrb[98].mxu1  ;;  %8396 = vmatpush3.bf16.msra.mxu1 %v9348_v33  ;;  %v9358_v6 = vld [vmem:[%s11397_s0 + $0x438] sm:$0xff]   ;;  %v9266_v25 = vld [vmem:[%s9669_s30 + $0x424] ss:$100 sps:$4 sm:$0xff]  }
 0x1d2   : > { %5514 = vmatmul.mubr.bf16.gmra.mrb[204].mxu0 %v9253_v29  ;;  %v7781_v4 = vpop.f32.mrb[99].mxu1  ;;  %8397 = vmatprep.subr.bf16.mxu1 %v9355_v38  ;;  %v9262_v41 = vld [vmem:[%s9669_s30 + $0x358] ss:$100 sps:$4 sm:$0xff]  }
 0x1d3   : > { %v4915_v18 = vadd.f32 %v7670_v50, %v10324_v14  ;;  %5521 = vmatprep.mubr.bf16.mxu0 %v9257_v39  ;;  %8286 = vmatpush3.bf16.msra.mxu0 %v9353_v3  ;;  %v7782_v13 = vadd.f32 %v7781_v4, %v7780_v21  ;;  %v10573_v37 = vadd.f32 %v7779_v2, %v4912_v15  ;;  %v9265_v58 = vld [vmem:[%s9669_s30 + $0x418] ss:$100 sps:$4 sm:$0xff]  }
 0x1d4   : > { %8287 = vmatprep.subr.bf16.mxu0 %v9357_v42  ;;  %5675 = vmatmul.mubr.bf16.gmra.mrb[204].mxu1 %v9256_v61 }
 0x1d5   : > { %v7671_v63 = vpop.f32.mrb[100].mxu0  ;;  %5682 = vmatprep.mubr.bf16.mxu1 %v9260_v1  ;;  %8398 = vmatpush3.bf16.msra.mxu1 %v9356_v32  ;;  %v10579_v19 = vadd.f32 %v7782_v13, %v4915_v18  ;;  %v9269_v1 = vld [vmem:[%s9669_s30 + $0x4e4] ss:$100 sps:$4 sm:$0xff]  }
 0x1d6   : > { %v7672_v14 = vpop.f32.mrb[101].mxu0  ;;  %8399 = vmatprep.subr.bf16.mxu1 %v9359_v57  ;;  %v9268_v57 = vld [vmem:[%s9669_s30 + $0x420] ss:$100 sps:$4 sm:$0xff]  }
 0x1d7   : > { %v7673_v43 = vadd.f32 %v7672_v14, %v7671_v63  ;;  %v7674_v23 = vpop.f32.mrb[102].mxu0  ;;  %8288 = vmatpush3.bf16.msra.mxu0 %v9358_v6  ;;  %v7783_v52 = vpop.f32.mrb[100].mxu1  ;;  %v9272_v14 = vld [vmem:[%s9669_s30 + $0x4ec] ss:$100 sps:$4 sm:$0xff]  }
 0x1d8   : > { %v7675_v30 = vpop.f32.mrb[103].mxu0  ;;  %v7784_v34 = vpop.f32.mrb[101].mxu1 }
 0x1d9   : > { %v4920_v29 = vadd.f32 %v7673_v43, %v10330_v49  ;;  %v7676_v33 = vadd.f32 %v7675_v30, %v7674_v23  ;;  %v7785_v39 = vadd.f32 %v7784_v34, %v7783_v52  ;;  %v7786_v3 = vpop.f32.mrb[102].mxu1  ;;  %8400 = vmatpush3.bf16.msra.mxu1 %v9363_v7  ;;  %v9271_v52 = vld [vmem:[%s9669_s30 + $0x4e0] ss:$100 sps:$4 sm:$0xff]   ;;  %v9275_v34 = vld [vmem:[%s9669_s30 + $0x5ac] ss:$100 sps:$4 sm:$0xff]  }
 0x1da   : > { %5522 = vmatmul.mubr.bf16.gmra.mrb[208].mxu0 %v9259_v12  ;;  %v7787_v38 = vpop.f32.mrb[103].mxu1 }
 0x1db   : > { %v4923_v46 = vadd.f32 %v7676_v33, %v10334_v53  ;;  %5529 = vmatprep.mubr.bf16.mxu0 %v9263_v31  ;;  %v7788_v42 = vadd.f32 %v7787_v38, %v7786_v3  ;;  %v10586_v15 = vadd.f32 %v7785_v39, %v4920_v29 }
 0x1dc   : > { %5683 = vmatmul.mubr.bf16.gmra.mrb[208].mxu1 %v9262_v41 }
 0x1dd   : > { %v7677_v49 = vpop.f32.mrb[104].mxu0  ;;  %5690 = vmatprep.mubr.bf16.mxu1 %v9266_v25  ;;  %v10589_v61 = vadd.f32 %v7788_v42, %v4923_v46  ;;  %v9274_v46 = vld [vmem:[%s9669_s30 + $0x4e8] ss:$100 sps:$4 sm:$0xff]  }
 0x1de   : > { %v7678_v50 = vpop.f32.mrb[105].mxu0 }
 0x1df   : > { %v7679_v2 = vadd.f32 %v7678_v50, %v7677_v49  ;;  %v7680_v21 = vpop.f32.mrb[106].mxu0  ;;  %v7789_v32 = vpop.f32.mrb[104].mxu1  ;;  %v9278_v49 = vld [vmem:[%s9669_s30 + $0x5b4] ss:$100 sps:$4 sm:$0xff]  }
 0x1e0   : > { %v7681_v18 = vpop.f32.mrb[107].mxu0  ;;  %v7790_v6 = vpop.f32.mrb[105].mxu1 }
 0x1e1   : > { %v4928_v53 = vadd.f32 %v7679_v2, %v10340_v16  ;;  %v7682_v4 = vadd.f32 %v7681_v18, %v7680_v21  ;;  %v7791_v13 = vadd.f32 %v7790_v6, %v7789_v32  ;;  %v7792_v63 = vpop.f32.mrb[106].mxu1  ;;  %v9277_v32 = vld [vmem:[%s9669_s30 + $0x5a8] ss:$100 sps:$4 sm:$0xff]   ;;  %v9281_v6 = vld [vmem:[%s9669_s30 + $0x674] ss:$100 sps:$4 sm:$0xff]  }
 0x1e2   : > { %5530 = vmatmul.mubr.bf16.gmra.mrb[212].mxu0 %v9265_v58  ;;  %v7793_v7 = vpop.f32.mrb[107].mxu1 }
 0x1e3   : > { %v4931_v12 = vadd.f32 %v7682_v4, %v10344_v24  ;;  %5537 = vmatprep.mubr.bf16.mxu0 %v9269_v1  ;;  %v7794_v43 = vadd.f32 %v7793_v7, %v7792_v63  ;;  %v10596_v23 = vadd.f32 %v7791_v13, %v4928_v53 }
 0x1e4   : > { %5691 = vmatmul.mubr.bf16.gmra.mrb[212].mxu1 %v9268_v57 }
 0x1e5   : > { %v7683_v31 = vpop.f32.mrb[108].mxu0  ;;  %5698 = vmatprep.mubr.bf16.mxu1 %v9272_v14  ;;  %v10599_v30 = vadd.f32 %v7794_v43, %v4931_v12  ;;  %v9280_v12 = vld [vmem:[%s9669_s30 + $0x5b0] ss:$100 sps:$4 sm:$0xff]  }
 0x1e6   : > { %v7684_v16 = vpop.f32.mrb[109].mxu0 }
 0x1e7   : > { %v7685_v29 = vadd.f32 %v7684_v16, %v7683_v31  ;;  %v7686_v33 = vpop.f32.mrb[110].mxu0  ;;  %v7795_v41 = vpop.f32.mrb[108].mxu1  ;;  %v9284_v31 = vld [vmem:[%s9669_s30 + $0x67c] ss:$100 sps:$4 sm:$0xff]  }
 0x1e8   : > { %v7687_v39 = vpop.f32.mrb[111].mxu0  ;;  %v7796_v25 = vpop.f32.mrb[109].mxu1 }
 0x1e9   : > { %v4936_v24 = vadd.f32 %v7685_v29, %v10350_v54  ;;  %v7688_v3 = vadd.f32 %v7687_v39, %v7686_v33  ;;  %v7797_v38 = vadd.f32 %v7796_v25, %v7795_v41  ;;  %v7798_v42 = vpop.f32.mrb[110].mxu1  ;;  %v9283_v41 = vld [vmem:[%s9669_s30 + $0x670] ss:$100 sps:$4 sm:$0xff]   ;;  %v9287_v25 = vld [vmem:[%s9669_s30 + $0x73c] ss:$100 sps:$4 sm:$0xff]  }
 0x1ea   : > { %5538 = vmatmul.mubr.bf16.gmra.mrb[216].mxu0 %v9271_v52  ;;  %v7799_v58 = vpop.f32.mrb[111].mxu1 }
 0x1eb   : > { %v4939_v50 = vadd.f32 %v7688_v3, %v10354_v44  ;;  %5545 = vmatprep.mubr.bf16.mxu0 %v9275_v34  ;;  %v7800_v2 = vadd.f32 %v7799_v58, %v7798_v42  ;;  %v10606_v21 = vadd.f32 %v7797_v38, %v4936_v24 }
 0x1ec   : > { %5699 = vmatmul.mubr.bf16.gmra.mrb[216].mxu1 %v9274_v46 }
 0x1ed   : > { %v7689_v1 = vpop.f32.mrb[112].mxu0  ;;  %5706 = vmatprep.mubr.bf16.mxu1 %v9278_v49  ;;  %v10609_v18 = vadd.f32 %v7800_v2, %v4939_v50  ;;  %v9286_v50 = vld [vmem:[%s9669_s30 + $0x678] ss:$100 sps:$4 sm:$0xff]  }
 0x1ee   : > { %v7690_v54 = vpop.f32.mrb[113].mxu0 }
 0x1ef   : > { %v7691_v53 = vadd.f32 %v7690_v54, %v7689_v1  ;;  %v7692_v4 = vpop.f32.mrb[114].mxu0  ;;  %v7801_v57 = vpop.f32.mrb[112].mxu1  ;;  %v9290_v1 = vld [vmem:[%s9669_s30 + $0x744] ss:$100 sps:$4 sm:$0xff]  }
 0x1f0   : > { %v7693_v13 = vpop.f32.mrb[115].mxu0  ;;  %v7802_v14 = vpop.f32.mrb[113].mxu1 }
 0x1f1   : > { %v4944_v44 = vadd.f32 %v7691_v53, %v10360_v26  ;;  %v7694_v63 = vadd.f32 %v7693_v13, %v7692_v4  ;;  %v7803_v7 = vadd.f32 %v7802_v14, %v7801_v57  ;;  %v7804_v43 = vpop.f32.mrb[114].mxu1  ;;  %v9289_v57 = vld [vmem:[%s9669_s30 + $0x738] ss:$100 sps:$4 sm:$0xff]   ;;  %v9293_v14 = vld [vmem:[%s9669_s30 + $0x804] ss:$100 sps:$4 sm:$0xff]  }
 0x1f2   : > { %5546 = vmatmul.mubr.bf16.gmra.mrb[220].mxu0 %v9277_v32  ;;  %v7805_v52 = vpop.f32.mrb[115].mxu1 }
 0x1f3   : > { %v4947_v16 = vadd.f32 %v7694_v63, %v10364_v55  ;;  %5553 = vmatprep.mubr.bf16.mxu0 %v9281_v6  ;;  %v7806_v29 = vadd.f32 %v7805_v52, %v7804_v43  ;;  %v10616_v33 = vadd.f32 %v7803_v7, %v4944_v44 }
 0x1f4   : > { %5707 = vmatmul.mubr.bf16.gmra.mrb[220].mxu1 %v9280_v12 }
 0x1f5   : > { %v7695_v34 = vpop.f32.mrb[116].mxu0  ;;  %5714 = vmatprep.mubr.bf16.mxu1 %v9284_v31  ;;  %v10619_v39 = vadd.f32 %v7806_v29, %v4947_v16  ;;  %v9292_v16 = vld [vmem:[%s9669_s30 + $0x740] ss:$100 sps:$4 sm:$0xff]  }
 0x1f6   : > { %v7696_v26 = vpop.f32.mrb[117].mxu0 }
 0x1f7   : > { %v7697_v24 = vadd.f32 %v7696_v26, %v7695_v34  ;;  %v7698_v3 = vpop.f32.mrb[118].mxu0  ;;  %v7807_v46 = vpop.f32.mrb[116].mxu1  ;;  %v9296_v34 = vld [vmem:[%s9669_s30 + $0x80c] ss:$100 sps:$4 sm:$0xff]  }
 0x1f8   : > { %v7699_v38 = vpop.f32.mrb[119].mxu0  ;;  %v7808_v49 = vpop.f32.mrb[117].mxu1 }
 0x1f9   : > { %v4952_v55 = vadd.f32 %v7697_v24, %v10370_v62  ;;  %v7700_v42 = vadd.f32 %v7699_v38, %v7698_v3  ;;  %v7809_v58 = vadd.f32 %v7808_v49, %v7807_v46  ;;  %v7810_v2 = vpop.f32.mrb[118].mxu1  ;;  %v9295_v46 = vld [vmem:[%s9669_s30 + $0x800] ss:$100 sps:$4 sm:$0xff]   ;;  %v9299_v49 = vld [vmem:[%s9669_s30 + $0x8cc] ss:$100 sps:$4 sm:$0xff]  }
 0x1fa   : > { %5554 = vmatmul.mubr.bf16.gmra.mrb[224].mxu0 %v9283_v41  ;;  %v7811_v32 = vpop.f32.mrb[119].mxu1 }
 0x1fb   : > { %v4955_v54 = vadd.f32 %v7700_v42, %v10374_v9  ;;  %5561 = vmatprep.mubr.bf16.mxu0 %v9287_v25  ;;  %v7812_v53 = vadd.f32 %v7811_v32, %v7810_v2  ;;  %v10626_v4 = vadd.f32 %v7809_v58, %v4952_v55 }
 0x1fc   : > { %5715 = vmatmul.mubr.bf16.gmra.mrb[224].mxu1 %v9286_v50 }
 0x1fd   : > { %v7701_v6 = vpop.f32.mrb[120].mxu0  ;;  %5722 = vmatprep.mubr.bf16.mxu1 %v9290_v1  ;;  %v10629_v13 = vadd.f32 %v7812_v53, %v4955_v54  ;;  %v9298_v54 = vld [vmem:[%s9669_s30 + $0x808] ss:$100 sps:$4 sm:$0xff]  }
 0x1fe   : > { %v7702_v62 = vpop.f32.mrb[121].mxu0 }
 0x1ff   : > { %v7703_v44 = vadd.f32 %v7702_v62, %v7701_v6  ;;  %v7704_v63 = vpop.f32.mrb[122].mxu0  ;;  %v7813_v12 = vpop.f32.mrb[120].mxu1  ;;  %v9302_v6 = vld [vmem:[%s9669_s30 + $0x8d4] ss:$100 sps:$4 sm:$0xff]  }
 0x200   : > { %v7705_v7 = vpop.f32.mrb[123].mxu0  ;;  %v7814_v31 = vpop.f32.mrb[121].mxu1 }
 0x201   : > { %v4960_v9 = vadd.f32 %v7703_v44, %v10380_v35  ;;  %v7706_v43 = vadd.f32 %v7705_v7, %v7704_v63  ;;  %v7815_v52 = vadd.f32 %v7814_v31, %v7813_v12  ;;  %v7816_v29 = vpop.f32.mrb[122].mxu1  ;;  %v9301_v12 = vld [vmem:[%s9669_s30 + $0x8c8] ss:$100 sps:$4 sm:$0xff]   ;;  %v9305_v31 = vld [vmem:[%s9669_s30 + $0x994] ss:$100 sps:$4 sm:$0xff]  }
 0x202   : > { %5562 = vmatmul.mubr.bf16.gmra.mrb[228].mxu0 %v9289_v57  ;;  %v7817_v41 = vpop.f32.mrb[123].mxu1 }
 0x203   : > { %v4963_v26 = vadd.f32 %v7706_v43, %v10384_v47  ;;  %5569 = vmatprep.mubr.bf16.mxu0 %v9293_v14  ;;  %v7818_v24 = vadd.f32 %v7817_v41, %v7816_v29  ;;  %v10636_v3 = vadd.f32 %v7815_v52, %v4960_v9 }
 0x204   : > { %5723 = vmatmul.mubr.bf16.gmra.mrb[228].mxu1 %v9292_v16 }
 0x205   : > { %v7707_v25 = vpop.f32.mrb[124].mxu0  ;;  %5730 = vmatprep.mubr.bf16.mxu1 %v9296_v34  ;;  %v10639_v38 = vadd.f32 %v7818_v24, %v4963_v26  ;;  %v9304_v26 = vld [vmem:[%s9669_s30 + $0x8d0] ss:$100 sps:$4 sm:$0xff]  }
 0x206   : > { %v7708_v35 = vpop.f32.mrb[125].mxu0 }
 0x207   : > { %v7709_v55 = vadd.f32 %v7708_v35, %v7707_v25  ;;  %v7710_v42 = vpop.f32.mrb[126].mxu0  ;;  %v7819_v50 = vpop.f32.mrb[124].mxu1  ;;  %v9309_v25 = vld [vmem:[%s9669_s30 + $0x99c] ss:$100 sps:$4 sm:$0xff]  }
 0x208   : > { %v7711_v58 = vpop.f32.mrb[127].mxu0  ;;  %v7820_v1 = vpop.f32.mrb[125].mxu1 }
 0x209   : > { %v4968_v47 = vadd.f32 %v7709_v55, %v10390_v0  ;;  %v7712_v2 = vadd.f32 %v7711_v58, %v7710_v42  ;;  %v7821_v32 = vadd.f32 %v7820_v1, %v7819_v50  ;;  %v7822_v53 = vpop.f32.mrb[126].mxu1  ;;  %v9307_v50 = vld [vmem:[%s9669_s30 + $0x990] ss:$100 sps:$4 sm:$0xff]   ;;  %v9318_v1 = vld [vmem:[%s9669_s30 + $0xa5c] ss:$100 sps:$4 sm:$0xff]  }
 0x20a   : > { %5570 = vmatmul.mubr.bf16.gmra.mrb[232].mxu0 %v9295_v46  ;;  %v7823_v57 = vpop.f32.mrb[127].mxu1 }
 0x20b   : > { %v4971_v62 = vadd.f32 %v7712_v2, %v10394_v27  ;;  %5577 = vmatprep.mubr.bf16.mxu0 %v9299_v49  ;;  %v7824_v44 = vadd.f32 %v7823_v57, %v7822_v53  ;;  %v10646_v63 = vadd.f32 %v7821_v32, %v4968_v47  ;;  %v9436_v57 = vld [vmem:[%s11397_s0 + $0x540] sm:$0xff]  }
 0x20c   : > { %5731 = vmatmul.mubr.bf16.gmra.mrb[232].mxu1 %v9298_v54  ;;  %8497 = vmatprep.subr.bf16.mxu0 %v9436_v57  ;;  %v9346_v57 = vld [vmem:[%s9669_s30 + $0xbec] ss:$100 sps:$4 sm:$0xff]  }
 0x20d   : > { %v7841_v14 = vpop.f32.mrb[128].mxu0  ;;  %5738 = vmatprep.mubr.bf16.mxu1 %v9302_v6  ;;  %v10649_v7 = vadd.f32 %v7824_v44, %v4971_v62  ;;  %v9312_v62 = vld [vmem:[%s9669_s30 + $0x998] ss:$100 sps:$4 sm:$0xff]  }
 0x20e   : > { %v7842_v0 = vpop.f32.mrb[129].mxu0 }
 0x20f   : > { %v7843_v9 = vadd.f32 %v7842_v0, %v7841_v14  ;;  %v7844_v43 = vpop.f32.mrb[130].mxu0  ;;  %v7953_v16 = vpop.f32.mrb[128].mxu1  ;;  %v9323_v0 = vld [vmem:[%s9669_s30 + $0xa64] ss:$100 sps:$4 sm:$0xff]  }
 0x210   : > { %v7845_v52 = vpop.f32.mrb[131].mxu0  ;;  %v7954_v34 = vpop.f32.mrb[129].mxu1 }
 0x211   : > { %v5170_v27 = vadd.f32 %v7843_v9, %v10400_v45  ;;  %v7846_v29 = vadd.f32 %v7845_v52, %v7844_v43  ;;  %v7955_v41 = vadd.f32 %v7954_v34, %v7953_v16  ;;  %v7956_v24 = vpop.f32.mrb[130].mxu1 }
 0x212   : > { %5578 = vmatmul.mubr.bf16.gmra.mrb[236].mxu0 %v9301_v12  ;;  %v7957_v46 = vpop.f32.mrb[131].mxu1 }
 0x213   : > { %v5173_v35 = vadd.f32 %v7846_v29, %v10404_v10  ;;  %5585 = vmatprep.mubr.bf16.mxu0 %v9305_v31  ;;  %v7958_v55 = vadd.f32 %v7957_v46, %v7956_v24  ;;  %v10656_v42 = vadd.f32 %v7955_v41, %v5170_v27 }
 0x214   : > { %5739 = vmatmul.mubr.bf16.gmra.mrb[236].mxu1 %v9304_v26  ;;  %v9332_v26 = vld [vmem:[%s9669_s30 + $0xb24] ss:$100 sps:$4 sm:$0xff]  }
 0x215   : > { %v7847_v49 = vpop.f32.mrb[132].mxu0  ;;  %5746 = vmatprep.mubr.bf16.mxu1 %v9309_v25  ;;  %v10659_v58 = vadd.f32 %v7958_v55, %v5173_v35  ;;  %v9326_v55 = vld [vmem:[%s9669_s30 + $0xa60] ss:$100 sps:$4 sm:$0xff]  }
 0x216   : > { %v7848_v45 = vpop.f32.mrb[133].mxu0 }
 0x217   : > { %v7849_v47 = vadd.f32 %v7848_v45, %v7847_v49  ;;  %v7850_v2 = vpop.f32.mrb[134].mxu0  ;;  %v7959_v54 = vpop.f32.mrb[132].mxu1 }
 0x218   : > { %v7851_v32 = vpop.f32.mrb[135].mxu0  ;;  %v7960_v6 = vpop.f32.mrb[133].mxu1 }
 0x219   : > { %v7852_v10 = vadd.f32 %v7851_v32, %v7850_v2  ;;  %v5178_v53 = vadd.f32 %v7849_v47, %v10416_v59  ;;  %v7961_v44 = vadd.f32 %v7960_v6, %v7959_v54  ;;  %v7962_v14 = vpop.f32.mrb[134].mxu1  ;;  %v9441_v59 = vld [vmem:[%s11397_s0 + $0x5c0] sm:$0xff]  }
 0x21a   : > { %5586 = vmatmul.mubr.bf16.gmra.mrb[240].mxu0 %v9307_v50  ;;  %v7963_v9 = vpop.f32.mrb[135].mxu1  ;;  %8609 = vmatprep.subr.bf16.mxu1 %v9441_v59  ;;  %v9337_v50 = vld [vmem:[%s9669_s30 + $0xb2c] ss:$100 sps:$4 sm:$0xff]  }
 0x21b   : > { %v5181_v12 = vadd.f32 %v7852_v10, %v10418_v17  ;;  %5593 = vmatprep.mubr.bf16.mxu0 %v9318_v1  ;;  %v10672_v43 = vadd.f32 %v7961_v44, %v5178_v53  ;;  %v7964_v31 = vadd.f32 %v7963_v9, %v7962_v14  ;;  %v9321_v17 = vld [vmem:[%s9669_s30 + $0xa58] ss:$100 sps:$4 sm:$0xff]   ;;  %v9335_v53 = vld [vmem:[%s9669_s30 + $0xb20] ss:$100 sps:$4 sm:$0xff]   ;;  %v9340_v9 = vld [vmem:[%s9669_s30 + $0xb28] ss:$100 sps:$4 sm:$0xff]  }
 0x21c   : > { %5747 = vmatmul.mubr.bf16.gmra.mrb[240].mxu1 %v9312_v62 }
 0x21d   : > { %v7853_v16 = vpop.f32.mrb[136].mxu0  ;;  %v10674_v52 = vadd.f32 %v7964_v31, %v5181_v12  ;;  %5754 = vmatprep.mubr.bf16.mxu1 %v9323_v0 }
 0x21e   : > { %v7854_v27 = vpop.f32.mrb[137].mxu0 }
 0x21f   : > { %v7855_v29 = vadd.f32 %v7854_v27, %v7853_v16  ;;  %v7856_v34 = vpop.f32.mrb[138].mxu0  ;;  %v7965_v41 = vpop.f32.mrb[136].mxu1  ;;  %v9351_v16 = vld [vmem:[%s9669_s30 + $0xbf4] ss:$100 sps:$4 sm:$0xff]  }
 0x220   : > { %v7857_v24 = vpop.f32.mrb[139].mxu0  ;;  %v7966_v46 = vpop.f32.mrb[137].mxu1 }
 0x221   : > { %v7858_v25 = vadd.f32 %v7857_v24, %v7856_v34  ;;  %v5186_v35 = vadd.f32 %v7855_v29, %v10426_v60  ;;  %v7967_v49 = vadd.f32 %v7966_v46, %v7965_v41  ;;  %v7968_v45 = vpop.f32.mrb[138].mxu1  ;;  %v9349_v24 = vld [vmem:[%s9669_s30 + $0xbe8] ss:$100 sps:$4 sm:$0xff]  }
 0x222   : > { %5594 = vmatmul.mubr.bf16.gmra.mrb[244].mxu0 %v9321_v17  ;;  %v7969_v2 = vpop.f32.mrb[139].mxu1  ;;  %v9362_v46 = vld [vmem:[%s9669_s30 + $0x44] ss:$100 sps:$4 sm:$0xff]  }
 0x223   : > { %v5189_v47 = vadd.f32 %v7858_v25, %v10428_v8  ;;  %5601 = vmatprep.mubr.bf16.mxu0 %v9332_v26  ;;  %v10682_v1 = vadd.f32 %v7967_v49, %v5186_v35  ;;  %v7970_v54 = vadd.f32 %v7969_v2, %v7968_v45 }
 0x224   : > { %5755 = vmatmul.mubr.bf16.gmra.mrb[244].mxu1 %v9326_v55 }
 0x225   : > { %v7859_v32 = vpop.f32.mrb[140].mxu0  ;;  %v10684_v10 = vadd.f32 %v7970_v54, %v5189_v47  ;;  %5762 = vmatprep.mubr.bf16.mxu1 %v9337_v50  ;;  %v9354_v47 = vld [vmem:[%s9669_s30 + $0xbf0] ss:$100 sps:$4 sm:$0xff]  }
 0x226   : > { %v7860_v60 = vpop.f32.mrb[141].mxu0 }
 0x227   : > { %v7861_v6 = vadd.f32 %v7860_v60, %v7859_v32  ;;  %v7862_v62 = vpop.f32.mrb[142].mxu0  ;;  %v7971_v44 = vpop.f32.mrb[140].mxu1  ;;  %v9366_v32 = vld [vmem:[%s9669_s30 + $0x4c] ss:$100 sps:$4 sm:$0xff]  }
 0x228   : > { %v7863_v14 = vpop.f32.mrb[143].mxu0  ;;  %v7972_v12 = vpop.f32.mrb[141].mxu1 }
 0x229   : > { %v7864_v8 = vadd.f32 %v7863_v14, %v7862_v62  ;;  %v5194_v0 = vadd.f32 %v7861_v6, %v10436_v28  ;;  %v7973_v59 = vadd.f32 %v7972_v12, %v7971_v44  ;;  %v7974_v31 = vpop.f32.mrb[142].mxu1  ;;  %v9360_v14 = vld [vmem:[%s9669_s30 + $0x40] ss:$100 sps:$4 sm:$0xff]   ;;  %v9369_v12 = vld [vmem:[%s9669_s30 + $0x10c] ss:$100 sps:$4 sm:$0xff]  }
 0x22a   : > { %5602 = vmatmul.mubr.bf16.gmra.mrb[248].mxu0 %v9335_v53  ;;  %v7975_v17 = vpop.f32.mrb[143].mxu1 }
 0x22b   : > { %v5197_v27 = vadd.f32 %v7864_v8, %v10440_v20  ;;  %5609 = vmatprep.mubr.bf16.mxu0 %v9346_v57  ;;  %v10692_v29 = vadd.f32 %v7973_v59, %v5194_v0  ;;  %v7976_v34 = vadd.f32 %v7975_v17, %v7974_v31  ;;  %v9443_v31 = vld [vmem:[%s11397_s0 + $0x548] sm:$0xff]  }
 0x22c   : > { %5763 = vmatmul.mubr.bf16.gmra.mrb[248].mxu1 %v9340_v9 }
 0x22d   : > { %v7865_v26 = vpop.f32.mrb[144].mxu0  ;;  %v10694_v41 = vadd.f32 %v7976_v34, %v5197_v27  ;;  %5770 = vmatprep.mubr.bf16.mxu1 %v9351_v16  ;;  %v9364_v34 = vld [vmem:[%s9669_s30 + $0x48] ss:$100 sps:$4 sm:$0xff]  }
 0x22e   : > { %v7866_v28 = vpop.f32.mrb[145].mxu0 }
 0x22f   : > { %v7867_v25 = vadd.f32 %v7866_v28, %v7865_v26  ;;  %v7868_v35 = vpop.f32.mrb[146].mxu0  ;;  %v7977_v55 = vpop.f32.mrb[144].mxu1 }
 0x230   : > { %v7869_v49 = vpop.f32.mrb[147].mxu0  ;;  %v7978_v50 = vpop.f32.mrb[145].mxu1 }
 0x231   : > { %v7870_v20 = vadd.f32 %v7869_v49, %v7868_v35  ;;  %v5202_v45 = vadd.f32 %v7867_v25, %v10446_v5  ;;  %v7979_v2 = vadd.f32 %v7978_v50, %v7977_v55  ;;  %v7980_v54 = vpop.f32.mrb[146].mxu1  ;;  %v9442_v25 = vld [vmem:[%s11397_s0 + $0x580] sm:$0xff]   ;;  %v9445_v55 = vld [vmem:[%s11397_s0 + $0x5c8] sm:$0xff]  }
 0x232   : > { %5610 = vmatmul.mubr.bf16.gmra.mrb[252].mxu0 %v9349_v24  ;;  %v7981_v53 = vpop.f32.mrb[147].mxu1  ;;  %v9372_v24 = vld [vmem:[%s9669_s30 + $0x114] ss:$100 sps:$4 sm:$0xff]  }
 0x233   : > { %v5205_v60 = vadd.f32 %v7870_v20, %v10450_v11  ;;  %5811 = vmatprep.mubr.bf16.mxu0 %v9362_v46  ;;  %v10702_v6 = vadd.f32 %v7979_v2, %v5202_v45  ;;  %v7982_v62 = vadd.f32 %v7981_v53, %v7980_v54  ;;  %v9440_v11 = vld [vmem:[%s11397_s0 + $0x500] sm:$0xff]   ;;  %v9367_v2 = vld [vmem:[%s9669_s30 + $0x108] ss:$100 sps:$4 sm:$0xff]   ;;  %v9375_v53 = vld [vmem:[%s9669_s30 + $0x1d4] ss:$100 sps:$4 sm:$0xff]  }
 0x234   : > { %5771 = vmatmul.mubr.bf16.gmra.mrb[252].mxu1 %v9354_v47  ;;  %v9449_v54 = vld [vmem:[%s11397_s0 + $0x588] sm:$0xff]  }
 0x235   : > { %v7871_v57 = vpop.f32.mrb[148].mxu0  ;;  %v10704_v44 = vadd.f32 %v7982_v62, %v5205_v60  ;;  %5972 = vmatprep.mubr.bf16.mxu1 %v9366_v32  ;;  %v9454_v62 = vld [vmem:[%s11397_s0 + $0x510] sm:$0xff]  }
 0x236   : > { %v7872_v5 = vpop.f32.mrb[149].mxu0 }
 0x237   : > { %v7873_v8 = vadd.f32 %v7872_v5, %v7871_v57  ;;  %v7874_v0 = vpop.f32.mrb[150].mxu0  ;;  %v7983_v9 = vpop.f32.mrb[148].mxu1 }
 0x238   : > { %v7875_v59 = vpop.f32.mrb[151].mxu0  ;;  %v7984_v17 = vpop.f32.mrb[149].mxu1 }
 0x239   : > { %v7876_v16 = vadd.f32 %v7875_v59, %v7874_v0  ;;  %v5210_v27 = vadd.f32 %v7873_v8, %v10474_v51  ;;  %v7985_v26 = vadd.f32 %v7984_v17, %v7983_v9  ;;  %v7986_v28 = vpop.f32.mrb[150].mxu1  ;;  %v9444_v51 = vld [vmem:[%s11397_s0 + $0x508] sm:$0xff]   ;;  %v9457_v8 = vld [vmem:[%s11397_s0 + $0x558] sm:$0xff]   ;;  %v9370_v9 = vld [vmem:[%s9669_s30 + $0x110] ss:$100 sps:$4 sm:$0xff]  }
 0x23a   : > { %5812 = vmatmul.mubr.bf16.vlgmr.msra.gmra.mrb[0].mxu0 %v9360_v14  ;;  %v7987_v46 = vpop.f32.mrb[151].mxu1  ;;  %v9455_v14 = vld [vmem:[%s11397_s0 + $0x5d0] sm:$0xff]  }
 0x23b   : > { %v5213_v35 = vadd.f32 %v7876_v16, %v10478_v56  ;;  %5819 = vmatprep.mubr.bf16.mxu0 %v9369_v12  ;;  %8498 = vmatpush3.bf16.msra.mxu0 %v9440_v11  ;;  %v10727_v49 = vadd.f32 %v7985_v26, %v5210_v27  ;;  %v7988_v20 = vadd.f32 %v7987_v46, %v7986_v28  ;;  %v9450_v56 = vld [vmem:[%s11397_s0 + $0x550] sm:$0xff]   ;;  %v9378_v16 = vld [vmem:[%s9669_s30 + $0x1dc] ss:$100 sps:$4 sm:$0xff]  }
 0x23c   : > { %8499 = vmatprep.subr.bf16.mxu0 %v9443_v31  ;;  %5973 = vmatmul.mubr.bf16.vlgmr.msra.gmra.mrb[0].mxu1 %v9364_v34  ;;  %v9456_v27 = vld [vmem:[%s11397_s0 + $0x590] sm:$0xff]   ;;  %v9459_v26 = vld [vmem:[%s11397_s0 + $0x5d8] sm:$0xff]  }
 0x23d   : > { %v7877_v45 = vpop.f32.mrb[152].mxu0  ;;  %v10732_v50 = vadd.f32 %v7988_v20, %v5213_v35  ;;  %5980 = vmatprep.mubr.bf16.mxu1 %v9372_v24  ;;  %8610 = vmatpush3.bf16.msra.mxu1 %v9442_v25 }
 0x23e   : > { %v7878_v47 = vpop.f32.mrb[153].mxu0  ;;  %8611 = vmatprep.subr.bf16.mxu1 %v9445_v55  ;;  %v9463_v55 = vld [vmem:[%s11397_s0 + $0x598] sm:$0xff]  }
 0x23f   : > { %v7879_v32 = vadd.f32 %v7878_v47, %v7877_v45  ;;  %v7880_v60 = vpop.f32.mrb[154].mxu0  ;;  %8500 = vmatpush3.bf16.msra.mxu0 %v9444_v51  ;;  %v7989_v57 = vpop.f32.mrb[152].mxu1  ;;  %v9373_v51 = vld [vmem:[%s9669_s30 + $0x1d0] ss:$100 sps:$4 sm:$0xff]   ;;  %v9381_v45 = vld [vmem:[%s9669_s30 + $0x29c] ss:$100 sps:$4 sm:$0xff]  }
 0x240   : > { %v7881_v5 = vpop.f32.mrb[155].mxu0  ;;  %8501 = vmatprep.subr.bf16.mxu0 %v9450_v56  ;;  %v7990_v11 = vpop.f32.mrb[153].mxu1  ;;  %v9468_v47 = vld [vmem:[%s11397_s0 + $0x520] sm:$0xff]  }
 0x241   : > { %v7882_v0 = vadd.f32 %v7881_v5, %v7880_v60  ;;  %v5218_v12 = vadd.f32 %v7879_v32, %v10505_v40  ;;  %v7991_v59 = vadd.f32 %v7990_v11, %v7989_v57  ;;  %v7992_v31 = vpop.f32.mrb[154].mxu1  ;;  %8612 = vmatpush3.bf16.msra.mxu1 %v9449_v54  ;;  %v9458_v40 = vld [vmem:[%s11397_s0 + $0x518] sm:$0xff]   ;;  %v9469_v32 = vld [vmem:[%s11397_s0 + $0x5e0] sm:$0xff]   ;;  %v9471_v60 = vld [vmem:[%s11397_s0 + $0x568] sm:$0xff]  }
 0x242   : > { %5820 = vmatmul.mubr.bf16.gmra.mrb[4].mxu0 %v9367_v2  ;;  %v7993_v34 = vpop.f32.mrb[155].mxu1  ;;  %8613 = vmatprep.subr.bf16.mxu1 %v9455_v14  ;;  %v9376_v5 = vld [vmem:[%s9669_s30 + $0x1d8] ss:$100 sps:$4 sm:$0xff]  }
 0x243   : > { %v5221_v17 = vadd.f32 %v7882_v0, %v10510_v36  ;;  %5827 = vmatprep.mubr.bf16.mxu0 %v9375_v53  ;;  %8502 = vmatpush3.bf16.msra.mxu0 %v9454_v62  ;;  %v10761_v28 = vadd.f32 %v7991_v59, %v5218_v12  ;;  %v7994_v24 = vadd.f32 %v7993_v34, %v7992_v31  ;;  %v9464_v36 = vld [vmem:[%s11397_s0 + $0x560] sm:$0xff]   ;;  %v9473_v59 = vld [vmem:[%s11397_s0 + $0x5e8] sm:$0xff]  }
 0x244   : > { %8503 = vmatprep.subr.bf16.mxu0 %v9457_v8  ;;  %5981 = vmatmul.mubr.bf16.gmra.mrb[4].mxu1 %v9370_v9  ;;  %v9384_v0 = vld [vmem:[%s9669_s30 + $0x2a4] ss:$100 sps:$4 sm:$0xff]  }
 0x245   : > { %v7883_v25 = vpop.f32.mrb[156].mxu0  ;;  %v10766_v35 = vadd.f32 %v7994_v24, %v5221_v17  ;;  %5988 = vmatprep.mubr.bf16.mxu1 %v9378_v16  ;;  %8614 = vmatpush3.bf16.msra.mxu1 %v9456_v27  ;;  %v9470_v12 = vld [vmem:[%s11397_s0 + $0x5a0] sm:$0xff]  }
 0x246   : > { %v7884_v46 = vpop.f32.mrb[157].mxu0  ;;  %8615 = vmatprep.subr.bf16.mxu1 %v9459_v26  ;;  %v9477_v26 = vld [vmem:[%s11397_s0 + $0x5a8] sm:$0xff]  }
 0x247   : > { %v7885_v20 = vadd.f32 %v7884_v46, %v7883_v25  ;;  %v7886_v56 = vpop.f32.mrb[158].mxu0  ;;  %8504 = vmatpush3.bf16.msra.mxu0 %v9458_v40  ;;  %v7995_v2 = vpop.f32.mrb[156].mxu1  ;;  %v9379_v40 = vld [vmem:[%s9669_s30 + $0x298] ss:$100 sps:$4 sm:$0xff]   ;;  %v9387_v25 = vld [vmem:[%s9669_s30 + $0x364] ss:$100 sps:$4 sm:$0xff]  }
 0x248   : > { %v7887_v54 = vpop.f32.mrb[159].mxu0  ;;  %8505 = vmatprep.subr.bf16.mxu0 %v9464_v36  ;;  %v7996_v57 = vpop.f32.mrb[157].mxu1  ;;  %v9482_v46 = vld [vmem:[%s11397_s0 + $0x530] sm:$0xff]  }
 0x249   : > { %v7888_v53 = vadd.f32 %v7887_v54, %v7886_v56  ;;  %v5226_v62 = vadd.f32 %v7885_v20, %v10539_v22  ;;  %v7997_v14 = vadd.f32 %v7996_v57, %v7995_v2  ;;  %v7998_v8 = vpop.f32.mrb[158].mxu1  ;;  %8616 = vmatpush3.bf16.msra.mxu1 %v9463_v55  ;;  %v9472_v22 = vld [vmem:[%s11397_s0 + $0x528] sm:$0xff]   ;;  %v9483_v20 = vld [vmem:[%s11397_s0 + $0x5f0] sm:$0xff]   ;;  %v9485_v56 = vld [vmem:[%s11397_s0 + $0x578] sm:$0xff]  }
 0x24a   : > { %5828 = vmatmul.mubr.bf16.gmra.mrb[8].mxu0 %v9373_v51  ;;  %v7999_v9 = vpop.f32.mrb[159].mxu1  ;;  %8617 = vmatprep.subr.bf16.mxu1 %v9469_v32  ;;  %v9382_v54 = vld [vmem:[%s9669_s30 + $0x2a0] ss:$100 sps:$4 sm:$0xff]  }
 0x24b   : > { %v5229_v11 = vadd.f32 %v7888_v53, %v10544_v48  ;;  %5835 = vmatprep.mubr.bf16.mxu0 %v9381_v45  ;;  %8506 = vmatpush3.bf16.msra.mxu0 %v9468_v47  ;;  %v10795_v31 = vadd.f32 %v7997_v14, %v5226_v62  ;;  %v8000_v16 = vadd.f32 %v7999_v9, %v7998_v8  ;;  %v9478_v48 = vld [vmem:[%s11397_s0 + $0x570] sm:$0xff]   ;;  %v9487_v14 = vld [vmem:[%s11397_s0 + $0x5f8] sm:$0xff]   ;;  %v9385_v9 = vld [vmem:[%s9669_s30 + $0x360] ss:$100 sps:$4 sm:$0xff]  }
 0x24c   : > { %8507 = vmatprep.subr.bf16.mxu0 %v9471_v60  ;;  %5989 = vmatmul.mubr.bf16.gmra.mrb[8].mxu1 %v9376_v5  ;;  %v9390_v53 = vld [vmem:[%s9669_s30 + $0x36c] ss:$100 sps:$4 sm:$0xff]  }
 0x24d   : > { %v7889_v27 = vpop.f32.mrb[160].mxu0  ;;  %v10800_v17 = vadd.f32 %v8000_v16, %v5229_v11  ;;  %5996 = vmatprep.mubr.bf16.mxu1 %v9384_v0  ;;  %8618 = vmatpush3.bf16.msra.mxu1 %v9470_v12  ;;  %v9484_v62 = vld [vmem:[%s11397_s0 + $0x5b0] sm:$0xff]  }
 0x24e   : > { %v7890_v34 = vpop.f32.mrb[161].mxu0  ;;  %8619 = vmatprep.subr.bf16.mxu1 %v9473_v59 }
 0x24f   : > { %v7891_v24 = vadd.f32 %v7890_v34, %v7889_v27  ;;  %v7892_v36 = vpop.f32.mrb[162].mxu0  ;;  %8508 = vmatpush3.bf16.msra.mxu0 %v9472_v22  ;;  %v8001_v51 = vpop.f32.mrb[160].mxu1  ;;  %v9491_v22 = vld [vmem:[%s11397_s0 + $0x5b8] sm:$0xff]  }
 0x250   : > { %v7893_v55 = vpop.f32.mrb[163].mxu0  ;;  %8509 = vmatprep.subr.bf16.mxu0 %v9478_v48  ;;  %v8002_v2 = vpop.f32.mrb[161].mxu1  ;;  %v9393_v48 = vld [vmem:[%s9669_s30 + $0x42c] ss:$100 sps:$4 sm:$0xff]  }
 0x251   : > { %v5234_v45 = vadd.f32 %v7891_v24, %v10573_v37  ;;  %v7894_v47 = vadd.f32 %v7893_v55, %v7892_v36  ;;  %v8003_v32 = vadd.f32 %v8002_v2, %v8001_v51  ;;  %v8004_v60 = vpop.f32.mrb[162].mxu1  ;;  %8620 = vmatpush3.bf16.msra.mxu1 %v9477_v26  ;;  %v9486_v37 = vld [vmem:[%s11397_s0 + $0x538] sm:$0xff]   ;;  %v9388_v36 = vld [vmem:[%s9669_s30 + $0x368] ss:$100 sps:$4 sm:$0xff]  }
 0x252   : > { %5836 = vmatmul.mubr.bf16.gmra.mrb[12].mxu0 %v9379_v40  ;;  %v8005_v5 = vpop.f32.mrb[163].mxu1  ;;  %8621 = vmatprep.subr.bf16.mxu1 %v9483_v20  ;;  %v9396_v51 = vld [vmem:[%s9669_s30 + $0x434] ss:$100 sps:$4 sm:$0xff]  }
 0x253   : > { %v5237_v57 = vadd.f32 %v7894_v47, %v10579_v19  ;;  %5843 = vmatprep.mubr.bf16.mxu0 %v9387_v25  ;;  %8510 = vmatpush3.bf16.msra.mxu0 %v9482_v46  ;;  %v10829_v8 = vadd.f32 %v8003_v32, %v5234_v45  ;;  %v8006_v0 = vadd.f32 %v8005_v5, %v8004_v60 }
 0x254   : > { %8511 = vmatprep.subr.bf16.mxu0 %v9485_v56  ;;  %5997 = vmatmul.mubr.bf16.gmra.mrb[12].mxu1 %v9382_v54  ;;  %v9391_v54 = vld [vmem:[%s9669_s30 + $0x428] ss:$100 sps:$4 sm:$0xff]  }
 0x255   : > { %v7895_v12 = vpop.f32.mrb[164].mxu0  ;;  %v10831_v19 = vadd.f32 %v8006_v0, %v5237_v57  ;;  %6004 = vmatprep.mubr.bf16.mxu1 %v9390_v53  ;;  %8622 = vmatpush3.bf16.msra.mxu1 %v9484_v62  ;;  %v9399_v53 = vld [vmem:[%s9669_s30 + $0x4f4] ss:$100 sps:$4 sm:$0xff]  }
 0x256   : > { %v7896_v11 = vpop.f32.mrb[165].mxu0  ;;  %8623 = vmatprep.subr.bf16.mxu1 %v9487_v14  ;;  %v9394_v14 = vld [vmem:[%s9669_s30 + $0x430] ss:$100 sps:$4 sm:$0xff]  }
 0x257   : > { %v7897_v59 = vadd.f32 %v7896_v11, %v7895_v12  ;;  %v7898_v16 = vpop.f32.mrb[166].mxu0  ;;  %8512 = vmatpush3.bf16.msra.mxu0 %v9486_v37  ;;  %v8007_v27 = vpop.f32.mrb[164].mxu1  ;;  %v9402_v11 = vld [vmem:[%s9669_s30 + $0x4fc] ss:$100 sps:$4 sm:$0xff]  }
 0x258   : > { %v7899_v34 = vpop.f32.mrb[167].mxu0  ;;  %v8008_v24 = vpop.f32.mrb[165].mxu1 }
 0x259   : > { %v5242_v40 = vadd.f32 %v7897_v59, %v10586_v15  ;;  %v7900_v26 = vadd.f32 %v7899_v34, %v7898_v16  ;;  %v8009_v25 = vadd.f32 %v8008_v24, %v8007_v27  ;;  %v8010_v46 = vpop.f32.mrb[166].mxu1  ;;  %8624 = vmatpush3.bf16.msra.mxu1 %v9491_v22  ;;  %v9397_v34 = vld [vmem:[%s9669_s30 + $0x4f0] ss:$100 sps:$4 sm:$0xff]   ;;  %v9405_v24 = vld [vmem:[%s9669_s30 + $0x5bc] ss:$100 sps:$4 sm:$0xff]  }
 0x25a   : > { %5844 = vmatmul.mubr.bf16.gmra.mrb[16].mxu0 %v9385_v9  ;;  %v8011_v20 = vpop.f32.mrb[167].mxu1 }
 0x25b   : > { %v5245_v55 = vadd.f32 %v7900_v26, %v10589_v61  ;;  %5851 = vmatprep.mubr.bf16.mxu0 %v9393_v48  ;;  %v10842_v56 = vadd.f32 %v8009_v25, %v5242_v40  ;;  %v8012_v45 = vadd.f32 %v8011_v20, %v8010_v46 }
 0x25c   : > { %6005 = vmatmul.mubr.bf16.gmra.mrb[16].mxu1 %v9388_v36 }
 0x25d   : > { %v7901_v15 = vpop.f32.mrb[168].mxu0  ;;  %v10844_v47 = vadd.f32 %v8012_v45, %v5245_v55  ;;  %6012 = vmatprep.mubr.bf16.mxu1 %v9396_v51  ;;  %v9400_v55 = vld [vmem:[%s9669_s30 + $0x4f8] ss:$100 sps:$4 sm:$0xff]  }
 0x25e   : > { %v7902_v2 = vpop.f32.mrb[169].mxu0 }
 0x25f   : > { %v7903_v32 = vadd.f32 %v7902_v2, %v7901_v15  ;;  %v7904_v60 = vpop.f32.mrb[170].mxu0  ;;  %v8013_v62 = vpop.f32.mrb[168].mxu1  ;;  %v9408_v15 = vld [vmem:[%s9669_s30 + $0x5c4] ss:$100 sps:$4 sm:$0xff]  }
 0x260   : > { %v7905_v57 = vpop.f32.mrb[171].mxu0  ;;  %v8014_v37 = vpop.f32.mrb[169].mxu1 }
 0x261   : > { %v5250_v61 = vadd.f32 %v7903_v32, %v10596_v23  ;;  %v7906_v5 = vadd.f32 %v7905_v57, %v7904_v60  ;;  %v8015_v0 = vadd.f32 %v8014_v37, %v8013_v62  ;;  %v8016_v12 = vpop.f32.mrb[170].mxu1  ;;  %v9403_v57 = vld [vmem:[%s9669_s30 + $0x5b8] ss:$100 sps:$4 sm:$0xff]   ;;  %v9411_v37 = vld [vmem:[%s9669_s30 + $0x684] ss:$100 sps:$4 sm:$0xff]  }
 0x262   : > { %5852 = vmatmul.mubr.bf16.gmra.mrb[20].mxu0 %v9391_v54  ;;  %v8017_v22 = vpop.f32.mrb[171].mxu1 }
 0x263   : > { %v5253_v9 = vadd.f32 %v7906_v5, %v10599_v30  ;;  %5859 = vmatprep.mubr.bf16.mxu0 %v9399_v53  ;;  %v10852_v59 = vadd.f32 %v8015_v0, %v5250_v61  ;;  %v8018_v16 = vadd.f32 %v8017_v22, %v8016_v12 }
 0x264   : > { %6013 = vmatmul.mubr.bf16.gmra.mrb[20].mxu1 %v9394_v14 }
 0x265   : > { %v7907_v48 = vpop.f32.mrb[172].mxu0  ;;  %v10854_v23 = vadd.f32 %v8018_v16, %v5253_v9  ;;  %6020 = vmatprep.mubr.bf16.mxu1 %v9402_v11  ;;  %v9406_v9 = vld [vmem:[%s9669_s30 + $0x5c0] ss:$100 sps:$4 sm:$0xff]  }
 0x266   : > { %v7908_v27 = vpop.f32.mrb[173].mxu0 }
 0x267   : > { %v7909_v40 = vadd.f32 %v7908_v27, %v7907_v48  ;;  %v7910_v26 = vpop.f32.mrb[174].mxu0  ;;  %v8019_v36 = vpop.f32.mrb[172].mxu1  ;;  %v9414_v48 = vld [vmem:[%s9669_s30 + $0x68c] ss:$100 sps:$4 sm:$0xff]  }
 0x268   : > { %v7911_v25 = vpop.f32.mrb[175].mxu0  ;;  %v8020_v51 = vpop.f32.mrb[173].mxu1 }
 0x269   : > { %v5258_v30 = vadd.f32 %v7909_v40, %v10606_v21  ;;  %v7912_v46 = vadd.f32 %v7911_v25, %v7910_v26  ;;  %v8021_v20 = vadd.f32 %v8020_v51, %v8019_v36  ;;  %v8022_v45 = vpop.f32.mrb[174].mxu1  ;;  %v9409_v25 = vld [vmem:[%s9669_s30 + $0x680] ss:$100 sps:$4 sm:$0xff]   ;;  %v9417_v51 = vld [vmem:[%s9669_s30 + $0x74c] ss:$100 sps:$4 sm:$0xff]  }
 0x26a   : > { %5860 = vmatmul.mubr.bf16.gmra.mrb[24].mxu0 %v9397_v34  ;;  %v8023_v54 = vpop.f32.mrb[175].mxu1 }
 0x26b   : > { %v5261_v2 = vadd.f32 %v7912_v46, %v10609_v18  ;;  %5867 = vmatprep.mubr.bf16.mxu0 %v9405_v24  ;;  %v10862_v32 = vadd.f32 %v8021_v20, %v5258_v30  ;;  %v8024_v60 = vadd.f32 %v8023_v54, %v8022_v45 }
 0x26c   : > { %6021 = vmatmul.mubr.bf16.gmra.mrb[24].mxu1 %v9400_v55 }
 0x26d   : > { %v7913_v53 = vpop.f32.mrb[176].mxu0  ;;  %v10864_v21 = vadd.f32 %v8024_v60, %v5261_v2  ;;  %6028 = vmatprep.mubr.bf16.mxu1 %v9408_v15  ;;  %v9412_v2 = vld [vmem:[%s9669_s30 + $0x688] ss:$100 sps:$4 sm:$0xff]  }
 0x26e   : > { %v7914_v62 = vpop.f32.mrb[177].mxu0 }
 0x26f   : > { %v7915_v61 = vadd.f32 %v7914_v62, %v7913_v53  ;;  %v7916_v5 = vpop.f32.mrb[178].mxu0  ;;  %v8025_v14 = vpop.f32.mrb[176].mxu1  ;;  %v9420_v53 = vld [vmem:[%s9669_s30 + $0x754] ss:$100 sps:$4 sm:$0xff]  }
 0x270   : > { %v7917_v0 = vpop.f32.mrb[179].mxu0  ;;  %v8026_v11 = vpop.f32.mrb[177].mxu1 }
 0x271   : > { %v5266_v18 = vadd.f32 %v7915_v61, %v10616_v33  ;;  %v7918_v12 = vadd.f32 %v7917_v0, %v7916_v5  ;;  %v8027_v22 = vadd.f32 %v8026_v11, %v8025_v14  ;;  %v8028_v16 = vpop.f32.mrb[178].mxu1  ;;  %v9415_v0 = vld [vmem:[%s9669_s30 + $0x748] ss:$100 sps:$4 sm:$0xff]   ;;  %v9423_v11 = vld [vmem:[%s9669_s30 + $0x814] ss:$100 sps:$4 sm:$0xff]  }
 0x272   : > { %5868 = vmatmul.mubr.bf16.gmra.mrb[28].mxu0 %v9403_v57  ;;  %v8029_v34 = vpop.f32.mrb[179].mxu1 }
 0x273   : > { %v5269_v27 = vadd.f32 %v7918_v12, %v10619_v39  ;;  %5875 = vmatprep.mubr.bf16.mxu0 %v9411_v37  ;;  %v10872_v40 = vadd.f32 %v8027_v22, %v5266_v18  ;;  %v8030_v26 = vadd.f32 %v8029_v34, %v8028_v16 }
 0x274   : > { %6029 = vmatmul.mubr.bf16.gmra.mrb[28].mxu1 %v9406_v9 }
 0x275   : > { %v7919_v24 = vpop.f32.mrb[180].mxu0  ;;  %v10874_v33 = vadd.f32 %v8030_v26, %v5269_v27  ;;  %6036 = vmatprep.mubr.bf16.mxu1 %v9414_v48  ;;  %v9418_v27 = vld [vmem:[%s9669_s30 + $0x750] ss:$100 sps:$4 sm:$0xff]  }
 0x276   : > { %v7920_v36 = vpop.f32.mrb[181].mxu0 }
 0x277   : > { %v7921_v30 = vadd.f32 %v7920_v36, %v7919_v24  ;;  %v7922_v46 = vpop.f32.mrb[182].mxu0  ;;  %v8031_v55 = vpop.f32.mrb[180].mxu1  ;;  %v9426_v24 = vld [vmem:[%s9669_s30 + $0x81c] ss:$100 sps:$4 sm:$0xff]  }
 0x278   : > { %v7923_v20 = vpop.f32.mrb[183].mxu0  ;;  %v8032_v15 = vpop.f32.mrb[181].mxu1 }
 0x279   : > { %v5274_v39 = vadd.f32 %v7921_v30, %v10626_v4  ;;  %v7924_v45 = vadd.f32 %v7923_v20, %v7922_v46  ;;  %v8033_v54 = vadd.f32 %v8032_v15, %v8031_v55  ;;  %v8034_v60 = vpop.f32.mrb[182].mxu1  ;;  %v9421_v20 = vld [vmem:[%s9669_s30 + $0x810] ss:$100 sps:$4 sm:$0xff]   ;;  %v9429_v15 = vld [vmem:[%s9669_s30 + $0x8dc] ss:$100 sps:$4 sm:$0xff]  }
 0x27a   : > { %5876 = vmatmul.mubr.bf16.gmra.mrb[32].mxu0 %v9409_v25  ;;  %v8035_v57 = vpop.f32.mrb[183].mxu1 }
 0x27b   : > { %v5277_v62 = vadd.f32 %v7924_v45, %v10629_v13  ;;  %5883 = vmatprep.mubr.bf16.mxu0 %v9417_v51  ;;  %v10882_v61 = vadd.f32 %v8033_v54, %v5274_v39  ;;  %v8036_v5 = vadd.f32 %v8035_v57, %v8034_v60 }
 0x27c   : > { %6037 = vmatmul.mubr.bf16.gmra.mrb[32].mxu1 %v9412_v2 }
 0x27d   : > { %v7925_v37 = vpop.f32.mrb[184].mxu0  ;;  %v10884_v4 = vadd.f32 %v8036_v5, %v5277_v62  ;;  %6044 = vmatprep.mubr.bf16.mxu1 %v9420_v53  ;;  %v9424_v62 = vld [vmem:[%s9669_s30 + $0x818] ss:$100 sps:$4 sm:$0xff]  }
 0x27e   : > { %v7926_v14 = vpop.f32.mrb[185].mxu0 }
 0x27f   : > { %v7927_v18 = vadd.f32 %v7926_v14, %v7925_v37  ;;  %v7928_v12 = vpop.f32.mrb[186].mxu0  ;;  %v8037_v9 = vpop.f32.mrb[184].mxu1  ;;  %v9432_v37 = vld [vmem:[%s9669_s30 + $0x8e4] ss:$100 sps:$4 sm:$0xff]  }
 0x280   : > { %v7929_v22 = vpop.f32.mrb[187].mxu0  ;;  %v8038_v48 = vpop.f32.mrb[185].mxu1 }
 0x281   : > { %v5282_v13 = vadd.f32 %v7927_v18, %v10636_v3  ;;  %v7930_v16 = vadd.f32 %v7929_v22, %v7928_v12  ;;  %v8039_v34 = vadd.f32 %v8038_v48, %v8037_v9  ;;  %v8040_v26 = vpop.f32.mrb[186].mxu1  ;;  %v9427_v22 = vld [vmem:[%s9669_s30 + $0x8d8] ss:$100 sps:$4 sm:$0xff]   ;;  %v9435_v48 = vld [vmem:[%s9669_s30 + $0x9a4] ss:$100 sps:$4 sm:$0xff]  }
 0x282   : > { %5884 = vmatmul.mubr.bf16.gmra.mrb[36].mxu0 %v9415_v0  ;;  %v8041_v25 = vpop.f32.mrb[187].mxu1 }
 0x283   : > { %v5285_v36 = vadd.f32 %v7930_v16, %v10639_v38  ;;  %5891 = vmatprep.mubr.bf16.mxu0 %v9423_v11  ;;  %v10892_v30 = vadd.f32 %v8039_v34, %v5282_v13  ;;  %v8042_v46 = vadd.f32 %v8041_v25, %v8040_v26 }
 0x284   : > { %6045 = vmatmul.mubr.bf16.gmra.mrb[36].mxu1 %v9418_v27 }
 0x285   : > { %v7931_v51 = vpop.f32.mrb[188].mxu0  ;;  %v10894_v3 = vadd.f32 %v8042_v46, %v5285_v36  ;;  %6052 = vmatprep.mubr.bf16.mxu1 %v9426_v24  ;;  %v9430_v36 = vld [vmem:[%s9669_s30 + $0x8e0] ss:$100 sps:$4 sm:$0xff]  }
 0x286   : > { %v7932_v55 = vpop.f32.mrb[189].mxu0 }
 0x287   : > { %v7933_v39 = vadd.f32 %v7932_v55, %v7931_v51  ;;  %v7934_v45 = vpop.f32.mrb[190].mxu0  ;;  %v8043_v2 = vpop.f32.mrb[188].mxu1  ;;  %v9439_v51 = vld [vmem:[%s9669_s30 + $0x9ac] ss:$100 sps:$4 sm:$0xff]  }
 0x288   : > { %v7935_v54 = vpop.f32.mrb[191].mxu0  ;;  %v8044_v53 = vpop.f32.mrb[189].mxu1 }
 0x289   : > { %v5290_v38 = vadd.f32 %v7933_v39, %v10646_v63  ;;  %v7936_v60 = vadd.f32 %v7935_v54, %v7934_v45  ;;  %v8045_v57 = vadd.f32 %v8044_v53, %v8043_v2  ;;  %v8046_v5 = vpop.f32.mrb[190].mxu1  ;;  %v9433_v54 = vld [vmem:[%s9669_s30 + $0x9a0] ss:$100 sps:$4 sm:$0xff]   ;;  %v9448_v53 = vld [vmem:[%s9669_s30 + $0xa6c] ss:$100 sps:$4 sm:$0xff]  }
 0x28a   : > { %5892 = vmatmul.mubr.bf16.gmra.mrb[40].mxu0 %v9421_v20  ;;  %v8047_v0 = vpop.f32.mrb[191].mxu1 }
 0x28b   : > { %v5293_v14 = vadd.f32 %v7936_v60, %v10649_v7  ;;  %5899 = vmatprep.mubr.bf16.mxu0 %v9429_v15  ;;  %v10902_v18 = vadd.f32 %v8045_v57, %v5290_v38  ;;  %v8048_v12 = vadd.f32 %v8047_v0, %v8046_v5 }
 0x28c   : > { %6053 = vmatmul.mubr.bf16.gmra.mrb[40].mxu1 %v9424_v62 }
 0x28d   : > { %v8065_v11 = vpop.f32.mrb[192].mxu0  ;;  %v10904_v63 = vadd.f32 %v8048_v12, %v5293_v14  ;;  %6060 = vmatprep.mubr.bf16.mxu1 %v9432_v37  ;;  %v9437_v14 = vld [vmem:[%s9669_s30 + $0x9a8] ss:$100 sps:$4 sm:$0xff]  }
 0x28e   : > { %v8066_v9 = vpop.f32.mrb[193].mxu0 }
 0x28f   : > { %v8067_v13 = vadd.f32 %v8066_v9, %v8065_v11  ;;  %v8068_v16 = vpop.f32.mrb[194].mxu0  ;;  %v8177_v27 = vpop.f32.mrb[192].mxu1  ;;  %v9453_v11 = vld [vmem:[%s9669_s30 + $0xa74] ss:$100 sps:$4 sm:$0xff]  }
 0x290   : > { %v8069_v34 = vpop.f32.mrb[195].mxu0  ;;  %v8178_v24 = vpop.f32.mrb[193].mxu1 }
 0x291   : > { %v5492_v7 = vadd.f32 %v8067_v13, %v10656_v42  ;;  %v8070_v26 = vadd.f32 %v8069_v34, %v8068_v16  ;;  %v8179_v25 = vadd.f32 %v8178_v24, %v8177_v27  ;;  %v8180_v46 = vpop.f32.mrb[194].mxu1  ;;  %v9446_v34 = vld [vmem:[%s9669_s30 + $0xa68] ss:$100 sps:$4 sm:$0xff]   ;;  %v9462_v24 = vld [vmem:[%s9669_s30 + $0xb34] ss:$100 sps:$4 sm:$0xff]  }
 0x292   : > { %5900 = vmatmul.mubr.bf16.gmra.mrb[44].mxu0 %v9427_v22  ;;  %v8181_v20 = vpop.f32.mrb[195].mxu1 }
 0x293   : > { %v5495_v55 = vadd.f32 %v8070_v26, %v10659_v58  ;;  %5907 = vmatprep.mubr.bf16.mxu0 %v9435_v48  ;;  %v10912_v39 = vadd.f32 %v8179_v25, %v5492_v7  ;;  %v8182_v45 = vadd.f32 %v8181_v20, %v8180_v46  ;;  %v10930_v7 = vld [vmem:[%s11397_s0 + $0x600] sm:$0xff]   ;;  %v9451_v20 = vld [vmem:[%s9669_s30 + $0xa70] ss:$100 sps:$4 sm:$0xff]  }
 0x294   : > { %6061 = vmatmul.mubr.bf16.gmra.mrb[44].mxu1 %v9430_v36  ;;  %8763 = vmatprep.subr.bf16.mxu0 %v10930_v7 }
 0x295   : > { %v8071_v15 = vpop.f32.mrb[196].mxu0  ;;  %v10914_v42 = vadd.f32 %v8182_v45, %v5495_v55  ;;  %6068 = vmatprep.mubr.bf16.mxu1 %v9439_v51 }
 0x296   : > { %v8072_v2 = vpop.f32.mrb[197].mxu0 }
 0x297   : > { %v8073_v38 = vadd.f32 %v8072_v2, %v8071_v15  ;;  %v8074_v60 = vpop.f32.mrb[198].mxu0  ;;  %v8183_v62 = vpop.f32.mrb[196].mxu1  ;;  %v9467_v2 = vld [vmem:[%s9669_s30 + $0xb3c] ss:$100 sps:$4 sm:$0xff]  }
 0x298   : > { %v8075_v57 = vpop.f32.mrb[199].mxu0  ;;  %v8184_v37 = vpop.f32.mrb[197].mxu1 }
 0x299   : > { %v5500_v58 = vadd.f32 %v8073_v38, %v10672_v43  ;;  %v8076_v5 = vadd.f32 %v8075_v57, %v8074_v60  ;;  %v8185_v0 = vadd.f32 %v8184_v37, %v8183_v62  ;;  %v8186_v12 = vpop.f32.mrb[198].mxu1 }
 0x29a   : > { %5908 = vmatmul.mubr.bf16.gmra.mrb[48].mxu0 %v9433_v54  ;;  %v8187_v22 = vpop.f32.mrb[199].mxu1 }
 0x29b   : > { %v5503_v9 = vadd.f32 %v8076_v5, %v10674_v52  ;;  %5915 = vmatprep.mubr.bf16.mxu0 %v9448_v53  ;;  %v10922_v13 = vadd.f32 %v8185_v0, %v5500_v58  ;;  %v8188_v16 = vadd.f32 %v8187_v22, %v8186_v12  ;;  %v9460_v58 = vld [vmem:[%s9669_s30 + $0xb30] ss:$100 sps:$4 sm:$0xff]   ;;  %v9465_v22 = vld [vmem:[%s9669_s30 + $0xb38] ss:$100 sps:$4 sm:$0xff]  }
 0x29c   : > { %6069 = vmatmul.mubr.bf16.gmra.mrb[48].mxu1 %v9437_v14  ;;  %v9476_v14 = vld [vmem:[%s9669_s30 + $0xbfc] ss:$100 sps:$4 sm:$0xff]  }
 0x29d   : > { %v8077_v48 = vpop.f32.mrb[200].mxu0  ;;  %v10924_v43 = vadd.f32 %v8188_v16, %v5503_v9  ;;  %6076 = vmatprep.mubr.bf16.mxu1 %v9453_v11 }
 0x29e   : > { %v8078_v27 = vpop.f32.mrb[201].mxu0 }
 0x29f   : > { %v8079_v52 = vadd.f32 %v8078_v27, %v8077_v48  ;;  %v8080_v26 = vpop.f32.mrb[202].mxu0  ;;  %v8189_v36 = vpop.f32.mrb[200].mxu1  ;;  %v9481_v27 = vld [vmem:[%s9669_s30 + $0xc04] ss:$100 sps:$4 sm:$0xff]  }
 0x2a0   : > { %v8081_v25 = vpop.f32.mrb[203].mxu0  ;;  %v8190_v55 = vpop.f32.mrb[201].mxu1 }
 0x2a1   : > { %v5508_v46 = vadd.f32 %v8079_v52, %v10682_v1  ;;  %v8082_v51 = vadd.f32 %v8081_v25, %v8080_v26  ;;  %v8191_v45 = vadd.f32 %v8190_v55, %v8189_v36  ;;  %v8192_v15 = vpop.f32.mrb[202].mxu1 }
 0x2a2   : > { %5916 = vmatmul.mubr.bf16.gmra.mrb[52].mxu0 %v9446_v34  ;;  %v8193_v38 = vpop.f32.mrb[203].mxu1 }
 0x2a3   : > { %v5511_v54 = vadd.f32 %v8082_v51, %v10684_v10  ;;  %5923 = vmatprep.mubr.bf16.mxu0 %v9462_v24  ;;  %v10938_v60 = vadd.f32 %v8191_v45, %v5508_v46  ;;  %v8194_v53 = vadd.f32 %v8193_v38, %v8192_v15  ;;  %v9474_v46 = vld [vmem:[%s9669_s30 + $0xbf8] ss:$100 sps:$4 sm:$0xff]   ;;  %v9479_v38 = vld [vmem:[%s9669_s30 + $0xc00] ss:$100 sps:$4 sm:$0xff]  }
 0x2a4   : > { %6077 = vmatmul.mubr.bf16.gmra.mrb[52].mxu1 %v9451_v20  ;;  %v9490_v20 = vld [vmem:[%s9669_s30 + $0x54] ss:$100 sps:$4 sm:$0xff]  }
 0x2a5   : > { %v8083_v62 = vpop.f32.mrb[204].mxu0  ;;  %v10940_v1 = vadd.f32 %v8194_v53, %v5511_v54  ;;  %6084 = vmatprep.mubr.bf16.mxu1 %v9467_v2 }
 0x2a6   : > { %v8084_v57 = vpop.f32.mrb[205].mxu0 }
 0x2a7   : > { %v8085_v5 = vadd.f32 %v8084_v57, %v8083_v62  ;;  %v8086_v37 = vpop.f32.mrb[206].mxu0  ;;  %v8195_v0 = vpop.f32.mrb[204].mxu1  ;;  %v9494_v57 = vld [vmem:[%s9669_s30 + $0x5c] ss:$100 sps:$4 sm:$0xff]  }
 0x2a8   : > { %v8087_v12 = vpop.f32.mrb[207].mxu0  ;;  %v8196_v9 = vpop.f32.mrb[205].mxu1 }
 0x2a9   : > { %v5516_v10 = vadd.f32 %v8085_v5, %v10692_v29  ;;  %v8088_v11 = vadd.f32 %v8087_v12, %v8086_v37  ;;  %v8197_v16 = vadd.f32 %v8196_v9, %v8195_v0  ;;  %v8198_v48 = vpop.f32.mrb[206].mxu1 }
 0x2aa   : > { %5924 = vmatmul.mubr.bf16.gmra.mrb[56].mxu0 %v9460_v58  ;;  %v8199_v52 = vpop.f32.mrb[207].mxu1 }
 0x2ab   : > { %v5519_v34 = vadd.f32 %v8088_v11, %v10694_v41  ;;  %5931 = vmatprep.mubr.bf16.mxu0 %v9476_v14  ;;  %v10948_v26 = vadd.f32 %v8197_v16, %v5516_v10  ;;  %v8200_v24 = vadd.f32 %v8199_v52, %v8198_v48  ;;  %v9488_v10 = vld [vmem:[%s9669_s30 + $0x50] ss:$100 sps:$4 sm:$0xff]  }
 0x2ac   : > { %6085 = vmatmul.mubr.bf16.gmra.mrb[56].mxu1 %v9465_v22  ;;  %v9497_v22 = vld [vmem:[%s9669_s30 + $0x11c] ss:$100 sps:$4 sm:$0xff]  }
 0x2ad   : > { %v8089_v36 = vpop.f32.mrb[208].mxu0  ;;  %v10950_v29 = vadd.f32 %v8200_v24, %v5519_v34  ;;  %6092 = vmatprep.mubr.bf16.mxu1 %v9481_v27  ;;  %v9492_v24 = vld [vmem:[%s9669_s30 + $0x58] ss:$100 sps:$4 sm:$0xff]  }
 0x2ae   : > { %v8090_v25 = vpop.f32.mrb[209].mxu0 }
 0x2af   : > { %v8091_v51 = vadd.f32 %v8090_v25, %v8089_v36  ;;  %v8092_v55 = vpop.f32.mrb[210].mxu0  ;;  %v8201_v45 = vpop.f32.mrb[208].mxu1 }
 0x2b0   : > { %v8093_v15 = vpop.f32.mrb[211].mxu0  ;;  %v8202_v54 = vpop.f32.mrb[209].mxu1 }
 0x2b1   : > { %v5524_v41 = vadd.f32 %v8091_v51, %v10702_v6  ;;  %v8094_v2 = vadd.f32 %v8093_v15, %v8092_v55  ;;  %v8203_v53 = vadd.f32 %v8202_v54, %v8201_v45  ;;  %v8204_v62 = vpop.f32.mrb[210].mxu1 }
 0x2b2   : > { %5932 = vmatmul.mubr.bf16.gmra.mrb[60].mxu0 %v9474_v46  ;;  %v8205_v5 = vpop.f32.mrb[211].mxu1  ;;  %v9500_v46 = vld [vmem:[%s9669_s30 + $0x124] ss:$100 sps:$4 sm:$0xff]  }
 0x2b3   : > { %v5527_v58 = vadd.f32 %v8094_v2, %v10704_v44  ;;  %6133 = vmatprep.mubr.bf16.mxu0 %v9490_v20  ;;  %v10958_v37 = vadd.f32 %v8203_v53, %v5524_v41  ;;  %v8206_v14 = vadd.f32 %v8205_v5, %v8204_v62  ;;  %v9580_v44 = vld [vmem:[%s11397_s0 + $0x608] sm:$0xff]  }
 0x2b4   : > { %6093 = vmatmul.mubr.bf16.gmra.mrb[60].mxu1 %v9479_v38 }
 0x2b5   : > { %v8095_v0 = vpop.f32.mrb[212].mxu0  ;;  %v10960_v6 = vadd.f32 %v8206_v14, %v5527_v58  ;;  %6294 = vmatprep.mubr.bf16.mxu1 %v9494_v57  ;;  %v9588_v57 = vld [vmem:[%s11397_s0 + $0x618] sm:$0xff]  }
 0x2b6   : > { %v8096_v12 = vpop.f32.mrb[213].mxu0 }
 0x2b7   : > { %v8097_v11 = vadd.f32 %v8096_v12, %v8095_v0  ;;  %v8098_v9 = vpop.f32.mrb[214].mxu0  ;;  %v8207_v16 = vpop.f32.mrb[212].mxu1  ;;  %v9498_v0 = vld [vmem:[%s9669_s30 + $0x120] ss:$100 sps:$4 sm:$0xff]  }
 0x2b8   : > { %v8099_v48 = vpop.f32.mrb[215].mxu0  ;;  %v8208_v52 = vpop.f32.mrb[213].mxu1 }
 0x2b9   : > { %v5532_v27 = vadd.f32 %v8097_v11, %v10727_v49  ;;  %v8100_v34 = vadd.f32 %v8099_v48, %v8098_v9  ;;  %v8209_v36 = vadd.f32 %v8208_v52, %v8207_v16  ;;  %v8210_v25 = vpop.f32.mrb[214].mxu1  ;;  %v9584_v49 = vld [vmem:[%s11397_s0 + $0x610] sm:$0xff]  }
 0x2ba   : > { %6134 = vmatmul.mubr.bf16.vlgmr.msra.gmra.mrb[64].mxu0 %v9488_v10  ;;  %v8211_v55 = vpop.f32.mrb[215].mxu1  ;;  %v9506_v11 = vld [vmem:[%s9669_s30 + $0x1ec] ss:$100 sps:$4 sm:$0xff]  }
 0x2bb   : > { %v5535_v51 = vadd.f32 %v8100_v34, %v10732_v50  ;;  %6141 = vmatprep.mubr.bf16.mxu0 %v9497_v22  ;;  %8764 = vmatpush3.bf16.msra.mxu0 %v10930_v7  ;;  %v10972_v20 = vadd.f32 %v8209_v36, %v5532_v27  ;;  %v8212_v45 = vadd.f32 %v8211_v55, %v8210_v25  ;;  %v9495_v50 = vld [vmem:[%s9669_s30 + $0x118] ss:$100 sps:$4 sm:$0xff]   ;;  %v9503_v7 = vld [vmem:[%s9669_s30 + $0x1e4] ss:$100 sps:$4 sm:$0xff]   ;;  %v9509_v36 = vld [vmem:[%s9669_s30 + $0x2ac] ss:$100 sps:$4 sm:$0xff]  }
 0x2bc   : > { %8765 = vmatprep.subr.bf16.mxu0 %v9580_v44  ;;  %6295 = vmatmul.mubr.bf16.vlgmr.msra.gmra.mrb[64].mxu1 %v9492_v24  ;;  %v9501_v34 = vld [vmem:[%s9669_s30 + $0x1e0] ss:$100 sps:$4 sm:$0xff]  }
 0x2bd   : > { %v8101_v15 = vpop.f32.mrb[216].mxu0  ;;  %v10977_v41 = vadd.f32 %v8212_v45, %v5535_v51  ;;  %6302 = vmatprep.mubr.bf16.mxu1 %v9500_v46  ;;  %v9504_v45 = vld [vmem:[%s9669_s30 + $0x1e8] ss:$100 sps:$4 sm:$0xff]  }
 0x2be   : > { %v8102_v2 = vpop.f32.mrb[217].mxu0 }
 0x2bf   : > { %v8103_v54 = vadd.f32 %v8102_v2, %v8101_v15  ;;  %v8104_v38 = vpop.f32.mrb[218].mxu0  ;;  %8766 = vmatpush3.bf16.msra.mxu0 %v9580_v44  ;;  %v8213_v53 = vpop.f32.mrb[216].mxu1  ;;  %v9512_v2 = vld [vmem:[%s9669_s30 + $0x2b4] ss:$100 sps:$4 sm:$0xff]  }
 0x2c0   : > { %v8105_v62 = vpop.f32.mrb[219].mxu0  ;;  %8767 = vmatprep.subr.bf16.mxu0 %v9584_v49  ;;  %v8214_v14 = vpop.f32.mrb[217].mxu1 }
 0x2c1   : > { %v5540_v58 = vadd.f32 %v8103_v54, %v10761_v28  ;;  %v8106_v5 = vadd.f32 %v8105_v62, %v8104_v38  ;;  %v8215_v12 = vadd.f32 %v8214_v14, %v8213_v53  ;;  %v8216_v10 = vpop.f32.mrb[218].mxu1  ;;  %v9515_v14 = vld [vmem:[%s9669_s30 + $0x374] ss:$100 sps:$4 sm:$0xff]  }
 0x2c2   : > { %6142 = vmatmul.mubr.bf16.gmra.mrb[68].mxu0 %v9495_v50  ;;  %v8217_v22 = vpop.f32.mrb[219].mxu1 }
 0x2c3   : > { %v5543_v9 = vadd.f32 %v8106_v5, %v10766_v35  ;;  %6149 = vmatprep.mubr.bf16.mxu0 %v9503_v7  ;;  %8768 = vmatpush3.bf16.msra.mxu0 %v9584_v49  ;;  %v10988_v16 = vadd.f32 %v8215_v12, %v5540_v58  ;;  %v8218_v48 = vadd.f32 %v8217_v22, %v8216_v10 }
 0x2c4   : > { %8769 = vmatprep.subr.bf16.mxu0 %v9588_v57  ;;  %6303 = vmatmul.mubr.bf16.gmra.mrb[68].mxu1 %v9498_v0 }
 0x2c5   : > { %v8107_v28 = vpop.f32.mrb[220].mxu0  ;;  %v10990_v44 = vadd.f32 %v8218_v48, %v5543_v9  ;;  %6310 = vmatprep.mubr.bf16.mxu1 %v9506_v11  ;;  %v9510_v9 = vld [vmem:[%s9669_s30 + $0x2b0] ss:$100 sps:$4 sm:$0xff]  }
 0x2c6   : > { %v8108_v27 = vpop.f32.mrb[221].mxu0 }
 0x2c7   : > { %v8109_v52 = vadd.f32 %v8108_v27, %v8107_v28  ;;  %v8110_v24 = vpop.f32.mrb[222].mxu0  ;;  %8770 = vmatpush3.bf16.msra.mxu0 %v9588_v57  ;;  %v8219_v35 = vpop.f32.mrb[220].mxu1  ;;  %v9507_v57 = vld [vmem:[%s9669_s30 + $0x2a8] ss:$100 sps:$4 sm:$0xff]   ;;  %v9518_v28 = vld [vmem:[%s9669_s30 + $0x37c] ss:$100 sps:$4 sm:$0xff]  }
 0x2c8   : > { %v8111_v25 = vpop.f32.mrb[223].mxu0  ;;  %v8220_v55 = vpop.f32.mrb[221].mxu1 }
 0x2c9   : > { %v5548_v46 = vadd.f32 %v8109_v52, %v10795_v31  ;;  %v8112_v51 = vadd.f32 %v8111_v25, %v8110_v24  ;;  %v8221_v49 = vadd.f32 %v8220_v55, %v8219_v35  ;;  %v8222_v15 = vpop.f32.mrb[222].mxu1  ;;  %v9513_v25 = vld [vmem:[%s9669_s30 + $0x370] ss:$100 sps:$4 sm:$0xff]   ;;  %v9521_v55 = vld [vmem:[%s9669_s30 + $0x43c] ss:$100 sps:$4 sm:$0xff]  }
 0x2ca   : > { %6150 = vmatmul.mubr.bf16.gmra.mrb[72].mxu0 %v9501_v34  ;;  %v8223_v54 = vpop.f32.mrb[223].mxu1 }
 0x2cb   : > { %v5551_v50 = vadd.f32 %v8112_v51, %v10800_v17  ;;  %6157 = vmatprep.mubr.bf16.mxu0 %v9509_v36  ;;  %v10998_v38 = vadd.f32 %v8221_v49, %v5548_v46  ;;  %v8224_v7 = vadd.f32 %v8223_v54, %v8222_v15 }
 0x2cc   : > { %6311 = vmatmul.mubr.bf16.gmra.mrb[72].mxu1 %v9504_v45 }
 0x2cd   : > { %v8113_v53 = vpop.f32.mrb[224].mxu0  ;;  %v11000_v31 = vadd.f32 %v8224_v7, %v5551_v50  ;;  %6318 = vmatprep.mubr.bf16.mxu1 %v9512_v2  ;;  %v9516_v50 = vld [vmem:[%s9669_s30 + $0x378] ss:$100 sps:$4 sm:$0xff]  }
 0x2ce   : > { %v8114_v62 = vpop.f32.mrb[225].mxu0 }
 0x2cf   : > { %v8115_v58 = vadd.f32 %v8114_v62, %v8113_v53  ;;  %v8116_v5 = vpop.f32.mrb[226].mxu0  ;;  %v8225_v0 = vpop.f32.mrb[224].mxu1  ;;  %v9524_v53 = vld [vmem:[%s9669_s30 + $0x444] ss:$100 sps:$4 sm:$0xff]  }
 0x2d0   : > { %v8117_v12 = vpop.f32.mrb[227].mxu0  ;;  %v8226_v11 = vpop.f32.mrb[225].mxu1 }
 0x2d1   : > { %v5556_v17 = vadd.f32 %v8115_v58, %v10829_v8  ;;  %v8118_v10 = vadd.f32 %v8117_v12, %v8116_v5  ;;  %v8227_v22 = vadd.f32 %v8226_v11, %v8225_v0  ;;  %v8228_v48 = vpop.f32.mrb[226].mxu1  ;;  %v9519_v12 = vld [vmem:[%s9669_s30 + $0x438] ss:$100 sps:$4 sm:$0xff]   ;;  %v9527_v11 = vld [vmem:[%s9669_s30 + $0x504] ss:$100 sps:$4 sm:$0xff]  }
 0x2d2   : > { %6158 = vmatmul.mubr.bf16.gmra.mrb[76].mxu0 %v9507_v57  ;;  %v8229_v34 = vpop.f32.mrb[227].mxu1 }
 0x2d3   : > { %v5559_v27 = vadd.f32 %v8118_v10, %v10831_v19  ;;  %6165 = vmatprep.mubr.bf16.mxu0 %v9515_v14  ;;  %v11008_v52 = vadd.f32 %v8227_v22, %v5556_v17  ;;  %v8230_v24 = vadd.f32 %v8229_v34, %v8228_v48 }
 0x2d4   : > { %6319 = vmatmul.mubr.bf16.gmra.mrb[76].mxu1 %v9510_v9 }
 0x2d5   : > { %v8119_v36 = vpop.f32.mrb[228].mxu0  ;;  %v11010_v8 = vadd.f32 %v8230_v24, %v5559_v27  ;;  %6326 = vmatprep.mubr.bf16.mxu1 %v9518_v28  ;;  %v9522_v27 = vld [vmem:[%s9669_s30 + $0x440] ss:$100 sps:$4 sm:$0xff]  }
 0x2d6   : > { %v8120_v35 = vpop.f32.mrb[229].mxu0 }
 0x2d7   : > { %v8121_v46 = vadd.f32 %v8120_v35, %v8119_v36  ;;  %v8122_v51 = vpop.f32.mrb[230].mxu0  ;;  %v8231_v45 = vpop.f32.mrb[228].mxu1  ;;  %v9530_v36 = vld [vmem:[%s9669_s30 + $0x50c] ss:$100 sps:$4 sm:$0xff]  }
 0x2d8   : > { %v8123_v49 = vpop.f32.mrb[231].mxu0  ;;  %v8232_v2 = vpop.f32.mrb[229].mxu1 }
 0x2d9   : > { %v5564_v19 = vadd.f32 %v8121_v46, %v10842_v56  ;;  %v8124_v15 = vadd.f32 %v8123_v49, %v8122_v51  ;;  %v8233_v54 = vadd.f32 %v8232_v2, %v8231_v45  ;;  %v8234_v7 = vpop.f32.mrb[230].mxu1  ;;  %v9525_v49 = vld [vmem:[%s9669_s30 + $0x500] ss:$100 sps:$4 sm:$0xff]   ;;  %v9533_v2 = vld [vmem:[%s9669_s30 + $0x5cc] ss:$100 sps:$4 sm:$0xff]  }
 0x2da   : > { %6166 = vmatmul.mubr.bf16.gmra.mrb[80].mxu0 %v9513_v25  ;;  %v8235_v57 = vpop.f32.mrb[231].mxu1 }
 0x2db   : > { %v5567_v62 = vadd.f32 %v8124_v15, %v10844_v47  ;;  %6173 = vmatprep.mubr.bf16.mxu0 %v9521_v55  ;;  %v11018_v58 = vadd.f32 %v8233_v54, %v5564_v19  ;;  %v8236_v5 = vadd.f32 %v8235_v57, %v8234_v7 }
 0x2dc   : > { %6327 = vmatmul.mubr.bf16.gmra.mrb[80].mxu1 %v9516_v50 }
 0x2dd   : > { %v8125_v14 = vpop.f32.mrb[232].mxu0  ;;  %v11020_v56 = vadd.f32 %v8236_v5, %v5567_v62  ;;  %6334 = vmatprep.mubr.bf16.mxu1 %v9524_v53  ;;  %v9528_v62 = vld [vmem:[%s9669_s30 + $0x508] ss:$100 sps:$4 sm:$0xff]  }
 0x2de   : > { %v8126_v0 = vpop.f32.mrb[233].mxu0 }
 0x2df   : > { %v8127_v17 = vadd.f32 %v8126_v0, %v8125_v14  ;;  %v8128_v10 = vpop.f32.mrb[234].mxu0  ;;  %v8237_v9 = vpop.f32.mrb[232].mxu1  ;;  %v9536_v14 = vld [vmem:[%s9669_s30 + $0x5d4] ss:$100 sps:$4 sm:$0xff]  }
 0x2e0   : > { %v8129_v22 = vpop.f32.mrb[235].mxu0  ;;  %v8238_v28 = vpop.f32.mrb[233].mxu1 }
 0x2e1   : > { %v5572_v47 = vadd.f32 %v8127_v17, %v10852_v59  ;;  %v8130_v48 = vadd.f32 %v8129_v22, %v8128_v10  ;;  %v8239_v34 = vadd.f32 %v8238_v28, %v8237_v9  ;;  %v8240_v24 = vpop.f32.mrb[234].mxu1  ;;  %v9531_v22 = vld [vmem:[%s9669_s30 + $0x5c8] ss:$100 sps:$4 sm:$0xff]   ;;  %v9539_v28 = vld [vmem:[%s9669_s30 + $0x694] ss:$100 sps:$4 sm:$0xff]  }
 0x2e2   : > { %6174 = vmatmul.mubr.bf16.gmra.mrb[84].mxu0 %v9519_v12  ;;  %v8241_v25 = vpop.f32.mrb[235].mxu1 }
 0x2e3   : > { %v5575_v35 = vadd.f32 %v8130_v48, %v10854_v23  ;;  %6181 = vmatprep.mubr.bf16.mxu0 %v9527_v11  ;;  %v11028_v46 = vadd.f32 %v8239_v34, %v5572_v47  ;;  %v8242_v51 = vadd.f32 %v8241_v25, %v8240_v24 }
 0x2e4   : > { %6335 = vmatmul.mubr.bf16.gmra.mrb[84].mxu1 %v9522_v27 }
 0x2e5   : > { %v8131_v55 = vpop.f32.mrb[236].mxu0  ;;  %v11030_v59 = vadd.f32 %v8242_v51, %v5575_v35  ;;  %6342 = vmatprep.mubr.bf16.mxu1 %v9530_v36  ;;  %v9534_v35 = vld [vmem:[%s9669_s30 + $0x5d0] ss:$100 sps:$4 sm:$0xff]  }
 0x2e6   : > { %v8132_v45 = vpop.f32.mrb[237].mxu0 }
 0x2e7   : > { %v8133_v19 = vadd.f32 %v8132_v45, %v8131_v55  ;;  %v8134_v15 = vpop.f32.mrb[238].mxu0  ;;  %v8243_v50 = vpop.f32.mrb[236].mxu1  ;;  %v9542_v55 = vld [vmem:[%s9669_s30 + $0x69c] ss:$100 sps:$4 sm:$0xff]  }
 0x2e8   : > { %v8135_v54 = vpop.f32.mrb[239].mxu0  ;;  %v8244_v53 = vpop.f32.mrb[237].mxu1 }
 0x2e9   : > { %v5580_v23 = vadd.f32 %v8133_v19, %v10862_v32  ;;  %v8136_v7 = vadd.f32 %v8135_v54, %v8134_v15  ;;  %v8245_v57 = vadd.f32 %v8244_v53, %v8243_v50  ;;  %v8246_v5 = vpop.f32.mrb[238].mxu1  ;;  %v9537_v54 = vld [vmem:[%s9669_s30 + $0x690] ss:$100 sps:$4 sm:$0xff]   ;;  %v9545_v53 = vld [vmem:[%s9669_s30 + $0x75c] ss:$100 sps:$4 sm:$0xff]  }
 0x2ea   : > { %6182 = vmatmul.mubr.bf16.gmra.mrb[88].mxu0 %v9525_v49  ;;  %v8247_v12 = vpop.f32.mrb[239].mxu1 }
 0x2eb   : > { %v5583_v0 = vadd.f32 %v8136_v7, %v10864_v21  ;;  %6189 = vmatprep.mubr.bf16.mxu0 %v9533_v2  ;;  %v11038_v17 = vadd.f32 %v8245_v57, %v5580_v23  ;;  %v8248_v10 = vadd.f32 %v8247_v12, %v8246_v5 }
 0x2ec   : > { %6343 = vmatmul.mubr.bf16.gmra.mrb[88].mxu1 %v9528_v62 }
 0x2ed   : > { %v8137_v11 = vpop.f32.mrb[240].mxu0  ;;  %v11040_v32 = vadd.f32 %v8248_v10, %v5583_v0  ;;  %6350 = vmatprep.mubr.bf16.mxu1 %v9536_v14  ;;  %v9540_v0 = vld [vmem:[%s9669_s30 + $0x698] ss:$100 sps:$4 sm:$0xff]  }
 0x2ee   : > { %v8138_v9 = vpop.f32.mrb[241].mxu0 }
 0x2ef   : > { %v8139_v47 = vadd.f32 %v8138_v9, %v8137_v11  ;;  %v8140_v48 = vpop.f32.mrb[242].mxu0  ;;  %v8249_v27 = vpop.f32.mrb[240].mxu1  ;;  %v9548_v11 = vld [vmem:[%s9669_s30 + $0x764] ss:$100 sps:$4 sm:$0xff]  }
 0x2f0   : > { %v8141_v34 = vpop.f32.mrb[243].mxu0  ;;  %v8250_v36 = vpop.f32.mrb[241].mxu1 }
 0x2f1   : > { %v5588_v21 = vadd.f32 %v8139_v47, %v10872_v40  ;;  %v8142_v24 = vadd.f32 %v8141_v34, %v8140_v48  ;;  %v8251_v25 = vadd.f32 %v8250_v36, %v8249_v27  ;;  %v8252_v51 = vpop.f32.mrb[242].mxu1  ;;  %v9543_v34 = vld [vmem:[%s9669_s30 + $0x758] ss:$100 sps:$4 sm:$0xff]   ;;  %v9551_v36 = vld [vmem:[%s9669_s30 + $0x824] ss:$100 sps:$4 sm:$0xff]  }
 0x2f2   : > { %6190 = vmatmul.mubr.bf16.gmra.mrb[92].mxu0 %v9531_v22  ;;  %v8253_v49 = vpop.f32.mrb[243].mxu1 }
 0x2f3   : > { %v5591_v45 = vadd.f32 %v8142_v24, %v10874_v33  ;;  %6197 = vmatprep.mubr.bf16.mxu0 %v9539_v28  ;;  %v11048_v19 = vadd.f32 %v8251_v25, %v5588_v21  ;;  %v8254_v15 = vadd.f32 %v8253_v49, %v8252_v51 }
 0x2f4   : > { %6351 = vmatmul.mubr.bf16.gmra.mrb[92].mxu1 %v9534_v35 }
 0x2f5   : > { %v8143_v2 = vpop.f32.mrb[244].mxu0  ;;  %v11050_v40 = vadd.f32 %v8254_v15, %v5591_v45  ;;  %6358 = vmatprep.mubr.bf16.mxu1 %v9542_v55  ;;  %v9546_v45 = vld [vmem:[%s9669_s30 + $0x760] ss:$100 sps:$4 sm:$0xff]  }
 0x2f6   : > { %v8144_v50 = vpop.f32.mrb[245].mxu0 }
 0x2f7   : > { %v8145_v23 = vadd.f32 %v8144_v50, %v8143_v2  ;;  %v8146_v7 = vpop.f32.mrb[246].mxu0  ;;  %v8255_v62 = vpop.f32.mrb[244].mxu1  ;;  %v9554_v2 = vld [vmem:[%s9669_s30 + $0x82c] ss:$100 sps:$4 sm:$0xff]  }
 0x2f8   : > { %v8147_v57 = vpop.f32.mrb[247].mxu0  ;;  %v8256_v14 = vpop.f32.mrb[245].mxu1 }
 0x2f9   : > { %v5596_v33 = vadd.f32 %v8145_v23, %v10882_v61  ;;  %v8148_v5 = vadd.f32 %v8147_v57, %v8146_v7  ;;  %v8257_v12 = vadd.f32 %v8256_v14, %v8255_v62  ;;  %v8258_v10 = vpop.f32.mrb[246].mxu1  ;;  %v9549_v57 = vld [vmem:[%s9669_s30 + $0x820] ss:$100 sps:$4 sm:$0xff]   ;;  %v9557_v14 = vld [vmem:[%s9669_s30 + $0x8ec] ss:$100 sps:$4 sm:$0xff]  }
 0x2fa   : > { %6198 = vmatmul.mubr.bf16.gmra.mrb[96].mxu0 %v9537_v54  ;;  %v8259_v22 = vpop.f32.mrb[247].mxu1 }
 0x2fb   : > { %v5599_v9 = vadd.f32 %v8148_v5, %v10884_v4  ;;  %6205 = vmatprep.mubr.bf16.mxu0 %v9545_v53  ;;  %v11058_v47 = vadd.f32 %v8257_v12, %v5596_v33  ;;  %v8260_v48 = vadd.f32 %v8259_v22, %v8258_v10 }
 0x2fc   : > { %6359 = vmatmul.mubr.bf16.gmra.mrb[96].mxu1 %v9540_v0 }
 0x2fd   : > { %v8149_v28 = vpop.f32.mrb[248].mxu0  ;;  %v11060_v61 = vadd.f32 %v8260_v48, %v5599_v9  ;;  %6366 = vmatprep.mubr.bf16.mxu1 %v9548_v11  ;;  %v9552_v9 = vld [vmem:[%s9669_s30 + $0x828] ss:$100 sps:$4 sm:$0xff]  }
 0x2fe   : > { %v8150_v27 = vpop.f32.mrb[249].mxu0 }
 0x2ff   : > { %v8151_v21 = vadd.f32 %v8150_v27, %v8149_v28  ;;  %v8152_v24 = vpop.f32.mrb[250].mxu0  ;;  %v8261_v35 = vpop.f32.mrb[248].mxu1  ;;  %v9560_v28 = vld [vmem:[%s9669_s30 + $0x8f4] ss:$100 sps:$4 sm:$0xff]  }
 0x300   : > { %v8153_v25 = vpop.f32.mrb[251].mxu0  ;;  %v8262_v55 = vpop.f32.mrb[249].mxu1 }
 0x301   : > { %v5604_v4 = vadd.f32 %v8151_v21, %v10892_v30  ;;  %v8154_v51 = vadd.f32 %v8153_v25, %v8152_v24  ;;  %v8263_v49 = vadd.f32 %v8262_v55, %v8261_v35  ;;  %v8264_v15 = vpop.f32.mrb[250].mxu1  ;;  %v9555_v25 = vld [vmem:[%s9669_s30 + $0x8e8] ss:$100 sps:$4 sm:$0xff]   ;;  %v9563_v55 = vld [vmem:[%s9669_s30 + $0x9b4] ss:$100 sps:$4 sm:$0xff]  }
 0x302   : > { %6206 = vmatmul.mubr.bf16.gmra.mrb[100].mxu0 %v9543_v34  ;;  %v8265_v54 = vpop.f32.mrb[251].mxu1 }
 0x303   : > { %v5607_v50 = vadd.f32 %v8154_v51, %v10894_v3  ;;  %6213 = vmatprep.mubr.bf16.mxu0 %v9551_v36  ;;  %v11068_v23 = vadd.f32 %v8263_v49, %v5604_v4  ;;  %v8266_v7 = vadd.f32 %v8265_v54, %v8264_v15 }
 0x304   : > { %6367 = vmatmul.mubr.bf16.gmra.mrb[100].mxu1 %v9546_v45 }
 0x305   : > { %v8155_v53 = vpop.f32.mrb[252].mxu0  ;;  %v11070_v30 = vadd.f32 %v8266_v7, %v5607_v50  ;;  %6374 = vmatprep.mubr.bf16.mxu1 %v9554_v2  ;;  %v9558_v50 = vld [vmem:[%s9669_s30 + $0x8f0] ss:$100 sps:$4 sm:$0xff]  }
 0x306   : > { %v8156_v62 = vpop.f32.mrb[253].mxu0 }
 0x307   : > { %v8157_v33 = vadd.f32 %v8156_v62, %v8155_v53  ;;  %v8158_v5 = vpop.f32.mrb[254].mxu0  ;;  %v8267_v0 = vpop.f32.mrb[252].mxu1  ;;  %v9567_v53 = vld [vmem:[%s9669_s30 + $0x9bc] ss:$100 sps:$4 sm:$0xff]  }
 0x308   : > { %v8159_v12 = vpop.f32.mrb[255].mxu0  ;;  %v8268_v11 = vpop.f32.mrb[253].mxu1 }
 0x309   : > { %v5612_v3 = vadd.f32 %v8157_v33, %v10902_v18  ;;  %v8160_v10 = vadd.f32 %v8159_v12, %v8158_v5  ;;  %v8269_v22 = vadd.f32 %v8268_v11, %v8267_v0  ;;  %v8270_v48 = vpop.f32.mrb[254].mxu1  ;;  %v9561_v12 = vld [vmem:[%s9669_s30 + $0x9b0] ss:$100 sps:$4 sm:$0xff]   ;;  %v9570_v11 = vld [vmem:[%s9669_s30 + $0xa7c] ss:$100 sps:$4 sm:$0xff]  }
 0x30a   : > { %6214 = vmatmul.mubr.bf16.gmra.mrb[104].mxu0 %v9549_v57  ;;  %v8271_v34 = vpop.f32.mrb[255].mxu1 }
 0x30b   : > { %v5615_v27 = vadd.f32 %v8160_v10, %v10904_v63  ;;  %6221 = vmatprep.mubr.bf16.mxu0 %v9557_v14  ;;  %v11078_v21 = vadd.f32 %v8269_v22, %v5612_v3  ;;  %v8272_v24 = vadd.f32 %v8271_v34, %v8270_v48 }
 0x30c   : > { %6375 = vmatmul.mubr.bf16.gmra.mrb[104].mxu1 %v9552_v9 }
 0x30d   : > { %v8289_v36 = vpop.f32.mrb[0].mxu0  ;;  %v11080_v18 = vadd.f32 %v8272_v24, %v5615_v27  ;;  %6382 = vmatprep.mubr.bf16.mxu1 %v9560_v28  ;;  %v9565_v27 = vld [vmem:[%s9669_s30 + $0x9b8] ss:$100 sps:$4 sm:$0xff]  }
 0x30e   : > { %v8290_v35 = vpop.f32.mrb[1].mxu0 }
 0x30f   : > { %v8291_v4 = vadd.f32 %v8290_v35, %v8289_v36  ;;  %v8292_v51 = vpop.f32.mrb[2].mxu0  ;;  %v8401_v45 = vpop.f32.mrb[0].mxu1  ;;  %v9573_v36 = vld [vmem:[%s9669_s30 + $0xa84] ss:$100 sps:$4 sm:$0xff]  }
 0x310   : > { %v8293_v49 = vpop.f32.mrb[3].mxu0  ;;  %v8402_v2 = vpop.f32.mrb[1].mxu1 }
 0x311   : > { %v5814_v63 = vadd.f32 %v8291_v4, %v10912_v39  ;;  %v8294_v15 = vadd.f32 %v8293_v49, %v8292_v51  ;;  %v8403_v54 = vadd.f32 %v8402_v2, %v8401_v45  ;;  %v8404_v7 = vpop.f32.mrb[2].mxu1  ;;  %v9568_v49 = vld [vmem:[%s9669_s30 + $0xa78] ss:$100 sps:$4 sm:$0xff]   ;;  %v9576_v2 = vld [vmem:[%s9669_s30 + $0xb44] ss:$100 sps:$4 sm:$0xff]  }
 0x312   : > { %6222 = vmatmul.mubr.bf16.gmra.mrb[108].mxu0 %v9555_v25  ;;  %v8405_v57 = vpop.f32.mrb[3].mxu1 }
 0x313   : > { %v5817_v62 = vadd.f32 %v8294_v15, %v10914_v42  ;;  %6229 = vmatprep.mubr.bf16.mxu0 %v9563_v55  ;;  %v11088_v33 = vadd.f32 %v8403_v54, %v5814_v63  ;;  %v8406_v5 = vadd.f32 %v8405_v57, %v8404_v7 }
 0x314   : > { %6383 = vmatmul.mubr.bf16.gmra.mrb[108].mxu1 %v9558_v50 }
 0x315   : > { %v8295_v14 = vpop.f32.mrb[4].mxu0  ;;  %v11090_v39 = vadd.f32 %v8406_v5, %v5817_v62  ;;  %6390 = vmatprep.mubr.bf16.mxu1 %v9567_v53  ;;  %v9571_v62 = vld [vmem:[%s9669_s30 + $0xa80] ss:$100 sps:$4 sm:$0xff]  }
 0x316   : > { %v8296_v0 = vpop.f32.mrb[5].mxu0 }
 0x317   : > { %v8297_v3 = vadd.f32 %v8296_v0, %v8295_v14  ;;  %v8298_v10 = vpop.f32.mrb[6].mxu0  ;;  %v8407_v9 = vpop.f32.mrb[4].mxu1  ;;  %v9579_v14 = vld [vmem:[%s9669_s30 + $0xb4c] ss:$100 sps:$4 sm:$0xff]  }
 0x318   : > { %v8299_v22 = vpop.f32.mrb[7].mxu0  ;;  %v8408_v28 = vpop.f32.mrb[5].mxu1 }
 0x319   : > { %v5822_v42 = vadd.f32 %v8297_v3, %v10922_v13  ;;  %v8300_v48 = vadd.f32 %v8299_v22, %v8298_v10  ;;  %v8409_v34 = vadd.f32 %v8408_v28, %v8407_v9  ;;  %v8410_v24 = vpop.f32.mrb[6].mxu1  ;;  %v9574_v22 = vld [vmem:[%s9669_s30 + $0xb40] ss:$100 sps:$4 sm:$0xff]   ;;  %v9583_v28 = vld [vmem:[%s9669_s30 + $0xc0c] ss:$100 sps:$4 sm:$0xff]  }
 0x31a   : > { %6230 = vmatmul.mubr.bf16.gmra.mrb[112].mxu0 %v9561_v12  ;;  %v8411_v25 = vpop.f32.mrb[7].mxu1 }
 0x31b   : > { %v5825_v35 = vadd.f32 %v8300_v48, %v10924_v43  ;;  %6237 = vmatprep.mubr.bf16.mxu0 %v9570_v11  ;;  %v11098_v4 = vadd.f32 %v8409_v34, %v5822_v42  ;;  %v8412_v51 = vadd.f32 %v8411_v25, %v8410_v24 }
 0x31c   : > { %6391 = vmatmul.mubr.bf16.gmra.mrb[112].mxu1 %v9565_v27 }
 0x31d   : > { %v8301_v55 = vpop.f32.mrb[8].mxu0  ;;  %v11100_v13 = vadd.f32 %v8412_v51, %v5825_v35  ;;  %6398 = vmatprep.mubr.bf16.mxu1 %v9573_v36  ;;  %v9577_v35 = vld [vmem:[%s9669_s30 + $0xb48] ss:$100 sps:$4 sm:$0xff]  }
 0x31e   : > { %v8302_v45 = vpop.f32.mrb[9].mxu0 }
 0x31f   : > { %v8303_v63 = vadd.f32 %v8302_v45, %v8301_v55  ;;  %v8304_v15 = vpop.f32.mrb[10].mxu0  ;;  %v8413_v50 = vpop.f32.mrb[8].mxu1  ;;  %v9587_v55 = vld [vmem:[%s9669_s30 + $0xc14] ss:$100 sps:$4 sm:$0xff]  }
 0x320   : > { %v8305_v54 = vpop.f32.mrb[11].mxu0  ;;  %v8414_v53 = vpop.f32.mrb[9].mxu1 }
 0x321   : > { %v5830_v43 = vadd.f32 %v8303_v63, %v10938_v60  ;;  %v8306_v7 = vadd.f32 %v8305_v54, %v8304_v15  ;;  %v8415_v57 = vadd.f32 %v8414_v53, %v8413_v50  ;;  %v8416_v5 = vpop.f32.mrb[10].mxu1  ;;  %v9581_v54 = vld [vmem:[%s9669_s30 + $0xc08] ss:$100 sps:$4 sm:$0xff]   ;;  %v9589_v53 = vld [vmem:[%s9669_s30 + $0x60] ss:$100 sps:$4 sm:$0xff]  }
 0x322   : > { %6238 = vmatmul.mubr.bf16.gmra.mrb[116].mxu0 %v9568_v49  ;;  %v8417_v12 = vpop.f32.mrb[11].mxu1 }
 0x323   : > { %v5833_v0 = vadd.f32 %v8306_v7, %v10940_v1  ;;  %6245 = vmatprep.mubr.bf16.mxu0 %v9576_v2  ;;  %v11108_v3 = vadd.f32 %v8415_v57, %v5830_v43  ;;  %v8418_v10 = vadd.f32 %v8417_v12, %v8416_v5 }
 0x324   : > { %6399 = vmatmul.mubr.bf16.gmra.mrb[116].mxu1 %v9571_v62 }
 0x325   : > { %v8307_v11 = vpop.f32.mrb[12].mxu0  ;;  %v11110_v60 = vadd.f32 %v8418_v10, %v5833_v0  ;;  %6406 = vmatprep.mubr.bf16.mxu1 %v9579_v14  ;;  %v9585_v0 = vld [vmem:[%s9669_s30 + $0xc10] ss:$100 sps:$4 sm:$0xff]  }
 0x326   : > { %v8308_v9 = vpop.f32.mrb[13].mxu0 }
 0x327   : > { %v8309_v42 = vadd.f32 %v8308_v9, %v8307_v11  ;;  %v8310_v48 = vpop.f32.mrb[14].mxu0  ;;  %v8419_v27 = vpop.f32.mrb[12].mxu1 }
 0x328   : > { %v8311_v34 = vpop.f32.mrb[15].mxu0  ;;  %v8420_v36 = vpop.f32.mrb[13].mxu1 }
 0x329   : > { %v5838_v1 = vadd.f32 %v8309_v42, %v10948_v26  ;;  %v8312_v24 = vadd.f32 %v8311_v34, %v8310_v48  ;;  %v8421_v25 = vadd.f32 %v8420_v36, %v8419_v27  ;;  %v8422_v51 = vpop.f32.mrb[14].mxu1  ;;  %v9590_v27 = vld [vmem:[%s9669_s30 + $0x128] ss:$100 sps:$4 sm:$0xff]  }
 0x32a   : > { %6246 = vmatmul.mubr.bf16.gmra.mrb[120].mxu0 %v9574_v22  ;;  %v8423_v49 = vpop.f32.mrb[15].mxu1 }
 0x32b   : > { %v5841_v45 = vadd.f32 %v8312_v24, %v10950_v29  ;;  %6253 = vmatprep.mubr.bf16.mxu0 %v9583_v28  ;;  %v11118_v63 = vadd.f32 %v8421_v25, %v5838_v1  ;;  %v8424_v15 = vadd.f32 %v8423_v49, %v8422_v51  ;;  %v9591_v24 = vld [vmem:[%s9669_s30 + $0x1f0] ss:$100 sps:$4 sm:$0xff]  }
 0x32c   : > { %6407 = vmatmul.mubr.bf16.gmra.mrb[120].mxu1 %v9577_v35 }
 0x32d   : > { %v8313_v2 = vpop.f32.mrb[16].mxu0  ;;  %v11120_v26 = vadd.f32 %v8424_v15, %v5841_v45  ;;  %6414 = vmatprep.mubr.bf16.mxu1 %v9587_v55 }
 0x32e   : > { %v8314_v50 = vpop.f32.mrb[17].mxu0 }
 0x32f   : > { %v8315_v43 = vadd.f32 %v8314_v50, %v8313_v2  ;;  %v8316_v7 = vpop.f32.mrb[18].mxu0  ;;  %v8425_v62 = vpop.f32.mrb[16].mxu1 }
 0x330   : > { %v8317_v57 = vpop.f32.mrb[19].mxu0  ;;  %v8426_v14 = vpop.f32.mrb[17].mxu1 }
 0x331   : > { %v5846_v29 = vadd.f32 %v8315_v43, %v10958_v37  ;;  %v8318_v5 = vadd.f32 %v8317_v57, %v8316_v7  ;;  %v8427_v12 = vadd.f32 %v8426_v14, %v8425_v62  ;;  %v8428_v10 = vpop.f32.mrb[18].mxu1  ;;  %v9593_v57 = vld [vmem:[%s9669_s30 + $0x380] ss:$100 sps:$4 sm:$0xff]  }
 0x332   : > { %6254 = vmatmul.mubr.bf16.gmra.mrb[124].mxu0 %v9581_v54  ;;  %v8429_v9 = vpop.f32.mrb[19].mxu1 }
 0x333   : > { %v5849_v11 = vadd.f32 %v8318_v5, %v10960_v6  ;;  %8771 = vmatprep.mubr.msk.bf16.mxu0 %vm4442_vm1, %v9589_v53  ;;  %v11128_v22 = vadd.f32 %v8427_v12, %v5846_v29  ;;  %v8430_v42 = vadd.f32 %v8429_v9, %v8428_v10 }
 0x334   : > { %6415 = vmatmul.mubr.bf16.gmra.mrb[124].mxu1 %v9585_v0 }
 0x335   : > { %v8319_v48 = vpop.f32.mrb[20].mxu0  ;;  %v11130_v28 = vadd.f32 %v8430_v42, %v5849_v11 }
 0x336   : > { %v8320_v37 = vpop.f32.mrb[21].mxu0 }
 0x337   : > { %v8321_v34 = vadd.f32 %v8320_v37, %v8319_v48  ;;  %v8322_v1 = vpop.f32.mrb[22].mxu0  ;;  %v8431_v36 = vpop.f32.mrb[20].mxu1 }
 0x338   : > { %v8323_v35 = vpop.f32.mrb[23].mxu0  ;;  %v8432_v51 = vpop.f32.mrb[21].mxu1 }
 0x339   : > { %v5854_v6 = vadd.f32 %v8321_v34, %v10972_v20  ;;  %v8324_v25 = vadd.f32 %v8323_v35, %v8322_v1  ;;  %v8433_v55 = vadd.f32 %v8432_v51, %v8431_v36  ;;  %v8434_v45 = vpop.f32.mrb[22].mxu1  ;;  %v9592_v20 = vld [vmem:[%s9669_s30 + $0x2b8] ss:$100 sps:$4 sm:$0xff]   ;;  %v9595_v36 = vld [vmem:[%s9669_s30 + $0x510] ss:$100 sps:$4 sm:$0xff]  }
 0x33a   : > { %8772 = vmatmul.mubr.msk.bf16.vlgmr.msra.gmra.mrb[128].mxu0 %vm4442_vm1, %v9590_v27  ;;  %v8435_v15 = vpop.f32.mrb[23].mxu1 }
 0x33b   : > { %v5857_v49 = vadd.f32 %v8324_v25, %v10977_v41  ;;  %8775 = vmatprep.mubr.msk.bf16.mxu0 %vm4442_vm1, %v9591_v24  ;;  %v11138_v2 = vadd.f32 %v8433_v55, %v5854_v6  ;;  %v8436_v50 = vadd.f32 %v8435_v15, %v8434_v45 }
 0x33d   : > { %v8325_v54 = vpop.f32.mrb[24].mxu0  ;;  %v11140_v43 = vadd.f32 %v8436_v50, %v5857_v49 }
 0x33e   : > { %v8326_v7 = vpop.f32.mrb[25].mxu0 }
 0x33f   : > { %v8327_v53 = vadd.f32 %v8326_v7, %v8325_v54  ;;  %v8328_v62 = vpop.f32.mrb[26].mxu0  ;;  %v8437_v29 = vpop.f32.mrb[24].mxu1 }
 0x340   : > { %v8329_v5 = vpop.f32.mrb[27].mxu0  ;;  %v8438_v0 = vpop.f32.mrb[25].mxu1 }
 0x341   : > { %v5862_v14 = vadd.f32 %v8327_v53, %v10988_v16  ;;  %v8330_v41 = vadd.f32 %v8329_v5, %v8328_v62  ;;  %v8439_v12 = vadd.f32 %v8438_v0, %v8437_v29  ;;  %v8440_v10 = vpop.f32.mrb[26].mxu1  ;;  %v9594_v16 = vld [vmem:[%s9669_s30 + $0x448] ss:$100 sps:$4 sm:$0xff]   ;;  %v9597_v29 = vld [vmem:[%s9669_s30 + $0x6a0] ss:$100 sps:$4 sm:$0xff]  }
 0x342   : > { %8776 = vmatmul.mubr.msk.bf16.gmra.mrb[132].mxu0 %vm4442_vm1, %v9592_v20  ;;  %v8441_v9 = vpop.f32.mrb[27].mxu1 }
 0x343   : > { %v5865_v11 = vadd.f32 %v8330_v41, %v10990_v44  ;;  %8779 = vmatprep.mubr.msk.bf16.mxu0 %vm4442_vm1, %v9593_v57  ;;  %v11148_v42 = vadd.f32 %v8439_v12, %v5862_v14  ;;  %v8442_v48 = vadd.f32 %v8441_v9, %v8440_v10 }
 0x345   : > { %v8331_v37 = vpop.f32.mrb[28].mxu0  ;;  %v11150_v27 = vadd.f32 %v8442_v48, %v5865_v11 }
 0x346   : > { %v8332_v34 = vpop.f32.mrb[29].mxu0 }
 0x347   : > { %v8333_v1 = vadd.f32 %v8332_v34, %v8331_v37  ;;  %v8334_v24 = vpop.f32.mrb[30].mxu0  ;;  %v8443_v35 = vpop.f32.mrb[28].mxu1 }
 0x348   : > { %v8335_v6 = vpop.f32.mrb[31].mxu0  ;;  %v8444_v51 = vpop.f32.mrb[29].mxu1 }
 0x349   : > { %v5870_v25 = vadd.f32 %v8333_v1, %v10998_v38  ;;  %v8336_v44 = vadd.f32 %v8335_v6, %v8334_v24  ;;  %v8445_v55 = vadd.f32 %v8444_v51, %v8443_v35  ;;  %v8446_v45 = vpop.f32.mrb[30].mxu1  ;;  %v9596_v38 = vld [vmem:[%s9669_s30 + $0x5d8] ss:$100 sps:$4 sm:$0xff]   ;;  %v9599_v35 = vld [vmem:[%s9669_s30 + $0x830] ss:$100 sps:$4 sm:$0xff]  }
 0x34a   : > { %8780 = vmatmul.mubr.msk.bf16.gmra.mrb[136].mxu0 %vm4442_vm1, %v9594_v16  ;;  %v8447_v15 = vpop.f32.mrb[31].mxu1 }
 0x34b   : > { %v5873_v49 = vadd.f32 %v8336_v44, %v11000_v31  ;;  %8783 = vmatprep.mubr.msk.bf16.mxu0 %vm4442_vm1, %v9595_v36  ;;  %v11158_v50 = vadd.f32 %v8445_v55, %v5870_v25  ;;  %v8448_v54 = vadd.f32 %v8447_v15, %v8446_v45 }
 0x34d   : > { %v8337_v7 = vpop.f32.mrb[32].mxu0  ;;  %v11160_v20 = vadd.f32 %v8448_v54, %v5873_v49 }
 0x34e   : > { %v8338_v53 = vpop.f32.mrb[33].mxu0 }
 0x34f   : > { %v8339_v62 = vadd.f32 %v8338_v53, %v8337_v7  ;;  %v8340_v57 = vpop.f32.mrb[34].mxu0  ;;  %v8449_v5 = vpop.f32.mrb[32].mxu1 }
 0x350   : > { %v8341_v14 = vpop.f32.mrb[35].mxu0  ;;  %v8450_v0 = vpop.f32.mrb[33].mxu1 }
 0x351   : > { %v5878_v41 = vadd.f32 %v8339_v62, %v11008_v52  ;;  %v8342_v31 = vadd.f32 %v8341_v14, %v8340_v57  ;;  %v8451_v12 = vadd.f32 %v8450_v0, %v8449_v5  ;;  %v8452_v10 = vpop.f32.mrb[34].mxu1  ;;  %v9598_v52 = vld [vmem:[%s9669_s30 + $0x768] ss:$100 sps:$4 sm:$0xff]   ;;  %v9601_v5 = vld [vmem:[%s9669_s30 + $0x9c0] ss:$100 sps:$4 sm:$0xff]  }
 0x352   : > { %8784 = vmatmul.mubr.msk.bf16.gmra.mrb[140].mxu0 %vm4442_vm1, %v9596_v38  ;;  %v8453_v9 = vpop.f32.mrb[35].mxu1 }
 0x353   : > { %v5881_v11 = vadd.f32 %v8342_v31, %v11010_v8  ;;  %8787 = vmatprep.mubr.msk.bf16.mxu0 %vm4442_vm1, %v9597_v29  ;;  %v11168_v48 = vadd.f32 %v8451_v12, %v5878_v41  ;;  %v8454_v37 = vadd.f32 %v8453_v9, %v8452_v10 }
 0x355   : > { %v8343_v34 = vpop.f32.mrb[36].mxu0  ;;  %v11170_v16 = vadd.f32 %v8454_v37, %v5881_v11 }
 0x356   : > { %v8344_v1 = vpop.f32.mrb[37].mxu0 }
 0x357   : > { %v8345_v24 = vadd.f32 %v8344_v1, %v8343_v34  ;;  %v8346_v36 = vpop.f32.mrb[38].mxu0  ;;  %v8455_v6 = vpop.f32.mrb[36].mxu1 }
 0x358   : > { %v8347_v25 = vpop.f32.mrb[39].mxu0  ;;  %v8456_v51 = vpop.f32.mrb[37].mxu1 }
 0x359   : > { %v5886_v44 = vadd.f32 %v8345_v24, %v11018_v58  ;;  %v8348_v8 = vadd.f32 %v8347_v25, %v8346_v36  ;;  %v8457_v55 = vadd.f32 %v8456_v51, %v8455_v6  ;;  %v8458_v45 = vpop.f32.mrb[38].mxu1  ;;  %v9600_v58 = vld [vmem:[%s9669_s30 + $0x8f8] ss:$100 sps:$4 sm:$0xff]   ;;  %v9603_v6 = vld [vmem:[%s9669_s30 + $0xb50] ss:$100 sps:$4 sm:$0xff]  }
 0x35a   : > { %8788 = vmatmul.mubr.msk.bf16.gmra.mrb[144].mxu0 %vm4442_vm1, %v9598_v52  ;;  %v8459_v15 = vpop.f32.mrb[39].mxu1 }
 0x35b   : > { %v5889_v49 = vadd.f32 %v8348_v8, %v11020_v56  ;;  %8791 = vmatprep.mubr.msk.bf16.mxu0 %vm4442_vm1, %v9599_v35  ;;  %v11178_v54 = vadd.f32 %v8457_v55, %v5886_v44  ;;  %v8460_v7 = vadd.f32 %v8459_v15, %v8458_v45 }
 0x35d   : > { %v8349_v53 = vpop.f32.mrb[40].mxu0  ;;  %v11180_v38 = vadd.f32 %v8460_v7, %v5889_v49 }
 0x35e   : > { %v8350_v62 = vpop.f32.mrb[41].mxu0 }
 0x35f   : > { %v8351_v57 = vadd.f32 %v8350_v62, %v8349_v53  ;;  %v8352_v29 = vpop.f32.mrb[42].mxu0  ;;  %v8461_v14 = vpop.f32.mrb[40].mxu1 }
 0x360   : > { %v8353_v41 = vpop.f32.mrb[43].mxu0  ;;  %v8462_v0 = vpop.f32.mrb[41].mxu1 }
 0x361   : > { %v5894_v31 = vadd.f32 %v8351_v57, %v11028_v46  ;;  %v8354_v56 = vadd.f32 %v8353_v41, %v8352_v29  ;;  %v8463_v12 = vadd.f32 %v8462_v0, %v8461_v14  ;;  %v8464_v10 = vpop.f32.mrb[42].mxu1  ;;  %v9602_v46 = vld [vmem:[%s9669_s30 + $0xa88] ss:$100 sps:$4 sm:$0xff]   ;;  %v9604_v29 = vld [vmem:[%s9669_s30 + $0xc18] ss:$100 sps:$4 sm:$0xff]  }
 0x362   : > { %8792 = vmatmul.mubr.msk.bf16.gmra.mrb[148].mxu0 %vm4442_vm1, %v9600_v58  ;;  %v8465_v9 = vpop.f32.mrb[43].mxu1 }
 0x363   : > { %v5897_v11 = vadd.f32 %v8354_v56, %v11030_v59  ;;  %8795 = vmatprep.mubr.msk.bf16.mxu0 %vm4442_vm1, %v9601_v5  ;;  %v11188_v37 = vadd.f32 %v8463_v12, %v5894_v31  ;;  %v8466_v34 = vadd.f32 %v8465_v9, %v8464_v10 }
 0x365   : > { %v8355_v1 = vpop.f32.mrb[44].mxu0  ;;  %v11190_v52 = vadd.f32 %v8466_v34, %v5897_v11 }
 0x366   : > { %v8356_v24 = vpop.f32.mrb[45].mxu0 }
 0x367   : > { %v8357_v36 = vadd.f32 %v8356_v24, %v8355_v1  ;;  %v8358_v35 = vpop.f32.mrb[46].mxu0  ;;  %v8467_v25 = vpop.f32.mrb[44].mxu1 }
 0x368   : > { %v8359_v44 = vpop.f32.mrb[47].mxu0  ;;  %v8468_v51 = vpop.f32.mrb[45].mxu1 }
 0x369   : > { %v5902_v8 = vadd.f32 %v8357_v36, %v11038_v17  ;;  %v8360_v59 = vadd.f32 %v8359_v44, %v8358_v35  ;;  %v8469_v55 = vadd.f32 %v8468_v51, %v8467_v25  ;;  %v8470_v45 = vpop.f32.mrb[46].mxu1 }
 0x36a   : > { %8796 = vmatmul.mubr.msk.bf16.gmra.mrb[152].mxu0 %vm4442_vm1, %v9602_v46  ;;  %v8471_v15 = vpop.f32.mrb[47].mxu1 }
 0x36b   : > { %v5905_v49 = vadd.f32 %v8360_v59, %v11040_v32  ;;  %8799 = vmatprep.mubr.msk.bf16.mxu0 %vm4442_vm1, %v9603_v6  ;;  %v11198_v7 = vadd.f32 %v8469_v55, %v5902_v8  ;;  %v8472_v53 = vadd.f32 %v8471_v15, %v8470_v45 }
 0x36d   : > { %v8361_v62 = vpop.f32.mrb[48].mxu0  ;;  %v11200_v58 = vadd.f32 %v8472_v53, %v5905_v49 }
 0x36e   : > { %v8362_v57 = vpop.f32.mrb[49].mxu0 }
 0x36f   : > { %v8363_v17 = vadd.f32 %v8362_v57, %v8361_v62  ;;  %v8364_v5 = vpop.f32.mrb[50].mxu0  ;;  %v8473_v14 = vpop.f32.mrb[48].mxu1 }
 0x370   : > { %v8365_v41 = vpop.f32.mrb[51].mxu0  ;;  %v8474_v0 = vpop.f32.mrb[49].mxu1 }
 0x371   : > { %v5910_v31 = vadd.f32 %v8363_v17, %v11048_v19  ;;  %v8366_v56 = vadd.f32 %v8365_v41, %v8364_v5  ;;  %v8475_v32 = vadd.f32 %v8474_v0, %v8473_v14  ;;  %v8476_v12 = vpop.f32.mrb[50].mxu1 }
 0x372   : > { %8800 = vmatmul.mubr.msk.bf16.gmra.mrb[156].mxu0 %vm4442_vm1, %v9604_v29  ;;  %v8477_v11 = vpop.f32.mrb[51].mxu1 }
 0x373   : > { %v5913_v10 = vadd.f32 %v8366_v56, %v11050_v40  ;;  %v11206_v9 = vadd.f32 %v8475_v32, %v5910_v31  ;;  %v8478_v34 = vadd.f32 %v8477_v11, %v8476_v12 }
 0x375   : > { %v8367_v1 = vpop.f32.mrb[52].mxu0  ;;  %v11208_v24 = vadd.f32 %v8478_v34, %v5913_v10 }
 0x376   : > { %v8368_v46 = vpop.f32.mrb[53].mxu0 }
 0x377   : > { %v8369_v36 = vadd.f32 %v8368_v46, %v8367_v1  ;;  %v8370_v35 = vpop.f32.mrb[54].mxu0  ;;  %v8479_v6 = vpop.f32.mrb[52].mxu1 }
 0x378   : > { %v8371_v19 = vpop.f32.mrb[55].mxu0  ;;  %v8480_v8 = vpop.f32.mrb[53].mxu1 }
 0x379   : > { %v5918_v25 = vadd.f32 %v8369_v36, %v11058_v47  ;;  %v8372_v44 = vadd.f32 %v8371_v19, %v8370_v35  ;;  %v8481_v59 = vadd.f32 %v8480_v8, %v8479_v6  ;;  %v8482_v51 = vpop.f32.mrb[54].mxu1 }
 0x37a   : > { %v8483_v55 = vpop.f32.mrb[55].mxu1 }
 0x37b   : > { %v5921_v40 = vadd.f32 %v8372_v44, %v11060_v61  ;;  %v11212_v45 = vadd.f32 %v8481_v59, %v5918_v25  ;;  %v8484_v49 = vadd.f32 %v8483_v55, %v8482_v51 }
 0x37d   : > { %v8373_v15 = vpop.f32.mrb[56].mxu0  ;;  %v11214_v53 = vadd.f32 %v8484_v49, %v5921_v40 }
 0x37e   : > { %v8374_v62 = vpop.f32.mrb[57].mxu0 }
 0x37f   : > { %v8375_v57 = vadd.f32 %v8374_v62, %v8373_v15  ;;  %v8376_v29 = vpop.f32.mrb[58].mxu0  ;;  %v8485_v17 = vpop.f32.mrb[56].mxu1 }
 0x380   : > { %v8377_v5 = vpop.f32.mrb[59].mxu0  ;;  %v8486_v41 = vpop.f32.mrb[57].mxu1 }
 0x381   : > { %v5926_v47 = vadd.f32 %v8375_v57, %v11068_v23  ;;  %v8378_v14 = vadd.f32 %v8377_v5, %v8376_v29  ;;  %v8487_v31 = vadd.f32 %v8486_v41, %v8485_v17  ;;  %v8488_v56 = vpop.f32.mrb[58].mxu1 }
 0x382   : > { %v8489_v0 = vpop.f32.mrb[59].mxu1 }
 0x383   : > { %v5929_v61 = vadd.f32 %v8378_v14, %v11070_v30  ;;  %v11218_v32 = vadd.f32 %v8487_v31, %v5926_v47  ;;  %v8490_v12 = vadd.f32 %v8489_v0, %v8488_v56 }
 0x385   : > { %v8379_v10 = vpop.f32.mrb[60].mxu0  ;;  %v11220_v11 = vadd.f32 %v8490_v12, %v5929_v61 }
 0x386   : > { %v8380_v34 = vpop.f32.mrb[61].mxu0 }
 0x387   : > { %v8381_v1 = vadd.f32 %v8380_v34, %v8379_v10  ;;  %v8382_v46 = vpop.f32.mrb[62].mxu0  ;;  %v8491_v36 = vpop.f32.mrb[60].mxu1 }
 0x388   : > { %v8383_v35 = vpop.f32.mrb[63].mxu0  ;;  %v8492_v19 = vpop.f32.mrb[61].mxu1 }
 0x389   : > { %v5934_v23 = vadd.f32 %v8381_v1, %v11078_v21  ;;  %v8384_v6 = vadd.f32 %v8383_v35, %v8382_v46  ;;  %v8493_v25 = vadd.f32 %v8492_v19, %v8491_v36  ;;  %v8494_v44 = vpop.f32.mrb[62].mxu1 }
 0x38a   : > { %v8495_v8 = vpop.f32.mrb[63].mxu1 }
 0x38b   : > { %v5937_v30 = vadd.f32 %v8384_v6, %v11080_v18  ;;  %v11224_v59 = vadd.f32 %v8493_v25, %v5934_v23  ;;  %v8496_v51 = vadd.f32 %v8495_v8, %v8494_v44 }
 0x38d   : > { %v8513_v40 = vpop.f32.mrb[64].mxu0  ;;  %v11226_v55 = vadd.f32 %v8496_v51, %v5937_v30 }
 0x38e   : > { %v8514_v49 = vpop.f32.mrb[65].mxu0 }
 0x38f   : > { %v8515_v15 = vadd.f32 %v8514_v49, %v8513_v40  ;;  %v8516_v62 = vpop.f32.mrb[66].mxu0  ;;  %v8625_v57 = vpop.f32.mrb[64].mxu1 }
 0x390   : > { %v8517_v29 = vpop.f32.mrb[67].mxu0  ;;  %v8626_v5 = vpop.f32.mrb[65].mxu1 }
 0x391   : > { %v6136_v21 = vadd.f32 %v8515_v15, %v11088_v33  ;;  %v8518_v17 = vadd.f32 %v8517_v29, %v8516_v62  ;;  %v8627_v47 = vadd.f32 %v8626_v5, %v8625_v57  ;;  %v8628_v14 = vpop.f32.mrb[66].mxu1 }
 0x392   : > { %v8629_v41 = vpop.f32.mrb[67].mxu1 }
 0x393   : > { %v6139_v18 = vadd.f32 %v8518_v17, %v11090_v39  ;;  %v8630_v31 = vadd.f32 %v8629_v41, %v8628_v14  ;;  %v11230_v56 = vadd.f32 %v8627_v47, %v6136_v21 }
 0x395   : > { %v8519_v61 = vpop.f32.mrb[68].mxu0  ;;  %v11232_v12 = vadd.f32 %v8630_v31, %v6139_v18 }
 0x396   : > { %v8520_v0 = vpop.f32.mrb[69].mxu0 }
 0x397   : > { %v8521_v10 = vadd.f32 %v8520_v0, %v8519_v61  ;;  %v8522_v34 = vpop.f32.mrb[70].mxu0  ;;  %v8631_v1 = vpop.f32.mrb[68].mxu1 }
 0x398   : > { %v8523_v46 = vpop.f32.mrb[71].mxu0  ;;  %v8632_v35 = vpop.f32.mrb[69].mxu1 }
 0x399   : > { %v6144_v33 = vadd.f32 %v8521_v10, %v11098_v4  ;;  %v8524_v36 = vadd.f32 %v8523_v46, %v8522_v34  ;;  %v8633_v23 = vadd.f32 %v8632_v35, %v8631_v1  ;;  %v8634_v6 = vpop.f32.mrb[70].mxu1 }
 0x39a   : > { %v8635_v19 = vpop.f32.mrb[71].mxu1 }
 0x39b   : > { %v6147_v39 = vadd.f32 %v8524_v36, %v11100_v13  ;;  %v8636_v25 = vadd.f32 %v8635_v19, %v8634_v6  ;;  %v11236_v44 = vadd.f32 %v8633_v23, %v6144_v33 }
 0x39d   : > { %v8525_v30 = vpop.f32.mrb[72].mxu0  ;;  %v11238_v51 = vadd.f32 %v8636_v25, %v6147_v39 }
 0x39e   : > { %v8526_v8 = vpop.f32.mrb[73].mxu0 }
 0x39f   : > { %v8527_v40 = vadd.f32 %v8526_v8, %v8525_v30  ;;  %v8528_v49 = vpop.f32.mrb[74].mxu0  ;;  %v8637_v15 = vpop.f32.mrb[72].mxu1 }
 0x3a0   : > { %v8529_v62 = vpop.f32.mrb[75].mxu0  ;;  %v8638_v29 = vpop.f32.mrb[73].mxu1 }
 0x3a1   : > { %v6152_v4 = vadd.f32 %v8527_v40, %v11108_v3  ;;  %v8530_v57 = vadd.f32 %v8529_v62, %v8528_v49  ;;  %v8639_v21 = vadd.f32 %v8638_v29, %v8637_v15  ;;  %v8640_v17 = vpop.f32.mrb[74].mxu1 }
 0x3a2   : > { %v8641_v5 = vpop.f32.mrb[75].mxu1 }
 0x3a3   : > { %v6155_v13 = vadd.f32 %v8530_v57, %v11110_v60  ;;  %v8642_v47 = vadd.f32 %v8641_v5, %v8640_v17  ;;  %v11242_v14 = vadd.f32 %v8639_v21, %v6152_v4 }
 0x3a5   : > { %v8531_v18 = vpop.f32.mrb[76].mxu0  ;;  %v11244_v31 = vadd.f32 %v8642_v47, %v6155_v13 }
 0x3a6   : > { %v8532_v41 = vpop.f32.mrb[77].mxu0 }
 0x3a7   : > { %v8533_v61 = vadd.f32 %v8532_v41, %v8531_v18  ;;  %v8534_v0 = vpop.f32.mrb[78].mxu0  ;;  %v8643_v10 = vpop.f32.mrb[76].mxu1 }
 0x3a8   : > { %v8535_v34 = vpop.f32.mrb[79].mxu0  ;;  %v8644_v46 = vpop.f32.mrb[77].mxu1 }
 0x3a9   : > { %v6160_v3 = vadd.f32 %v8533_v61, %v11118_v63  ;;  %v8536_v1 = vadd.f32 %v8535_v34, %v8534_v0  ;;  %v8645_v33 = vadd.f32 %v8644_v46, %v8643_v10  ;;  %v8646_v36 = vpop.f32.mrb[78].mxu1 }
 0x3aa   : > { %v8647_v35 = vpop.f32.mrb[79].mxu1 }
 0x3ab   : > { %v6163_v60 = vadd.f32 %v8536_v1, %v11120_v26  ;;  %v8648_v23 = vadd.f32 %v8647_v35, %v8646_v36  ;;  %v11248_v6 = vadd.f32 %v8645_v33, %v6160_v3 }
 0x3ad   : > { %v8537_v39 = vpop.f32.mrb[80].mxu0  ;;  %v11250_v25 = vadd.f32 %v8648_v23, %v6163_v60 }
 0x3ae   : > { %v8538_v19 = vpop.f32.mrb[81].mxu0 }
 0x3af   : > { %v8539_v30 = vadd.f32 %v8538_v19, %v8537_v39  ;;  %v8540_v8 = vpop.f32.mrb[82].mxu0  ;;  %v8649_v40 = vpop.f32.mrb[80].mxu1 }
 0x3b0   : > { %v8541_v49 = vpop.f32.mrb[83].mxu0  ;;  %v8650_v62 = vpop.f32.mrb[81].mxu1 }
 0x3b1   : > { %v6168_v63 = vadd.f32 %v8539_v30, %v11128_v22  ;;  %v8542_v15 = vadd.f32 %v8541_v49, %v8540_v8  ;;  %v8651_v4 = vadd.f32 %v8650_v62, %v8649_v40  ;;  %v8652_v57 = vpop.f32.mrb[82].mxu1 }
 0x3b2   : > { %v8653_v29 = vpop.f32.mrb[83].mxu1 }
 0x3b3   : > { %v6171_v26 = vadd.f32 %v8542_v15, %v11130_v28  ;;  %v8654_v21 = vadd.f32 %v8653_v29, %v8652_v57  ;;  %v11254_v17 = vadd.f32 %v8651_v4, %v6168_v63 }
 0x3b5   : > { %v8543_v13 = vpop.f32.mrb[84].mxu0  ;;  %v11256_v47 = vadd.f32 %v8654_v21, %v6171_v26 }
 0x3b6   : > { %v8544_v5 = vpop.f32.mrb[85].mxu0 }
 0x3b7   : > { %v8545_v18 = vadd.f32 %v8544_v5, %v8543_v13  ;;  %v8546_v41 = vpop.f32.mrb[86].mxu0  ;;  %v8655_v61 = vpop.f32.mrb[84].mxu1 }
 0x3b8   : > { %v8547_v0 = vpop.f32.mrb[87].mxu0  ;;  %v8656_v34 = vpop.f32.mrb[85].mxu1 }
 0x3b9   : > { %v6176_v22 = vadd.f32 %v8545_v18, %v11138_v2  ;;  %v8548_v10 = vadd.f32 %v8547_v0, %v8546_v41  ;;  %v8657_v3 = vadd.f32 %v8656_v34, %v8655_v61  ;;  %v8658_v1 = vpop.f32.mrb[86].mxu1 }
 0x3ba   : > { %v8659_v46 = vpop.f32.mrb[87].mxu1 }
 0x3bb   : > { %v6179_v28 = vadd.f32 %v8548_v10, %v11140_v43  ;;  %v8660_v33 = vadd.f32 %v8659_v46, %v8658_v1  ;;  %v11260_v36 = vadd.f32 %v8657_v3, %v6176_v22 }
 0x3bd   : > { %v8549_v60 = vpop.f32.mrb[88].mxu0  ;;  %v11262_v23 = vadd.f32 %v8660_v33, %v6179_v28 }
 0x3be   : > { %v8550_v35 = vpop.f32.mrb[89].mxu0 }
 0x3bf   : > { %v8551_v39 = vadd.f32 %v8550_v35, %v8549_v60  ;;  %v8552_v19 = vpop.f32.mrb[90].mxu0  ;;  %v8661_v30 = vpop.f32.mrb[88].mxu1 }
 0x3c0   : > { %v8553_v8 = vpop.f32.mrb[91].mxu0  ;;  %v8662_v49 = vpop.f32.mrb[89].mxu1 }
 0x3c1   : > { %v6184_v2 = vadd.f32 %v8551_v39, %v11148_v42  ;;  %v8554_v40 = vadd.f32 %v8553_v8, %v8552_v19  ;;  %v8663_v63 = vadd.f32 %v8662_v49, %v8661_v30  ;;  %v8664_v15 = vpop.f32.mrb[90].mxu1 }
 0x3c2   : > { %v8665_v62 = vpop.f32.mrb[91].mxu1 }
 0x3c3   : > { %v6187_v43 = vadd.f32 %v8554_v40, %v11150_v27  ;;  %v8666_v4 = vadd.f32 %v8665_v62, %v8664_v15  ;;  %v11266_v57 = vadd.f32 %v8663_v63, %v6184_v2 }
 0x3c5   : > { %v8555_v26 = vpop.f32.mrb[92].mxu0  ;;  %v11268_v21 = vadd.f32 %v8666_v4, %v6187_v43  ;;  %v11281_v43 = vld [vmem:[%s9674_s8] sm:$0x77] }
 0x3c6   : > { %v8556_v29 = vpop.f32.mrb[93].mxu0  ;;  %v7373_v4 = vcombine.high %v11281_v43, %v11281_v43 }
 0x3c7   : > { %v8557_v13 = vadd.f32 %v8556_v29, %v8555_v26  ;;  %v8558_v5 = vpop.f32.mrb[94].mxu0  ;;  %v8667_v18 = vpop.f32.mrb[92].mxu1 }
 0x3c8   : > { %v8559_v41 = vpop.f32.mrb[95].mxu0  ;;  %v8668_v0 = vpop.f32.mrb[93].mxu1  ;;  %6673 = vmatprep.mubr.bf16.mxu1 %v7373_v4 }
 0x3c9   : > { %v6192_v42 = vadd.f32 %v8557_v13, %v11158_v50  ;;  %v8560_v61 = vadd.f32 %v8559_v41, %v8558_v5  ;;  %v8669_v22 = vadd.f32 %v8668_v0, %v8667_v18  ;;  %v8670_v10 = vpop.f32.mrb[94].mxu1 }
 0x3ca   : > { %v8671_v34 = vpop.f32.mrb[95].mxu1 }
 0x3cb   : > { %v6195_v27 = vadd.f32 %v8560_v61, %v11160_v20  ;;  %v8672_v3 = vadd.f32 %v8671_v34, %v8670_v10  ;;  %v11272_v1 = vadd.f32 %v8669_v22, %v6192_v42 }
 0x3cd   : > { %v8561_v28 = vpop.f32.mrb[96].mxu0  ;;  %v11274_v33 = vadd.f32 %v8672_v3, %v6195_v27 }
 0x3ce   : > { %v8562_v46 = vpop.f32.mrb[97].mxu0 }
 0x3cf   : > { %v8563_v60 = vadd.f32 %v8562_v46, %v8561_v28  ;;  %v8564_v35 = vpop.f32.mrb[98].mxu0  ;;  %v8673_v39 = vpop.f32.mrb[96].mxu1 }
 0x3d0   : > { %v8565_v19 = vpop.f32.mrb[99].mxu0  ;;  %v8674_v8 = vpop.f32.mrb[97].mxu1 }
 0x3d1   : > { %v6200_v50 = vadd.f32 %v8563_v60, %v11168_v48  ;;  %v8566_v30 = vadd.f32 %v8565_v19, %v8564_v35  ;;  %v8675_v2 = vadd.f32 %v8674_v8, %v8673_v39  ;;  %v8676_v40 = vpop.f32.mrb[98].mxu1 }
 0x3d2   : > { %v8677_v49 = vpop.f32.mrb[99].mxu1 }
 0x3d3   : > { %v6203_v20 = vadd.f32 %v8566_v30, %v11170_v16  ;;  %v8678_v63 = vadd.f32 %v8677_v49, %v8676_v40  ;;  %v11278_v15 = vadd.f32 %v8675_v2, %v6200_v50 }
 0x3d5   : > { %v8567_v62 = vpop.f32.mrb[100].mxu0  ;;  %v11285_v29 = vadd.f32 %v8678_v63, %v6203_v20 }
 0x3d6   : > { %v8568_v26 = vpop.f32.mrb[101].mxu0 }
 0x3d7   : > { %v8569_v48 = vadd.f32 %v8568_v26, %v8567_v62  ;;  %v8570_v13 = vpop.f32.mrb[102].mxu0  ;;  %v8679_v5 = vpop.f32.mrb[100].mxu1 }
 0x3d8   : > { %v8571_v18 = vpop.f32.mrb[103].mxu0  ;;  %v8680_v42 = vpop.f32.mrb[101].mxu1 }
 0x3d9   : > { %v6208_v16 = vadd.f32 %v8569_v48, %v11178_v54  ;;  %v8572_v41 = vadd.f32 %v8571_v18, %v8570_v13  ;;  %v8681_v61 = vadd.f32 %v8680_v42, %v8679_v5  ;;  %v8682_v0 = vpop.f32.mrb[102].mxu1 }
 0x3da   : > { %v8683_v10 = vpop.f32.mrb[103].mxu1 }
 0x3db   : > { %v6211_v22 = vadd.f32 %v8572_v41, %v11180_v38  ;;  %v8684_v27 = vadd.f32 %v8683_v10, %v8682_v0  ;;  %v11289_v34 = vadd.f32 %v8681_v61, %v6208_v16 }
 0x3dd   : > { %v8573_v3 = vpop.f32.mrb[104].mxu0  ;;  %v11291_v46 = vadd.f32 %v8684_v27, %v6211_v22 }
 0x3de   : > { %v8574_v28 = vpop.f32.mrb[105].mxu0 }
 0x3df   : > { %v8575_v60 = vadd.f32 %v8574_v28, %v8573_v3  ;;  %v8576_v35 = vpop.f32.mrb[106].mxu0  ;;  %v8685_v39 = vpop.f32.mrb[104].mxu1 }
 0x3e0   : > { %v8577_v19 = vpop.f32.mrb[107].mxu0  ;;  %v8686_v30 = vpop.f32.mrb[105].mxu1 }
 0x3e1   : > { %v6216_v54 = vadd.f32 %v8575_v60, %v11188_v37  ;;  %v8578_v50 = vadd.f32 %v8577_v19, %v8576_v35  ;;  %v8687_v8 = vadd.f32 %v8686_v30, %v8685_v39  ;;  %v8688_v2 = vpop.f32.mrb[106].mxu1 }
 0x3e2   : > { %v8689_v40 = vpop.f32.mrb[107].mxu1 }
 0x3e3   : > { %v6219_v38 = vadd.f32 %v8578_v50, %v11190_v52  ;;  %v8690_v20 = vadd.f32 %v8689_v40, %v8688_v2  ;;  %v11295_v49 = vadd.f32 %v8687_v8, %v6216_v54 }
 0x3e5   : > { %v8579_v63 = vpop.f32.mrb[108].mxu0  ;;  %v11297_v4 = vadd.f32 %v8690_v20, %v6219_v38 }
 0x3e6   : > { %v8580_v62 = vpop.f32.mrb[109].mxu0 }
 0x3e7   : > { %v8581_v26 = vadd.f32 %v8580_v62, %v8579_v63  ;;  %v8582_v48 = vpop.f32.mrb[110].mxu0  ;;  %v8691_v13 = vpop.f32.mrb[108].mxu1 }
 0x3e8   : > { %v8583_v5 = vpop.f32.mrb[111].mxu0  ;;  %v8692_v16 = vpop.f32.mrb[109].mxu1 }
 0x3e9   : > { %v6224_v37 = vadd.f32 %v8581_v26, %v11198_v7  ;;  %v8584_v18 = vadd.f32 %v8583_v5, %v8582_v48  ;;  %v8693_v41 = vadd.f32 %v8692_v16, %v8691_v13  ;;  %v8694_v42 = vpop.f32.mrb[110].mxu1 }
 0x3ea   : > { %v8695_v61 = vpop.f32.mrb[111].mxu1 }
 0x3eb   : > { %v6227_v52 = vadd.f32 %v8584_v18, %v11200_v58  ;;  %v8696_v0 = vadd.f32 %v8695_v61, %v8694_v42  ;;  %v11301_v22 = vadd.f32 %v8693_v41, %v6224_v37 }
 0x3ed   : > { %v8585_v10 = vpop.f32.mrb[112].mxu0  ;;  %v11303_v3 = vadd.f32 %v8696_v0, %v6227_v52 }
 0x3ee   : > { %v8586_v27 = vpop.f32.mrb[113].mxu0 }
 0x3ef   : > { %v8587_v28 = vadd.f32 %v8586_v27, %v8585_v10  ;;  %v8588_v60 = vpop.f32.mrb[114].mxu0  ;;  %v8697_v35 = vpop.f32.mrb[112].mxu1 }
 0x3f0   : > { %v8589_v39 = vpop.f32.mrb[115].mxu0  ;;  %v8698_v54 = vpop.f32.mrb[113].mxu1 }
 0x3f1   : > { %v6232_v7 = vadd.f32 %v8587_v28, %v11206_v9  ;;  %v8590_v19 = vadd.f32 %v8589_v39, %v8588_v60  ;;  %v8699_v50 = vadd.f32 %v8698_v54, %v8697_v35  ;;  %v8700_v30 = vpop.f32.mrb[114].mxu1 }
 0x3f2   : > { %v8701_v8 = vpop.f32.mrb[115].mxu1 }
 0x3f3   : > { %v6235_v58 = vadd.f32 %v8590_v19, %v11208_v24  ;;  %v8702_v2 = vadd.f32 %v8701_v8, %v8700_v30  ;;  %v11307_v38 = vadd.f32 %v8699_v50, %v6232_v7 }
 0x3f5   : > { %v8591_v40 = vpop.f32.mrb[116].mxu0  ;;  %v11309_v63 = vadd.f32 %v8702_v2, %v6235_v58 }
 0x3f6   : > { %v8592_v20 = vpop.f32.mrb[117].mxu0 }
 0x3f7   : > { %v8593_v62 = vadd.f32 %v8592_v20, %v8591_v40  ;;  %v8594_v26 = vpop.f32.mrb[118].mxu0  ;;  %v8703_v48 = vpop.f32.mrb[116].mxu1 }
 0x3f8   : > { %v8595_v13 = vpop.f32.mrb[119].mxu0  ;;  %v8704_v37 = vpop.f32.mrb[117].mxu1 }
 0x3f9   : > { %v6240_v9 = vadd.f32 %v8593_v62, %v11212_v45  ;;  %v8596_v5 = vadd.f32 %v8595_v13, %v8594_v26  ;;  %v8705_v18 = vadd.f32 %v8704_v37, %v8703_v48  ;;  %v8706_v16 = vpop.f32.mrb[118].mxu1 }
 0x3fa   : > { %v8707_v41 = vpop.f32.mrb[119].mxu1 }
 0x3fb   : > { %v6243_v24 = vadd.f32 %v8596_v5, %v11214_v53  ;;  %v8708_v42 = vadd.f32 %v8707_v41, %v8706_v16  ;;  %v11313_v52 = vadd.f32 %v8705_v18, %v6240_v9 }
 0x3fd   : > { %v8597_v61 = vpop.f32.mrb[120].mxu0  ;;  %v11315_v10 = vadd.f32 %v8708_v42, %v6243_v24 }
 0x3fe   : > { %v8598_v0 = vpop.f32.mrb[121].mxu0 }
 0x3ff   : > { %v8599_v27 = vadd.f32 %v8598_v0, %v8597_v61  ;;  %v8600_v28 = vpop.f32.mrb[122].mxu0  ;;  %v8709_v60 = vpop.f32.mrb[120].mxu1 }
 0x400   : > { %v8601_v35 = vpop.f32.mrb[123].mxu0  ;;  %v8710_v7 = vpop.f32.mrb[121].mxu1 }
 0x401   : > { %v6248_v45 = vadd.f32 %v8599_v27, %v11218_v32  ;;  %v8602_v39 = vadd.f32 %v8601_v35, %v8600_v28  ;;  %v8711_v19 = vadd.f32 %v8710_v7, %v8709_v60  ;;  %v8712_v54 = vpop.f32.mrb[122].mxu1 }
 0x402   : > { %v8713_v50 = vpop.f32.mrb[123].mxu1 }
 0x403   : > { %v6251_v53 = vadd.f32 %v8602_v39, %v11220_v11  ;;  %v8714_v30 = vadd.f32 %v8713_v50, %v8712_v54  ;;  %v11319_v58 = vadd.f32 %v8711_v19, %v6248_v45 }
 0x405   : > { %v8603_v8 = vpop.f32.mrb[124].mxu0  ;;  %v11321_v40 = vadd.f32 %v8714_v30, %v6251_v53 }
 0x406   : > { %v8604_v2 = vpop.f32.mrb[125].mxu0 }
 0x407   : > { %v8605_v20 = vadd.f32 %v8604_v2, %v8603_v8  ;;  %v8606_v62 = vpop.f32.mrb[126].mxu0  ;;  %v8715_v26 = vpop.f32.mrb[124].mxu1 }
 0x408   : > { %v8607_v48 = vpop.f32.mrb[127].mxu0  ;;  %v8716_v9 = vpop.f32.mrb[125].mxu1 }
 0x409   : > { %v6256_v32 = vadd.f32 %v8605_v20, %v11224_v59  ;;  %v8608_v13 = vadd.f32 %v8607_v48, %v8606_v62  ;;  %v8717_v5 = vadd.f32 %v8716_v9, %v8715_v26  ;;  %v8718_v37 = vpop.f32.mrb[126].mxu1 }
 0x40a   : > { %v8719_v18 = vpop.f32.mrb[127].mxu1 }
 0x40b   : > { %v6259_v11 = vadd.f32 %v8608_v13, %v11226_v55  ;;  %v8720_v16 = vadd.f32 %v8719_v18, %v8718_v37  ;;  %v11325_v24 = vadd.f32 %v8717_v5, %v6256_v32 }
 0x40d   : > { %v8773_v41 = vpop.f32.mrb[128].mxu0  ;;  %v11328_v0 = vadd.f32 %v8720_v16, %v6259_v11 }
 0x40e   : > { %v6466_v42 = vadd.f32 %v8773_v41, %v11236_v44  ;;  %v6457_v61 = vpop.f32.mrb[129].mxu0 }
 0x40f   : > { %v6458_v27 = vadd.f32 %v6457_v61, %v11230_v56  ;;  %v8774_v28 = vpop.f32.mrb[130].mxu0 }
 0x410   : > { %v6469_v59 = vadd.f32 %v8774_v28, %v11238_v51  ;;  %v6460_v60 = vpop.f32.mrb[131].mxu0  ;;  %v6586_v45 = vmax.f32 %v6466_v42, 0.0 }
 0x411   : > { %v6461_v35 = vadd.f32 %v6460_v60, %v11232_v12  ;;  %v6584_v39 = vmax.f32 %v6458_v27, 0.0 }
 0x412   : > { %v6587_v55 = vmax.f32 %v6469_v59, 0.0 }
 0x413   : > { %v6585_v7 = vmax.f32 %v6461_v35, 0.0 }
 0x414   : > { %v11333_v19 = vpack.c.bf16 %v6587_v55, %v6586_v45 }
 0x415   : > { %v11335_v54 = vpack.c.bf16 %v6585_v7, %v6584_v39  ;;  %v8777_v44 = vpop.f32.mrb[132].mxu0 }
 0x416   : > { %v6482_v53 = vadd.f32 %v8777_v44, %v11248_v6  ;;  %v6473_v50 = vpop.f32.mrb[133].mxu0 }
 0x417   : > { %v6474_v56 = vadd.f32 %v6473_v50, %v11242_v14  ;;  %v8778_v30 = vpop.f32.mrb[134].mxu0 }
 0x418   : > { %v6485_v51 = vadd.f32 %v8778_v30, %v11250_v25  ;;  %v6476_v8 = vpop.f32.mrb[135].mxu0  ;;  %v6590_v2 = vmax.f32 %v6482_v53, 0.0 }
 0x419   : > { %v6477_v12 = vadd.f32 %v6476_v8, %v11244_v31  ;;  %v6588_v62 = vmax.f32 %v6474_v56, 0.0 }
 0x41a   : > { %v6591_v20 = vmax.f32 %v6485_v51, 0.0 }
 0x41b   : > { %v6589_v26 = vmax.f32 %v6477_v12, 0.0 }
 0x41c   : > { %v11341_v48 = vpack.c.bf16 %v6591_v20, %v6590_v2 }
 0x41d   : > { %v11343_v32 = vpack.c.bf16 %v6589_v26, %v6588_v62  ;;  %v8781_v13 = vpop.f32.mrb[136].mxu0 }
 0x41e   : > { %v6498_v6 = vadd.f32 %v8781_v13, %v11260_v36  ;;  %v6489_v9 = vpop.f32.mrb[137].mxu0 }
 0x41f   : > { %v6490_v14 = vadd.f32 %v6489_v9, %v11254_v17  ;;  %v8782_v5 = vpop.f32.mrb[138].mxu0 }
 0x420   : > { %v6501_v25 = vadd.f32 %v8782_v5, %v11262_v23  ;;  %v6492_v37 = vpop.f32.mrb[139].mxu0  ;;  %v6594_v11 = vmax.f32 %v6498_v6, 0.0 }
 0x421   : > { %v6493_v31 = vadd.f32 %v6492_v37, %v11256_v47  ;;  %v6592_v16 = vmax.f32 %v6490_v14, 0.0 }
 0x422   : > { %v6595_v18 = vmax.f32 %v6501_v25, 0.0 }
 0x423   : > { %v6593_v41 = vmax.f32 %v6493_v31, 0.0 }
 0x424   : > { %v11349_v42 = vpack.c.bf16 %v6595_v18, %v6594_v11 }
 0x425   : > { %v11351_v61 = vpack.c.bf16 %v6593_v41, %v6592_v16  ;;  %v8785_v27 = vpop.f32.mrb[140].mxu0 }
 0x426   : > { %v6514_v36 = vadd.f32 %v8785_v27, %v11272_v1  ;;  %v6505_v28 = vpop.f32.mrb[141].mxu0 }
 0x427   : > { %v6506_v17 = vadd.f32 %v6505_v28, %v11266_v57  ;;  %v8786_v59 = vpop.f32.mrb[142].mxu0 }
 0x428   : > { %v6517_v23 = vadd.f32 %v8786_v59, %v11274_v33  ;;  %v6508_v60 = vpop.f32.mrb[143].mxu0  ;;  %v6598_v35 = vmax.f32 %v6514_v36, 0.0 }
 0x429   : > { %v6509_v47 = vadd.f32 %v6508_v60, %v11268_v21  ;;  %v6596_v55 = vmax.f32 %v6506_v17, 0.0 }
 0x42a   : > { %v6599_v45 = vmax.f32 %v6517_v23, 0.0 }
 0x42b   : > { %v6597_v39 = vmax.f32 %v6509_v47, 0.0 }
 0x42c   : > { %v11357_v7 = vpack.c.bf16 %v6599_v45, %v6598_v35 }
 0x42d   : > { %v11359_v44 = vpack.c.bf16 %v6597_v39, %v6596_v55  ;;  %v8789_v53 = vpop.f32.mrb[144].mxu0 }
 0x42e   : > { %v6530_v1 = vadd.f32 %v8789_v53, %v11289_v34  ;;  %v6521_v50 = vpop.f32.mrb[145].mxu0 }
 0x42f   : > { %v6522_v57 = vadd.f32 %v6521_v50, %v11278_v15  ;;  %v8790_v56 = vpop.f32.mrb[146].mxu0 }
 0x430   : > { %v6533_v33 = vadd.f32 %v8790_v56, %v11291_v46  ;;  %v6524_v30 = vpop.f32.mrb[147].mxu0  ;;  %v6602_v51 = vmax.f32 %v6530_v1, 0.0 }
 0x431   : > { %v6525_v21 = vadd.f32 %v6524_v30, %v11285_v29  ;;  %v6600_v12 = vmax.f32 %v6522_v57, 0.0 }
 0x432   : > { %v6603_v8 = vmax.f32 %v6533_v33, 0.0 }
 0x433   : > { %v6601_v2 = vmax.f32 %v6525_v21, 0.0 }
 0x434   : > { %v6627_v20 = vpack.c.bf16 %v6603_v8, %v6602_v51 }
 0x435   : > { %v6626_v62 = vpack.c.bf16 %v6601_v2, %v6600_v12  ;;  %v8793_v26 = vpop.f32.mrb[148].mxu0 }
 0x436   : > { %v6546_v13 = vadd.f32 %v8793_v26, %v11301_v22  ;;  %v6537_v6 = vpop.f32.mrb[149].mxu0 }
 0x437   : > { %v6538_v34 = vadd.f32 %v6537_v6, %v11295_v49  ;;  %v8794_v9 = vpop.f32.mrb[150].mxu0  ;;  %8741 = vmatprep.subr.bf16.mxu1 %v6626_v62 }
 0x438   : > { %v6549_v15 = vadd.f32 %v8794_v9, %v11303_v3  ;;  %v6540_v46 = vpop.f32.mrb[151].mxu0  ;;  %8742 = vmatpush3.bf16.msra.mxu1 %v11335_v54  ;;  %v6606_v14 = vmax.f32 %v6546_v13, 0.0 }
 0x439   : > { %v6541_v29 = vadd.f32 %v6540_v46, %v11297_v4  ;;  %8743 = vmatprep.subr.bf16.mxu1 %v6627_v20  ;;  %v6604_v25 = vmax.f32 %v6538_v34, 0.0 }
 0x43a   : > { %v6607_v5 = vmax.f32 %v6549_v15, 0.0 }
 0x43b   : > { %v6605_v37 = vmax.f32 %v6541_v29, 0.0 }
 0x43c   : > { %v6629_v31 = vpack.c.bf16 %v6607_v5, %v6606_v14  ;;  %8744 = vmatpush3.bf16.msra.mxu1 %v11333_v19 }
 0x43d   : > { %v6628_v22 = vpack.c.bf16 %v6605_v37, %v6604_v25  ;;  %v8797_v11 = vpop.f32.mrb[152].mxu0 }
 0x43e   : > { %v6562_v49 = vadd.f32 %v8797_v11, %v11313_v52  ;;  %v6553_v18 = vpop.f32.mrb[153].mxu0 }
 0x43f   : > { %v6554_v3 = vadd.f32 %v6553_v18, %v11307_v38  ;;  %v8798_v16 = vpop.f32.mrb[154].mxu0  ;;  %8745 = vmatprep.subr.bf16.mxu1 %v6628_v22 }
 0x440   : > { %v6565_v54 = vadd.f32 %v8798_v16, %v11315_v10  ;;  %v6556_v4 = vpop.f32.mrb[155].mxu0  ;;  %8746 = vmatpush3.bf16.msra.mxu1 %v11343_v32  ;;  %v6610_v27 = vmax.f32 %v6562_v49, 0.0 }
 0x441   : > { %v6557_v41 = vadd.f32 %v6556_v4, %v11309_v63  ;;  %8747 = vmatprep.subr.bf16.mxu1 %v6629_v31  ;;  %v6608_v19 = vmax.f32 %v6554_v3, 0.0 }
 0x442   : > { %v6611_v36 = vmax.f32 %v6565_v54, 0.0 }
 0x443   : > { %v6609_v28 = vmax.f32 %v6557_v41, 0.0 }
 0x444   : > { %v6631_v17 = vpack.c.bf16 %v6611_v36, %v6610_v27  ;;  %8748 = vmatpush3.bf16.msra.mxu1 %v11341_v48 }
 0x445   : > { %v6630_v52 = vpack.c.bf16 %v6609_v28, %v6608_v19  ;;  %v8801_v59 = vpop.f32.mrb[156].mxu0 }
 0x446   : > { %v6578_v38 = vadd.f32 %v8801_v59, %v11325_v24  ;;  %v6569_v23 = vpop.f32.mrb[157].mxu0 }
 0x447   : > { %v6570_v10 = vadd.f32 %v6569_v23, %v11319_v58  ;;  %v8802_v60 = vpop.f32.mrb[158].mxu0  ;;  %8749 = vmatprep.subr.bf16.mxu1 %v6630_v52  ;;  %v7372_v58 = vcombine.low %v11281_v43, %v11281_v43  ;;  %v9618_v43 = vmov (!%p7374_p6), 0  }
 0x448   : > { %v6581_v32 = vadd.f32 %v8802_v60, %v11328_v0  ;;  %v6572_v63 = vpop.f32.mrb[159].mxu0  ;;  %8750 = vmatpush3.bf16.msra.mxu1 %v11351_v61  ;;  %v6614_v35 = vmax.f32 %v6578_v38, 0.0  ;;  %v6616_v0 = vld [vmem:[#allocation2] sm:$0x3f]  ;;  %9607 = vset.pattern.permute.xlu0 (!%p7374_p6), %v9618_v43 }
 0x449   : > { %v6573_v47 = vadd.f32 %v6572_v63, %v11321_v40  ;;  %8751 = vmatprep.subr.bf16.mxu1 %v6631_v17  ;;  %v6612_v48 = vmax.f32 %v6570_v10, 0.0 }
 0x44a   : > { %v6615_v45 = vmax.f32 %v6581_v32, 0.0 }
 0x44b   : > { %v6613_v55 = vmax.f32 %v6573_v47, 0.0 }
 0x44c   : > { %v6633_v39 = vpack.c.bf16 %v6615_v45, %v6614_v35  ;;  %8752 = vmatpush3.bf16.msra.mxu1 %v11349_v42  ;;  %v6689_v42 = vld [vmem:[%s11401_s4] sm:$0x3f] (!%p7374_p6) }
 0x44d   : > { %v6632_v24 = vpack.c.bf16 %v6613_v55, %v6612_v48  ;;  %6692 = vperm.xlu0 (!%p7374_p6), %9607, %v6689_v42  }
 0x44f   : > { %8753 = vmatprep.subr.bf16.mxu1 %v6632_v24 }
 0x450   : > { %8754 = vmatpush3.bf16.msra.mxu1 %v11359_v44 }
 0x451   : > { %8755 = vmatprep.subr.bf16.mxu1 %v6633_v39 }
 0x454   : > { %8756 = vmatpush3.bf16.msra.mxu1 %v11357_v7 }
 0x457   : > { %6674 = vmatmul.mubr.bf16.vlgmr.msra.gmra.mrb[128].mxu1 %v7372_v58 }
 0x4cc   : > { %v6693_v44 = vpop.permute.xlu0 (!%p7374_p6), %6692 }
 0x52a   : > { %v8757_v40 = vpop.f32.mrb[128].mxu1  ;;  %6687 = sbr.rel (%p7374_p6) target bundleno = 1339 (0x53b), region = 48 }
 0x52b   : > { %v8758_v61 = vpop.f32.mrb[129].mxu1 }
 0x52c   : > { %v8759_v53 = vadd.f32 %v8758_v61, %v8757_v40  ;;  %v8760_v1 = vpop.f32.mrb[130].mxu1 }
 0x52d   : > { %v8761_v50 = vpop.f32.mrb[131].mxu1 }
 0x52e   : > { %v6681_v57 = vadd.f32 %v8759_v53, %v6616_v0 }
 0x530   : > { %6683 = vst.msk [vmem:[#allocation2] sm:$0x3f] %vm6682_vm2, %v6681_v57 }
 0x537   : > { %v6688_v7 = vld [vmem:[#allocation2] sm:$0x3f] }
 0x538   : > { %v6695_v56 = vadd.f32 %v6693_v44, %v6688_v7 }
 0x53a   : > { %6696 = vst.msk [vmem:[%s11402_s5] sm:$0x3f] %vm6682_vm2, %v6695_v56 }
 0x53b PF: > { %s15_s18 = sadd.s32 1, %s9614_s18  }
 0x53c   : > { %p12_p7 = scmp.ge.s32.totalorder %s15_s18, 4  }
 0x53e   :  { %14 = sbr.rel (!%p12_p7) target bundleno = 1 (0x1), region = 80 }

</bundles_post_ra>
